<compile_context>
chip_gen: v7x
topology: tpu7x:2x2x1
jax: 0.10.0
libtpu: 0.0.40
codegen_flags: <defaults>
</compile_context>

<pallas_src>
import functools

import jax
import jax.numpy as jnp
import numpy as np
from jax import lax
from jax.experimental import pallas as pl
from jax.experimental.pallas import tpu as pltpu


def _round_up(x, m):
    return ((x + m - 1) // m) * m


def _hsi_kernel(H, W, D,
                x_ref, w0, b0, w1, b1, w2, b2, w3, b3, w4t, b4,
                feat_ref, sal_ref, pad64, pad128):
    f32 = jnp.float32
    bf16 = jnp.bfloat16

    # Zero only the 1-wide halo of the scratch pads. The (H, W) interior is
    # fully overwritten before every use below. This runs every grid step (not
    # under pl.when(program_id == 0)) so it is correct when the batch axis is
    # split across TensorCores ("parallel"): each core has its own scratch.
    def zero_halo(pad, cin):
        pad[0:1, :, :] = jnp.zeros((1, W + 2, cin), f32)
        pad[H + 1:H + 2, :, :] = jnp.zeros((1, W + 2, cin), f32)
        pad[:, 0:1, :] = jnp.zeros((H + 2, 1, cin), f32)
        pad[:, W + 1:W + 2, :] = jnp.zeros((H + 2, 1, cin), f32)

    zero_halo(pad64, 64)
    zero_halo(pad128, 128)

    # ---- input_conv (C -> 64): im2col prepared in wrapper, single matmul ----
    a = jnp.dot(x_ref[0].astype(bf16), w0[...],
                preferred_element_type=f32) + b0[...]
    a = jnp.maximum(a, 0.0)                                   # (H*W, 64) f32

    def conv3x3(a_in, cin, pad, w_ref, b_ref):
        # Write the activation into the padded scratch interior (halo stays 0).
        pad[1:H + 1, 1:W + 1, :] = a_in.reshape(H, W, cin)
        # Ref-sliced taps folded into the contraction dim: one MXU matmul with
        # K = 9*cin instead of 9 matmuls of K = cin (+ 8 VPU accumulate adds).
        taps = [pad[kh:kh + H, kw:kw + W, :].astype(bf16)
                for kh in range(3) for kw in range(3)]
        patch = jnp.concatenate(taps, axis=-1).reshape(H * W, 9 * cin)
        y = jnp.dot(patch, w_ref[...], preferred_element_type=f32) + b_ref[...]
        return jnp.maximum(y, 0.0)                            # (H*W, cout) f32

    a = conv3x3(a, 64, pad64, w1, b1)        # block1 conv a: 64  -> 128
    a = conv3x3(a, 128, pad128, w2, b2)      # block1 conv b: 128 -> 128
    a = conv3x3(a, 128, pad128, w3, b3)      # block2:        128 -> 64

    # ---- output_conv 1x1 (64 -> D), computed transposed so the feature block
    #      (D, H*W) is lane-dense and already channel-major (NCHW order). ----
    featT = lax.dot_general(w4t[...], a.astype(bf16),
                            dimension_numbers=(((1,), (1,)), ((), ())),
                            preferred_element_type=f32) + b4[...]   # (D, H*W)

    feat_ref[0] = featT
    # saliency = L2 norm over the channel (sublane) axis -> (1, H*W), lane-dense
    sal_ref[0] = jnp.sqrt(jnp.sum(featT * featT, axis=0, keepdims=True))


def hsi_feature_net(hsi_nchw, params):
    """hsi_nchw: (B, C, H, W) f32 -> (features (B, D, H, W), saliency (B, 1, H, W))."""
    B, C, H, W = hsi_nchw.shape
    D = params['w4'].shape[-1]
    bf16 = jnp.bfloat16

    # ---------------- layout prep in XLA (no conv math here) ----------------
    x = jnp.transpose(hsi_nchw, (0, 2, 3, 1))                     # NHWC
    xp = jnp.pad(x, ((0, 0), (1, 1), (1, 1), (0, 0)))
    # im2col for the lane-sparse Cin=C input layer: (B, H*W, 9*C), then pad
    # the contraction dim to a multiple of 128 so the input block is lane-dense.
    cols = [xp[:, kh:kh + H, kw:kw + W, :] for kh in range(3) for kw in range(3)]
    x_p = jnp.concatenate(cols, axis=-1).reshape(B, H * W, 9 * C)
    K0 = 9 * C
    K0p = _round_up(K0, 128)
    x_p = jnp.pad(x_p, ((0, 0), (0, 0), (0, K0p - K0)))

    # Fold (kh, kw, cin) into the contraction dim; cast weights to bf16 once.
    w0 = jnp.pad(params['w0'].reshape(K0, 64),
                 ((0, K0p - K0), (0, 0))).astype(bf16)            # (K0p, 64)

    def fold(w):                                                  # (3,3,ci,co)->(9*ci,co)
        return w.reshape(-1, w.shape[-1]).astype(bf16)

    w1, w2, w3 = fold(params['w1']), fold(params['w2']), fold(params['w3'])
    w4t = jnp.transpose(params['w4']).astype(bf16)                # (D, 64)
    b0, b1, b2, b3 = (params[k].astype(jnp.float32)
                      for k in ('b0', 'b1', 'b2', 'b3'))
    b4 = params['b4'].reshape(D, 1).astype(jnp.float32)

    args = [x_p, w0, b0, w1, b1, w2, b2, w3, b3, w4t, b4]
    in_specs = [pl.BlockSpec((1, H * W, K0p), lambda b: (b, 0, 0))]
    for arr in args[1:]:
        in_specs.append(pl.BlockSpec(arr.shape, lambda b, _n=arr.ndim: (0,) * _n))

    kernel = functools.partial(_hsi_kernel, H, W, D)
    featT, sal = pl.pallas_call(
        kernel,
        out_shape=(jax.ShapeDtypeStruct((B, D, H * W), jnp.float32),
                   jax.ShapeDtypeStruct((B, 1, H * W), jnp.float32)),
        grid_spec=pltpu.PrefetchScalarGridSpec(
            num_scalar_prefetch=0,
            grid=(B,),
            in_specs=in_specs,
            out_specs=[pl.BlockSpec((1, D, H * W), lambda b: (b, 0, 0)),
                       pl.BlockSpec((1, 1, H * W), lambda b: (b, 0, 0))],
            scratch_shapes=[pltpu.VMEM((H + 2, W + 2, 64), jnp.float32),
                            pltpu.VMEM((H + 2, W + 2, 128), jnp.float32)]),
        compiler_params=pltpu.CompilerParams(
            dimension_semantics=("parallel",),
            vmem_limit_bytes=32 * 1024 * 1024),
    )(*args)

    # Outputs are already channel-major: only reshapes, no transposes.
    features = featT.reshape(B, D, H, W)
    saliency = sal.reshape(B, 1, H, W)
    return features, saliency


def init_params(key, num_spectral_bands, out_features=64):
    """Deterministic synthetic weights matching the nn.Module's shapes (HWIO)."""
    def conv_w(k, kh, kw, cin, cout):
        fan_in = cin * kh * kw
        return jax.random.normal(k, (kh, kw, cin, cout), jnp.float32) / np.sqrt(fan_in)

    ks = jax.random.split(key, 10)
    C, D = num_spectral_bands, out_features
    return {
        'w0': conv_w(ks[0], 3, 3, C, 64),
        'b0': jax.random.normal(ks[1], (1, 64), jnp.float32) * 0.01,
        'w1': conv_w(ks[2], 3, 3, 64, 128),
        'b1': jax.random.normal(ks[3], (1, 128), jnp.float32) * 0.01,
        'w2': conv_w(ks[4], 3, 3, 128, 128),
        'b2': jax.random.normal(ks[5], (1, 128), jnp.float32) * 0.01,
        'w3': conv_w(ks[6], 3, 3, 128, 64),
        'b3': jax.random.normal(ks[7], (1, 64), jnp.float32) * 0.01,
        'w4': jax.random.normal(ks[8], (64, D), jnp.float32) / np.sqrt(64.0),
        'b4': jax.random.normal(ks[9], (1, D), jnp.float32) * 0.01,
    }


def ref_forward(hsi_nchw, params, bf16_operands=False):
    """Pure-JAX reference (mirrors the PyTorch forward).

    bf16_operands=True applies the same operand rounding as the kernel
    (bf16 matmul operands, f32 accumulation) for a tight structural check.
    """
    def maybe(x):
        return x.astype(jnp.bfloat16).astype(jnp.float32) if bf16_operands else x

    x = jnp.transpose(hsi_nchw, (0, 2, 3, 1))
    prec = None if bf16_operands else lax.Precision.HIGHEST

    def conv(x, w, b, relu=True):
        y = lax.conv_general_dilated(
            maybe(x), maybe(w), (1, 1), 'SAME',
            dimension_numbers=('NHWC', 'HWIO', 'NHWC'),
            precision=prec) + b.reshape(1, 1, 1, -1)
        return jnp.maximum(y, 0.0) if relu else y

    x = conv(x, params['w0'], params['b0'])
    x = conv(x, params['w1'], params['b1'])
    x = conv(x, params['w2'], params['b2'])
    x = conv(x, params['w3'], params['b3'])
    feat = jnp.einsum('bhwc,cd->bhwd', maybe(x), maybe(params['w4']),
                      precision=prec) + params['b4'].reshape(1, 1, 1, -1)
    sal = jnp.sqrt(jnp.sum(feat * feat, axis=-1, keepdims=True))
    return (jnp.transpose(feat, (0, 3, 1, 2)),
            jnp.transpose(sal, (0, 3, 1, 2)))


if __name__ == "__main__":
    B, C, H, W, D = 2, 4, 16, 16, 64

    hsi = jax.random.normal(jax.random.PRNGKey(0), (B, C, H, W), jnp.float32)
    params = init_params(jax.random.PRNGKey(42), num_spectral_bands=C, out_features=D)

    fwd = jax.jit(hsi_feature_net)
    features, saliency = fwd(hsi, params)
    jax.block_until_ready((features, saliency))

    assert features.shape == (B, D, H, W) and saliency.shape == (B, 1, H, W)

    # Tight structural check vs. a reference with the same bf16 operand rounding.
    f_bf, s_bf = ref_forward(hsi, params, bf16_operands=True)
    np.testing.assert_allclose(np.asarray(features), np.asarray(f_bf), rtol=2e-3, atol=2e-3)
    np.testing.assert_allclose(np.asarray(saliency), np.asarray(s_bf), rtol=2e-3, atol=2e-3)

    # Loose sanity check vs. the full-f32 module forward (kernel uses bf16
    # matmul operands with f32 accumulation).
    f_32, s_32 = ref_forward(hsi, params, bf16_operands=False)
    np.testing.assert_allclose(np.asarray(features), np.asarray(f_32), rtol=5e-2, atol=5e-2)
    np.testing.assert_allclose(np.asarray(saliency), np.asarray(s_32), rtol=5e-2, atol=5e-2)

    print("KERNEL_OK")
</pallas_src>

<mosaic_0001>
module attributes {stable_mosaic.version = 11 : i64} {
  func.func @_hsi_kernel(%arg0: i32, %arg1: memref<1x256x128xf32, #tpu.memory_space<vmem>>, %arg2: memref<128x64xbf16, #tpu.memory_space<vmem>>, %arg3: memref<1x64xf32, #tpu.memory_space<vmem>>, %arg4: memref<576x128xbf16, #tpu.memory_space<vmem>>, %arg5: memref<1x128xf32, #tpu.memory_space<vmem>>, %arg6: memref<1152x128xbf16, #tpu.memory_space<vmem>>, %arg7: memref<1x128xf32, #tpu.memory_space<vmem>>, %arg8: memref<1152x64xbf16, #tpu.memory_space<vmem>>, %arg9: memref<1x64xf32, #tpu.memory_space<vmem>>, %arg10: memref<64x64xbf16, #tpu.memory_space<vmem>>, %arg11: memref<64x1xf32, #tpu.memory_space<vmem>>, %arg12: memref<1x64x256xf32, #tpu.memory_space<vmem>>, %arg13: memref<1x1x256xf32, #tpu.memory_space<vmem>>, %arg14: memref<18x18x64xf32, #tpu.memory_space<vmem>>, %arg15: memref<18x18x128xf32, #tpu.memory_space<vmem>>) attributes {dimension_semantics = [#tpu.dimension_semantics<parallel>], iteration_bounds = array<i64: 2>, scalar_prefetch = 0 : i64, scratch_operands = 2 : i64, tpu.core_type = #tpu.core_type<tc>, window_params = [{transform_indices = @transform_0, window_bounds = array<i64: 1, 256, 128>}, {pipeline_mode = #tpu.pipeline_mode<synchronous>, transform_indices = @transform_1, window_bounds = array<i64: 128, 64>}, {pipeline_mode = #tpu.pipeline_mode<synchronous>, transform_indices = @transform_2, window_bounds = array<i64: 1, 64>}, {pipeline_mode = #tpu.pipeline_mode<synchronous>, transform_indices = @transform_3, window_bounds = array<i64: 576, 128>}, {pipeline_mode = #tpu.pipeline_mode<synchronous>, transform_indices = @transform_4, window_bounds = array<i64: 1, 128>}, {pipeline_mode = #tpu.pipeline_mode<synchronous>, transform_indices = @transform_5, window_bounds = array<i64: 1152, 128>}, {pipeline_mode = #tpu.pipeline_mode<synchronous>, transform_indices = @transform_6, window_bounds = array<i64: 1, 128>}, {pipeline_mode = #tpu.pipeline_mode<synchronous>, transform_indices = @transform_7, window_bounds = array<i64: 1152, 64>}, {pipeline_mode = #tpu.pipeline_mode<synchronous>, transform_indices = @transform_8, window_bounds = array<i64: 1, 64>}, {pipeline_mode = #tpu.pipeline_mode<synchronous>, transform_indices = @transform_9, window_bounds = array<i64: 64, 64>}, {pipeline_mode = #tpu.pipeline_mode<synchronous>, transform_indices = @transform_10, window_bounds = array<i64: 64, 1>}, {transform_indices = @transform_11, window_bounds = array<i64: 1, 64, 256>}, {transform_indices = @transform_12, window_bounds = array<i64: 1, 1, 256>}]} {
    %cst = arith.constant 0.000000e+00 : f32
    %0 = vector.broadcast %cst : f32 to vector<1x18x64xf32>
    %c0 = arith.constant 0 : index
    %c0_0 = arith.constant 0 : index
    %c0_1 = arith.constant 0 : index
    %1 = vector.load %arg14[%c0, %c0_0, %c0_1] : memref<18x18x64xf32, #tpu.memory_space<vmem>>, vector<1x18x64xf32>
    tpu.vector_store %arg14[%c0, %c0_0, %c0_1], %0 {strides = array<i32>} : memref<18x18x64xf32, #tpu.memory_space<vmem>>, vector<1x18x64xf32>,
    %cst_2 = arith.constant 0.000000e+00 : f32
    %2 = vector.broadcast %cst_2 : f32 to vector<1x18x64xf32>
    %c17 = arith.constant 17 : index
    %c0_3 = arith.constant 0 : index
    %c0_4 = arith.constant 0 : index
    %3 = vector.load %arg14[%c17, %c0_3, %c0_4] : memref<18x18x64xf32, #tpu.memory_space<vmem>>, vector<1x18x64xf32>
    tpu.vector_store %arg14[%c17, %c0_3, %c0_4], %2 {strides = array<i32>} : memref<18x18x64xf32, #tpu.memory_space<vmem>>, vector<1x18x64xf32>,
    %cst_5 = arith.constant 0.000000e+00 : f32
    %4 = vector.broadcast %cst_5 : f32 to vector<18x1x64xf32>
    %c0_6 = arith.constant 0 : index
    %c0_7 = arith.constant 0 : index
    %c0_8 = arith.constant 0 : index
    %5 = vector.load %arg14[%c0_6, %c0_7, %c0_8] : memref<18x18x64xf32, #tpu.memory_space<vmem>>, vector<18x1x64xf32>
    tpu.vector_store %arg14[%c0_6, %c0_7, %c0_8], %4 {strides = array<i32>} : memref<18x18x64xf32, #tpu.memory_space<vmem>>, vector<18x1x64xf32>,
    %cst_9 = arith.constant 0.000000e+00 : f32
    %6 = vector.broadcast %cst_9 : f32 to vector<18x1x64xf32>
    %c0_10 = arith.constant 0 : index
    %c17_11 = arith.constant 17 : index
    %c0_12 = arith.constant 0 : index
    %7 = vector.load %arg14[%c0_10, %c17_11, %c0_12] : memref<18x18x64xf32, #tpu.memory_space<vmem>>, vector<18x1x64xf32>
    tpu.vector_store %arg14[%c0_10, %c17_11, %c0_12], %6 {strides = array<i32>} : memref<18x18x64xf32, #tpu.memory_space<vmem>>, vector<18x1x64xf32>,
    %cst_13 = arith.constant 0.000000e+00 : f32
    %8 = vector.broadcast %cst_13 : f32 to vector<1x18x128xf32>
    %c0_14 = arith.constant 0 : index
    %c0_15 = arith.constant 0 : index
    %c0_16 = arith.constant 0 : index
    %9 = vector.load %arg15[%c0_14, %c0_15, %c0_16] : memref<18x18x128xf32, #tpu.memory_space<vmem>>, vector<1x18x128xf32>
    tpu.vector_store %arg15[%c0_14, %c0_15, %c0_16], %8 {strides = array<i32>} : memref<18x18x128xf32, #tpu.memory_space<vmem>>, vector<1x18x128xf32>,
    %cst_17 = arith.constant 0.000000e+00 : f32
    %10 = vector.broadcast %cst_17 : f32 to vector<1x18x128xf32>
    %c17_18 = arith.constant 17 : index
    %c0_19 = arith.constant 0 : index
    %c0_20 = arith.constant 0 : index
    %11 = vector.load %arg15[%c17_18, %c0_19, %c0_20] : memref<18x18x128xf32, #tpu.memory_space<vmem>>, vector<1x18x128xf32>
    tpu.vector_store %arg15[%c17_18, %c0_19, %c0_20], %10 {strides = array<i32>} : memref<18x18x128xf32, #tpu.memory_space<vmem>>, vector<1x18x128xf32>,
    %cst_21 = arith.constant 0.000000e+00 : f32
    %12 = vector.broadcast %cst_21 : f32 to vector<18x1x128xf32>
    %c0_22 = arith.constant 0 : index
    %c0_23 = arith.constant 0 : index
    %c0_24 = arith.constant 0 : index
    %13 = vector.load %arg15[%c0_22, %c0_23, %c0_24] : memref<18x18x128xf32, #tpu.memory_space<vmem>>, vector<18x1x128xf32>
    tpu.vector_store %arg15[%c0_22, %c0_23, %c0_24], %12 {strides = array<i32>} : memref<18x18x128xf32, #tpu.memory_space<vmem>>, vector<18x1x128xf32>,
    %cst_25 = arith.constant 0.000000e+00 : f32
    %14 = vector.broadcast %cst_25 : f32 to vector<18x1x128xf32>
    %c0_26 = arith.constant 0 : index
    %c17_27 = arith.constant 17 : index
    %c0_28 = arith.constant 0 : index
    %15 = vector.load %arg15[%c0_26, %c17_27, %c0_28] : memref<18x18x128xf32, #tpu.memory_space<vmem>>, vector<18x1x128xf32>
    tpu.vector_store %arg15[%c0_26, %c17_27, %c0_28], %14 {strides = array<i32>} : memref<18x18x128xf32, #tpu.memory_space<vmem>>, vector<18x1x128xf32>,
    %c0_29 = arith.constant 0 : index
    %c0_30 = arith.constant 0 : index
    %c0_31 = arith.constant 0 : index
    %16 = vector.load %arg1[%c0_29, %c0_30, %c0_31] : memref<1x256x128xf32, #tpu.memory_space<vmem>>, vector<1x256x128xf32>
    %17 = vector.shape_cast %16 : vector<1x256x128xf32> to vector<256x128xf32>
    %18 = arith.truncf %17 : vector<256x128xf32> to vector<256x128xbf16>
    %c0_32 = arith.constant 0 : index
    %c0_33 = arith.constant 0 : index
    %19 = vector.load %arg2[%c0_32, %c0_33] : memref<128x64xbf16, #tpu.memory_space<vmem>>, vector<128x64xbf16>
    %cst_34 = arith.constant dense<0.000000e+00> : vector<256x64xf32>
    %20 = tpu.matmul %18, %19, %cst_34 {dimension_numbers = #tpu.dot_dimension_numbers<[1], [0], [0], [1], [0, 0, 1, 1], [], []>} : vector<256x128xbf16>, vector<128x64xbf16>, vector<256x64xf32> -> vector<256x64xf32>
    %c0_35 = arith.constant 0 : index
    %c0_36 = arith.constant 0 : index
    %21 = vector.load %arg3[%c0_35, %c0_36] : memref<1x64xf32, #tpu.memory_space<vmem>>, vector<1x64xf32>
    %22 = vector.broadcast %21 : vector<1x64xf32> to vector<256x64xf32>
    %23 = arith.addf %20, %22 : vector<256x64xf32>
    %cst_37 = arith.constant 0.000000e+00 : f32
    %24 = vector.broadcast %cst_37 : f32 to vector<256x64xf32>
    %25 = arith.maximumf %23, %24 : vector<256x64xf32>
    %26 = vector.shape_cast %25 : vector<256x64xf32> to vector<16x16x64xf32>
    %c1 = arith.constant 1 : index
    %c1_38 = arith.constant 1 : index
    %c0_39 = arith.constant 0 : index
    %27 = vector.load %arg14[%c1, %c1_38, %c0_39] : memref<18x18x64xf32, #tpu.memory_space<vmem>>, vector<16x16x64xf32>
    tpu.vector_store %arg14[%c1, %c1_38, %c0_39], %26 {strides = array<i32>} : memref<18x18x64xf32, #tpu.memory_space<vmem>>, vector<16x16x64xf32>,
    %c0_40 = arith.constant 0 : index
    %c0_41 = arith.constant 0 : index
    %c0_42 = arith.constant 0 : index
    %28 = vector.load %arg14[%c0_40, %c0_41, %c0_42] : memref<18x18x64xf32, #tpu.memory_space<vmem>>, vector<16x16x64xf32>
    %29 = arith.truncf %28 : vector<16x16x64xf32> to vector<16x16x64xbf16>
    %c0_43 = arith.constant 0 : index
    %c1_44 = arith.constant 1 : index
    %c0_45 = arith.constant 0 : index
    %30 = vector.load %arg14[%c0_43, %c1_44, %c0_45] : memref<18x18x64xf32, #tpu.memory_space<vmem>>, vector<16x16x64xf32>
    %31 = arith.truncf %30 : vector<16x16x64xf32> to vector<16x16x64xbf16>
    %c0_46 = arith.constant 0 : index
    %c2 = arith.constant 2 : index
    %c0_47 = arith.constant 0 : index
    %32 = vector.load %arg14[%c0_46, %c2, %c0_47] : memref<18x18x64xf32, #tpu.memory_space<vmem>>, vector<16x16x64xf32>
    %33 = arith.truncf %32 : vector<16x16x64xf32> to vector<16x16x64xbf16>
    %c1_48 = arith.constant 1 : index
    %c0_49 = arith.constant 0 : index
    %c0_50 = arith.constant 0 : index
    %34 = vector.load %arg14[%c1_48, %c0_49, %c0_50] : memref<18x18x64xf32, #tpu.memory_space<vmem>>, vector<16x16x64xf32>
    %35 = arith.truncf %34 : vector<16x16x64xf32> to vector<16x16x64xbf16>
    %c1_51 = arith.constant 1 : index
    %c1_52 = arith.constant 1 : index
    %c0_53 = arith.constant 0 : index
    %36 = vector.load %arg14[%c1_51, %c1_52, %c0_53] : memref<18x18x64xf32, #tpu.memory_space<vmem>>, vector<16x16x64xf32>
    %37 = arith.truncf %36 : vector<16x16x64xf32> to vector<16x16x64xbf16>
    %c1_54 = arith.constant 1 : index
    %c2_55 = arith.constant 2 : index
    %c0_56 = arith.constant 0 : index
    %38 = vector.load %arg14[%c1_54, %c2_55, %c0_56] : memref<18x18x64xf32, #tpu.memory_space<vmem>>, vector<16x16x64xf32>
    %39 = arith.truncf %38 : vector<16x16x64xf32> to vector<16x16x64xbf16>
    %c2_57 = arith.constant 2 : index
    %c0_58 = arith.constant 0 : index
    %c0_59 = arith.constant 0 : index
    %40 = vector.load %arg14[%c2_57, %c0_58, %c0_59] : memref<18x18x64xf32, #tpu.memory_space<vmem>>, vector<16x16x64xf32>
    %41 = arith.truncf %40 : vector<16x16x64xf32> to vector<16x16x64xbf16>
    %c2_60 = arith.constant 2 : index
    %c1_61 = arith.constant 1 : index
    %c0_62 = arith.constant 0 : index
    %42 = vector.load %arg14[%c2_60, %c1_61, %c0_62] : memref<18x18x64xf32, #tpu.memory_space<vmem>>, vector<16x16x64xf32>
    %43 = arith.truncf %42 : vector<16x16x64xf32> to vector<16x16x64xbf16>
    %c2_63 = arith.constant 2 : index
    %c2_64 = arith.constant 2 : index
    %c0_65 = arith.constant 0 : index
    %44 = vector.load %arg14[%c2_63, %c2_64, %c0_65] : memref<18x18x64xf32, #tpu.memory_space<vmem>>, vector<16x16x64xf32>
    %45 = arith.truncf %44 : vector<16x16x64xf32> to vector<16x16x64xbf16>
    %46 = tpu.concatenate %29, %31, %33, %35, %37, %39, %41, %43, %45 in 2 : vector<16x16x64xbf16>, vector<16x16x64xbf16>, vector<16x16x64xbf16>, vector<16x16x64xbf16>, vector<16x16x64xbf16>, vector<16x16x64xbf16>, vector<16x16x64xbf16>, vector<16x16x64xbf16>, vector<16x16x64xbf16> -> vector<16x16x576xbf16>
    %47 = vector.shape_cast %46 : vector<16x16x576xbf16> to vector<256x576xbf16>
    %c0_66 = arith.constant 0 : index
    %c0_67 = arith.constant 0 : index
    %48 = vector.load %arg4[%c0_66, %c0_67] : memref<576x128xbf16, #tpu.memory_space<vmem>>, vector<576x128xbf16>
    %cst_68 = arith.constant dense<0.000000e+00> : vector<256x128xf32>
    %49 = tpu.matmul %47, %48, %cst_68 {dimension_numbers = #tpu.dot_dimension_numbers<[1], [0], [0], [1], [0, 0, 1, 1], [], []>} : vector<256x576xbf16>, vector<576x128xbf16>, vector<256x128xf32> -> vector<256x128xf32>
    %c0_69 = arith.constant 0 : index
    %c0_70 = arith.constant 0 : index
    %50 = vector.load %arg5[%c0_69, %c0_70] : memref<1x128xf32, #tpu.memory_space<vmem>>, vector<1x128xf32>
    %51 = vector.broadcast %50 : vector<1x128xf32> to vector<256x128xf32>
    %52 = arith.addf %49, %51 : vector<256x128xf32>
    %cst_71 = arith.constant 0.000000e+00 : f32
    %53 = vector.broadcast %cst_71 : f32 to vector<256x128xf32>
    %54 = arith.maximumf %52, %53 : vector<256x128xf32>
    %55 = vector.shape_cast %54 : vector<256x128xf32> to vector<16x16x128xf32>
    %c1_72 = arith.constant 1 : index
    %c1_73 = arith.constant 1 : index
    %c0_74 = arith.constant 0 : index
    %56 = vector.load %arg15[%c1_72, %c1_73, %c0_74] : memref<18x18x128xf32, #tpu.memory_space<vmem>>, vector<16x16x128xf32>
    tpu.vector_store %arg15[%c1_72, %c1_73, %c0_74], %55 {strides = array<i32>} : memref<18x18x128xf32, #tpu.memory_space<vmem>>, vector<16x16x128xf32>,
    %c0_75 = arith.constant 0 : index
    %c0_76 = arith.constant 0 : index
    %c0_77 = arith.constant 0 : index
    %57 = vector.load %arg15[%c0_75, %c0_76, %c0_77] : memref<18x18x128xf32, #tpu.memory_space<vmem>>, vector<16x16x128xf32>
    %58 = arith.truncf %57 : vector<16x16x128xf32> to vector<16x16x128xbf16>
    %c0_78 = arith.constant 0 : index
    %c1_79 = arith.constant 1 : index
    %c0_80 = arith.constant 0 : index
    %59 = vector.load %arg15[%c0_78, %c1_79, %c0_80] : memref<18x18x128xf32, #tpu.memory_space<vmem>>, vector<16x16x128xf32>
    %60 = arith.truncf %59 : vector<16x16x128xf32> to vector<16x16x128xbf16>
    %c0_81 = arith.constant 0 : index
    %c2_82 = arith.constant 2 : index
    %c0_83 = arith.constant 0 : index
    %61 = vector.load %arg15[%c0_81, %c2_82, %c0_83] : memref<18x18x128xf32, #tpu.memory_space<vmem>>, vector<16x16x128xf32>
    %62 = arith.truncf %61 : vector<16x16x128xf32> to vector<16x16x128xbf16>
    %c1_84 = arith.constant 1 : index
    %c0_85 = arith.constant 0 : index
    %c0_86 = arith.constant 0 : index
    %63 = vector.load %arg15[%c1_84, %c0_85, %c0_86] : memref<18x18x128xf32, #tpu.memory_space<vmem>>, vector<16x16x128xf32>
    %64 = arith.truncf %63 : vector<16x16x128xf32> to vector<16x16x128xbf16>
    %c1_87 = arith.constant 1 : index
    %c1_88 = arith.constant 1 : index
    %c0_89 = arith.constant 0 : index
    %65 = vector.load %arg15[%c1_87, %c1_88, %c0_89] : memref<18x18x128xf32, #tpu.memory_space<vmem>>, vector<16x16x128xf32>
    %66 = arith.truncf %65 : vector<16x16x128xf32> to vector<16x16x128xbf16>
    %c1_90 = arith.constant 1 : index
    %c2_91 = arith.constant 2 : index
    %c0_92 = arith.constant 0 : index
    %67 = vector.load %arg15[%c1_90, %c2_91, %c0_92] : memref<18x18x128xf32, #tpu.memory_space<vmem>>, vector<16x16x128xf32>
    %68 = arith.truncf %67 : vector<16x16x128xf32> to vector<16x16x128xbf16>
    %c2_93 = arith.constant 2 : index
    %c0_94 = arith.constant 0 : index
    %c0_95 = arith.constant 0 : index
    %69 = vector.load %arg15[%c2_93, %c0_94, %c0_95] : memref<18x18x128xf32, #tpu.memory_space<vmem>>, vector<16x16x128xf32>
    %70 = arith.truncf %69 : vector<16x16x128xf32> to vector<16x16x128xbf16>
    %c2_96 = arith.constant 2 : index
    %c1_97 = arith.constant 1 : index
    %c0_98 = arith.constant 0 : index
    %71 = vector.load %arg15[%c2_96, %c1_97, %c0_98] : memref<18x18x128xf32, #tpu.memory_space<vmem>>, vector<16x16x128xf32>
    %72 = arith.truncf %71 : vector<16x16x128xf32> to vector<16x16x128xbf16>
    %c2_99 = arith.constant 2 : index
    %c2_100 = arith.constant 2 : index
    %c0_101 = arith.constant 0 : index
    %73 = vector.load %arg15[%c2_99, %c2_100, %c0_101] : memref<18x18x128xf32, #tpu.memory_space<vmem>>, vector<16x16x128xf32>
    %74 = arith.truncf %73 : vector<16x16x128xf32> to vector<16x16x128xbf16>
    %75 = tpu.concatenate %58, %60, %62, %64, %66, %68, %70, %72, %74 in 2 : vector<16x16x128xbf16>, vector<16x16x128xbf16>, vector<16x16x128xbf16>, vector<16x16x128xbf16>, vector<16x16x128xbf16>, vector<16x16x128xbf16>, vector<16x16x128xbf16>, vector<16x16x128xbf16>, vector<16x16x128xbf16> -> vector<16x16x1152xbf16>
    %76 = vector.shape_cast %75 : vector<16x16x1152xbf16> to vector<256x1152xbf16>
    %c0_102 = arith.constant 0 : index
    %c0_103 = arith.constant 0 : index
    %77 = vector.load %arg6[%c0_102, %c0_103] : memref<1152x128xbf16, #tpu.memory_space<vmem>>, vector<1152x128xbf16>
    %cst_104 = arith.constant dense<0.000000e+00> : vector<256x128xf32>
    %78 = tpu.matmul %76, %77, %cst_104 {dimension_numbers = #tpu.dot_dimension_numbers<[1], [0], [0], [1], [0, 0, 1, 1], [], []>} : vector<256x1152xbf16>, vector<1152x128xbf16>, vector<256x128xf32> -> vector<256x128xf32>
    %c0_105 = arith.constant 0 : index
    %c0_106 = arith.constant 0 : index
    %79 = vector.load %arg7[%c0_105, %c0_106] : memref<1x128xf32, #tpu.memory_space<vmem>>, vector<1x128xf32>
    %80 = vector.broadcast %79 : vector<1x128xf32> to vector<256x128xf32>
    %81 = arith.addf %78, %80 : vector<256x128xf32>
    %cst_107 = arith.constant 0.000000e+00 : f32
    %82 = vector.broadcast %cst_107 : f32 to vector<256x128xf32>
    %83 = arith.maximumf %81, %82 : vector<256x128xf32>
    %84 = vector.shape_cast %83 : vector<256x128xf32> to vector<16x16x128xf32>
    %c1_108 = arith.constant 1 : index
    %c1_109 = arith.constant 1 : index
    %c0_110 = arith.constant 0 : index
    %85 = vector.load %arg15[%c1_108, %c1_109, %c0_110] : memref<18x18x128xf32, #tpu.memory_space<vmem>>, vector<16x16x128xf32>
    tpu.vector_store %arg15[%c1_108, %c1_109, %c0_110], %84 {strides = array<i32>} : memref<18x18x128xf32, #tpu.memory_space<vmem>>, vector<16x16x128xf32>,
    %c0_111 = arith.constant 0 : index
    %c0_112 = arith.constant 0 : index
    %c0_113 = arith.constant 0 : index
    %86 = vector.load %arg15[%c0_111, %c0_112, %c0_113] : memref<18x18x128xf32, #tpu.memory_space<vmem>>, vector<16x16x128xf32>
    %87 = arith.truncf %86 : vector<16x16x128xf32> to vector<16x16x128xbf16>
    %c0_114 = arith.constant 0 : index
    %c1_115 = arith.constant 1 : index
    %c0_116 = arith.constant 0 : index
    %88 = vector.load %arg15[%c0_114, %c1_115, %c0_116] : memref<18x18x128xf32, #tpu.memory_space<vmem>>, vector<16x16x128xf32>
    %89 = arith.truncf %88 : vector<16x16x128xf32> to vector<16x16x128xbf16>
    %c0_117 = arith.constant 0 : index
    %c2_118 = arith.constant 2 : index
    %c0_119 = arith.constant 0 : index
    %90 = vector.load %arg15[%c0_117, %c2_118, %c0_119] : memref<18x18x128xf32, #tpu.memory_space<vmem>>, vector<16x16x128xf32>
    %91 = arith.truncf %90 : vector<16x16x128xf32> to vector<16x16x128xbf16>
    %c1_120 = arith.constant 1 : index
    %c0_121 = arith.constant 0 : index
    %c0_122 = arith.constant 0 : index
    %92 = vector.load %arg15[%c1_120, %c0_121, %c0_122] : memref<18x18x128xf32, #tpu.memory_space<vmem>>, vector<16x16x128xf32>
    %93 = arith.truncf %92 : vector<16x16x128xf32> to vector<16x16x128xbf16>
    %c1_123 = arith.constant 1 : index
    %c1_124 = arith.constant 1 : index
    %c0_125 = arith.constant 0 : index
    %94 = vector.load %arg15[%c1_123, %c1_124, %c0_125] : memref<18x18x128xf32, #tpu.memory_space<vmem>>, vector<16x16x128xf32>
    %95 = arith.truncf %94 : vector<16x16x128xf32> to vector<16x16x128xbf16>
    %c1_126 = arith.constant 1 : index
    %c2_127 = arith.constant 2 : index
    %c0_128 = arith.constant 0 : index
    %96 = vector.load %arg15[%c1_126, %c2_127, %c0_128] : memref<18x18x128xf32, #tpu.memory_space<vmem>>, vector<16x16x128xf32>
    %97 = arith.truncf %96 : vector<16x16x128xf32> to vector<16x16x128xbf16>
    %c2_129 = arith.constant 2 : index
    %c0_130 = arith.constant 0 : index
    %c0_131 = arith.constant 0 : index
    %98 = vector.load %arg15[%c2_129, %c0_130, %c0_131] : memref<18x18x128xf32, #tpu.memory_space<vmem>>, vector<16x16x128xf32>
    %99 = arith.truncf %98 : vector<16x16x128xf32> to vector<16x16x128xbf16>
    %c2_132 = arith.constant 2 : index
    %c1_133 = arith.constant 1 : index
    %c0_134 = arith.constant 0 : index
    %100 = vector.load %arg15[%c2_132, %c1_133, %c0_134] : memref<18x18x128xf32, #tpu.memory_space<vmem>>, vector<16x16x128xf32>
    %101 = arith.truncf %100 : vector<16x16x128xf32> to vector<16x16x128xbf16>
    %c2_135 = arith.constant 2 : index
    %c2_136 = arith.constant 2 : index
    %c0_137 = arith.constant 0 : index
    %102 = vector.load %arg15[%c2_135, %c2_136, %c0_137] : memref<18x18x128xf32, #tpu.memory_space<vmem>>, vector<16x16x128xf32>
    %103 = arith.truncf %102 : vector<16x16x128xf32> to vector<16x16x128xbf16>
    %104 = tpu.concatenate %87, %89, %91, %93, %95, %97, %99, %101, %103 in 2 : vector<16x16x128xbf16>, vector<16x16x128xbf16>, vector<16x16x128xbf16>, vector<16x16x128xbf16>, vector<16x16x128xbf16>, vector<16x16x128xbf16>, vector<16x16x128xbf16>, vector<16x16x128xbf16>, vector<16x16x128xbf16> -> vector<16x16x1152xbf16>
    %105 = vector.shape_cast %104 : vector<16x16x1152xbf16> to vector<256x1152xbf16>
    %c0_138 = arith.constant 0 : index
    %c0_139 = arith.constant 0 : index
    %106 = vector.load %arg8[%c0_138, %c0_139] : memref<1152x64xbf16, #tpu.memory_space<vmem>>, vector<1152x64xbf16>
    %cst_140 = arith.constant dense<0.000000e+00> : vector<256x64xf32>
    %107 = tpu.matmul %105, %106, %cst_140 {dimension_numbers = #tpu.dot_dimension_numbers<[1], [0], [0], [1], [0, 0, 1, 1], [], []>} : vector<256x1152xbf16>, vector<1152x64xbf16>, vector<256x64xf32> -> vector<256x64xf32>
    %c0_141 = arith.constant 0 : index
    %c0_142 = arith.constant 0 : index
    %108 = vector.load %arg9[%c0_141, %c0_142] : memref<1x64xf32, #tpu.memory_space<vmem>>, vector<1x64xf32>
    %109 = vector.broadcast %108 : vector<1x64xf32> to vector<256x64xf32>
    %110 = arith.addf %107, %109 : vector<256x64xf32>
    %cst_143 = arith.constant 0.000000e+00 : f32
    %111 = vector.broadcast %cst_143 : f32 to vector<256x64xf32>
    %112 = arith.maximumf %110, %111 : vector<256x64xf32>
    %c0_144 = arith.constant 0 : index
    %c0_145 = arith.constant 0 : index
    %113 = vector.load %arg10[%c0_144, %c0_145] : memref<64x64xbf16, #tpu.memory_space<vmem>>, vector<64x64xbf16>
    %114 = arith.truncf %112 : vector<256x64xf32> to vector<256x64xbf16>
    %cst_146 = arith.constant dense<0.000000e+00> : vector<64x256xf32>
    %115 = tpu.matmul %113, %114, %cst_146 {dimension_numbers = #tpu.dot_dimension_numbers<[1], [1], [0], [0], [0, 0, 1, 0], [], []>} : vector<64x64xbf16>, vector<256x64xbf16>, vector<64x256xf32> -> vector<64x256xf32>
    %c0_147 = arith.constant 0 : index
    %c0_148 = arith.constant 0 : index
    %116 = vector.load %arg11[%c0_147, %c0_148] : memref<64x1xf32, #tpu.memory_space<vmem>>, vector<64x1xf32>
    %117 = vector.broadcast %116 : vector<64x1xf32> to vector<64x256xf32>
    %118 = arith.addf %115, %117 : vector<64x256xf32>
    %c0_149 = arith.constant 0 : index
    %c0_150 = arith.constant 0 : index
    %c0_151 = arith.constant 0 : index
    %119 = vector.load %arg12[%c0_149, %c0_150, %c0_151] : memref<1x64x256xf32, #tpu.memory_space<vmem>>, vector<1x64x256xf32>
    %120 = vector.shape_cast %119 : vector<1x64x256xf32> to vector<64x256xf32>
    %121 = vector.shape_cast %118 : vector<64x256xf32> to vector<1x64x256xf32>
    tpu.vector_store %arg12[%c0_149, %c0_150, %c0_151], %121 {strides = array<i32>} : memref<1x64x256xf32, #tpu.memory_space<vmem>>, vector<1x64x256xf32>,
    %122 = arith.mulf %118, %118 : vector<64x256xf32>
    %cst_152 = arith.constant dense<0.000000e+00> : vector<256xf32>
    %123 = vector.multi_reduction <add>, %122, %cst_152 [0] : vector<64x256xf32> to vector<256xf32>
    %124 = vector.shape_cast %123 : vector<256xf32> to vector<1x256xf32>
    %125 = math.sqrt %124 : vector<1x256xf32>
    %c0_153 = arith.constant 0 : index
    %c0_154 = arith.constant 0 : index
    %c0_155 = arith.constant 0 : index
    %126 = vector.load %arg13[%c0_153, %c0_154, %c0_155] : memref<1x1x256xf32, #tpu.memory_space<vmem>>, vector<1x1x256xf32>
    %127 = vector.shape_cast %126 : vector<1x1x256xf32> to vector<1x256xf32>
    %128 = vector.shape_cast %125 : vector<1x256xf32> to vector<1x1x256xf32>
    tpu.vector_store %arg13[%c0_153, %c0_154, %c0_155], %128 {strides = array<i32>} : memref<1x1x256xf32, #tpu.memory_space<vmem>>, vector<1x1x256xf32>,
    return
  }
  func.func @transform_0(%arg0: i32) -> (i32, i32, i32) {
    %c0_i32 = arith.constant 0 : i32
    %c0_i32_0 = arith.constant 0 : i32
    %c0_i32_1 = arith.constant 0 : i32
    return %arg0, %c0_i32, %c0_i32_0 : i32, i32, i32
  }
  func.func @transform_1(%arg0: i32) -> (i32, i32) {
    %c0_i32 = arith.constant 0 : i32
    %c0_i32_0 = arith.constant 0 : i32
    %c0_i32_1 = arith.constant 0 : i32
    return %c0_i32, %c0_i32_0 : i32, i32
  }
  func.func @transform_2(%arg0: i32) -> (i32, i32) {
    %c0_i32 = arith.constant 0 : i32
    %c0_i32_0 = arith.constant 0 : i32
    %c0_i32_1 = arith.constant 0 : i32
    return %c0_i32, %c0_i32_0 : i32, i32
  }
  func.func @transform_3(%arg0: i32) -> (i32, i32) {
    %c0_i32 = arith.constant 0 : i32
    %c0_i32_0 = arith.constant 0 : i32
    %c0_i32_1 = arith.constant 0 : i32
    return %c0_i32, %c0_i32_0 : i32, i32
  }
  func.func @transform_4(%arg0: i32) -> (i32, i32) {
    %c0_i32 = arith.constant 0 : i32
    %c0_i32_0 = arith.constant 0 : i32
    %c0_i32_1 = arith.constant 0 : i32
    return %c0_i32, %c0_i32_0 : i32, i32
  }
  func.func @transform_5(%arg0: i32) -> (i32, i32) {
    %c0_i32 = arith.constant 0 : i32
    %c0_i32_0 = arith.constant 0 : i32
    %c0_i32_1 = arith.constant 0 : i32
    return %c0_i32, %c0_i32_0 : i32, i32
  }
  func.func @transform_6(%arg0: i32) -> (i32, i32) {
    %c0_i32 = arith.constant 0 : i32
    %c0_i32_0 = arith.constant 0 : i32
    %c0_i32_1 = arith.constant 0 : i32
    return %c0_i32, %c0_i32_0 : i32, i32
  }
  func.func @transform_7(%arg0: i32) -> (i32, i32) {
    %c0_i32 = arith.constant 0 : i32
    %c0_i32_0 = arith.constant 0 : i32
    %c0_i32_1 = arith.constant 0 : i32
    return %c0_i32, %c0_i32_0 : i32, i32
  }
  func.func @transform_8(%arg0: i32) -> (i32, i32) {
    %c0_i32 = arith.constant 0 : i32
    %c0_i32_0 = arith.constant 0 : i32
    %c0_i32_1 = arith.constant 0 : i32
    return %c0_i32, %c0_i32_0 : i32, i32
  }
  func.func @transform_9(%arg0: i32) -> (i32, i32) {
    %c0_i32 = arith.constant 0 : i32
    %c0_i32_0 = arith.constant 0 : i32
    %c0_i32_1 = arith.constant 0 : i32
    return %c0_i32, %c0_i32_0 : i32, i32
  }
  func.func @transform_10(%arg0: i32) -> (i32, i32) {
    %c0_i32 = arith.constant 0 : i32
    %c0_i32_0 = arith.constant 0 : i32
    %c0_i32_1 = arith.constant 0 : i32
    return %c0_i32, %c0_i32_0 : i32, i32
  }
  func.func @transform_11(%arg0: i32) -> (i32, i32, i32) {
    %c0_i32 = arith.constant 0 : i32
    %c0_i32_0 = arith.constant 0 : i32
    %c0_i32_1 = arith.constant 0 : i32
    return %arg0, %c0_i32, %c0_i32_0 : i32, i32, i32
  }
  func.func @transform_12(%arg0: i32) -> (i32, i32, i32) {
    %c0_i32 = arith.constant 0 : i32
    %c0_i32_0 = arith.constant 0 : i32
    %c0_i32_1 = arith.constant 0 : i32
    return %arg0, %c0_i32, %c0_i32_0 : i32, i32, i32
  }
}

</mosaic_0001>

<bundles_post_ra>
// kernel: hsi_feature_net.1
= control target key start
LH: loop header
LB: loop body
LE: loop exit
PB: predicated region body
PF: predicated region fallthrough
CT: control target
= control target key end

     0   :  { %s8739_s21 = smov 0   ;;  %s11141_s0 = inlined_call_operand.vmem [shape: f32[2,256,128], index: 0, kind: input, shape index: {}]   ;;  %s11142_s1 = inlined_call_operand.vmem [shape: bf16[128,64], index: 1, kind: input, shape index: {}]   ;;  %s11143_s2 = inlined_call_operand.vmem [shape: f32[1,64], index: 2, kind: input, shape index: {}]   ;;  %s11144_s3 = inlined_call_operand.vmem [shape: bf16[576,128], index: 3, kind: input, shape index: {}]   ;;  %s11145_s4 = inlined_call_operand.vmem [shape: f32[1,128], index: 4, kind: input, shape index: {}]   ;;  %s11146_s5 = inlined_call_operand.vmem [shape: bf16[1152,128], index: 5, kind: input, shape index: {}]   ;;  %s11147_s6 = inlined_call_operand.vmem [shape: f32[1,128], index: 6, kind: input, shape index: {}]   ;;  %s11148_s7 = inlined_call_operand.vmem [shape: bf16[1152,64], index: 7, kind: input, shape index: {}]   ;;  %s11149_s8 = inlined_call_operand.vmem [shape: f32[1,64], index: 8, kind: input, shape index: {}]   ;;  %s11150_s9 = inlined_call_operand.vmem [shape: bf16[64,64], index: 9, kind: input, shape index: {}]   ;;  %s11151_s10 = inlined_call_operand.vmem [shape: f32[64,1], index: 10, kind: input, shape index: {}]   ;;  %s11152_s11 = inlined_call_operand.vmem [shape: f32[2,64,256], index: 11, kind: output, shape index: {0}]   ;;  %s11153_s12 = inlined_call_operand.vmem [shape: f32[2,1,256], index: 12, kind: output, shape index: {1}]  }
   0x1 LB: > { %s6775_s22 = sadd.s32 4294967295, %s8668_s21   ;;  %p6779_p0 = scmp.ge.s32.totalorder %s8668_s21, 1  ;;  %s8668_s21 = sphi %s8739_s21, %s23_s21  }
   0x2   : > { %p365_p1 = scmp.lt.s32.totalorder %s8668_s21, 3 }
   0x4   : > { %p366_p2 = pnand %p6779_p0, %p365_p1 }
   0x5   : > { %v8463_v0 = vld [vmem:[%s11142_s1] sm:$0xff] (!%p366_p2)   ;;  %p411_p3 = scmp.lt.s32.totalorder (!%p366_p2), %s6775_s22, 1  ;;  %v8464_v1 = vld [vmem:[%s11142_s1 + $0x8] sm:$0xff] (!%p366_p2)   ;;  %v8465_v2 = vld [vmem:[%s11142_s1 + $0x10] sm:$0xff] (!%p366_p2)   ;;  %vm426_vm0 = vcmask (!%p366_p2), 523264   ;;  %vm435_vm1 = vcmask (!%p366_p2), 516096  }
   0x6   : > { %369 = sbr.rel (%p366_p2) target bundleno = 2081 (0x821), region = 64  ;;  %8241 = vmatprep.subr.bf16.mxu0 (!%p366_p2), %v8463_v0  ;;  %v8466_v3 = vld [vmem:[%s11142_s1 + $0x18] sm:$0xff] (!%p366_p2)   ;;  %v8467_v7 = vld [vmem:[%s11142_s1 + $0x20] sm:$0xff] (!%p366_p2)   ;;  %v8468_v8 = vld [vmem:[%s11142_s1 + $0x28] sm:$0xff] (!%p366_p2)   ;;  %v8670_v56 = vmov (!%p366_p2), 0.0   ;;  %vm429_vm2 = vcmask (!%p366_p2), 517120  }
   0x7   : > { %8242 = vmatpush3.bf16.msra.mxu0 (!%p366_p2), %v8463_v0  ;;  %v8469_v9 = vld [vmem:[%s11142_s1 + $0x30] sm:$0xff] (!%p366_p2)   ;;  %v8470_v10 = vld [vmem:[%s11142_s1 + $0x38] sm:$0xff] (!%p366_p2)   ;;  %438 = vst.msk [vmem:[#allocation2 + $0x30] sm:$0x1] (!%p366_p2), %vm435_vm1, %v8670_v56  ;;  %437 = vst.msk [vmem:[#allocation2 + $0x18] sm:$0x1] (!%p366_p2), %vm435_vm1, %v8670_v56 }
   0x8   : > { %8243 = vmatprep.subr.bf16.mxu0 (!%p366_p2), %v8464_v1  ;;  %427 = vst.msk [vmem:[#allocation2] sm:$0xff] (!%p366_p2), %vm426_vm0, %v8670_v56  ;;  %428 = vst.msk [vmem:[#allocation2 + $0x8] sm:$0xff] (!%p366_p2), %vm426_vm0, %v8670_v56  ;;  %v8471_v57 = vld [vmem:[%s11144_s3 + $0x40] sm:$0xff] (!%p366_p2)   ;;  %v8473_v59 = vld [vmem:[%s11144_s3 + $0x48] sm:$0xff] (!%p366_p2)  }
   0x9   : > { %432 = vst.msk [vmem:[#allocation2 + $0x198] sm:$0xff] (!%p366_p2), %vm426_vm0, %v8670_v56  ;;  %433 = vst.msk [vmem:[#allocation2 + $0x1a0] sm:$0xff] (!%p366_p2), %vm426_vm0, %v8670_v56  ;;  %v8472_v58 = vld [vmem:[%s11144_s3] sm:$0xff] (!%p366_p2)   ;;  %7029 = vmatprep.subr.bf16.mxu1 (!%p366_p2), %v8471_v57  ;;  %v8474_v60 = vld [vmem:[%s11144_s3 + $0x8] sm:$0xff] (!%p366_p2)  }
   0xa   : > { %439 = vst.msk [vmem:[#allocation2 + $0x48] sm:$0x1] (!%p366_p2), %vm435_vm1, %v8670_v56  ;;  %440 = vst.msk [vmem:[#allocation2 + $0x60] sm:$0x1] (!%p366_p2), %vm435_vm1, %v8670_v56  ;;  %7030 = vmatpush3.bf16.msra.mxu1 (!%p366_p2), %v8472_v58  ;;  %v8475_v61 = vld [vmem:[%s11144_s3 + $0x50] sm:$0xff] (!%p366_p2)   ;;  %v8477_v63 = vld [vmem:[%s11144_s3 + $0x58] sm:$0xff] (!%p366_p2)  }
   0xb   : > { %8244 = vmatpush3.bf16.msra.mxu0 (!%p366_p2), %v8464_v1  ;;  %441 = vst.msk [vmem:[#allocation2 + $0x78] sm:$0x1] (!%p366_p2), %vm435_vm1, %v8670_v56  ;;  %442 = vst.msk [vmem:[#allocation2 + $0x90] sm:$0x1] (!%p366_p2), %vm435_vm1, %v8670_v56  ;;  %7031 = vmatprep.subr.bf16.mxu1 (!%p366_p2), %v8473_v59  ;;  %v8476_v62 = vld [vmem:[%s11144_s3 + $0x10] sm:$0xff] (!%p366_p2)   ;;  %v8478_v0 = vld [vmem:[%s11144_s3 + $0x18] sm:$0xff] (!%p366_p2)  }
   0xc   : > { %8245 = vmatprep.subr.bf16.mxu0 (!%p366_p2), %v8465_v2  ;;  %443 = vst.msk [vmem:[#allocation2 + $0xa8] sm:$0x1] (!%p366_p2), %vm435_vm1, %v8670_v56  ;;  %444 = vst.msk [vmem:[#allocation2 + $0xc0] sm:$0x1] (!%p366_p2), %vm435_vm1, %v8670_v56  ;;  %v8479_v1 = vld [vmem:[%s11144_s3 + $0x60] sm:$0xff] (!%p366_p2)  }
   0xd   : > { %s11155_s22 = smov (!%p411_p3, %s6775_s22), 1  ;;  %445 = vst.msk [vmem:[#allocation2 + $0xd8] sm:$0x1] %vm435_vm1, %v8670_v56  ;;  %446 = vst.msk [vmem:[#allocation2 + $0xf0] sm:$0x1] %vm435_vm1, %v8670_v56 }
   0xe   : > { %s7003_s29 = sshll.u32 %s11155_s22, 8  ;;  %447 = vst.msk [vmem:[#allocation2 + $0x108] sm:$0x1] %vm435_vm1, %v8670_v56  ;;  %448 = vst.msk [vmem:[#allocation2 + $0x120] sm:$0x1] %vm435_vm1, %v8670_v56  ;;  %7032 = vmatpush3.bf16.msra.mxu1 %v8474_v60  ;;  %s7004_s19 = sshll.u32 %s11155_s22, 7 }
   0xf   : > { %s8762_s14 = scalar_lea.vmem %s11141_s0, %s7003_s29  ;;  %8246 = vmatpush3.bf16.msra.mxu0 %v8465_v2  ;;  %449 = vst.msk [vmem:[#allocation2 + $0x138] sm:$0x1] %vm435_vm1, %v8670_v56  ;;  %450 = vst.msk [vmem:[#allocation2 + $0x150] sm:$0x1] %vm435_vm1, %v8670_v56  ;;  %7033 = vmatprep.subr.bf16.mxu1 %v8475_v61  ;;  %v8480_v2 = vld [vmem:[%s11144_s3 + $0x20] sm:$0xff]   ;;  %s8671_s29 = smov 64  }
  0x10   : > { %v515_v4 = vld [vmem:[%s8762_s14] sm:$0xff]  ;;  %v516_v5 = vld [vmem:[%s8762_s14 + $0x8] sm:$0xff]  ;;  %8247 = vmatprep.subr.bf16.mxu0 %v8466_v3  ;;  %v517_v11 = vld [vmem:[%s8762_s14 + $0x10] sm:$0xff]  ;;  %451 = vst.msk [vmem:[#allocation2 + $0x168] sm:$0x1] %vm435_vm1, %v8670_v56  ;;  %s11116_s24 = scalar_lea.vmem %s11152_s11, %s7004_s19  ;;  %s6784_s25 = sshll.u32 %s11155_s22, 1 }
  0x11   : > { %v547_v6 = vpack.c.bf16 %v516_v5, %v515_v4  ;;  %v518_v12 = vld [vmem:[%s8762_s14 + $0x18] sm:$0xff]  ;;  %v519_v13 = vld [vmem:[%s8762_s14 + $0x20] sm:$0xff]  ;;  %v520_v14 = vld [vmem:[%s8762_s14 + $0x28] sm:$0xff]  ;;  %452 = vst.msk [vmem:[#allocation2 + $0x180] sm:$0x1] %vm435_vm1, %v8670_v56  ;;  %s424_s28 = scalar_lea.vmem %s11153_s12, %s6784_s25 }
  0x12   : > { %v548_v15 = vpack.c.bf16 %v518_v12, %v517_v11  ;;  %v549_v16 = vpack.c.bf16 %v520_v14, %v519_v13  ;;  %v521_v17 = vld [vmem:[%s8762_s14 + $0x30] sm:$0xff]  ;;  %v522_v18 = vld [vmem:[%s8762_s14 + $0x38] sm:$0xff]  ;;  %v523_v19 = vld [vmem:[%s8762_s14 + $0x40] sm:$0xff]  ;;  %455 = vst.msk [vmem:[#allocation2 + $0x29] sm:$0x1] %vm435_vm1, %v8670_v56  ;;  %7034 = vmatpush3.bf16.msra.mxu1 %v8476_v62 }
  0x13   : > { %8257 = vmatprep.mubr.bf16.mxu0 %v547_v6  ;;  %8248 = vmatpush3.bf16.msra.mxu0 %v8466_v3  ;;  %v524_v20 = vld [vmem:[%s8762_s14 + $0x48] sm:$0xff]  ;;  %v550_v21 = vpack.c.bf16 %v522_v18, %v521_v17  ;;  %v525_v23 = vld [vmem:[%s8762_s14 + $0x50] sm:$0xff]  ;;  %v526_v24 = vld [vmem:[%s8762_s14 + $0x58] sm:$0xff]  ;;  %456 = vst.msk [vmem:[#allocation2 + $0x41] sm:$0x1] %vm435_vm1, %v8670_v56 }
  0x14   : > { %8249 = vmatprep.subr.bf16.mxu0 %v8467_v7  ;;  %v551_v22 = vpack.c.bf16 %v524_v20, %v523_v19  ;;  %v527_v25 = vld [vmem:[%s8762_s14 + $0x60] sm:$0xff]  ;;  %v528_v26 = vld [vmem:[%s8762_s14 + $0x68] sm:$0xff]  ;;  %v552_v27 = vpack.c.bf16 %v526_v24, %v525_v23  ;;  %v529_v29 = vld [vmem:[%s8762_s14 + $0x70] sm:$0xff]  ;;  %457 = vst.msk [vmem:[#allocation2 + $0x59] sm:$0x1] %vm435_vm1, %v8670_v56  ;;  %7035 = vmatprep.subr.bf16.mxu1 %v8477_v63 }
  0x15   : > { %v553_v28 = vpack.c.bf16 %v528_v26, %v527_v25  ;;  %v530_v30 = vld [vmem:[%s8762_s14 + $0x78] sm:$0xff]  ;;  %v531_v31 = vld [vmem:[%s8762_s14 + $0x80] sm:$0xff]  ;;  %v532_v32 = vld [vmem:[%s8762_s14 + $0x88] sm:$0xff]  ;;  %458 = vst.msk [vmem:[#allocation2 + $0x71] sm:$0x1] %vm435_vm1, %v8670_v56 }
  0x16   : > { %v554_v33 = vpack.c.bf16 %v530_v30, %v529_v29  ;;  %v555_v34 = vpack.c.bf16 %v532_v32, %v531_v31  ;;  %v533_v35 = vld [vmem:[%s8762_s14 + $0x90] sm:$0xff]  ;;  %v534_v36 = vld [vmem:[%s8762_s14 + $0x98] sm:$0xff]  ;;  %v535_v37 = vld [vmem:[%s8762_s14 + $0xa0] sm:$0xff]  ;;  %459 = vst.msk [vmem:[#allocation2 + $0x89] sm:$0x1] %vm435_vm1, %v8670_v56  ;;  %7036 = vmatpush3.bf16.msra.mxu1 %v8478_v0 }
  0x17   : > { %8250 = vmatpush3.bf16.msra.mxu0 %v8467_v7  ;;  %v536_v38 = vld [vmem:[%s8762_s14 + $0xa8] sm:$0xff]  ;;  %v556_v39 = vpack.c.bf16 %v534_v36, %v533_v35  ;;  %v537_v41 = vld [vmem:[%s8762_s14 + $0xb0] sm:$0xff]  ;;  %v538_v42 = vld [vmem:[%s8762_s14 + $0xb8] sm:$0xff]  ;;  %460 = vst.msk [vmem:[#allocation2 + $0xa1] sm:$0x1] %vm435_vm1, %v8670_v56  ;;  %7037 = vmatprep.subr.bf16.mxu1 %v8479_v1 }
  0x18   : > { %8251 = vmatprep.subr.bf16.mxu0 %v8468_v8  ;;  %v557_v40 = vpack.c.bf16 %v536_v38, %v535_v37  ;;  %v539_v43 = vld [vmem:[%s8762_s14 + $0xc0] sm:$0xff]  ;;  %v540_v44 = vld [vmem:[%s8762_s14 + $0xc8] sm:$0xff]  ;;  %v558_v45 = vpack.c.bf16 %v538_v42, %v537_v41  ;;  %v541_v47 = vld [vmem:[%s8762_s14 + $0xd0] sm:$0xff]  ;;  %461 = vst.msk [vmem:[#allocation2 + $0xb9] sm:$0x1] %vm435_vm1, %v8670_v56 }
  0x19   : > { %v559_v46 = vpack.c.bf16 %v540_v44, %v539_v43  ;;  %v542_v48 = vld [vmem:[%s8762_s14 + $0xd8] sm:$0xff]  ;;  %v543_v49 = vld [vmem:[%s8762_s14 + $0xe0] sm:$0xff]  ;;  %v544_v50 = vld [vmem:[%s8762_s14 + $0xe8] sm:$0xff]  ;;  %462 = vst.msk [vmem:[#allocation2 + $0xd1] sm:$0x1] %vm435_vm1, %v8670_v56 }
  0x1a   : > { %v560_v51 = vpack.c.bf16 %v542_v48, %v541_v47  ;;  %v561_v52 = vpack.c.bf16 %v544_v50, %v543_v49  ;;  %v545_v53 = vld [vmem:[%s8762_s14 + $0xf0] sm:$0xff]  ;;  %v546_v54 = vld [vmem:[%s8762_s14 + $0xf8] sm:$0xff]  ;;  %463 = vst.msk [vmem:[#allocation2 + $0xe9] sm:$0x1] %vm435_vm1, %v8670_v56  ;;  %464 = vst.msk [vmem:[#allocation2 + $0x101] sm:$0x1] %vm435_vm1, %v8670_v56  ;;  %7038 = vmatpush3.bf16.msra.mxu1 %v8480_v2 }
  0x1b   : > { %8252 = vmatpush3.bf16.msra.mxu0 %v8468_v8  ;;  %v562_v55 = vpack.c.bf16 %v546_v54, %v545_v53  ;;  %465 = vst.msk [vmem:[#allocation2 + $0x119] sm:$0x1] %vm435_vm1, %v8670_v56  ;;  %466 = vst.msk [vmem:[#allocation2 + $0x131] sm:$0x1] %vm435_vm1, %v8670_v56  ;;  %v8481_v3 = vld [vmem:[%s11144_s3 + $0x68] sm:$0xff]   ;;  %v8484_v12 = vld [vmem:[%s11144_s3 + $0x30] sm:$0xff]  }
  0x1c   : > { %8253 = vmatprep.subr.bf16.mxu0 %v8469_v9  ;;  %467 = vst.msk [vmem:[#allocation2 + $0x149] sm:$0x1] %vm435_vm1, %v8670_v56  ;;  %468 = vst.msk [vmem:[#allocation2 + $0x161] sm:$0x1] %vm435_vm1, %v8670_v56  ;;  %v8971_v4 = vld [vmem:[%s11143_s2] ss:$0 sm:$0xff]  ;;  %7039 = vmatprep.subr.bf16.mxu1 %v8481_v3 }
  0x1d   : > { %469 = vst.msk [vmem:[#allocation2 + $0x179] sm:$0x1] %vm435_vm1, %v8670_v56  ;;  %470 = vst.msk [vmem:[#allocation2 + $0x191] sm:$0x1] %vm435_vm1, %v8670_v56  ;;  %v8482_v5 = vld [vmem:[%s11144_s3 + $0x28] sm:$0xff]   ;;  %v8485_v19 = vld [vmem:[%s11144_s3 + $0x78] sm:$0xff]  }
  0x1e   : > { %472 = vst [vmem:[#allocation3] sm:$0xff] %v8670_v56  ;;  %473 = vst [vmem:[#allocation3 + $0x8] sm:$0xff] %v8670_v56  ;;  %7040 = vmatpush3.bf16.msra.mxu1 %v8482_v5  ;;  %v908_v36 = vld [vmem:[#allocation2 + $0x1] sm:$0xff] }
  0x1f   : > { %8254 = vmatpush3.bf16.msra.mxu0 %v8469_v9  ;;  %474 = vst [vmem:[#allocation3 + $0x10] sm:$0x3] %v8670_v56  ;;  %476 = vst [vmem:[#allocation3 + $0x198] sm:$0xff] %v8670_v56  ;;  %v8483_v9 = vld [vmem:[%s11144_s3 + $0x70] sm:$0xff]  }
  0x20   : > { %8255 = vmatprep.subr.bf16.mxu0 %v8470_v10  ;;  %477 = vst [vmem:[#allocation3 + $0x1a0] sm:$0xff] %v8670_v56  ;;  %478 = vst [vmem:[#allocation3 + $0x1a8] sm:$0x3] %v8670_v56  ;;  %7041 = vmatprep.subr.bf16.mxu1 %v8483_v9 }
  0x21   : > { %480 = vst [vmem:[#allocation3 + $0x18] sm:$0x1] %v8670_v56  ;;  %481 = vst [vmem:[#allocation3 + $0x30] sm:$0x1] %v8670_v56 }
  0x22   : > { %482 = vst [vmem:[#allocation3 + $0x48] sm:$0x1] %v8670_v56  ;;  %483 = vst [vmem:[#allocation3 + $0x60] sm:$0x1] %v8670_v56  ;;  %7042 = vmatpush3.bf16.msra.mxu1 %v8484_v12 }
  0x23   : > { %8256 = vmatpush3.bf16.msra.mxu0 %v8470_v10  ;;  %484 = vst [vmem:[#allocation3 + $0x78] sm:$0x1] %v8670_v56  ;;  %485 = vst [vmem:[#allocation3 + $0x90] sm:$0x1] %v8670_v56  ;;  %7043 = vmatprep.subr.bf16.mxu1 %v8485_v19 }
  0x24   : > { %486 = vst [vmem:[#allocation3 + $0xa8] sm:$0x1] %v8670_v56  ;;  %487 = vst [vmem:[#allocation3 + $0xc0] sm:$0x1] %v8670_v56 }
  0x25   : > { %488 = vst [vmem:[#allocation3 + $0xd8] sm:$0x1] %v8670_v56  ;;  %489 = vst [vmem:[#allocation3 + $0xf0] sm:$0x1] %v8670_v56 }
  0x26   : > { %8258 = vmatmul.mubr.bf16.vlgmr.msra.gmra.mrb[0].mxu0 %v548_v15  ;;  %490 = vst [vmem:[#allocation3 + $0x108] sm:$0x1] %v8670_v56  ;;  %491 = vst [vmem:[#allocation3 + $0x120] sm:$0x1] %v8670_v56 }
  0x27   : > { %8261 = vmatprep.mubr.bf16.mxu0 %v549_v16  ;;  %492 = vst [vmem:[#allocation3 + $0x138] sm:$0x1] %v8670_v56  ;;  %493 = vst [vmem:[#allocation3 + $0x150] sm:$0x1] %v8670_v56 }
  0x28   : > { %494 = vst [vmem:[#allocation3 + $0x168] sm:$0x1] %v8670_v56  ;;  %495 = vst [vmem:[#allocation3 + $0x180] sm:$0x1] %v8670_v56 }
  0x29   : > { %498 = vst [vmem:[#allocation3 + $0x29] sm:$0x1] %v8670_v56  ;;  %499 = vst [vmem:[#allocation3 + $0x41] sm:$0x1] %v8670_v56 }
  0x2a   : > { %500 = vst [vmem:[#allocation3 + $0x59] sm:$0x1] %v8670_v56  ;;  %501 = vst [vmem:[#allocation3 + $0x71] sm:$0x1] %v8670_v56 }
  0x2b   : > { %502 = vst [vmem:[#allocation3 + $0x89] sm:$0x1] %v8670_v56  ;;  %503 = vst [vmem:[#allocation3 + $0xa1] sm:$0x1] %v8670_v56 }
  0x2c   : > { %504 = vst [vmem:[#allocation3 + $0xb9] sm:$0x1] %v8670_v56  ;;  %505 = vst [vmem:[#allocation3 + $0xd1] sm:$0x1] %v8670_v56 }
  0x2d   : > { %506 = vst [vmem:[#allocation3 + $0xe9] sm:$0x1] %v8670_v56  ;;  %507 = vst [vmem:[#allocation3 + $0x101] sm:$0x1] %v8670_v56 }
  0x2e   : > { %8262 = vmatmul.mubr.bf16.gmra.mrb[4].mxu0 %v550_v21  ;;  %508 = vst [vmem:[#allocation3 + $0x119] sm:$0x1] %v8670_v56  ;;  %509 = vst [vmem:[#allocation3 + $0x131] sm:$0x1] %v8670_v56  ;;  %v8486_v21 = vld [vmem:[%s11144_s3 + $0x38] sm:$0xff]  }
  0x2f   : > { %8265 = vmatprep.mubr.bf16.mxu0 %v551_v22  ;;  %510 = vst [vmem:[#allocation3 + $0x149] sm:$0x1] %v8670_v56  ;;  %511 = vst [vmem:[#allocation3 + $0x161] sm:$0x1] %v8670_v56  ;;  %7044 = vmatpush3.bf16.msra.mxu1 %v8486_v21 }
  0x30   : > { %512 = vst [vmem:[#allocation3 + $0x179] sm:$0x1] %v8670_v56  ;;  %513 = vst [vmem:[#allocation3 + $0x191] sm:$0x1] %v8670_v56 }
  0x31   : > { %436 = vst.msk [vmem:[#allocation2] sm:$0x1] %vm435_vm1, %v8670_v56  ;;  %453 = vst.msk [vmem:[#allocation2 + $0x198] sm:$0x1] %vm435_vm1, %v8670_v56 }
  0x32   : > { %479 = vst [vmem:[#allocation3] sm:$0x1] %v8670_v56  ;;  %496 = vst [vmem:[#allocation3 + $0x198] sm:$0x1] %v8670_v56 }
  0x33   : > { %497 = vst [vmem:[#allocation3 + $0x11] sm:$0x1] %v8670_v56  ;;  %514 = vst [vmem:[#allocation3 + $0x1a9] sm:$0x1] %v8670_v56 }
  0x34   : > { %430 = vst.msk [vmem:[#allocation2 + $0x10] sm:$0x3] %vm429_vm2, %v8670_v56  ;;  %434 = vst.msk [vmem:[#allocation2 + $0x1a8] sm:$0x3] %vm429_vm2, %v8670_v56 }
  0x35   : > { %454 = vst.msk [vmem:[#allocation2 + $0x11] sm:$0x1] %vm435_vm1, %v8670_v56  ;;  %471 = vst.msk [vmem:[#allocation2 + $0x1a9] sm:$0x1] %vm435_vm1, %v8670_v56 }
  0x36   : > { %8266 = vmatmul.mubr.bf16.gmra.mrb[8].mxu0 %v552_v27 }
  0x37   : > { %8269 = vmatprep.mubr.bf16.mxu0 %v553_v28 }
  0x3e   : > { %8270 = vmatmul.mubr.bf16.gmra.mrb[12].mxu0 %v554_v33 }
  0x3f   : > { %8273 = vmatprep.mubr.bf16.mxu0 %v555_v34 }
  0x46   : > { %8274 = vmatmul.mubr.bf16.gmra.mrb[16].mxu0 %v556_v39 }
  0x47   : > { %8277 = vmatprep.mubr.bf16.mxu0 %v557_v40  ;;  %v909_v40 = vld [vmem:[#allocation2 + $0x9] sm:$0xff] }
  0x48   : > { %v940_v49 = vpack.c.bf16 %v909_v40, %v908_v36 }
  0x4e   : > { %8278 = vmatmul.mubr.bf16.gmra.mrb[20].mxu0 %v558_v45 }
  0x4f   : > { %8281 = vmatprep.mubr.bf16.mxu0 %v559_v46 }
  0x56   : > { %8282 = vmatmul.mubr.bf16.gmra.mrb[24].mxu0 %v560_v51 }
  0x57   : > { %8285 = vmatprep.mubr.bf16.mxu0 %v561_v52 }
  0x5e   : > { %8286 = vmatmul.mubr.bf16.gmra.mrb[28].mxu0 %v562_v55 }
  0xf9   : > { %v8259_v6 = vpop.f32.mrb[0].mxu0 }
  0xfa   : > { %v677_v7 = vadd.f32 %v8259_v6, %v8971_v4  ;;  %v668_v8 = vpop.f32.mrb[1].mxu0 }
  0xfb   : > { %v669_v10 = vadd.f32 %v8971_v4, %v668_v8  ;;  %v8260_v11 = vpop.f32.mrb[2].mxu0 }
  0xfc   : > { %v797_v13 = vmax.f32 %v677_v7, 0.0  ;;  %v680_v14 = vadd.f32 %v8260_v11, %v8971_v4  ;;  %v671_v15 = vpop.f32.mrb[3].mxu0 }
  0xfd   : > { %v795_v16 = vmax.f32 %v669_v10, 0.0  ;;  %v672_v17 = vadd.f32 %v8971_v4, %v671_v15 }
  0xfe   : > { %830 = vst.msk [vmem:[#allocation2 + $0x31] sm:$0xff] %vm426_vm0, %v797_v13  ;;  %v798_v18 = vmax.f32 %v680_v14, 0.0 }
  0xff   : > { %828 = vst.msk [vmem:[#allocation2 + $0x19] sm:$0xff] %vm426_vm0, %v795_v16  ;;  %v796_v20 = vmax.f32 %v672_v17, 0.0 }
 0x100   : > { %831 = vst.msk [vmem:[#allocation2 + $0x39] sm:$0xff] %vm426_vm0, %v798_v18 }
 0x101   : > { %829 = vst.msk [vmem:[#allocation2 + $0x21] sm:$0xff] %vm426_vm0, %v796_v20  ;;  %v8263_v22 = vpop.f32.mrb[4].mxu0 }
 0x102   : > { %v693_v23 = vadd.f32 %v8263_v22, %v8971_v4  ;;  %v684_v24 = vpop.f32.mrb[5].mxu0 }
 0x103   : > { %v685_v25 = vadd.f32 %v8971_v4, %v684_v24  ;;  %v8264_v26 = vpop.f32.mrb[6].mxu0 }
 0x104   : > { %v801_v27 = vmax.f32 %v693_v23, 0.0  ;;  %v696_v28 = vadd.f32 %v8264_v26, %v8971_v4  ;;  %v687_v29 = vpop.f32.mrb[7].mxu0 }
 0x105   : > { %v799_v30 = vmax.f32 %v685_v25, 0.0  ;;  %v688_v31 = vadd.f32 %v8971_v4, %v687_v29  ;;  %v1006_v34 = vld [vmem:[#allocation2 + $0x30] sm:$0xff] }
 0x106   : > { %834 = vst.msk [vmem:[#allocation2 + $0x61] sm:$0xff] %vm426_vm0, %v801_v27  ;;  %v802_v32 = vmax.f32 %v696_v28, 0.0  ;;  %v1004_v38 = vld [vmem:[#allocation2 + $0x18] sm:$0xff] }
 0x107   : > { %832 = vst.msk [vmem:[#allocation2 + $0x49] sm:$0xff] %vm426_vm0, %v799_v30  ;;  %v800_v33 = vmax.f32 %v688_v31, 0.0  ;;  %v1007_v35 = vld [vmem:[#allocation2 + $0x38] sm:$0xff] }
 0x108   : > { %835 = vst.msk [vmem:[#allocation2 + $0x69] sm:$0xff] %vm426_vm0, %v802_v32  ;;  %v1037_v37 = vpack.c.bf16 %v1007_v35, %v1006_v34  ;;  %v1005_v39 = vld [vmem:[#allocation2 + $0x20] sm:$0xff]  ;;  %v912_v60 = vld [vmem:[#allocation2 + $0x31] sm:$0xff] }
 0x109   : > { %833 = vst.msk [vmem:[#allocation2 + $0x51] sm:$0xff] %vm426_vm0, %v800_v33  ;;  %v8267_v41 = vpop.f32.mrb[8].mxu0  ;;  %v9004_v42 = vpack.c.bf16 %v1005_v39, %v1004_v38  ;;  %v911_v43 = vld [vmem:[#allocation2 + $0x21] sm:$0xff]  ;;  %v910_v48 = vld [vmem:[#allocation2 + $0x19] sm:$0xff] }
 0x10a   : > { %v709_v44 = vadd.f32 %v8267_v41, %v8971_v4  ;;  %1359 = vrot.lane.b32.xlu1 %v1037_v37, %s8671_s29  ;;  %v700_v45 = vpop.f32.mrb[9].mxu0  ;;  %v941_v53 = vpack.c.bf16 %v911_v43, %v910_v48  ;;  %v913_v56 = vld [vmem:[#allocation2 + $0x39] sm:$0xff] }
 0x10b   : > { %v701_v46 = vadd.f32 %v8971_v4, %v700_v45  ;;  %v8268_v47 = vpop.f32.mrb[10].mxu0  ;;  %1357 = vrot.lane.b32.xlu0 %v9004_v42, %s8671_s29  ;;  %v9018_v63 = vpack.c.bf16 %v913_v56, %v912_v60 }
 0x10c   : > { %v805_v50 = vmax.f32 %v709_v44, 0.0  ;;  %v712_v51 = vadd.f32 %v8268_v47, %v8971_v4  ;;  %v703_v52 = vpop.f32.mrb[11].mxu0 }
 0x10d   : > { %v803_v54 = vmax.f32 %v701_v46, 0.0  ;;  %v704_v55 = vadd.f32 %v8971_v4, %v703_v52  ;;  %v1010_v62 = vld [vmem:[#allocation2 + $0x60] sm:$0xff] }
 0x10e   : > { %838 = vst.msk [vmem:[#allocation2 + $0x91] sm:$0xff] %vm426_vm0, %v805_v50  ;;  %v806_v57 = vmax.f32 %v712_v51, 0.0  ;;  %1311 = vrot.lane.b32.xlu1 %v941_v53, %s8671_s29  ;;  %v1008_v58 = vld [vmem:[#allocation2 + $0x48] sm:$0xff] }
 0x10f   : > { %836 = vst.msk [vmem:[#allocation2 + $0x79] sm:$0xff] %vm426_vm0, %v803_v54  ;;  %v804_v59 = vmax.f32 %v704_v55, 0.0  ;;  %1309 = vrot.lane.b32.xlu0 %v940_v49, %s8671_s29  ;;  %v914_v61 = vld [vmem:[#allocation2 + $0x49] sm:$0xff]  ;;  %v916_v12 = vld [vmem:[#allocation2 + $0x61] sm:$0xff] }
 0x110   : > { %839 = vst.msk [vmem:[#allocation2 + $0x99] sm:$0xff] %vm426_vm0, %v806_v57  ;;  %v1009_v0 = vld [vmem:[#allocation2 + $0x50] sm:$0xff]  ;;  %v1011_v2 = vld [vmem:[#allocation2 + $0x68] sm:$0xff] }
 0x111   : > { %v915_v1 = vld [vmem:[#allocation2 + $0x51] sm:$0xff]  ;;  %837 = vst.msk [vmem:[#allocation2 + $0x81] sm:$0xff] %vm426_vm0, %v804_v59  ;;  %v8271_v3 = vpop.f32.mrb[12].mxu0  ;;  %v9021_v5 = vpack.c.bf16 %v1009_v0, %v1008_v58  ;;  %v9031_v11 = vpack.c.bf16 %v1011_v2, %v1010_v62  ;;  %v917_v13 = vld [vmem:[#allocation2 + $0x69] sm:$0xff] }
 0x112   : > { %v725_v6 = vadd.f32 %v8271_v3, %v8971_v4  ;;  %v716_v7 = vpop.f32.mrb[13].mxu0  ;;  %1313 = vrot.lane.b32.xlu1 %v9018_v63, %s8671_s29  ;;  %v9026_v8 = vpack.c.bf16 %v915_v1, %v914_v61  ;;  %v9038_v20 = vpack.c.bf16 %v917_v13, %v916_v12 }
 0x113   : > { %v717_v9 = vadd.f32 %v8971_v4, %v716_v7  ;;  %v8272_v10 = vpop.f32.mrb[14].mxu0  ;;  %1361 = vrot.lane.b32.xlu0 %v9021_v5, %s8671_s29  ;;  %v8487_v7 = vld [vmem:[%s11144_s3 + $0xc0] sm:$0xff]  }
 0x114   : > { %v809_v14 = vmax.f32 %v725_v6, 0.0  ;;  %v728_v15 = vadd.f32 %v8272_v10, %v8971_v4  ;;  %v719_v16 = vpop.f32.mrb[15].mxu0  ;;  %7141 = vmatprep.subr.bf16.mxu0 %v8487_v7  ;;  %8425 = vmatprep.subr.bf16.mxu1 %v8487_v7 }
 0x115   : > { %v807_v17 = vmax.f32 %v717_v9, 0.0  ;;  %v720_v18 = vadd.f32 %v8971_v4, %v719_v16  ;;  %v1014_v24 = vld [vmem:[#allocation2 + $0x90] sm:$0xff] }
 0x116   : > { %842 = vst.msk [vmem:[#allocation2 + $0xc1] sm:$0xff] %vm426_vm0, %v809_v14  ;;  %v810_v19 = vmax.f32 %v728_v15, 0.0  ;;  %1315 = vrot.lane.b32.xlu1 %v9026_v8, %s8671_s29  ;;  %v1012_v21 = vld [vmem:[#allocation2 + $0x78] sm:$0xff] }
 0x117   : > { %840 = vst.msk [vmem:[#allocation2 + $0xa9] sm:$0xff] %vm426_vm0, %v807_v17  ;;  %v808_v22 = vmax.f32 %v720_v18, 0.0  ;;  %1363 = vrot.lane.b32.xlu0 %v9031_v11, %s8671_s29  ;;  %v918_v23 = vld [vmem:[#allocation2 + $0x79] sm:$0xff]  ;;  %v920_v36 = vld [vmem:[#allocation2 + $0x91] sm:$0xff] }
 0x118   : > { %843 = vst.msk [vmem:[#allocation2 + $0xc9] sm:$0xff] %vm426_vm0, %v810_v19  ;;  %v1013_v25 = vld [vmem:[#allocation2 + $0x80] sm:$0xff]  ;;  %v1015_v27 = vld [vmem:[#allocation2 + $0x98] sm:$0xff] }
 0x119   : > { %v919_v26 = vld [vmem:[#allocation2 + $0x81] sm:$0xff]  ;;  %841 = vst.msk [vmem:[#allocation2 + $0xb1] sm:$0xff] %vm426_vm0, %v808_v22  ;;  %v8275_v28 = vpop.f32.mrb[16].mxu0  ;;  %v9045_v29 = vpack.c.bf16 %v1013_v25, %v1012_v21  ;;  %v9055_v35 = vpack.c.bf16 %v1015_v27, %v1014_v24  ;;  %v921_v37 = vld [vmem:[#allocation2 + $0x99] sm:$0xff] }
 0x11a   : > { %v741_v30 = vadd.f32 %v8275_v28, %v8971_v4  ;;  %v732_v31 = vpop.f32.mrb[17].mxu0  ;;  %1317 = vrot.lane.b32.xlu1 %v9038_v20, %s8671_s29  ;;  %v9050_v32 = vpack.c.bf16 %v919_v26, %v918_v23  ;;  %v9062_v45 = vpack.c.bf16 %v921_v37, %v920_v36  ;;  %v9101_v22 = vld [vmem:[%s11144_s3 + $0x80] sm:$0xff]  }
 0x11b   : > { %v733_v33 = vadd.f32 %v8971_v4, %v732_v31  ;;  %v8276_v34 = vpop.f32.mrb[18].mxu0  ;;  %1365 = vrot.lane.b32.xlu0 %v9045_v29, %s8671_s29  ;;  %7142 = vmatpush3.bf16.msra.mxu0 %v9101_v22 }
 0x11c   : > { %v813_v38 = vmax.f32 %v741_v30, 0.0  ;;  %v744_v39 = vadd.f32 %v8276_v34, %v8971_v4  ;;  %v735_v40 = vpop.f32.mrb[19].mxu0 }
 0x11d   : > { %v811_v41 = vmax.f32 %v733_v33, 0.0  ;;  %v736_v43 = vadd.f32 %v8971_v4, %v735_v40  ;;  %v1018_v49 = vld [vmem:[#allocation2 + $0xc0] sm:$0xff]  ;;  %v9117_v33 = vld [vmem:[%s11144_s3 + $0xc8] sm:$0xff]  }
 0x11e   : > { %846 = vst.msk [vmem:[#allocation2 + $0xf1] sm:$0xff] %vm426_vm0, %v813_v38  ;;  %v814_v44 = vmax.f32 %v744_v39, 0.0  ;;  %1319 = vrot.lane.b32.xlu1 %v9050_v32, %s8671_s29  ;;  %v1016_v46 = vld [vmem:[#allocation2 + $0xa8] sm:$0xff]  ;;  %7143 = vmatprep.subr.bf16.mxu0 %v9117_v33 }
 0x11f   : > { %844 = vst.msk [vmem:[#allocation2 + $0xd9] sm:$0xff] %vm426_vm0, %v811_v41  ;;  %v812_v47 = vmax.f32 %v736_v43, 0.0  ;;  %1367 = vrot.lane.b32.xlu0 %v9055_v35, %s8671_s29  ;;  %v922_v48 = vld [vmem:[#allocation2 + $0xa9] sm:$0xff]  ;;  %v924_v61 = vld [vmem:[#allocation2 + $0xc1] sm:$0xff] }
 0x120   : > { %847 = vst.msk [vmem:[#allocation2 + $0xf9] sm:$0xff] %vm426_vm0, %v814_v44  ;;  %v1017_v50 = vld [vmem:[#allocation2 + $0xb0] sm:$0xff]  ;;  %v1019_v52 = vld [vmem:[#allocation2 + $0xc8] sm:$0xff] }
 0x121   : > { %v923_v51 = vld [vmem:[#allocation2 + $0xb1] sm:$0xff]  ;;  %845 = vst.msk [vmem:[#allocation2 + $0xe1] sm:$0xff] %vm426_vm0, %v812_v47  ;;  %v8279_v53 = vpop.f32.mrb[20].mxu0  ;;  %v9069_v54 = vpack.c.bf16 %v1017_v50, %v1016_v46  ;;  %v9079_v60 = vpack.c.bf16 %v1019_v52, %v1018_v49  ;;  %v925_v62 = vld [vmem:[#allocation2 + $0xc9] sm:$0xff] }
 0x122   : > { %v757_v55 = vadd.f32 %v8279_v53, %v8971_v4  ;;  %v748_v56 = vpop.f32.mrb[21].mxu0  ;;  %1321 = vrot.lane.b32.xlu1 %v9062_v45, %s8671_s29  ;;  %v9074_v57 = vpack.c.bf16 %v923_v51, %v922_v48  ;;  %v9089_v10 = vpack.c.bf16 %v925_v62, %v924_v61  ;;  %v9123_v38 = vld [vmem:[%s11144_s3 + $0x88] sm:$0xff]   ;;  %v9130_v41 = vld [vmem:[%s11144_s3 + $0xd0] sm:$0xff]  }
 0x123   : > { %v749_v58 = vadd.f32 %v8971_v4, %v748_v56  ;;  %v8280_v59 = vpop.f32.mrb[22].mxu0  ;;  %1369 = vrot.lane.b32.xlu0 %v9069_v54, %s8671_s29  ;;  %7144 = vmatpush3.bf16.msra.mxu0 %v9123_v38  ;;  %v9149_v56 = vld [vmem:[%s11144_s3 + $0x90] sm:$0xff]  }
 0x124   : > { %v817_v0 = vmax.f32 %v757_v55, 0.0  ;;  %v760_v1 = vadd.f32 %v8280_v59, %v8971_v4  ;;  %v751_v2 = vpop.f32.mrb[23].mxu0  ;;  %7145 = vmatprep.subr.bf16.mxu0 %v9130_v41 }
 0x125   : > { %v815_v3 = vmax.f32 %v749_v58, 0.0  ;;  %v752_v6 = vadd.f32 %v8971_v4, %v751_v2  ;;  %v1022_v15 = vld [vmem:[#allocation2 + $0xf0] sm:$0xff] }
 0x126   : > { %850 = vst.msk [vmem:[#allocation2 + $0x121] sm:$0xff] %vm426_vm0, %v817_v0  ;;  %v818_v9 = vmax.f32 %v760_v1, 0.0  ;;  %1323 = vrot.lane.b32.xlu1 %v9074_v57, %s8671_s29  ;;  %v1020_v12 = vld [vmem:[#allocation2 + $0xd8] sm:$0xff] }
 0x127   : > { %848 = vst.msk [vmem:[#allocation2 + $0x109] sm:$0xff] %vm426_vm0, %v815_v3  ;;  %v816_v13 = vmax.f32 %v752_v6, 0.0  ;;  %1371 = vrot.lane.b32.xlu0 %v9079_v60, %s8671_s29  ;;  %v926_v14 = vld [vmem:[#allocation2 + $0xd9] sm:$0xff]  ;;  %v928_v30 = vld [vmem:[#allocation2 + $0xf1] sm:$0xff]  ;;  %7146 = vmatpush3.bf16.msra.mxu0 %v9149_v56 }
 0x128   : > { %851 = vst.msk [vmem:[#allocation2 + $0x129] sm:$0xff] %vm426_vm0, %v818_v9  ;;  %v1021_v16 = vld [vmem:[#allocation2 + $0xe0] sm:$0xff]  ;;  %v1023_v18 = vld [vmem:[#allocation2 + $0xf8] sm:$0xff] }
 0x129   : > { %v927_v17 = vld [vmem:[#allocation2 + $0xe1] sm:$0xff]  ;;  %849 = vst.msk [vmem:[#allocation2 + $0x111] sm:$0xff] %vm426_vm0, %v816_v13  ;;  %v8283_v19 = vpop.f32.mrb[24].mxu0  ;;  %v9096_v21 = vpack.c.bf16 %v1021_v16, %v1020_v12  ;;  %v9111_v28 = vpack.c.bf16 %v1023_v18, %v1022_v15  ;;  %v929_v31 = vld [vmem:[#allocation2 + $0xf9] sm:$0xff] }
 0x12a   : > { %v773_v23 = vadd.f32 %v8283_v19, %v8971_v4  ;;  %v764_v24 = vpop.f32.mrb[25].mxu0  ;;  %1325 = vrot.lane.b32.xlu1 %v9089_v10, %s8671_s29  ;;  %v9106_v25 = vpack.c.bf16 %v927_v17, %v926_v14  ;;  %v9135_v44 = vpack.c.bf16 %v929_v31, %v928_v30  ;;  %v9163_v6 = vld [vmem:[%s11144_s3 + $0xd8] sm:$0xff]   ;;  %v9176_v16 = vld [vmem:[%s11144_s3 + $0xe0] sm:$0xff]  }
 0x12b   : > { %v765_v26 = vadd.f32 %v8971_v4, %v764_v24  ;;  %v8284_v27 = vpop.f32.mrb[26].mxu0  ;;  %1373 = vrot.lane.b32.xlu0 %v9096_v21, %s8671_s29  ;;  %v9169_v13 = vld [vmem:[%s11144_s3 + $0x98] sm:$0xff]   ;;  %7147 = vmatprep.subr.bf16.mxu0 %v9163_v6 }
 0x12c   : > { %v821_v34 = vmax.f32 %v773_v23, 0.0  ;;  %v776_v36 = vadd.f32 %v8284_v27, %v8971_v4  ;;  %v767_v37 = vpop.f32.mrb[27].mxu0  ;;  %7148 = vmatpush3.bf16.msra.mxu0 %v9169_v13 }
 0x12d   : > { %v819_v39 = vmax.f32 %v765_v26, 0.0  ;;  %v768_v40 = vadd.f32 %v8971_v4, %v767_v37  ;;  %v1026_v49 = vld [vmem:[#allocation2 + $0x120] sm:$0xff]  ;;  %7149 = vmatprep.subr.bf16.mxu0 %v9176_v16 }
 0x12e   : > { %854 = vst.msk [vmem:[#allocation2 + $0x151] sm:$0xff] %vm426_vm0, %v821_v34  ;;  %v822_v43 = vmax.f32 %v776_v36, 0.0  ;;  %1327 = vrot.lane.b32.xlu1 %v9106_v25, %s8671_s29  ;;  %v1024_v46 = vld [vmem:[#allocation2 + $0x108] sm:$0xff]  ;;  %v9192_v34 = vld [vmem:[%s11144_s3 + $0xa0] sm:$0xff]  }
 0x12f   : > { %852 = vst.msk [vmem:[#allocation2 + $0x139] sm:$0xff] %vm426_vm0, %v819_v39  ;;  %v820_v47 = vmax.f32 %v768_v40, 0.0  ;;  %1375 = vrot.lane.b32.xlu0 %v9111_v28, %s8671_s29  ;;  %v930_v48 = vld [vmem:[#allocation2 + $0x109] sm:$0xff]  ;;  %v932_v2 = vld [vmem:[#allocation2 + $0x121] sm:$0xff] }
 0x130   : > { %855 = vst.msk [vmem:[#allocation2 + $0x159] sm:$0xff] %vm426_vm0, %v822_v43  ;;  %v1025_v50 = vld [vmem:[#allocation2 + $0x110] sm:$0xff]  ;;  %v1027_v52 = vld [vmem:[#allocation2 + $0x128] sm:$0xff]  ;;  %7150 = vmatpush3.bf16.msra.mxu0 %v9192_v34 }
 0x131   : > { %v931_v51 = vld [vmem:[#allocation2 + $0x111] sm:$0xff]  ;;  %853 = vst.msk [vmem:[#allocation2 + $0x141] sm:$0xff] %vm426_vm0, %v820_v47  ;;  %v8287_v53 = vpop.f32.mrb[28].mxu0  ;;  %v9144_v55 = vpack.c.bf16 %v1025_v50, %v1024_v46  ;;  %v1047_v1 = vpack.c.bf16 %v1027_v52, %v1026_v49  ;;  %v933_v3 = vld [vmem:[#allocation2 + $0x129] sm:$0xff] }
 0x132   : > { %v789_v58 = vadd.f32 %v8287_v53, %v8971_v4  ;;  %v780_v59 = vpop.f32.mrb[29].mxu0  ;;  %1329 = vrot.lane.b32.xlu1 %v9135_v44, %s8671_s29  ;;  %v9154_v61 = vpack.c.bf16 %v931_v51, %v930_v48  ;;  %v9181_v18 = vpack.c.bf16 %v933_v3, %v932_v2  ;;  %v9203_v43 = vld [vmem:[%s11144_s3 + $0xe8] sm:$0xff]   ;;  %v9218_v49 = vld [vmem:[%s11144_s3 + $0xf0] sm:$0xff]  }
 0x133   : > { %v781_v62 = vadd.f32 %v8971_v4, %v780_v59  ;;  %v8288_v0 = vpop.f32.mrb[30].mxu0  ;;  %1377 = vrot.lane.b32.xlu0 %v9144_v55, %s8671_s29  ;;  %7151 = vmatprep.subr.bf16.mxu0 %v9203_v43  ;;  %v9209_v46 = vld [vmem:[%s11144_s3 + $0xa8] sm:$0xff]  }
 0x134   : > { %v825_v7 = vmax.f32 %v789_v58, 0.0  ;;  %v792_v9 = vadd.f32 %v8288_v0, %v8971_v4  ;;  %v783_v12 = vpop.f32.mrb[31].mxu0  ;;  %7152 = vmatpush3.bf16.msra.mxu0 %v9209_v46 }
 0x135   : > { %v823_v14 = vmax.f32 %v781_v62, 0.0  ;;  %v784_v15 = vadd.f32 %v8971_v4, %v783_v12  ;;  %v1030_v24 = vld [vmem:[#allocation2 + $0x150] sm:$0xff]  ;;  %7153 = vmatprep.subr.bf16.mxu0 %v9218_v49 }
 0x136   : > { %858 = vst.msk [vmem:[#allocation2 + $0x181] sm:$0xff] %vm426_vm0, %v825_v7  ;;  %v826_v17 = vmax.f32 %v792_v9, 0.0  ;;  %1331 = vrot.lane.b32.xlu1 %v9154_v61, %s8671_s29  ;;  %v1028_v19 = vld [vmem:[#allocation2 + $0x138] sm:$0xff]  ;;  %v9226_v62 = vld [vmem:[%s11144_s3 + $0xb0] sm:$0xff]  }
 0x137   : > { %856 = vst.msk [vmem:[#allocation2 + $0x169] sm:$0xff] %vm426_vm0, %v823_v14  ;;  %v824_v23 = vmax.f32 %v784_v15, 0.0  ;;  %1379 = vrot.lane.b32.xlu0 %v1047_v1, %s8671_s29  ;;  %v934_v4 = vld [vmem:[#allocation2 + $0x139] sm:$0xff]  ;;  %v936_v39 = vld [vmem:[#allocation2 + $0x151] sm:$0xff] }
 0x138   : > { %859 = vst.msk [vmem:[#allocation2 + $0x189] sm:$0xff] %vm426_vm0, %v826_v17  ;;  %v1029_v26 = vld [vmem:[#allocation2 + $0x140] sm:$0xff]  ;;  %v1031_v30 = vld [vmem:[#allocation2 + $0x158] sm:$0xff]  ;;  %7154 = vmatpush3.bf16.msra.mxu0 %v9226_v62 }
 0x139   : > { %v935_v27 = vld [vmem:[#allocation2 + $0x141] sm:$0xff]  ;;  %857 = vst.msk [vmem:[#allocation2 + $0x171] sm:$0xff] %vm426_vm0, %v824_v23  ;;  %v1048_v31 = vpack.c.bf16 %v1029_v26, %v1028_v19  ;;  %v1049_v37 = vpack.c.bf16 %v1031_v30, %v1030_v24  ;;  %v937_v40 = vld [vmem:[#allocation2 + $0x159] sm:$0xff] }
 0x13a   : > { %1333 = vrot.lane.b32.xlu1 %v9181_v18, %s8671_s29  ;;  %v9196_v36 = vpack.c.bf16 %v935_v27, %v934_v4  ;;  %v9213_v47 = vpack.c.bf16 %v937_v40, %v936_v39  ;;  %v9237_v7 = vld [vmem:[%s11144_s3 + $0xf8] sm:$0xff]   ;;  %v1228_v24 = vld [vmem:[#allocation2 + $0x1a1] sm:$0xff] }
 0x13b   : > { %1381 = vrot.lane.b32.xlu0 %v1048_v31, %s8671_s29  ;;  %7155 = vmatprep.subr.bf16.mxu0 %v9237_v7  ;;  %v9243_v14 = vld [vmem:[%s11144_s3 + $0xb8] sm:$0xff]   ;;  %v1101_v31 = vld [vmem:[#allocation2 + $0x22] sm:$0xff] }
 0x13c   : > { %7156 = vmatpush3.bf16.msra.mxu0 %v9243_v14  ;;  %v1227_v4 = vld [vmem:[#allocation2 + $0x199] sm:$0xff] }
 0x13d   : > { %v1034_v51 = vld [vmem:[#allocation2 + $0x180] sm:$0xff]  ;;  %v1244_v27 = vpack.c.bf16 %v1228_v24, %v1227_v4  ;;  %v1102_v39 = vld [vmem:[#allocation2 + $0x32] sm:$0xff] }
 0x13e   : > { %1335 = vrot.lane.b32.xlu1 %v9196_v36, %s8671_s29  ;;  %v1032_v48 = vld [vmem:[#allocation2 + $0x168] sm:$0xff]  ;;  %v1100_v30 = vld [vmem:[#allocation2 + $0x1a] sm:$0xff]  ;;  %v1118_v4 = vld [vmem:[#allocation2 + $0xf2] sm:$0xff] }
 0x13f   : > { %1383 = vrot.lane.b32.xlu0 %v1049_v37, %s8671_s29  ;;  %v938_v50 = vld [vmem:[#allocation2 + $0x169] sm:$0xff]  ;;  %v1225_v9 = vld [vmem:[#allocation2 + $0x181] sm:$0xff]  ;;  %v9253_v37 = vpack.c.bf16 %v1101_v31, %v1100_v30 }
 0x140   : > { %v1033_v52 = vld [vmem:[#allocation2 + $0x170] sm:$0xff]  ;;  %v1035_v58 = vld [vmem:[#allocation2 + $0x188] sm:$0xff]  ;;  %v1103_v40 = vld [vmem:[#allocation2 + $0x3a] sm:$0xff] }
 0x141   : > { %v939_v53 = vld [vmem:[#allocation2 + $0x171] sm:$0xff]  ;;  %v1050_v59 = vpack.c.bf16 %v1033_v52, %v1032_v48  ;;  %v1051_v1 = vpack.c.bf16 %v1035_v58, %v1034_v51  ;;  %v1226_v12 = vld [vmem:[#allocation2 + $0x189] sm:$0xff]  ;;  %v9259_v48 = vpack.c.bf16 %v1103_v40, %v1102_v39  ;;  %v1119_v24 = vld [vmem:[#allocation2 + $0xfa] sm:$0xff] }
 0x142   : > { %1337 = vrot.lane.b32.xlu1 %v9213_v47, %s8671_s29  ;;  %v9230_v0 = vpack.c.bf16 %v939_v53, %v938_v50  ;;  %v1128_v2 = vld [vmem:[#allocation2 + $0x16a] sm:$0xff]  ;;  %v1129_v3 = vld [vmem:[#allocation2 + $0x172] sm:$0xff]  ;;  %v1243_v17 = vpack.c.bf16 %v1226_v12, %v1225_v9  ;;  %v1130_v19 = vld [vmem:[#allocation2 + $0x182] sm:$0xff] }
 0x143   : > { %1385 = vrot.lane.b32.xlu0 %v1050_v59, %s8671_s29  ;;  %v1146_v15 = vpack.c.bf16 %v1129_v3, %v1128_v2  ;;  %v1131_v23 = vld [vmem:[#allocation2 + $0x18a] sm:$0xff]  ;;  %v1105_v51 = vld [vmem:[#allocation2 + $0x52] sm:$0xff]  ;;  %v1106_v53 = vld [vmem:[#allocation2 + $0x62] sm:$0xff] }
 0x144   : > { %v1147_v26 = vpack.c.bf16 %v1131_v23, %v1130_v19  ;;  %v1104_v50 = vld [vmem:[#allocation2 + $0x4a] sm:$0xff]  ;;  %v1108_v59 = vld [vmem:[#allocation2 + $0x7a] sm:$0xff]  ;;  %v1110_v2 = vld [vmem:[#allocation2 + $0x92] sm:$0xff] }
 0x145   : > { %v9265_v52 = vpack.c.bf16 %v1105_v51, %v1104_v50  ;;  %v1107_v58 = vld [vmem:[#allocation2 + $0x6a] sm:$0xff]  ;;  %v1111_v3 = vld [vmem:[#allocation2 + $0x9a] sm:$0xff]  ;;  %v1113_v12 = vld [vmem:[#allocation2 + $0xb2] sm:$0xff] }
 0x146   : > { %1339 = vrot.lane.b32.xlu1 %v9230_v0, %s8671_s29  ;;  %v1112_v9 = vld [vmem:[#allocation2 + $0xaa] sm:$0xff]  ;;  %v1116_v19 = vld [vmem:[#allocation2 + $0xda] sm:$0xff]  ;;  %v1117_v23 = vld [vmem:[#allocation2 + $0xe2] sm:$0xff] }
 0x147   : > { %1387 = vrot.lane.b32.xlu0 %v1051_v1, %s8671_s29  ;;  %v1109_v1 = vld [vmem:[#allocation2 + $0x82] sm:$0xff]  ;;  %v957_v30 = vld [vmem:[#allocation2 + $0xa] sm:$0xff] }
 0x148   : > { %v1122_v39 = vld [vmem:[#allocation2 + $0x122] sm:$0xff]  ;;  %v1123_v40 = vld [vmem:[#allocation2 + $0x12a] sm:$0xff] }
 0x149   : > { %v860_v50 = vld [vmem:[#allocation2] sm:$0xff]  ;;  %v861_v51 = vld [vmem:[#allocation2 + $0x8] sm:$0xff] }
 0x14a   : > { %1433 = vrot.lane.b32.xlu1 %v1146_v15, %s8671_s29  ;;  %v1114_v15 = vld [vmem:[#allocation2 + $0xc2] sm:$0xff] }
 0x14b   : > { %1481 = vrot.lane.b32.xlu0 %v1243_v17, %s8671_s29  ;;  %v1115_v17 = vld [vmem:[#allocation2 + $0xca] sm:$0xff] }
 0x14e   : > { %1435 = vrot.lane.b32.xlu1 %v1147_v26, %s8671_s29  ;;  %v1120_v26 = vld [vmem:[#allocation2 + $0x10a] sm:$0xff] }
 0x14f   : > { %1483 = vrot.lane.b32.xlu0 %v1244_v27, %s8671_s29  ;;  %v1121_v27 = vld [vmem:[#allocation2 + $0x112] sm:$0xff] }
 0x150   : > { %v9313_v31 = vpack.c.bf16 %v1121_v27, %v1120_v26 }
 0x152   : > { %1405 = vrot.lane.b32.xlu1 %v9253_v37, %s8671_s29 }
 0x153   : > { %1453 = vrot.lane.b32.xlu0 %v9018_v63, %s8671_s29  ;;  %v9271_v63 = vpack.c.bf16 %v1107_v58, %v1106_v53  ;;  %v9319_v58 = vpack.c.bf16 %v1123_v40, %v1122_v39 }
 0x156   : > { %1407 = vrot.lane.b32.xlu1 %v9259_v48, %s8671_s29 }
 0x157   : > { %1455 = vrot.lane.b32.xlu0 %v9026_v8, %s8671_s29  ;;  %v9277_v8 = vpack.c.bf16 %v1109_v1, %v1108_v59  ;;  %v1125_v1 = vld [vmem:[#allocation2 + $0x142] sm:$0xff] }
 0x15a   : > { %1409 = vrot.lane.b32.xlu1 %v9265_v52, %s8671_s29 }
 0x15b   : > { %1457 = vrot.lane.b32.xlu0 %v9038_v20, %s8671_s29  ;;  %v9283_v20 = vpack.c.bf16 %v1111_v3, %v1110_v2  ;;  %v892_v3 = vpack.c.bf16 %v861_v51, %v860_v50 }
 0x15e   : > { %1411 = vrot.lane.b32.xlu1 %v9271_v63, %s8671_s29 }
 0x15f   : > { %1459 = vrot.lane.b32.xlu0 %v9050_v32, %s8671_s29  ;;  %v9289_v32 = vpack.c.bf16 %v1113_v12, %v1112_v9 }
 0x162   : > { %1413 = vrot.lane.b32.xlu1 %v9277_v8, %s8671_s29 }
 0x163   : > { %1461 = vrot.lane.b32.xlu0 %v9062_v45, %s8671_s29  ;;  %v9295_v45 = vpack.c.bf16 %v1115_v17, %v1114_v15  ;;  %v1126_v15 = vld [vmem:[#allocation2 + $0x152] sm:$0xff]  ;;  %v1127_v17 = vld [vmem:[#allocation2 + $0x15a] sm:$0xff] }
 0x166   : > { %1415 = vrot.lane.b32.xlu1 %v9283_v20, %s8671_s29 }
 0x167   : > { %1463 = vrot.lane.b32.xlu0 %v9074_v57, %s8671_s29  ;;  %v9301_v57 = vpack.c.bf16 %v1117_v23, %v1116_v19 }
 0x16a   : > { %1417 = vrot.lane.b32.xlu1 %v9289_v32, %s8671_s29 }
 0x16b   : > { %1465 = vrot.lane.b32.xlu0 %v9089_v10, %s8671_s29  ;;  %v9307_v10 = vpack.c.bf16 %v1119_v24, %v1118_v4  ;;  %v9335_v4 = vpack.c.bf16 %v1127_v17, %v1126_v15 }
 0x16e   : > { %1419 = vrot.lane.b32.xlu1 %v9295_v45, %s8671_s29 }
 0x16f   : > { %1467 = vrot.lane.b32.xlu0 %v9106_v25, %s8671_s29  ;;  %v956_v25 = vld [vmem:[#allocation2 + $0x2] sm:$0xff] }
 0x172   : > { %1421 = vrot.lane.b32.xlu1 %v9301_v57, %s8671_s29 }
 0x173   : > { %1469 = vrot.lane.b32.xlu0 %v9135_v44, %s8671_s29  ;;  %v988_v44 = vpack.c.bf16 %v957_v30, %v956_v25  ;;  %v865_v25 = vld [vmem:[#allocation2 + $0x38] sm:$0xff]  ;;  %v864_v30 = vld [vmem:[#allocation2 + $0x30] sm:$0xff] }
 0x174   : > { %v9351_v39 = vpack.c.bf16 %v865_v25, %v864_v30 }
 0x176   : > { %1423 = vrot.lane.b32.xlu1 %v9307_v10, %s8671_s29 }
 0x177   : > { %1471 = vrot.lane.b32.xlu0 %v9154_v61, %s8671_s29  ;;  %v1124_v61 = vld [vmem:[#allocation2 + $0x13a] sm:$0xff] }
 0x17a   : > { %1425 = vrot.lane.b32.xlu1 %v9313_v31, %s8671_s29 }
 0x17b   : > { %1473 = vrot.lane.b32.xlu0 %v9181_v18, %s8671_s29  ;;  %v9326_v18 = vpack.c.bf16 %v1125_v1, %v1124_v61 }
 0x17c   : > { %v1360_v53 = vpop.permute.xlu1 %1359 }
 0x17d   : > { %v1358_v59 = vpop.permute.xlu0 %1357  ;;  %v1555_v23 = vsel %vm426_vm0, %v9253_v37, %v1360_v53 }
 0x17e   : > { %1427 = vrot.lane.b32.xlu1 %v9319_v58, %s8671_s29  ;;  %v1551_v2 = vsel %vm426_vm0, %v988_v44, %v1358_v59 }
 0x17f   : > { %1475 = vrot.lane.b32.xlu0 %v9196_v36, %s8671_s29  ;;  %2116 = vmatprep.mubr.bf16.mxu1 %v1551_v2 }
 0x180   : > { %v1312_v9 = vpop.permute.xlu1 %1311 }
 0x181   : > { %v1310_v12 = vpop.permute.xlu0 %1309  ;;  %v1491_v37 = vsel %vm426_vm0, %v9004_v42, %v1312_v9 }
 0x182   : > { %1429 = vrot.lane.b32.xlu1 %v9326_v18, %s8671_s29  ;;  %v1487_v19 = vsel %vm426_vm0, %v892_v3, %v1310_v12 }
 0x183   : > { %1477 = vrot.lane.b32.xlu0 %v9213_v47, %s8671_s29  ;;  %2117 = vmatmul.mubr.bf16.vlgmr.msra.gmra.mrb[0].mxu1 %v1487_v19 }
 0x184   : > { %2124 = vmatprep.mubr.bf16.mxu1 %v1555_v23  ;;  %v1314_v36 = vpop.permute.xlu1 %1313  ;;  %8433 = vmatpush3.bf16.msra.mxu1 %v9101_v22 }
 0x185   : > { %v1362_v24 = vpop.permute.xlu0 %1361  ;;  %8426 = vmatprep.subr.bf16.mxu1 %v9117_v33  ;;  %v1495_v42 = vsel %vm426_vm0, %v9351_v39, %v1314_v36  ;;  %v1053_v36 = vld [vmem:[#allocation2 + $0x21] sm:$0xff] }
 0x186   : > { %1431 = vrot.lane.b32.xlu1 %v9335_v4, %s8671_s29  ;;  %v1559_v22 = vsel %vm426_vm0, %v9259_v48, %v1362_v24  ;;  %v1052_v24 = vld [vmem:[#allocation2 + $0x19] sm:$0xff] }
 0x187   : > { %1479 = vrot.lane.b32.xlu0 %v9230_v0, %s8671_s29 }
 0x188   : > { %v1316_v47 = vpop.permute.xlu1 %1315  ;;  %8434 = vmatpush3.bf16.msra.mxu1 %v9123_v38 }
 0x189   : > { %v1364_v26 = vpop.permute.xlu0 %1363  ;;  %8427 = vmatprep.subr.bf16.mxu1 %v9130_v41 }
 0x18b   : > { %2125 = vmatmul.mubr.bf16.gmra.mrb[4].mxu1 %v1491_v37  ;;  %v1151_v37 = vld [vmem:[#allocation2 + $0x48] sm:$0xff] }
 0x18c   : > { %v1318_v33 = vpop.permute.xlu1 %1317  ;;  %2132 = vmatprep.mubr.bf16.mxu1 %v1559_v22  ;;  %8435 = vmatpush3.bf16.msra.mxu1 %v9149_v56  ;;  %v1563_v56 = vsel %vm426_vm0, %v9265_v52, %v1364_v26  ;;  %v1152_v22 = vld [vmem:[#allocation2 + $0x50] sm:$0xff] }
 0x18d   : > { %v1366_v27 = vpop.permute.xlu0 %1365  ;;  %8428 = vmatprep.subr.bf16.mxu1 %v9163_v6 }
 0x18e   : > { %v1567_v52 = vsel %vm426_vm0, %v9271_v63, %v1366_v27 }
 0x190   : > { %v1320_v38 = vpop.permute.xlu1 %1319  ;;  %8436 = vmatpush3.bf16.msra.mxu1 %v9169_v13 }
 0x191   : > { %v1368_v41 = vpop.permute.xlu0 %1367  ;;  %8429 = vmatprep.subr.bf16.mxu1 %v9176_v16  ;;  %v1499_v16 = vsel %vm426_vm0, %v9021_v5, %v1316_v47 }
 0x193   : > { %2133 = vmatmul.mubr.bf16.gmra.mrb[8].mxu1 %v1495_v42  ;;  %v1153_v42 = vld [vmem:[#allocation2 + $0x60] sm:$0xff] }
 0x194   : > { %v1322_v48 = vpop.permute.xlu1 %1321  ;;  %2140 = vmatprep.mubr.bf16.mxu1 %v1563_v56  ;;  %8437 = vmatpush3.bf16.msra.mxu1 %v9192_v34  ;;  %v1154_v56 = vld [vmem:[#allocation2 + $0x68] sm:$0xff] }
 0x195   : > { %v1370_v6 = vpop.permute.xlu0 %1369  ;;  %8430 = vmatprep.subr.bf16.mxu1 %v9203_v43  ;;  %v9372_v43 = vld [vmem:[%s11144_s3 + $0x100] sm:$0xff]   ;;  %v1511_v1 = vsel %vm426_vm0, %v9055_v35, %v1322_v48  ;;  %v1054_v48 = vld [vmem:[#allocation2 + $0x31] sm:$0xff] }
 0x196   : > { %v1575_v53 = vsel %vm426_vm0, %v9283_v20, %v1370_v6 }
 0x198   : > { %v1324_v40 = vpop.permute.xlu1 %1323  ;;  %8438 = vmatpush3.bf16.msra.mxu1 %v9209_v46 }
 0x199   : > { %v1372_v13 = vpop.permute.xlu0 %1371  ;;  %8431 = vmatprep.subr.bf16.mxu1 %v9218_v49  ;;  %v1503_v49 = vsel %vm426_vm0, %v9031_v11, %v1318_v33  ;;  %v1515_v12 = vsel %vm426_vm0, %v9069_v54, %v1324_v40 }
 0x19b   : > { %2141 = vmatmul.mubr.bf16.gmra.mrb[12].mxu1 %v1499_v16 }
 0x19c   : > { %v1326_v44 = vpop.permute.xlu1 %1325  ;;  %2148 = vmatprep.mubr.bf16.mxu1 %v1567_v52  ;;  %8439 = vmatpush3.bf16.msra.mxu1 %v9226_v62  ;;  %v1571_v62 = vsel %vm426_vm0, %v9277_v8, %v1368_v41 }
 0x19d   : > { %v1374_v34 = vpop.permute.xlu0 %1373  ;;  %8432 = vmatprep.subr.bf16.mxu1 %v9237_v7  ;;  %v1519_v23 = vsel %vm426_vm0, %v9079_v60, %v1326_v44  ;;  %v1182_v60 = vpack.c.bf16 %v1152_v22, %v1151_v37  ;;  %v1056_v44 = vld [vmem:[#allocation2 + $0x49] sm:$0xff] }
 0x19e   : > { %v1583_v35 = vsel %vm426_vm0, %v9295_v45, %v1374_v34  ;;  %v1084_v45 = vpack.c.bf16 %v1053_v36, %v1052_v24  ;;  %v885_v24 = vld [vmem:[#allocation2 + $0x128] sm:$0xff] }
 0x19f   : > { %v1159_v22 = vld [vmem:[#allocation2 + $0xa8] sm:$0xff] }
 0x1a0   : > { %v1328_v46 = vpop.permute.xlu1 %1327  ;;  %8440 = vmatpush3.bf16.msra.mxu1 %v9243_v14  ;;  %v1507_v14 = vsel %vm426_vm0, %v9045_v29, %v1320_v38  ;;  %v1579_v29 = vsel %vm426_vm0, %v9289_v32, %v1372_v13  ;;  %v1055_v38 = vld [vmem:[#allocation2 + $0x39] sm:$0xff]  ;;  %v1183_v13 = vpack.c.bf16 %v1154_v56, %v1153_v42 }
 0x1a1   : > { %v1376_v5 = vpop.permute.xlu0 %1375  ;;  %8289 = vmatprep.subr.bf16.mxu1 %v9372_v43  ;;  %v1523_v30 = vsel %vm426_vm0, %v9096_v21, %v1328_v46  ;;  %v1085_v40 = vpack.c.bf16 %v1055_v38, %v1054_v48  ;;  %v1155_v46 = vld [vmem:[#allocation2 + $0x78] sm:$0xff]  ;;  %v1161_v48 = vld [vmem:[#allocation2 + $0xc0] sm:$0xff] }
 0x1a2   : > { %v1587_v54 = vsel %vm426_vm0, %v9301_v57, %v1376_v5  ;;  %v1156_v5 = vld [vmem:[#allocation2 + $0x80] sm:$0xff] }
 0x1a3   : > { %2149 = vmatmul.mubr.bf16.gmra.mrb[16].mxu1 %v1503_v49  ;;  %v1063_v56 = vld [vmem:[#allocation2 + $0x99] sm:$0xff] }
 0x1a4   : > { %v9380_v63 = vpop.permute.xlu1 %1329  ;;  %2156 = vmatprep.mubr.bf16.mxu1 %v1571_v62 }
 0x1a5   : > { %v1378_v7 = vpop.permute.xlu0 %1377  ;;  %v1527_v52 = vsel %vm426_vm0, %v9111_v28, %v9380_v63  ;;  %v1058_v63 = vld [vmem:[#allocation2 + $0x61] sm:$0xff] }
 0x1a6   : > { %v1591_v41 = vsel %vm426_vm0, %v9307_v10, %v1378_v7  ;;  %v1057_v10 = vld [vmem:[#allocation2 + $0x51] sm:$0xff] }
 0x1a7   : > { %v1086_v7 = vpack.c.bf16 %v1057_v10, %v1056_v44  ;;  %v986_v10 = vld [vmem:[#allocation2 + $0x16a] sm:$0xff] }
 0x1a8   : > { %v9382_v50 = vpop.permute.xlu1 %1331 }
 0x1a9   : > { %v9384_v51 = vpop.permute.xlu0 %1379  ;;  %v1531_v28 = vsel %vm426_vm0, %v9144_v55, %v9382_v50 }
 0x1aa   : > { %v1595_v34 = vsel %vm426_vm0, %v9313_v31, %v9384_v51  ;;  %v1157_v51 = vld [vmem:[#allocation2 + $0x90] sm:$0xff] }
 0x1ab   : > { %2157 = vmatmul.mubr.bf16.gmra.mrb[20].mxu1 %v1507_v14  ;;  %v1184_v14 = vpack.c.bf16 %v1156_v5, %v1155_v46 }
 0x1ac   : > { %v9390_v11 = vpop.permute.xlu1 %1333  ;;  %2164 = vmatprep.mubr.bf16.mxu1 %v1575_v53 }
 0x1ad   : > { %v9392_v59 = vpop.permute.xlu0 %1381 }
 0x1ae   : > { %v1599_v31 = vsel %vm426_vm0, %v9319_v58, %v9392_v59  ;;  %v1060_v59 = vld [vmem:[#allocation2 + $0x79] sm:$0xff] }
 0x1b0   : > { %v9394_v8 = vpop.permute.xlu1 %1335 }
 0x1b1   : > { %v9396_v61 = vpop.permute.xlu0 %1383 }
 0x1b2   : > { %v1603_v37 = vsel %vm426_vm0, %v9326_v18, %v9396_v61  ;;  %v1062_v61 = vld [vmem:[#allocation2 + $0x91] sm:$0xff] }
 0x1b3   : > { %2165 = vmatmul.mubr.bf16.gmra.mrb[24].mxu1 %v1511_v1 }
 0x1b4   : > { %v9402_v2 = vpop.permute.xlu1 %1337  ;;  %2172 = vmatprep.mubr.bf16.mxu1 %v1579_v29  ;;  %v1059_v29 = vld [vmem:[#allocation2 + $0x69] sm:$0xff] }
 0x1b5   : > { %v9404_v20 = vpop.permute.xlu0 %1385  ;;  %v1087_v36 = vpack.c.bf16 %v1059_v29, %v1058_v63  ;;  %v890_v29 = vld [vmem:[#allocation2 + $0x168] sm:$0xff] }
 0x1b8   : > { %v9406_v3 = vpop.permute.xlu1 %1339 }
 0x1b9   : > { %v9408_v9 = vpop.permute.xlu0 %1387 }
 0x1bb   : > { %2173 = vmatmul.mubr.bf16.gmra.mrb[28].mxu1 %v1515_v12  ;;  %v1158_v12 = vld [vmem:[#allocation2 + $0x98] sm:$0xff] }
 0x1bc   : > { %v9414_v15 = vpop.permute.xlu1 %1433  ;;  %2180 = vmatprep.mubr.bf16.mxu1 %v1583_v35 }
 0x1bd   : > { %v9416_v32 = vpop.permute.xlu0 %1481 }
 0x1c0   : > { %v9418_v17 = vpop.permute.xlu1 %1435 }
 0x1c1   : > { %v9420_v19 = vpop.permute.xlu0 %1483 }
 0x1c3   : > { %2181 = vmatmul.mubr.bf16.gmra.mrb[32].mxu1 %v1519_v23 }
 0x1c4   : > { %v1406_v47 = vpop.permute.xlu1 %1405  ;;  %2188 = vmatprep.mubr.bf16.mxu1 %v1587_v54  ;;  %v884_v54 = vld [vmem:[#allocation2 + $0x120] sm:$0xff] }
 0x1c5   : > { %v1454_v26 = vpop.permute.xlu0 %1453  ;;  %v1615_v27 = vsel %vm426_vm0, %v1084_v45, %v1406_v47  ;;  %v1185_v47 = vpack.c.bf16 %v1158_v12, %v1157_v51  ;;  %v9452_v50 = vpack.c.bf16 %v885_v24, %v884_v54  ;;  %v1177_v12 = vld [vmem:[#allocation2 + $0x180] sm:$0xff] }
 0x1c6   : > { %v1679_v33 = vsel %vm426_vm0, %v9351_v39, %v1454_v26  ;;  %v1061_v26 = vld [vmem:[#allocation2 + $0x81] sm:$0xff] }
 0x1c7   : > { %2277 = vmatprep.mubr.bf16.mxu0 %v1679_v33  ;;  %v1535_v58 = vsel %vm426_vm0, %v9452_v50, %v9390_v11  ;;  %v1160_v33 = vld [vmem:[#allocation2 + $0xb0] sm:$0xff]  ;;  %v1066_v54 = vld [vmem:[#allocation2 + $0xc1] sm:$0xff] }
 0x1c8   : > { %2278 = vmatmul.mubr.bf16.vlgmr.msra.gmra.mrb[32].mxu0 %v1615_v27  ;;  %v1408_v39 = vpop.permute.xlu1 %1407  ;;  %v1186_v38 = vpack.c.bf16 %v1160_v33, %v1159_v22 }
 0x1c9   : > { %v1456_v25 = vpop.permute.xlu0 %1455  ;;  %v1619_v16 = vsel %vm426_vm0, %v1085_v40, %v1408_v39  ;;  %v1607_v39 = vsel %vm426_vm0, %v9335_v4, %v9404_v20 }
 0x1ca   : > { %v1683_v57 = vsel %vm426_vm0, %v1182_v60, %v1456_v25  ;;  %v1088_v25 = vpack.c.bf16 %v1061_v26, %v1060_v59  ;;  %v1165_v59 = vld [vmem:[#allocation2 + $0xf0] sm:$0xff]  ;;  %v1166_v26 = vld [vmem:[#allocation2 + $0xf8] sm:$0xff] }
 0x1cb   : > { %2189 = vmatmul.mubr.bf16.gmra.mrb[36].mxu1 %v1523_v30  ;;  %2285 = vmatprep.mubr.bf16.mxu0 %v1683_v57  ;;  %v886_v30 = vld [vmem:[#allocation2 + $0x138] sm:$0xff]  ;;  %v887_v57 = vld [vmem:[#allocation2 + $0x140] sm:$0xff] }
 0x1cc   : > { %2196 = vmatprep.mubr.bf16.mxu1 %v1591_v41  ;;  %v1410_v49 = vpop.permute.xlu1 %1409  ;;  %v9462_v42 = vpack.c.bf16 %v887_v57, %v886_v30  ;;  %v8504_v30 = vld [vmem:[%s11144_s3 + $0x108] sm:$0xff]   ;;  %v1671_v57 = vsel %vm426_vm0, %v9230_v0, %v9414_v15  ;;  %v1245_v15 = vld [vmem:[#allocation2 + $0x32] sm:$0xff] }
 0x1cd   : > { %v1458_v6 = vpop.permute.xlu0 %1457  ;;  %v1623_v53 = vsel %vm426_vm0, %v1086_v7, %v1410_v49  ;;  %v1064_v49 = vld [vmem:[#allocation2 + $0xa9] sm:$0xff] }
 0x1ce   : > { %v1687_v21 = vsel %vm426_vm0, %v1183_v13, %v1458_v6  ;;  %v1539_v18 = vsel %vm426_vm0, %v9462_v42, %v9394_v8  ;;  %v1162_v6 = vld [vmem:[#allocation2 + $0xc8] sm:$0xff] }
 0x1cf   : > { %v1187_v44 = vpack.c.bf16 %v1162_v6, %v1161_v48  ;;  %v1082_v48 = vld [vmem:[#allocation2 + $0x181] sm:$0xff]  ;;  %v1083_v6 = vld [vmem:[#allocation2 + $0x189] sm:$0xff] }
 0x1d0   : > { %2286 = vmatmul.mubr.bf16.gmra.mrb[36].mxu0 %v1619_v16  ;;  %v1412_v35 = vpop.permute.xlu1 %1411  ;;  %v1089_v16 = vpack.c.bf16 %v1063_v56, %v1062_v61 }
 0x1d1   : > { %2293 = vmatprep.mubr.bf16.mxu0 %v1687_v21  ;;  %v1460_v62 = vpop.permute.xlu0 %1459  ;;  %v1627_v45 = vsel %vm426_vm0, %v1087_v36, %v1412_v35  ;;  %v888_v21 = vld [vmem:[#allocation2 + $0x150] sm:$0xff]  ;;  %v1178_v35 = vld [vmem:[#allocation2 + $0x188] sm:$0xff] }
 0x1d2   : > { %v1691_v1 = vsel %vm426_vm0, %v1184_v14, %v1460_v62  ;;  %v1065_v62 = vld [vmem:[#allocation2 + $0xb1] sm:$0xff] }
 0x1d3   : > { %2197 = vmatmul.mubr.bf16.gmra.mrb[40].mxu1 %v1527_v52  ;;  %v889_v52 = vld [vmem:[#allocation2 + $0x158] sm:$0xff]  ;;  %v1090_v63 = vpack.c.bf16 %v1065_v62, %v1064_v49  ;;  %v1247_v49 = vld [vmem:[#allocation2 + $0x4a] sm:$0xff] }
 0x1d4   : > { %2204 = vmatprep.mubr.bf16.mxu1 %v1595_v34  ;;  %v1414_v27 = vpop.permute.xlu1 %1413  ;;  %v987_v34 = vld [vmem:[#allocation2 + $0x172] sm:$0xff]  ;;  %v9472_v5 = vpack.c.bf16 %v889_v52, %v888_v21 }
 0x1d5   : > { %v1462_v23 = vpop.permute.xlu0 %1461  ;;  %v1631_v41 = vsel %vm426_vm0, %v1088_v25, %v1414_v27  ;;  %v9474_v4 = vpack.c.bf16 %v987_v34, %v986_v10  ;;  %v1163_v14 = vld [vmem:[#allocation2 + $0xd8] sm:$0xff] }
 0x1d6   : > { %v1695_v55 = vsel %vm426_vm0, %v1185_v47, %v1462_v23  ;;  %v1543_v20 = vsel %vm426_vm0, %v9472_v5, %v9402_v2  ;;  %v1067_v47 = vld [vmem:[#allocation2 + $0xc9] sm:$0xff]  ;;  %v8506_v21 = vld [vmem:[%s11144_s3 + $0x118] sm:$0xff]  }
 0x1d7   : > { %v1611_v7 = vsel %vm426_vm0, %v9474_v4, %v9408_v9  ;;  %v1195_v9 = vpack.c.bf16 %v1178_v35, %v1177_v12  ;;  %v1091_v33 = vpack.c.bf16 %v1067_v47, %v1066_v54  ;;  %v1070_v10 = vld [vmem:[#allocation2 + $0xf1] sm:$0xff]  ;;  %v1071_v34 = vld [vmem:[#allocation2 + $0xf9] sm:$0xff] }
 0x1d8   : > { %2294 = vmatmul.mubr.bf16.gmra.mrb[40].mxu0 %v1623_v53  ;;  %v1416_v40 = vpop.permute.xlu1 %1415  ;;  %v1164_v53 = vld [vmem:[#allocation2 + $0xe0] sm:$0xff]  ;;  %v1248_v62 = vld [vmem:[#allocation2 + $0x52] sm:$0xff] }
 0x1d9   : > { %2301 = vmatprep.mubr.bf16.mxu0 %v1691_v1  ;;  %v1464_v60 = vpop.permute.xlu0 %1463  ;;  %v1635_v8 = vsel %vm426_vm0, %v1089_v16, %v1416_v40  ;;  %v1188_v51 = vpack.c.bf16 %v1164_v53, %v1163_v14  ;;  %v1249_v14 = vld [vmem:[#allocation2 + $0x62] sm:$0xff]  ;;  %v1250_v53 = vld [vmem:[#allocation2 + $0x6a] sm:$0xff]  ;;  %v1251_v35 = vld [vmem:[#allocation2 + $0x7a] sm:$0xff] }
 0x1da   : > { %v1699_v11 = vsel %vm426_vm0, %v1186_v38, %v1464_v60  ;;  %v1189_v60 = vpack.c.bf16 %v1166_v26, %v1165_v59  ;;  %v1068_v38 = vld [vmem:[#allocation2 + $0xd9] sm:$0xff] }
 0x1db   : > { %2205 = vmatmul.mubr.bf16.gmra.mrb[44].mxu1 %v1531_v28  ;;  %v1254_v54 = vld [vmem:[#allocation2 + $0x9a] sm:$0xff] }
 0x1dc   : > { %2212 = vmatprep.mubr.bf16.mxu1 %v1599_v31  ;;  %v1418_v1 = vpop.permute.xlu1 %1417  ;;  %v891_v31 = vld [vmem:[#allocation2 + $0x170] sm:$0xff] }
 0x1dd   : > { %v1466_v13 = vpop.permute.xlu0 %1465  ;;  %v1639_v2 = vsel %vm426_vm0, %v1090_v63, %v1418_v1  ;;  %v9484_v36 = vpack.c.bf16 %v891_v31, %v890_v29  ;;  %v1278_v1 = vpack.c.bf16 %v1248_v62, %v1247_v49  ;;  %v1072_v63 = vld [vmem:[#allocation2 + $0x109] sm:$0xff]  ;;  %v1073_v29 = vld [vmem:[#allocation2 + $0x111] sm:$0xff] }
 0x1de   : > { %v1703_v46 = vsel %vm426_vm0, %v1187_v44, %v1466_v13  ;;  %v1246_v13 = vld [vmem:[#allocation2 + $0x3a] sm:$0xff]  ;;  %v1094_v12 = vpack.c.bf16 %v1073_v29, %v1072_v63  ;;  %v1273_v62 = vld [vmem:[#allocation2 + $0x182] sm:$0xff] }
 0x1df   : > { %v1547_v24 = vsel %vm426_vm0, %v9484_v36, %v9406_v3  ;;  %v1277_v44 = vpack.c.bf16 %v1246_v13, %v1245_v15  ;;  %v1263_v13 = vld [vmem:[#allocation2 + $0x10a] sm:$0xff] }
 0x1e0   : > { %2302 = vmatmul.mubr.bf16.gmra.mrb[44].mxu0 %v1627_v45  ;;  %v1179_v45 = vld [vmem:[#allocation2 + $0x198] sm:$0xff]  ;;  %v8510_v29 = vld [vmem:[%s11146_s5 + $0x8] sm:$0xff]  }
 0x1e1   : > { %2309 = vmatprep.mubr.bf16.mxu0 %v1695_v55  ;;  %v1468_v28 = vpop.permute.xlu0 %1467  ;;  %v1180_v55 = vld [vmem:[#allocation2 + $0x1a0] sm:$0xff] }
 0x1e2   : > { %v1707_v23 = vsel %vm426_vm0, %v1188_v51, %v1468_v28  ;;  %v1196_v27 = vpack.c.bf16 %v1180_v55, %v1179_v45  ;;  %v1279_v28 = vpack.c.bf16 %v1250_v53, %v1249_v14  ;;  %v1074_v45 = vld [vmem:[#allocation2 + $0x121] sm:$0xff]  ;;  %v1075_v55 = vld [vmem:[#allocation2 + $0x129] sm:$0xff] }
 0x1e3   : > { %2213 = vmatmul.mubr.bf16.gmra.mrb[48].mxu1 %v1535_v58  ;;  %v1735_v58 = vsel %vm426_vm0, %v1195_v9, %v9416_v32  ;;  %v1253_v9 = vld [vmem:[#allocation2 + $0x92] sm:$0xff]  ;;  %v1095_v26 = vpack.c.bf16 %v1075_v55, %v1074_v45  ;;  %v1275_v53 = vld [vmem:[#allocation2 + $0x19a] sm:$0xff]  ;;  %v8517_v55 = vld [vmem:[%s11146_s5 + $0xc8] sm:$0xff]  }
 0x1e4   : > { %2220 = vmatprep.mubr.bf16.mxu1 %v1603_v37  ;;  %v1420_v37 = vpop.permute.xlu1 %1419  ;;  %v1739_v32 = vsel %vm426_vm0, %v1196_v27, %v9420_v19  ;;  %v8505_v19 = vld [vmem:[%s11144_s3 + $0x110] sm:$0xff]   ;;  %v1281_v47 = vpack.c.bf16 %v1254_v54, %v1253_v9  ;;  %v1257_v27 = vld [vmem:[#allocation2 + $0xc2] sm:$0xff]  ;;  %v8516_v45 = vld [vmem:[%s11146_s5 + $0x18] sm:$0xff]  }
 0x1e5   : > { %v1470_v22 = vpop.permute.xlu0 %1469  ;;  %v1643_v25 = vsel %vm426_vm0, %v1091_v33, %v1420_v37  ;;  %v1255_v37 = vld [vmem:[#allocation2 + $0xaa] sm:$0xff] }
 0x1e6   : > { %v1711_v3 = vsel %vm426_vm0, %v1189_v60, %v1470_v22  ;;  %v1256_v22 = vld [vmem:[#allocation2 + $0xb2] sm:$0xff]  ;;  %v1258_v60 = vld [vmem:[#allocation2 + $0xca] sm:$0xff] }
 0x1e8   : > { %2310 = vmatmul.mubr.bf16.gmra.mrb[48].mxu0 %v1631_v41  ;;  %v1069_v41 = vld [vmem:[#allocation2 + $0xe1] sm:$0xff]  ;;  %v1422_v61 = vpop.permute.xlu1 %1421 }
 0x1e9   : > { %2317 = vmatprep.mubr.bf16.mxu0 %v1699_v11  ;;  %v1167_v11 = vld [vmem:[#allocation2 + $0x108] sm:$0xff]  ;;  %v1472_v56 = vpop.permute.xlu0 %1471 }
 0x1eb   : > { %2221 = vmatmul.mubr.bf16.gmra.mrb[52].mxu1 %v1539_v18  ;;  %v1168_v18 = vld [vmem:[#allocation2 + $0x110] sm:$0xff] }
 0x1ec   : > { %2228 = vmatprep.mubr.bf16.mxu1 %v1607_v39  ;;  %v1092_v39 = vpack.c.bf16 %v1069_v41, %v1068_v38  ;;  %v1190_v40 = vpack.c.bf16 %v1168_v18, %v1167_v11  ;;  %v1259_v11 = vld [vmem:[#allocation2 + $0xda] sm:$0xff]  ;;  %v1260_v18 = vld [vmem:[#allocation2 + $0xe2] sm:$0xff] }
 0x1ee   : > { %v1647_v0 = vsel %vm426_vm0, %v1092_v39, %v1422_v61  ;;  %v1715_v16 = vsel %vm426_vm0, %v1190_v40, %v1472_v56  ;;  %v1261_v56 = vld [vmem:[#allocation2 + $0xf2] sm:$0xff]  ;;  %v1262_v39 = vld [vmem:[#allocation2 + $0xfa] sm:$0xff] }
 0x1ef   : > { %v1079_v40 = vld [vmem:[#allocation2 + $0x159] sm:$0xff] }
 0x1f0   : > { %2318 = vmatmul.mubr.bf16.gmra.mrb[52].mxu0 %v1635_v8  ;;  %v1424_v8 = vpop.permute.xlu1 %1423 }
 0x1f1   : > { %2325 = vmatprep.mubr.bf16.mxu0 %v1703_v46  ;;  %v1474_v46 = vpop.permute.xlu0 %1473 }
 0x1f3   : > { %2229 = vmatmul.mubr.bf16.gmra.mrb[56].mxu1 %v1543_v20  ;;  %v1093_v20 = vpack.c.bf16 %v1071_v34, %v1070_v10  ;;  %v1267_v10 = vld [vmem:[#allocation2 + $0x13a] sm:$0xff]  ;;  %v1268_v34 = vld [vmem:[#allocation2 + $0x142] sm:$0xff] }
 0x1f4   : > { %2236 = vmatprep.mubr.bf16.mxu1 %v1611_v7  ;;  %v1426_v31 = vpop.permute.xlu1 %1425 }
 0x1f5   : > { %v1651_v7 = vsel %vm426_vm0, %v1093_v20, %v1424_v8  ;;  %v1476_v51 = vpop.permute.xlu0 %1475  ;;  %v1269_v8 = vld [vmem:[#allocation2 + $0x152] sm:$0xff]  ;;  %v1288_v20 = vpack.c.bf16 %v1268_v34, %v1267_v10 }
 0x1f6   : > { %v8659_v34 = vld [vmem:[#allocation3 + $0x8] sm:$0xff] }
 0x1f8   : > { %2326 = vmatmul.mubr.bf16.gmra.mrb[56].mxu0 %v1639_v2  ;;  %v1252_v2 = vld [vmem:[#allocation2 + $0x82] sm:$0xff] }
 0x1f9   : > { %2333 = vmatprep.mubr.bf16.mxu0 %v1707_v23  ;;  %v1655_v23 = vsel %vm426_vm0, %v1094_v12, %v1426_v31  ;;  %v1478_v59 = vpop.permute.xlu0 %1477  ;;  %v8511_v12 = vld [vmem:[%s11146_s5 + $0x50] sm:$0xff]  }
 0x1fb   : > { %2237 = vmatmul.mubr.bf16.gmra.mrb[60].mxu1 %v1547_v24  ;;  %v1280_v24 = vpack.c.bf16 %v1252_v2, %v1251_v35 }
 0x1fc   : > { %2389 = vmatprep.mubr.bf16.mxu1 %v1735_v58  ;;  %v1428_v58 = vpop.permute.xlu1 %1427 }
 0x1fd   : > { %v1659_v33 = vsel %vm426_vm0, %v1095_v26, %v1428_v58  ;;  %v1480_v38 = vpop.permute.xlu0 %1479  ;;  %v8518_v26 = vld [vmem:[%s11146_s5 + $0x60] sm:$0xff]  }
 0x200   : > { %2334 = vmatmul.mubr.bf16.gmra.mrb[60].mxu0 %v1643_v25  ;;  %v1282_v25 = vpack.c.bf16 %v1256_v22, %v1255_v37  ;;  %v8519_v37 = vld [vmem:[%s11146_s5 + $0x88] sm:$0xff]  }
 0x201   : > { %2341 = vmatprep.mubr.bf16.mxu0 %v1711_v3  ;;  %v1283_v3 = vpack.c.bf16 %v1258_v60, %v1257_v27  ;;  %v8520_v27 = vld [vmem:[%s11146_s5 + $0x20] sm:$0xff]  }
 0x203   : > { %2390 = vmatmul.mubr.bf16.vlgmr.msra.gmra.mrb[64].mxu1 %v1671_v57  ;;  %v1430_v57 = vpop.permute.xlu1 %1429 }
 0x204   : > { %8290 = vmatpush3.bf16.msra.mxu1 %v9372_v43  ;;  %2397 = vmatprep.mubr.bf16.mxu1 %v1739_v32  ;;  %v1099_v43 = vpack.c.bf16 %v1083_v6, %v1082_v48  ;;  %v1077_v32 = vld [vmem:[#allocation2 + $0x141] sm:$0xff]  ;;  %v1284_v48 = vpack.c.bf16 %v1260_v18, %v1259_v11  ;;  %v1285_v6 = vpack.c.bf16 %v1262_v39, %v1261_v56  ;;  %v8527_v39 = vld [vmem:[%s11146_s5 + $0x98] sm:$0xff]  }
 0x205   : > { %8291 = vmatprep.subr.bf16.mxu1 %v8504_v30 }
 0x206   : > { %v1675_v52 = vsel %vm426_vm0, %v1099_v43, %v9418_v17  ;;  %v1719_v17 = vsel %vm426_vm0, %v9452_v50, %v1474_v46  ;;  %v1723_v50 = vsel %vm426_vm0, %v9462_v42, %v1476_v51  ;;  %v1727_v42 = vsel %vm426_vm0, %v9472_v5, %v1478_v59  ;;  %v1270_v46 = vld [vmem:[#allocation2 + $0x15a] sm:$0xff] }
 0x207   : > { %v1731_v5 = vsel %vm426_vm0, %v9484_v36, %v1480_v38  ;;  %v1289_v49 = vpack.c.bf16 %v1270_v46, %v1269_v8 }
 0x208   : > { %2342 = vmatmul.mubr.bf16.gmra.mrb[64].mxu0 %v1647_v0  ;;  %8292 = vmatpush3.bf16.msra.mxu1 %v8504_v30  ;;  %v1076_v30 = vld [vmem:[#allocation2 + $0x139] sm:$0xff]  ;;  %v1432_v0 = vpop.permute.xlu1 %1431 }
 0x209   : > { %2349 = vmatprep.mubr.bf16.mxu0 %v1715_v16  ;;  %8293 = vmatprep.subr.bf16.mxu1 %v8505_v19  ;;  %v1096_v41 = vpack.c.bf16 %v1077_v32, %v1076_v30  ;;  %v1264_v16 = vld [vmem:[#allocation2 + $0x112] sm:$0xff]  ;;  %v8524_v32 = vld [vmem:[%s11146_s5 + $0x28] sm:$0xff]  }
 0x20a   : > { %v8523_v30 = vld [vmem:[%s11146_s5 + $0x90] sm:$0xff]  }
 0x20b   : > { %2398 = vmatmul.mubr.bf16.gmra.mrb[68].mxu1 %v1675_v52  ;;  %v1663_v61 = vsel %vm426_vm0, %v1096_v41, %v1430_v57  ;;  %v1266_v52 = vld [vmem:[#allocation2 + $0x12a] sm:$0xff]  ;;  %v8525_v57 = vld [vmem:[%s11146_s5 + $0xd8] sm:$0xff]  }
 0x20c   : > { %8294 = vmatpush3.bf16.msra.mxu1 %v8505_v19  ;;  %8297 = vmatprep.mubr.msk.bf16.mxu1 %vm426_vm0, %v1277_v44  ;;  %v1078_v19 = vld [vmem:[#allocation2 + $0x151] sm:$0xff]  ;;  %v1286_v44 = vpack.c.bf16 %v1264_v16, %v1263_v13  ;;  %v2681_v16 = vld [vmem:[#allocation3 + $0x9] sm:$0xff] }
 0x20d   : > { %8295 = vmatprep.subr.bf16.mxu1 %v8506_v21  ;;  %v1097_v15 = vpack.c.bf16 %v1079_v40, %v1078_v19  ;;  %v8530_v19 = vld [vmem:[%s11146_s5 + $0x78] sm:$0xff]   ;;  %v8531_v40 = vld [vmem:[%s11146_s5 + $0xa0] sm:$0xff]  }
 0x20e   : > { %v2680_v13 = vld [vmem:[#allocation3 + $0x1] sm:$0xff] }
 0x20f   : > { %v1667_v43 = vsel %vm426_vm0, %v1097_v15, %v1432_v0  ;;  %v8532_v0 = vld [vmem:[%s11146_s5 + $0x38] sm:$0xff]  }
 0x210   : > { %2350 = vmatmul.mubr.bf16.gmra.mrb[68].mxu0 %v1651_v7  ;;  %8296 = vmatpush3.bf16.msra.mxu1 %v8506_v21  ;;  %v1265_v21 = vld [vmem:[#allocation2 + $0x122] sm:$0xff]  ;;  %v1274_v7 = vld [vmem:[#allocation2 + $0x18a] sm:$0xff] }
 0x211   : > { %2357 = vmatprep.mubr.bf16.mxu0 %v1719_v17  ;;  %v1287_v36 = vpack.c.bf16 %v1266_v52, %v1265_v21  ;;  %v1291_v14 = vpack.c.bf16 %v1274_v7, %v1273_v62  ;;  %v1276_v17 = vld [vmem:[#allocation2 + $0x1a2] sm:$0xff]  ;;  %v2712_v52 = vpack.c.bf16 %v2681_v16, %v2680_v13  ;;  %v8535_v62 = vld [vmem:[%s11146_s5 + $0xf0] sm:$0xff]  }
 0x212   : > { %v1292_v63 = vpack.c.bf16 %v1276_v17, %v1275_v53  ;;  %v8536_v7 = vld [vmem:[%s11146_s5 + $0xb0] sm:$0xff]   ;;  %v8537_v53 = vld [vmem:[%s11146_s5 + $0xf8] sm:$0xff]  }
 0x213   : > { %8298 = vmatmul.mubr.msk.bf16.vlgmr.msra.gmra.mrb[72].mxu1 %vm426_vm0, %v1278_v1  ;;  %v8507_v1 = vld [vmem:[%s11146_s5 + $0x40] sm:$0xff]  }
 0x214   : > { %8301 = vmatprep.mubr.msk.bf16.mxu1 %vm426_vm0, %v1279_v28  ;;  %v8508_v28 = vld [vmem:[%s11146_s5] sm:$0xff]   ;;  %7273 = vmatprep.subr.bf16.mxu0 %v8507_v1 }
 0x215   : > { %7274 = vmatpush3.bf16.msra.mxu0 %v8508_v28 }
 0x218   : > { %2358 = vmatmul.mubr.bf16.gmra.mrb[72].mxu0 %v1655_v23  ;;  %v8512_v23 = vld [vmem:[%s11146_s5 + $0x10] sm:$0xff]  }
 0x219   : > { %2365 = vmatprep.mubr.bf16.mxu0 %v1723_v50  ;;  %v8513_v50 = vld [vmem:[%s11146_s5 + $0xc0] sm:$0xff]  }
 0x21a   : > { %7385 = vmatprep.subr.bf16.mxu1 %v8513_v50 }
 0x21b   : > { %8302 = vmatmul.mubr.msk.bf16.gmra.mrb[76].mxu1 %vm426_vm0, %v1280_v24  ;;  %v8514_v24 = vld [vmem:[%s11146_s5 + $0x58] sm:$0xff]  }
 0x21c   : > { %8305 = vmatprep.mubr.msk.bf16.mxu1 %vm426_vm0, %v1281_v47  ;;  %v8515_v47 = vld [vmem:[%s11146_s5 + $0x80] sm:$0xff]  }
 0x21d   : > { %7386 = vmatpush3.bf16.msra.mxu1 %v8515_v47 }
 0x21e   : > { %7387 = vmatprep.subr.bf16.mxu1 %v8517_v55 }
 0x220   : > { %2366 = vmatmul.mubr.bf16.gmra.mrb[76].mxu0 %v1659_v33 }
 0x221   : > { %2373 = vmatprep.mubr.bf16.mxu0 %v1727_v42  ;;  %7388 = vmatpush3.bf16.msra.mxu1 %v8519_v37 }
 0x223   : > { %8306 = vmatmul.mubr.msk.bf16.gmra.mrb[80].mxu1 %vm426_vm0, %v1282_v25  ;;  %v8521_v25 = vld [vmem:[%s11146_s5 + $0xd0] sm:$0xff]  }
 0x224   : > { %8309 = vmatprep.mubr.msk.bf16.mxu1 %vm426_vm0, %v1283_v3  ;;  %v8522_v3 = vld [vmem:[%s11146_s5 + $0x68] sm:$0xff]   ;;  %7389 = vmatprep.subr.bf16.mxu1 %v8521_v25 }
 0x225   : > { %7390 = vmatpush3.bf16.msra.mxu1 %v8523_v30 }
 0x226   : > { %7391 = vmatprep.subr.bf16.mxu1 %v8525_v57 }
 0x228   : > { %2374 = vmatmul.mubr.bf16.gmra.mrb[80].mxu0 %v1663_v61  ;;  %v8526_v61 = vld [vmem:[%s11146_s5 + $0x70] sm:$0xff]  }
 0x229   : > { %2381 = vmatprep.mubr.bf16.mxu0 %v1731_v5  ;;  %v8528_v5 = vld [vmem:[%s11146_s5 + $0x30] sm:$0xff]   ;;  %7392 = vmatpush3.bf16.msra.mxu1 %v8527_v39 }
 0x22b   : > { %8310 = vmatmul.mubr.msk.bf16.gmra.mrb[84].mxu1 %vm426_vm0, %v1284_v48 }
 0x22c   : > { %8313 = vmatprep.mubr.msk.bf16.mxu1 %vm426_vm0, %v1285_v6  ;;  %v8529_v6 = vld [vmem:[%s11146_s5 + $0xe0] sm:$0xff]  }
 0x22d   : > { %7393 = vmatprep.subr.bf16.mxu1 %v8529_v6 }
 0x22e   : > { %7394 = vmatpush3.bf16.msra.mxu1 %v8531_v40 }
 0x230   : > { %2382 = vmatmul.mubr.bf16.gmra.mrb[84].mxu0 %v1667_v43  ;;  %v8533_v43 = vld [vmem:[%s11146_s5 + $0xe8] sm:$0xff]  }
 0x231   : > { %7395 = vmatprep.subr.bf16.mxu1 %v8533_v43  ;;  %3680 = vmatprep.mubr.bf16.mxu0 %v2712_v52 }
 0x233   : > { %8314 = vmatmul.mubr.msk.bf16.gmra.mrb[88].mxu1 %vm426_vm0, %v1286_v44  ;;  %v2632_v44 = vld [vmem:[#allocation3] sm:$0xff] }
 0x234   : > { %8317 = vmatprep.mubr.msk.bf16.mxu1 %vm426_vm0, %v1287_v36  ;;  %v2664_v8 = vpack.c.bf16 %v8659_v34, %v2632_v44 }
 0x23b   : > { %8318 = vmatmul.mubr.msk.bf16.gmra.mrb[92].mxu1 %vm426_vm0, %v1288_v20  ;;  %v8534_v20 = vld [vmem:[%s11146_s5 + $0xa8] sm:$0xff]  }
 0x23c   : > { %8321 = vmatprep.mubr.msk.bf16.mxu1 %vm426_vm0, %v1289_v49  ;;  %7396 = vmatpush3.bf16.msra.mxu1 %v8534_v20 }
 0x23d   : > { %7397 = vmatprep.subr.bf16.mxu1 %v8535_v62 }
 0x240   : > { %7398 = vmatpush3.bf16.msra.mxu1 %v8536_v7 }
 0x241   : > { %7399 = vmatprep.subr.bf16.mxu1 %v8537_v53 }
 0x243   : > { %8322 = vmatmul.mubr.msk.bf16.gmra.mrb[96].mxu1 %vm426_vm0, %v9474_v4  ;;  %v8509_v4 = vld [vmem:[%s11146_s5 + $0x48] sm:$0xff]  }
 0x244   : > { %8325 = vmatprep.mubr.msk.bf16.mxu1 %vm426_vm0, %v1291_v14  ;;  %7275 = vmatprep.subr.bf16.mxu0 %v8509_v4  ;;  %v8538_v4 = vld [vmem:[%s11146_s5 + $0xb8] sm:$0xff]  }
 0x245   : > { %7276 = vmatpush3.bf16.msra.mxu0 %v8510_v29  ;;  %7400 = vmatpush3.bf16.msra.mxu1 %v8538_v4 }
 0x246   : > { %7277 = vmatprep.subr.bf16.mxu0 %v8511_v12 }
 0x249   : > { %7278 = vmatpush3.bf16.msra.mxu0 %v8512_v23 }
 0x24a   : > { %7279 = vmatprep.subr.bf16.mxu0 %v8514_v24 }
 0x24b   : > { %8326 = vmatmul.mubr.msk.bf16.gmra.mrb[100].mxu1 %vm426_vm0, %v1292_v63 }
 0x24d   : > { %7280 = vmatpush3.bf16.msra.mxu0 %v8516_v45 }
 0x24e   : > { %7281 = vmatprep.subr.bf16.mxu0 %v8518_v26 }
 0x251   : > { %7282 = vmatpush3.bf16.msra.mxu0 %v8520_v27 }
 0x252   : > { %7283 = vmatprep.subr.bf16.mxu0 %v8522_v3 }
 0x255   : > { %7284 = vmatpush3.bf16.msra.mxu0 %v8524_v32 }
 0x256   : > { %v7045_v31 = vpop.f32.mrb[0].mxu1  ;;  %7285 = vmatprep.subr.bf16.mxu0 %v8526_v61 }
 0x257   : > { %v7046_v51 = vpop.f32.mrb[1].mxu1 }
 0x258   : > { %v9557_v35 = vadd.f32 %v7046_v51, %v7045_v31  ;;  %v7048_v2 = vpop.f32.mrb[2].mxu1 }
 0x259   : > { %v7049_v9 = vpop.f32.mrb[3].mxu1  ;;  %7286 = vmatpush3.bf16.msra.mxu0 %v8528_v5 }
 0x25a   : > { %v9562_v54 = vadd.f32 %v7049_v9, %v7048_v2  ;;  %7287 = vmatprep.subr.bf16.mxu0 %v8530_v19 }
 0x25d   : > { %7288 = vmatpush3.bf16.msra.mxu0 %v8532_v0 }
 0x25e   : > { %v7051_v58 = vpop.f32.mrb[4].mxu1 }
 0x25f   : > { %v7052_v59 = vpop.f32.mrb[5].mxu1 }
 0x260   : > { %v9585_v22 = vadd.f32 %v7052_v59, %v7051_v58  ;;  %v7054_v33 = vpop.f32.mrb[6].mxu1  ;;  %3681 = vmatmul.mubr.bf16.vlgmr.msra.gmra.mrb[88].mxu0 %v2664_v8 }
 0x261   : > { %v7055_v60 = vpop.f32.mrb[7].mxu1 }
 0x262   : > { %v9590_v42 = vadd.f32 %v7055_v60, %v7054_v33 }
 0x266   : > { %v7057_v38 = vpop.f32.mrb[8].mxu1 }
 0x267   : > { %v7058_v41 = vpop.f32.mrb[9].mxu1 }
 0x268   : > { %v9607_v11 = vadd.f32 %v7058_v41, %v7057_v38  ;;  %v7060_v18 = vpop.f32.mrb[10].mxu1  ;;  %v9675_v38 = vld [vmem:[%s11145_s4] ss:$0 sm:$0xff] }
 0x269   : > { %v7061_v56 = vpop.f32.mrb[11].mxu1  ;;  %v2122_v40 = vadd.f32 %v9562_v54, %v9675_v38  ;;  %v2127_v34 = vadd.f32 %v9585_v22, %v9675_v38  ;;  %v2130_v62 = vadd.f32 %v9590_v42, %v9675_v38 }
 0x26a   : > { %v9618_v48 = vadd.f32 %v7061_v56, %v7060_v18  ;;  %v2119_v56 = vadd.f32 %v9557_v35, %v9675_v38 }
 0x26e   : > { %v7063_v15 = vpop.f32.mrb[12].mxu1 }
 0x26f   : > { %v7064_v21 = vpop.f32.mrb[13].mxu1 }
 0x270   : > { %v9635_v36 = vadd.f32 %v7064_v21, %v7063_v15  ;;  %v7066_v10 = vpop.f32.mrb[14].mxu1 }
 0x271   : > { %v7067_v46 = vpop.f32.mrb[15].mxu1 }
 0x272   : > { %v9640_v49 = vadd.f32 %v7067_v46, %v7066_v10 }
 0x276   : > { %v7069_v14 = vpop.f32.mrb[16].mxu1 }
 0x277   : > { %v7070_v17 = vpop.f32.mrb[17].mxu1 }
 0x278   : > { %v9651_v1 = vadd.f32 %v7070_v17, %v7069_v14  ;;  %v7072_v28 = vpop.f32.mrb[18].mxu1 }
 0x279   : > { %v7073_v63 = vpop.f32.mrb[19].mxu1 }
 0x27a   : > { %v9656_v29 = vadd.f32 %v7073_v63, %v7072_v28 }
 0x27e   : > { %v7075_v31 = vpop.f32.mrb[20].mxu1 }
 0x27f   : > { %v7076_v51 = vpop.f32.mrb[21].mxu1 }
 0x280   : > { %v9658_v12 = vadd.f32 %v7076_v51, %v7075_v31  ;;  %v7078_v2 = vpop.f32.mrb[22].mxu1 }
 0x281   : > { %v7079_v23 = vpop.f32.mrb[23].mxu1 }
 0x282   : > { %v9660_v9 = vadd.f32 %v7079_v23, %v7078_v2  ;;  %v2135_v2 = vadd.f32 %v9607_v11, %v9675_v38  ;;  %v8539_v11 = vld [vmem:[%s11146_s5 + $0x140] sm:$0xff]  }
 0x283   : > { %7497 = vmatprep.subr.bf16.mxu0 %v8539_v11 }
 0x284   : > { %v2162_v11 = vadd.f32 %v9660_v9, %v9675_v38 }
 0x286   : > { %v7081_v50 = vpop.f32.mrb[24].mxu1 }
 0x287   : > { %v7082_v24 = vpop.f32.mrb[25].mxu1 }
 0x288   : > { %v9662_v47 = vadd.f32 %v7082_v24, %v7081_v50  ;;  %v7084_v45 = vpop.f32.mrb[26].mxu1 }
 0x289   : > { %v7085_v55 = vpop.f32.mrb[27].mxu1 }
 0x28a   : > { %v9664_v58 = vadd.f32 %v7085_v55, %v7084_v45  ;;  %v2138_v45 = vadd.f32 %v9618_v48, %v9675_v38  ;;  %v8540_v48 = vld [vmem:[%s11146_s5 + $0x100] sm:$0xff]  }
 0x28b   : > { %7498 = vmatpush3.bf16.msra.mxu0 %v8540_v48 }
 0x28c   : > { %v2170_v9 = vadd.f32 %v9664_v58, %v9675_v38 }
 0x28e   : > { %v7087_v59 = vpop.f32.mrb[28].mxu1 }
 0x28f   : > { %v7088_v26 = vpop.f32.mrb[29].mxu1 }
 0x290   : > { %v9666_v37 = vadd.f32 %v7088_v26, %v7087_v59  ;;  %v7090_v33 = vpop.f32.mrb[30].mxu1 }
 0x291   : > { %v7091_v27 = vpop.f32.mrb[31].mxu1 }
 0x292   : > { %v9668_v60 = vadd.f32 %v7091_v27, %v7090_v33 }
 0x296   : > { %v7093_v25 = vpop.f32.mrb[32].mxu1 }
 0x297   : > { %v7094_v3 = vpop.f32.mrb[33].mxu1 }
 0x298   : > { %v9670_v30 = vadd.f32 %v7094_v3, %v7093_v25  ;;  %v7096_v32 = vpop.f32.mrb[34].mxu1 }
 0x299   : > { %v7097_v57 = vpop.f32.mrb[35].mxu1 }
 0x29a   : > { %v9677_v41 = vadd.f32 %v7097_v57, %v7096_v32 }
 0x29b   : > { %v7157_v18 = vpop.f32.mrb[32].mxu0 }
 0x29c   : > { %v7158_v61 = vpop.f32.mrb[33].mxu0 }
 0x29d   : > { %v7159_v39 = vadd.f32 %v7158_v61, %v7157_v18  ;;  %v7160_v5 = vpop.f32.mrb[34].mxu0  ;;  %v2143_v61 = vadd.f32 %v9635_v36, %v9675_v38 }
 0x29e   : > { %v7099_v6 = vpop.f32.mrb[36].mxu1  ;;  %v7161_v19 = vpop.f32.mrb[35].mxu0 }
 0x29f   : > { %v7162_v0 = vadd.f32 %v7161_v19, %v7160_v5  ;;  %v7100_v15 = vpop.f32.mrb[37].mxu1  ;;  %v9683_v13 = vadd.f32 %v7159_v39, %v2119_v56  ;;  %v2146_v19 = vadd.f32 %v9640_v49, %v9675_v38 }
 0x2a0   : > { %v9685_v16 = vadd.f32 %v7100_v15, %v7099_v6  ;;  %v7102_v43 = vpop.f32.mrb[38].mxu1 }
 0x2a1   : > { %v7103_v21 = vpop.f32.mrb[39].mxu1  ;;  %v9687_v52 = vadd.f32 %v7162_v0, %v2122_v40 }
 0x2a2   : > { %v9689_v44 = vadd.f32 %v7103_v21, %v7102_v43 }
 0x2a3   : > { %v7163_v35 = vpop.f32.mrb[36].mxu0 }
 0x2a4   : > { %v7164_v10 = vpop.f32.mrb[37].mxu0 }
 0x2a5   : > { %v7165_v8 = vadd.f32 %v7164_v10, %v7163_v35  ;;  %v7166_v46 = vpop.f32.mrb[38].mxu0 }
 0x2a6   : > { %v7105_v54 = vpop.f32.mrb[40].mxu1  ;;  %v7167_v20 = vpop.f32.mrb[39].mxu0 }
 0x2a7   : > { %v7168_v7 = vadd.f32 %v7167_v20, %v7166_v46  ;;  %v7106_v14 = vpop.f32.mrb[41].mxu1  ;;  %v9695_v53 = vadd.f32 %v7165_v8, %v2127_v34  ;;  %v2151_v46 = vadd.f32 %v9651_v1, %v9675_v38  ;;  %v8541_v1 = vld [vmem:[%s11146_s5 + $0x148] sm:$0xff]  }
 0x2a8   : > { %v9697_v17 = vadd.f32 %v7106_v14, %v7105_v54  ;;  %v7108_v28 = vpop.f32.mrb[42].mxu1  ;;  %7499 = vmatprep.subr.bf16.mxu0 %v8541_v1 }
 0x2a9   : > { %v7109_v63 = vpop.f32.mrb[43].mxu1  ;;  %v9699_v4 = vadd.f32 %v7168_v7, %v2130_v62  ;;  %v2154_v7 = vadd.f32 %v9656_v29, %v9675_v38  ;;  %v8542_v29 = vld [vmem:[%s11146_s5 + $0x108] sm:$0xff]  }
 0x2aa   : > { %v9701_v31 = vadd.f32 %v7109_v63, %v7108_v28  ;;  %7500 = vmatpush3.bf16.msra.mxu0 %v8542_v29 }
 0x2ab   : > { %v7169_v22 = vpop.f32.mrb[40].mxu0 }
 0x2ac   : > { %v7170_v51 = vpop.f32.mrb[41].mxu0 }
 0x2ad   : > { %v7171_v23 = vadd.f32 %v7170_v51, %v7169_v22  ;;  %v7172_v50 = vpop.f32.mrb[42].mxu0 }
 0x2ae   : > { %v7111_v42 = vpop.f32.mrb[44].mxu1  ;;  %v7173_v24 = vpop.f32.mrb[43].mxu0 }
 0x2af   : > { %v7174_v55 = vadd.f32 %v7173_v24, %v7172_v50  ;;  %v7112_v59 = vpop.f32.mrb[45].mxu1  ;;  %v9707_v26 = vadd.f32 %v7171_v23, %v2135_v2 }
 0x2b0   : > { %v9709_v33 = vadd.f32 %v7112_v59, %v7111_v42  ;;  %v7114_v27 = vpop.f32.mrb[46].mxu1 }
 0x2b1   : > { %v7115_v25 = vpop.f32.mrb[47].mxu1  ;;  %v9711_v3 = vadd.f32 %v7174_v55, %v2138_v45  ;;  %v2159_v45 = vadd.f32 %v9658_v12, %v9675_v38  ;;  %v2167_v12 = vadd.f32 %v9662_v47, %v9675_v38  ;;  %v8543_v47 = vld [vmem:[%s11146_s5 + $0x150] sm:$0xff]  }
 0x2b2   : > { %v9716_v32 = vadd.f32 %v7115_v25, %v7114_v27  ;;  %7501 = vmatprep.subr.bf16.mxu0 %v8543_v47 }
 0x2b3   : > { %v7175_v57 = vpop.f32.mrb[44].mxu0 }
 0x2b4   : > { %v7176_v18 = vpop.f32.mrb[45].mxu0 }
 0x2b5   : > { %v7177_v56 = vadd.f32 %v7176_v18, %v7175_v57  ;;  %v7178_v39 = vpop.f32.mrb[46].mxu0 }
 0x2b6   : > { %v7117_v5 = vpop.f32.mrb[48].mxu1  ;;  %v7179_v6 = vpop.f32.mrb[47].mxu0 }
 0x2b7   : > { %v7180_v40 = vadd.f32 %v7179_v6, %v7178_v39  ;;  %v7118_v0 = vpop.f32.mrb[49].mxu1  ;;  %v9725_v15 = vadd.f32 %v7177_v56, %v2143_v61 }
 0x2b8   : > { %v9727_v43 = vadd.f32 %v7118_v0, %v7117_v5  ;;  %v7120_v21 = vpop.f32.mrb[50].mxu1 }
 0x2b9   : > { %v7121_v35 = vpop.f32.mrb[51].mxu1  ;;  %v9729_v10 = vadd.f32 %v7180_v40, %v2146_v19 }
 0x2ba   : > { %v9731_v34 = vadd.f32 %v7121_v35, %v7120_v21 }
 0x2bb   : > { %v7181_v36 = vpop.f32.mrb[48].mxu0 }
 0x2bc   : > { %v7182_v8 = vpop.f32.mrb[49].mxu0 }
 0x2bd   : > { %v7183_v54 = vadd.f32 %v7182_v8, %v7181_v36  ;;  %v7184_v20 = vpop.f32.mrb[50].mxu0 }
 0x2be   : > { %v7123_v49 = vpop.f32.mrb[52].mxu1  ;;  %v7185_v62 = vpop.f32.mrb[51].mxu0 }
 0x2bf   : > { %v7186_v14 = vadd.f32 %v7185_v62, %v7184_v20  ;;  %v7124_v28 = vpop.f32.mrb[53].mxu1  ;;  %v9737_v63 = vadd.f32 %v7183_v54, %v2151_v46 }
 0x2c0   : > { %v9739_v22 = vadd.f32 %v7124_v28, %v7123_v49  ;;  %v7126_v51 = vpop.f32.mrb[54].mxu1  ;;  %v8544_v28 = vld [vmem:[%s11146_s5 + $0x110] sm:$0xff]  }
 0x2c1   : > { %v7127_v2 = vpop.f32.mrb[55].mxu1  ;;  %v9741_v23 = vadd.f32 %v7186_v14, %v2154_v7  ;;  %7502 = vmatpush3.bf16.msra.mxu0 %v8544_v28 }
 0x2c2   : > { %v9746_v50 = vadd.f32 %v7127_v2, %v7126_v51  ;;  %v2175_v2 = vadd.f32 %v9666_v37, %v9675_v38  ;;  %v8545_v37 = vld [vmem:[%s11146_s5 + $0x1c0] sm:$0xff]  }
 0x2c3   : > { %v7187_v42 = vpop.f32.mrb[52].mxu0  ;;  %7609 = vmatprep.subr.bf16.mxu1 %v8545_v37 }
 0x2c4   : > { %v7188_v24 = vpop.f32.mrb[53].mxu0 }
 0x2c5   : > { %v7189_v55 = vadd.f32 %v7188_v24, %v7187_v42  ;;  %v7190_v59 = vpop.f32.mrb[54].mxu0 }
 0x2c6   : > { %v7129_v27 = vpop.f32.mrb[56].mxu1  ;;  %v7191_v25 = vpop.f32.mrb[55].mxu0 }
 0x2c7   : > { %v7192_v48 = vadd.f32 %v7191_v25, %v7190_v59  ;;  %v7130_v57 = vpop.f32.mrb[57].mxu1  ;;  %v9755_v18 = vadd.f32 %v7189_v55, %v2159_v45  ;;  %v2178_v45 = vadd.f32 %v9668_v60, %v9675_v38  ;;  %v8547_v60 = vld [vmem:[%s11146_s5 + $0x158] sm:$0xff]  }
 0x2c8   : > { %v7131_v61 = vadd.f32 %v7130_v57, %v7129_v27  ;;  %v7132_v56 = vpop.f32.mrb[58].mxu1  ;;  %7503 = vmatprep.subr.bf16.mxu0 %v8547_v60 }
 0x2c9   : > { %v7133_v39 = vpop.f32.mrb[59].mxu1  ;;  %v9757_v5 = vadd.f32 %v7192_v48, %v2162_v11 }
 0x2ca   : > { %v7134_v6 = vadd.f32 %v7133_v39, %v7132_v56  ;;  %v2231_v25 = vadd.f32 %v7131_v61, %v9675_v38  ;;  %v8549_v61 = vld [vmem:[%s11146_s5 + $0x118] sm:$0xff]  }
 0x2cb   : > { %v7193_v19 = vpop.f32.mrb[56].mxu0  ;;  %7504 = vmatpush3.bf16.msra.mxu0 %v8549_v61 }
 0x2cc   : > { %v7194_v40 = vpop.f32.mrb[57].mxu0  ;;  %v2234_v39 = vadd.f32 %v7134_v6, %v9675_v38  ;;  %v2183_v6 = vadd.f32 %v9670_v30, %v9675_v38  ;;  %v8551_v30 = vld [vmem:[%s11146_s5 + $0x160] sm:$0xff]  }
 0x2cd   : > { %v7195_v0 = vadd.f32 %v7194_v40, %v7193_v19  ;;  %v7196_v21 = vpop.f32.mrb[58].mxu0  ;;  %7505 = vmatprep.subr.bf16.mxu0 %v8551_v30 }
 0x2ce   : > { %v7135_v35 = vpop.f32.mrb[60].mxu1  ;;  %v7197_v36 = vpop.f32.mrb[59].mxu0 }
 0x2cf   : > { %v7198_v8 = vadd.f32 %v7197_v36, %v7196_v21  ;;  %v7136_v46 = vpop.f32.mrb[61].mxu1  ;;  %v9763_v54 = vadd.f32 %v7195_v0, %v2167_v12 }
 0x2d0   : > { %v7137_v20 = vadd.f32 %v7136_v46, %v7135_v35  ;;  %v7138_v49 = vpop.f32.mrb[62].mxu1  ;;  %v2186_v46 = vadd.f32 %v9677_v41, %v9675_v38  ;;  %v8553_v41 = vld [vmem:[%s11146_s5 + $0x120] sm:$0xff]  }
 0x2d1   : > { %v7139_v62 = vpop.f32.mrb[63].mxu1  ;;  %v9765_v7 = vadd.f32 %v7198_v8, %v2170_v9  ;;  %7506 = vmatpush3.bf16.msra.mxu0 %v8553_v41 }
 0x2d2   : > { %v7140_v14 = vadd.f32 %v7139_v62, %v7138_v49  ;;  %v2239_v28 = vadd.f32 %v7137_v20, %v9675_v38  ;;  %v8555_v20 = vld [vmem:[%s11146_s5 + $0x168] sm:$0xff]  }
 0x2d3   : > { %v7199_v51 = vpop.f32.mrb[60].mxu0  ;;  %7507 = vmatprep.subr.bf16.mxu0 %v8555_v20  ;;  %v2202_v20 = vadd.f32 %v9701_v31, %v9675_v38 }
 0x2d4   : > { %v7200_v58 = vpop.f32.mrb[61].mxu0 }
 0x2d5   : > { %v7201_v1 = vadd.f32 %v7200_v58, %v7199_v51  ;;  %v7202_v29 = vpop.f32.mrb[62].mxu0 }
 0x2d6   : > { %v7203_v42 = vpop.f32.mrb[63].mxu0  ;;  %v7241_v24 = vpop.f32.mrb[64].mxu1 }
 0x2d7   : > { %v7204_v55 = vadd.f32 %v7203_v42, %v7202_v29  ;;  %v7242_v59 = vpop.f32.mrb[65].mxu1  ;;  %v9777_v27 = vadd.f32 %v7201_v1, %v2175_v2  ;;  %v2242_v29 = vadd.f32 %v7140_v14, %v9675_v38  ;;  %v8557_v14 = vld [vmem:[%s11146_s5 + $0x128] sm:$0xff]  }
 0x2d8   : > { %v7243_v11 = vadd.f32 %v7242_v59, %v7241_v24  ;;  %v7244_v48 = vpop.f32.mrb[66].mxu1  ;;  %7508 = vmatpush3.bf16.msra.mxu0 %v8557_v14 }
 0x2d9   : > { %v7245_v57 = vpop.f32.mrb[67].mxu1  ;;  %v9780_v56 = vadd.f32 %v7204_v55, %v2178_v45 }
 0x2da   : > { %v7246_v19 = vadd.f32 %v7245_v57, %v7244_v48  ;;  %v9786_v40 = vadd.f32 %v7243_v11, %v2231_v25  ;;  %v2191_v25 = vadd.f32 %v9685_v16, %v9675_v38 }
 0x2db   : > { %v7205_v12 = vpop.f32.mrb[64].mxu0 }
 0x2dc   : > { %v7206_v0 = vpop.f32.mrb[65].mxu0  ;;  %v9794_v21 = vadd.f32 %v7246_v19, %v2234_v39  ;;  %v2194_v39 = vadd.f32 %v9689_v44, %v9675_v38  ;;  %v8559_v44 = vld [vmem:[%s11146_s5 + $0x170] sm:$0xff]  }
 0x2dd   : > { %v7207_v35 = vadd.f32 %v7206_v0, %v7205_v12  ;;  %v7208_v36 = vpop.f32.mrb[66].mxu0  ;;  %7509 = vmatprep.subr.bf16.mxu0 %v8559_v44 }
 0x2de   : > { %v7209_v9 = vpop.f32.mrb[67].mxu0  ;;  %v7247_v8 = vpop.f32.mrb[68].mxu1 }
 0x2df   : > { %v7210_v49 = vadd.f32 %v7209_v9, %v7208_v36  ;;  %v7248_v62 = vpop.f32.mrb[69].mxu1  ;;  %v9800_v47 = vadd.f32 %v7207_v35, %v2183_v6 }
 0x2e0   : > { %v7249_v51 = vadd.f32 %v7248_v62, %v7247_v8  ;;  %v7250_v58 = vpop.f32.mrb[70].mxu1 }
 0x2e1   : > { %v7251_v2 = vpop.f32.mrb[71].mxu1  ;;  %v9803_v1 = vadd.f32 %v7210_v49, %v2186_v46  ;;  %v8561_v46 = vld [vmem:[%s11146_s5 + $0x130] sm:$0xff]  }
 0x2e2   : > { %v7252_v42 = vadd.f32 %v7251_v2, %v7250_v58  ;;  %v9809_v24 = vadd.f32 %v7249_v51, %v2239_v28  ;;  %7510 = vmatpush3.bf16.msra.mxu0 %v8561_v46  ;;  %v2199_v51 = vadd.f32 %v9697_v17, %v9675_v38 }
 0x2e3   : > { %v7211_v45 = vpop.f32.mrb[68].mxu0 }
 0x2e4   : > { %v7212_v55 = vpop.f32.mrb[69].mxu0  ;;  %v9817_v59 = vadd.f32 %v7252_v42, %v2242_v29 }
 0x2e5   : > { %v7213_v11 = vadd.f32 %v7212_v55, %v7211_v45  ;;  %v7214_v48 = vpop.f32.mrb[70].mxu0 }
 0x2e6   : > { %v7215_v57 = vpop.f32.mrb[71].mxu0  ;;  %v8299_v37 = vpop.f32.mrb[72].mxu1 }
 0x2e7   : > { %v7216_v19 = vadd.f32 %v7215_v57, %v7214_v48  ;;  %v2449_v60 = vadd.f32 %v8299_v37, %v9695_v53  ;;  %v2440_v12 = vpop.f32.mrb[73].mxu1  ;;  %v9827_v61 = vadd.f32 %v7213_v11, %v2191_v25 }
 0x2e8   : > { %v2441_v0 = vadd.f32 %v2440_v12, %v9683_v13  ;;  %v8300_v6 = vpop.f32.mrb[74].mxu1  ;;  %v8563_v13 = vld [vmem:[%s11146_s5 + $0x178] sm:$0xff]  }
 0x2e9   : > { %v2569_v35 = vmax.f32 %v2449_v60, 0.0  ;;  %v2452_v16 = vadd.f32 %v8300_v6, %v9699_v4  ;;  %v2443_v36 = vpop.f32.mrb[75].mxu1  ;;  %v9831_v9 = vadd.f32 %v7216_v19, %v2194_v39  ;;  %7511 = vmatprep.subr.bf16.mxu0 %v8563_v13  ;;  %v2728_v60 = vld [vmem:[#allocation3 + $0x2] sm:$0xff]  ;;  %v2729_v12 = vld [vmem:[#allocation3 + $0xa] sm:$0xff] }
 0x2ea   : > { %v2567_v8 = vmax.f32 %v2441_v0, 0.0  ;;  %v2444_v53 = vadd.f32 %v2443_v36, %v9687_v52  ;;  %v8565_v52 = vld [vmem:[%s11146_s5 + $0x138] sm:$0xff]  }
 0x2eb   : > { %2602 = vst [vmem:[#allocation3 + $0x31] sm:$0xff] %v2569_v35  ;;  %v2570_v4 = vmax.f32 %v2452_v16, 0.0  ;;  %v7217_v49 = vpop.f32.mrb[72].mxu0  ;;  %7512 = vmatpush3.bf16.msra.mxu0 %v8565_v52 }
 0x2ec   : > { %2600 = vst [vmem:[#allocation3 + $0x19] sm:$0xff] %v2567_v8  ;;  %v2568_v62 = vmax.f32 %v2444_v53, 0.0  ;;  %v7218_v28 = vpop.f32.mrb[73].mxu0 }
 0x2ed   : > { %2603 = vst [vmem:[#allocation3 + $0x39] sm:$0xff] %v2570_v4  ;;  %v7219_v58 = vadd.f32 %v7218_v28, %v7217_v49  ;;  %v7220_v2 = vpop.f32.mrb[74].mxu0  ;;  %v2714_v30 = vpack.c.bf16 %v2570_v4, %v2569_v35  ;;  %v2207_v35 = vadd.f32 %v9709_v33, %v9675_v38  ;;  %v2210_v33 = vadd.f32 %v9716_v32, %v9675_v38 }
 0x2ee   : > { %2601 = vst [vmem:[#allocation3 + $0x21] sm:$0xff] %v2568_v62  ;;  %v7221_v29 = vpop.f32.mrb[75].mxu0  ;;  %v8303_v42 = vpop.f32.mrb[76].mxu1  ;;  %v2713_v41 = vpack.c.bf16 %v2568_v62, %v2567_v8  ;;  %v2760_v8 = vpack.c.bf16 %v2729_v12, %v2728_v60  ;;  %v8546_v62 = vld [vmem:[%s11146_s5 + $0x180] sm:$0xff]  }
 0x2ef   : > { %v7222_v45 = vadd.f32 %v7221_v29, %v7220_v2  ;;  %v2465_v55 = vadd.f32 %v8303_v42, %v9725_v15  ;;  %v2456_v14 = vpop.f32.mrb[77].mxu1  ;;  %v9851_v25 = vadd.f32 %v7219_v58, %v2199_v51  ;;  %v8548_v29 = vld [vmem:[%s11146_s5 + $0x1c8] sm:$0xff]  }
 0x2f0   : > { %v2457_v17 = vadd.f32 %v2456_v14, %v9707_v26  ;;  %v8304_v11 = vpop.f32.mrb[78].mxu1  ;;  %3688 = vmatprep.mubr.bf16.mxu0 %v2713_v41 }
 0x2f1   : > { %v2573_v48 = vmax.f32 %v2465_v55, 0.0  ;;  %v2468_v57 = vadd.f32 %v8304_v11, %v9729_v10  ;;  %v2459_v37 = vpop.f32.mrb[79].mxu1  ;;  %v9855_v39 = vadd.f32 %v7222_v45, %v2202_v20 }
 0x2f2   : > { %v2571_v19 = vmax.f32 %v2457_v17, 0.0  ;;  %v2460_v31 = vadd.f32 %v2459_v37, %v9711_v3  ;;  %v2778_v58 = vld [vmem:[#allocation3 + $0x30] sm:$0xff] }
 0x2f3   : > { %2606 = vst [vmem:[#allocation3 + $0x61] sm:$0xff] %v2573_v48  ;;  %v2574_v15 = vmax.f32 %v2468_v57, 0.0  ;;  %v7223_v0 = vpop.f32.mrb[76].mxu0  ;;  %v2776_v36 = vld [vmem:[#allocation3 + $0x18] sm:$0xff] }
 0x2f4   : > { %2604 = vst [vmem:[#allocation3 + $0x49] sm:$0xff] %v2571_v19  ;;  %v2572_v6 = vmax.f32 %v2460_v31, 0.0  ;;  %v7224_v26 = vpop.f32.mrb[77].mxu0  ;;  %v2779_v53 = vld [vmem:[#allocation3 + $0x38] sm:$0xff] }
 0x2f5   : > { %2607 = vst [vmem:[#allocation3 + $0x69] sm:$0xff] %v2574_v15  ;;  %v7225_v16 = vadd.f32 %v7224_v26, %v7223_v0  ;;  %v7226_v10 = vpop.f32.mrb[78].mxu0  ;;  %v2777_v44 = vld [vmem:[#allocation3 + $0x20] sm:$0xff]  ;;  %v9860_v46 = vpack.c.bf16 %v2574_v15, %v2573_v48  ;;  %v9876_v20 = vpack.c.bf16 %v2779_v53, %v2778_v58  ;;  %v2218_v0 = vadd.f32 %v9731_v34, %v9675_v38  ;;  %v8556_v34 = vld [vmem:[%s11146_s5 + $0x1d8] sm:$0xff]  }
 0x2f6   : > { %2605 = vst [vmem:[#allocation3 + $0x51] sm:$0xff] %v2572_v6  ;;  %v7227_v3 = vpop.f32.mrb[79].mxu0  ;;  %v8307_v13 = vpop.f32.mrb[80].mxu1  ;;  %v2808_v4 = vpack.c.bf16 %v2777_v44, %v2776_v36  ;;  %v9862_v49 = vpack.c.bf16 %v2572_v6, %v2571_v19  ;;  %v2730_v37 = vld [vmem:[#allocation3 + $0x1a] sm:$0xff]  ;;  %v2215_v19 = vadd.f32 %v9727_v43, %v9675_v38 }
 0x2f7   : > { %v7228_v28 = vadd.f32 %v7227_v3, %v7226_v10  ;;  %v2481_v52 = vadd.f32 %v8307_v13, %v9755_v18  ;;  %v2472_v51 = vpop.f32.mrb[81].mxu1  ;;  %v9870_v2 = vadd.f32 %v7225_v16, %v2207_v35  ;;  %v8554_v16 = vld [vmem:[%s11146_s5 + $0x190] sm:$0xff]  }
 0x2f8   : > { %v2473_v42 = vadd.f32 %v2472_v51, %v9737_v63  ;;  %v8308_v41 = vpop.f32.mrb[82].mxu1  ;;  %3841 = vmatprep.mubr.bf16.mxu1 %v2808_v4  ;;  %3689 = vmatmul.mubr.bf16.gmra.mrb[92].mxu0 %v2808_v4  ;;  %v8550_v63 = vld [vmem:[%s11146_s5 + $0x188] sm:$0xff]  }
 0x2f9   : > { %v2577_v45 = vmax.f32 %v2481_v52, 0.0  ;;  %v2484_v32 = vadd.f32 %v8308_v41, %v9757_v5  ;;  %v2475_v55 = vpop.f32.mrb[83].mxu1  ;;  %3842 = vmatmul.mubr.bf16.vlgmr.msra.gmra.mrb[104].mxu1 %v2760_v8  ;;  %3696 = vmatprep.mubr.bf16.mxu0 %v2714_v30  ;;  %v9879_v18 = vadd.f32 %v7228_v28, %v2210_v33  ;;  %v8552_v5 = vld [vmem:[%s11146_s5 + $0x1d0] sm:$0xff]   ;;  %v2732_v41 = vld [vmem:[#allocation3 + $0x32] sm:$0xff] }
 0x2fa   : > { %v2575_v14 = vmax.f32 %v2473_v42, 0.0  ;;  %v2476_v17 = vadd.f32 %v2475_v55, %v9741_v23  ;;  %3849 = vmatprep.mubr.bf16.mxu1 %v9876_v20  ;;  %7610 = vmatpush3.bf16.msra.mxu1 %v8546_v62  ;;  %v2731_v23 = vld [vmem:[#allocation3 + $0x22] sm:$0xff] }
 0x2fb   : > { %2610 = vst [vmem:[#allocation3 + $0x91] sm:$0xff] %v2577_v45  ;;  %v2578_v11 = vmax.f32 %v2484_v32, 0.0  ;;  %v7229_v48 = vpop.f32.mrb[80].mxu0  ;;  %7611 = vmatprep.subr.bf16.mxu1 %v8548_v29  ;;  %v9901_v44 = vpack.c.bf16 %v2731_v23, %v2730_v37  ;;  %v2780_v8 = vld [vmem:[#allocation3 + $0x48] sm:$0xff] }
 0x2fc   : > { %2608 = vst [vmem:[#allocation3 + $0x79] sm:$0xff] %v2575_v14  ;;  %v2576_v30 = vmax.f32 %v2476_v17, 0.0  ;;  %v7230_v57 = vpop.f32.mrb[81].mxu0 }
 0x2fd   : > { %2611 = vst [vmem:[#allocation3 + $0x99] sm:$0xff] %v2578_v11  ;;  %v7231_v31 = vadd.f32 %v7230_v57, %v7229_v48  ;;  %v7232_v60 = vpop.f32.mrb[82].mxu0  ;;  %v2781_v12 = vld [vmem:[#allocation3 + $0x50] sm:$0xff]  ;;  %v9891_v15 = vpack.c.bf16 %v2578_v11, %v2577_v45  ;;  %v2223_v45 = vadd.f32 %v9739_v22, %v9675_v38 }
 0x2fe   : > { %2609 = vst [vmem:[#allocation3 + $0x81] sm:$0xff] %v2576_v30  ;;  %v7233_v6 = vpop.f32.mrb[83].mxu0  ;;  %v8311_v26 = vpop.f32.mrb[84].mxu1  ;;  %v9895_v35 = vpack.c.bf16 %v2576_v30, %v2575_v14  ;;  %7612 = vmatpush3.bf16.msra.mxu1 %v8550_v63  ;;  %v9910_v4 = vpack.c.bf16 %v2781_v12, %v2780_v8  ;;  %v2783_v14 = vld [vmem:[#allocation3 + $0x68] sm:$0xff]  ;;  %v2226_v63 = vadd.f32 %v9746_v50, %v9675_v38  ;;  %v8562_v30 = vld [vmem:[%s11146_s5 + $0x1a0] sm:$0xff]   ;;  %v8564_v38 = vld [vmem:[%s11146_s5 + $0x1e8] sm:$0xff]  }
 0x2ff   : > { %v7234_v43 = vadd.f32 %v7233_v6, %v7232_v60  ;;  %v2497_v10 = vadd.f32 %v8311_v26, %v9777_v27  ;;  %v2488_v36 = vpop.f32.mrb[85].mxu1  ;;  %v9903_v53 = vadd.f32 %v7231_v31, %v2215_v19  ;;  %7613 = vmatprep.subr.bf16.mxu1 %v8552_v5  ;;  %v2782_v19 = vld [vmem:[#allocation3 + $0x60] sm:$0xff]  ;;  %v2735_v8 = vld [vmem:[#allocation3 + $0x52] sm:$0xff] }
 0x300   : > { %v2489_v3 = vadd.f32 %v2488_v36, %v9763_v54  ;;  %v8312_v13 = vpop.f32.mrb[86].mxu1  ;;  %3697 = vmatmul.mubr.bf16.gmra.mrb[96].mxu0 %v9876_v20  ;;  %v8558_v54 = vld [vmem:[%s11146_s5 + $0x198] sm:$0xff]   ;;  %v9946_v12 = vpack.c.bf16 %v2783_v14, %v2782_v19 }
 0x301   : > { %v2581_v62 = vmax.f32 %v2497_v10, 0.0  ;;  %v2500_v27 = vadd.f32 %v8312_v13, %v9780_v56  ;;  %v2491_v33 = vpop.f32.mrb[87].mxu1  ;;  %3850 = vmatmul.mubr.bf16.gmra.mrb[108].mxu1 %v9901_v44  ;;  %3704 = vmatprep.mubr.bf16.mxu0 %v9862_v49  ;;  %v9915_v28 = vadd.f32 %v7234_v43, %v2218_v0  ;;  %v8560_v49 = vld [vmem:[%s11146_s5 + $0x1e0] sm:$0xff]  }
 0x302   : > { %v2579_v52 = vmax.f32 %v2489_v3, 0.0  ;;  %v2492_v51 = vadd.f32 %v2491_v33, %v9765_v7  ;;  %3857 = vmatprep.mubr.bf16.mxu1 %v9910_v4  ;;  %7614 = vmatpush3.bf16.msra.mxu1 %v8554_v16  ;;  %v2733_v7 = vld [vmem:[#allocation3 + $0x3a] sm:$0xff]  ;;  %v2734_v36 = vld [vmem:[#allocation3 + $0x4a] sm:$0xff] }
 0x303   : > { %2614 = vst [vmem:[#allocation3 + $0xc1] sm:$0xff] %v2581_v62  ;;  %v2582_v58 = vmax.f32 %v2500_v27, 0.0  ;;  %v7235_v56 = vpop.f32.mrb[84].mxu0  ;;  %7615 = vmatprep.subr.bf16.mxu1 %v8556_v34  ;;  %v9937_v23 = vpack.c.bf16 %v2733_v7, %v2732_v41 }
 0x304   : > { %2612 = vst [vmem:[#allocation3 + $0xa9] sm:$0xff] %v2579_v52  ;;  %v2580_v29 = vmax.f32 %v2492_v51, 0.0  ;;  %v7236_v42 = vpop.f32.mrb[85].mxu0  ;;  %v2784_v51 = vld [vmem:[#allocation3 + $0x78] sm:$0xff] }
 0x305   : > { %2615 = vst [vmem:[#allocation3 + $0xc9] sm:$0xff] %v2582_v58  ;;  %v7237_v32 = vadd.f32 %v7236_v42, %v7235_v56  ;;  %v7238_v55 = vpop.f32.mrb[86].mxu0  ;;  %v9927_v17 = vpack.c.bf16 %v2582_v58, %v2581_v62  ;;  %v8568_v62 = vld [vmem:[%s11146_s5 + $0x1b0] sm:$0xff]   ;;  %v2787_v14 = vld [vmem:[#allocation3 + $0x98] sm:$0xff] }
 0x306   : > { %2613 = vst [vmem:[#allocation3 + $0xb1] sm:$0xff] %v2580_v29  ;;  %v7239_v11 = vpop.f32.mrb[87].mxu0  ;;  %v8315_v48 = vpop.f32.mrb[88].mxu1  ;;  %v9931_v5 = vpack.c.bf16 %v2580_v29, %v2579_v52  ;;  %7616 = vmatpush3.bf16.msra.mxu1 %v8558_v54  ;;  %v9969_v52 = vpack.c.bf16 %v2735_v8, %v2734_v36  ;;  %v8569_v54 = vld [vmem:[%s11146_s5 + $0x1f8] sm:$0xff]  }
 0x307   : > { %v7240_v22 = vadd.f32 %v7239_v11, %v7238_v55  ;;  %v2513_v57 = vadd.f32 %v8315_v48, %v9827_v61  ;;  %v2504_v37 = vpop.f32.mrb[89].mxu1  ;;  %v9939_v31 = vadd.f32 %v7237_v32, %v2223_v45  ;;  %7617 = vmatprep.subr.bf16.mxu1 %v8560_v49  ;;  %v2736_v32 = vld [vmem:[#allocation3 + $0x62] sm:$0xff]  ;;  %v2737_v55 = vld [vmem:[#allocation3 + $0x6a] sm:$0xff] }
 0x308   : > { %v2505_v50 = vadd.f32 %v2504_v37, %v9800_v47  ;;  %v8316_v60 = vpop.f32.mrb[90].mxu1  ;;  %3705 = vmatmul.mubr.bf16.gmra.mrb[100].mxu0 %v9910_v4  ;;  %v8566_v47 = vld [vmem:[%s11146_s5 + $0x1a8] sm:$0xff]  }
 0x309   : > { %v2585_v0 = vmax.f32 %v2513_v57, 0.0  ;;  %v2516_v61 = vadd.f32 %v8316_v60, %v9831_v9  ;;  %v2507_v6 = vpop.f32.mrb[91].mxu1  ;;  %3858 = vmatmul.mubr.bf16.gmra.mrb[112].mxu1 %v9937_v23  ;;  %3712 = vmatprep.mubr.bf16.mxu0 %v9860_v46  ;;  %v9951_v26 = vadd.f32 %v7240_v22, %v2226_v63  ;;  %v8567_v9 = vld [vmem:[%s11146_s5 + $0x1f0] sm:$0xff]   ;;  %v2786_v22 = vld [vmem:[#allocation3 + $0x90] sm:$0xff] }
 0x30a   : > { %v2583_v16 = vmax.f32 %v2505_v50, 0.0  ;;  %v2508_v43 = vadd.f32 %v2507_v6, %v9803_v1  ;;  %3865 = vmatprep.mubr.bf16.mxu1 %v9946_v12  ;;  %7618 = vmatpush3.bf16.msra.mxu1 %v8562_v30  ;;  %v2785_v1 = vld [vmem:[#allocation3 + $0x80] sm:$0xff]  ;;  %v9991_v30 = vpack.c.bf16 %v2737_v55, %v2736_v32  ;;  %v9995_v19 = vpack.c.bf16 %v2787_v14, %v2786_v22 }
 0x30b   : > { %2618 = vst [vmem:[#allocation3 + $0xf1] sm:$0xff] %v2585_v0  ;;  %v2586_v10 = vmax.f32 %v2516_v61, 0.0  ;;  %7619 = vmatprep.subr.bf16.mxu1 %v8564_v38  ;;  %v9976_v49 = vpack.c.bf16 %v2785_v1, %v2784_v51  ;;  %v2738_v6 = vld [vmem:[#allocation3 + $0x7a] sm:$0xff] }
 0x30c   : > { %2616 = vst [vmem:[#allocation3 + $0xd9] sm:$0xff] %v2583_v16  ;;  %v2584_v46 = vmax.f32 %v2508_v43, 0.0  ;;  %v2745_v32 = vld [vmem:[#allocation3 + $0xca] sm:$0xff] }
 0x30d   : > { %2619 = vst [vmem:[#allocation3 + $0xf9] sm:$0xff] %v2586_v10  ;;  %v9961_v34 = vpack.c.bf16 %v2586_v10, %v2585_v0  ;;  %v2789_v43 = vld [vmem:[#allocation3 + $0xb0] sm:$0xff] }
 0x30e   : > { %2617 = vst [vmem:[#allocation3 + $0xe1] sm:$0xff] %v2584_v46  ;;  %v8319_v3 = vpop.f32.mrb[92].mxu1  ;;  %v9963_v13 = vpack.c.bf16 %v2584_v46, %v2583_v16  ;;  %7620 = vmatpush3.bf16.msra.mxu1 %v8566_v47  ;;  %v2739_v16 = vld [vmem:[#allocation3 + $0x82] sm:$0xff] }
 0x30f   : > { %v2529_v27 = vadd.f32 %v8319_v3, %v9870_v2  ;;  %v2520_v33 = vpop.f32.mrb[93].mxu1  ;;  %7621 = vmatprep.subr.bf16.mxu1 %v8567_v9  ;;  %v2788_v46 = vld [vmem:[#allocation3 + $0xa8] sm:$0xff] }
 0x310   : > { %v2521_v58 = vadd.f32 %v2520_v33, %v9851_v25  ;;  %v8320_v56 = vpop.f32.mrb[94].mxu1  ;;  %3713 = vmatmul.mubr.bf16.gmra.mrb[104].mxu0 %v9946_v12  ;;  %v8570_v25 = vld [vmem:[%s11146_s5 + $0x1b8] sm:$0xff]   ;;  %v10011_v1 = vpack.c.bf16 %v2789_v43, %v2788_v46 }
 0x311   : > { %v2589_v29 = vmax.f32 %v2529_v27, 0.0  ;;  %v2532_v42 = vadd.f32 %v8320_v56, %v9879_v18  ;;  %v2523_v2 = vpop.f32.mrb[95].mxu1  ;;  %3866 = vmatmul.mubr.bf16.gmra.mrb[116].mxu1 %v9969_v52  ;;  %3720 = vmatprep.mubr.bf16.mxu0 %v9895_v35  ;;  %v2791_v56 = vld [vmem:[#allocation3 + $0xc8] sm:$0xff] }
 0x312   : > { %v2587_v41 = vmax.f32 %v2521_v58, 0.0  ;;  %v2524_v7 = vadd.f32 %v2523_v2, %v9855_v39  ;;  %3873 = vmatprep.mubr.bf16.mxu1 %v9976_v49  ;;  %7622 = vmatpush3.bf16.msra.mxu1 %v8568_v62  ;;  %v2741_v58 = vld [vmem:[#allocation3 + $0x9a] sm:$0xff]  ;;  %v2743_v2 = vld [vmem:[#allocation3 + $0xb2] sm:$0xff] }
 0x313   : > { %2622 = vst [vmem:[#allocation3 + $0x121] sm:$0xff] %v2589_v29  ;;  %v2590_v45 = vmax.f32 %v2532_v42, 0.0  ;;  %7623 = vmatprep.subr.bf16.mxu1 %v8569_v54  ;;  %v2740_v54 = vld [vmem:[#allocation3 + $0x92] sm:$0xff]  ;;  %v2790_v42 = vld [vmem:[#allocation3 + $0xc0] sm:$0xff] }
 0x314   : > { %2620 = vst [vmem:[#allocation3 + $0x109] sm:$0xff] %v2587_v41  ;;  %v2588_v18 = vmax.f32 %v2524_v7, 0.0  ;;  %v2795_v55 = vld [vmem:[#allocation3 + $0xf8] sm:$0xff] }
 0x315   : > { %2623 = vst [vmem:[#allocation3 + $0x129] sm:$0xff] %v2590_v45  ;;  %v9986_v35 = vpack.c.bf16 %v2590_v45, %v2589_v29  ;;  %v10020_v29 = vpack.c.bf16 %v2741_v58, %v2740_v54 }
 0x316   : > { %2621 = vst [vmem:[#allocation3 + $0x111] sm:$0xff] %v2588_v18  ;;  %v8323_v39 = vpop.f32.mrb[96].mxu1  ;;  %v9988_v63 = vpack.c.bf16 %v2588_v18, %v2587_v41  ;;  %7624 = vmatpush3.bf16.msra.mxu1 %v8570_v25  ;;  %v2793_v41 = vld [vmem:[#allocation3 + $0xe0] sm:$0xff]  ;;  %v2792_v25 = vld [vmem:[#allocation3 + $0xd8] sm:$0xff] }
 0x317   : > { %v2545_v11 = vadd.f32 %v8323_v39, %v9939_v31  ;;  %v2536_v48 = vpop.f32.mrb[97].mxu1  ;;  %v10031_v45 = vpack.c.bf16 %v2793_v41, %v2792_v25  ;;  %v2744_v18 = vld [vmem:[#allocation3 + $0xc2] sm:$0xff]  ;;  %v2794_v39 = vld [vmem:[#allocation3 + $0xf0] sm:$0xff] }
 0x318   : > { %v2537_v57 = vadd.f32 %v2536_v48, %v9903_v53  ;;  %v8324_v37 = vpop.f32.mrb[98].mxu1  ;;  %3721 = vmatmul.mubr.bf16.gmra.mrb[108].mxu0 %v9976_v49  ;;  %v10042_v14 = vpack.c.bf16 %v2745_v32, %v2744_v18  ;;  %v2747_v48 = vld [vmem:[#allocation3 + $0xe2] sm:$0xff] }
 0x319   : > { %v2593_v38 = vmax.f32 %v2545_v11, 0.0  ;;  %v2548_v50 = vadd.f32 %v8324_v37, %v9951_v26  ;;  %v2539_v60 = vpop.f32.mrb[99].mxu1  ;;  %3874 = vmatmul.mubr.bf16.gmra.mrb[120].mxu1 %v9991_v30  ;;  %3728 = vmatprep.mubr.bf16.mxu0 %v9891_v15  ;;  %v10045_v11 = vpack.c.bf16 %v2795_v55, %v2794_v39  ;;  %v2825_v32 = vld [vmem:[#allocation3 + $0x21] sm:$0xff]  ;;  %v2824_v39 = vld [vmem:[#allocation3 + $0x19] sm:$0xff] }
 0x31a   : > { %v2591_v31 = vmax.f32 %v2537_v57, 0.0  ;;  %v2540_v0 = vadd.f32 %v2539_v60, %v9915_v28  ;;  %3881 = vmatprep.mubr.bf16.mxu1 %v9995_v19  ;;  %v10007_v28 = vpack.c.bf16 %v2739_v16, %v2738_v6 }
 0x31b   : > { %2626 = vst [vmem:[#allocation3 + $0x151] sm:$0xff] %v2593_v38  ;;  %v2594_v53 = vmax.f32 %v2548_v50, 0.0  ;;  %v2796_v37 = vld [vmem:[#allocation3 + $0x108] sm:$0xff]  ;;  %v2748_v50 = vld [vmem:[#allocation3 + $0xf2] sm:$0xff] }
 0x31c   : > { %2624 = vst [vmem:[#allocation3 + $0x139] sm:$0xff] %v2591_v31  ;;  %v2592_v61 = vmax.f32 %v2540_v0, 0.0  ;;  %v2799_v60 = vld [vmem:[#allocation3 + $0x128] sm:$0xff] }
 0x31d   : > { %2627 = vst [vmem:[#allocation3 + $0x159] sm:$0xff] %v2594_v53  ;;  %v10002_v47 = vpack.c.bf16 %v2594_v53, %v2593_v38  ;;  %v2797_v22 = vld [vmem:[#allocation3 + $0x110] sm:$0xff] }
 0x31e   : > { %2625 = vst [vmem:[#allocation3 + $0x141] sm:$0xff] %v2592_v61  ;;  %v8327_v26 = vpop.f32.mrb[100].mxu1  ;;  %v10004_v10 = vpack.c.bf16 %v2592_v61, %v2591_v31  ;;  %v10053_v38 = vpack.c.bf16 %v2797_v22, %v2796_v37  ;;  %v2798_v61 = vld [vmem:[#allocation3 + $0x120] sm:$0xff]  ;;  %v2969_v37 = vld [vmem:[#allocation3 + $0x31] sm:$0xff] }
 0x31f   : > { %v2561_v15 = vadd.f32 %v8327_v26, %v9809_v24  ;;  %v2552_v9 = vpop.f32.mrb[101].mxu1  ;;  %v10063_v43 = vpack.c.bf16 %v2799_v60, %v2798_v61  ;;  %v2972_v60 = vld [vmem:[#allocation3 + $0x51] sm:$0xff] }
 0x320   : > { %v2553_v36 = vadd.f32 %v2552_v9, %v9786_v40  ;;  %v8328_v8 = vpop.f32.mrb[102].mxu1  ;;  %3729 = vmatmul.mubr.bf16.gmra.mrb[112].mxu0 %v9995_v19  ;;  %v2751_v9 = vld [vmem:[#allocation3 + $0x112] sm:$0xff] }
 0x321   : > { %v2597_v3 = vmax.f32 %v2561_v15, 0.0  ;;  %v2564_v62 = vadd.f32 %v8328_v8, %v9817_v59  ;;  %v2555_v27 = vpop.f32.mrb[103].mxu1  ;;  %3882 = vmatmul.mubr.bf16.gmra.mrb[124].mxu1 %v10007_v28  ;;  %3736 = vmatprep.mubr.bf16.mxu0 %v9931_v5  ;;  %v10023_v5 = vpack.c.bf16 %v2791_v56, %v2790_v42  ;;  %v2750_v15 = vld [vmem:[#allocation3 + $0x10a] sm:$0xff] }
 0x322   : > { %v2595_v24 = vmax.f32 %v2553_v36, 0.0  ;;  %v2556_v33 = vadd.f32 %v2555_v27, %v9794_v21  ;;  %3889 = vmatprep.mubr.bf16.mxu1 %v10011_v1  ;;  %v2742_v21 = vld [vmem:[#allocation3 + $0xaa] sm:$0xff]  ;;  %v10070_v36 = vpack.c.bf16 %v2751_v9, %v2750_v15  ;;  %v2975_v9 = vld [vmem:[#allocation3 + $0x79] sm:$0xff] }
 0x323   : > { %2630 = vst [vmem:[#allocation3 + $0x181] sm:$0xff] %v2597_v3  ;;  %v2598_v40 = vmax.f32 %v2564_v62, 0.0  ;;  %v10028_v7 = vpack.c.bf16 %v2743_v2, %v2742_v21  ;;  %v2800_v8 = vld [vmem:[#allocation3 + $0x138] sm:$0xff]  ;;  %v2753_v62 = vld [vmem:[#allocation3 + $0x12a] sm:$0xff] }
 0x324   : > { %2628 = vst [vmem:[#allocation3 + $0x169] sm:$0xff] %v2595_v24  ;;  %v2596_v51 = vmax.f32 %v2556_v33, 0.0  ;;  %v2803_v27 = vld [vmem:[#allocation3 + $0x158] sm:$0xff]  ;;  %v2802_v33 = vld [vmem:[#allocation3 + $0x150] sm:$0xff] }
 0x325   : > { %2631 = vst [vmem:[#allocation3 + $0x189] sm:$0xff] %v2598_v40  ;;  %v2801_v46 = vld [vmem:[#allocation3 + $0x140] sm:$0xff]  ;;  %v10081_v40 = vpack.c.bf16 %v2803_v27, %v2802_v33  ;;  %v2756_v21 = vld [vmem:[#allocation3 + $0x152] sm:$0xff]  ;;  %v2979_v27 = vld [vmem:[#allocation3 + $0xa9] sm:$0xff] }
 0x326   : > { %2629 = vst [vmem:[#allocation3 + $0x171] sm:$0xff] %v2596_v51  ;;  %v10018_v59 = vpack.c.bf16 %v2596_v51, %v2595_v24  ;;  %v10073_v3 = vpack.c.bf16 %v2801_v46, %v2800_v8  ;;  %v2754_v51 = vld [vmem:[#allocation3 + $0x13a] sm:$0xff]  ;;  %v8578_v46 = vld [vmem:[%s11146_s5 + $0x238] sm:$0xff]  }
 0x328   : > { %3737 = vmatmul.mubr.bf16.gmra.mrb[116].mxu0 %v10011_v1 }
 0x329   : > { %3890 = vmatmul.mubr.bf16.gmra.mrb[128].mxu1 %v10020_v29  ;;  %3744 = vmatprep.mubr.bf16.mxu0 %v9927_v17  ;;  %v10038_v17 = vld [vmem:[%s11146_s5 + $0x200] sm:$0xff]  }
 0x32a   : > { %3897 = vmatprep.mubr.bf16.mxu1 %v10023_v5  ;;  %8329 = vmatprep.subr.bf16.mxu0 %v10038_v17  ;;  %v2806_v25 = vld [vmem:[#allocation3 + $0x180] sm:$0xff] }
 0x32b   : > { %v2804_v56 = vld [vmem:[#allocation3 + $0x168] sm:$0xff] }
 0x32c   : > { %v2807_v2 = vld [vmem:[#allocation3 + $0x188] sm:$0xff] }
 0x32d   : > { %v2805_v54 = vld [vmem:[#allocation3 + $0x170] sm:$0xff]  ;;  %v10097_v18 = vpack.c.bf16 %v2807_v2, %v2806_v25 }
 0x32e   : > { %v10089_v42 = vpack.c.bf16 %v2805_v54, %v2804_v56  ;;  %v2759_v55 = vld [vmem:[#allocation3 + $0x172] sm:$0xff] }
 0x330   : > { %3745 = vmatmul.mubr.bf16.gmra.mrb[120].mxu0 %v10023_v5 }
 0x331   : > { %3898 = vmatmul.mubr.bf16.gmra.mrb[132].mxu1 %v10028_v7  ;;  %3752 = vmatprep.mubr.bf16.mxu0 %v9963_v13  ;;  %v2746_v13 = vld [vmem:[#allocation3 + $0xda] sm:$0xff] }
 0x332   : > { %3905 = vmatprep.mubr.bf16.mxu1 %v10031_v45  ;;  %v10050_v57 = vpack.c.bf16 %v2747_v48, %v2746_v13  ;;  %v2970_v13 = vld [vmem:[#allocation3 + $0x39] sm:$0xff]  ;;  %v2856_v48 = vpack.c.bf16 %v2825_v32, %v2824_v39 }
 0x333   : > { %v7289_v31 = vpop.f32.mrb[88].mxu0 }
 0x334   : > { %v7290_v0 = vpop.f32.mrb[89].mxu0 }
 0x335   : > { %v10060_v6 = vadd.f32 %v7290_v0, %v7289_v31  ;;  %v7292_v16 = vpop.f32.mrb[90].mxu0  ;;  %v2971_v31 = vld [vmem:[#allocation3 + $0x49] sm:$0xff] }
 0x336   : > { %v7293_v26 = vpop.f32.mrb[91].mxu0  ;;  %v8574_v0 = vld [vmem:[%s11146_s5 + $0x218] sm:$0xff]   ;;  %v3002_v61 = vpack.c.bf16 %v2972_v60, %v2971_v31 }
 0x338   : > { %3753 = vmatmul.mubr.bf16.gmra.mrb[124].mxu0 %v10031_v45 }
 0x339   : > { %3906 = vmatmul.mubr.bf16.gmra.mrb[136].mxu1 %v10042_v14  ;;  %3760 = vmatprep.mubr.bf16.mxu0 %v9961_v34  ;;  %v2749_v34 = vld [vmem:[#allocation3 + $0xfa] sm:$0xff] }
 0x33a   : > { %3913 = vmatprep.mubr.bf16.mxu1 %v10045_v11  ;;  %v10058_v53 = vpack.c.bf16 %v2749_v34, %v2748_v50  ;;  %v8572_v50 = vld [vmem:[%s11146_s5 + $0x208] sm:$0xff]   ;;  %v3001_v34 = vpack.c.bf16 %v2970_v13, %v2969_v37 }
 0x33b   : > { %v2993_v37 = vld [vmem:[#allocation3 + $0x151] sm:$0xff] }
 0x340   : > { %3761 = vmatmul.mubr.bf16.gmra.mrb[128].mxu0 %v10045_v11 }
 0x341   : > { %3914 = vmatmul.mubr.bf16.gmra.mrb[140].mxu1 %v10050_v57  ;;  %3768 = vmatprep.mubr.bf16.mxu0 %v9988_v63  ;;  %v10067_v63 = vadd.f32 %v7293_v26, %v7292_v16  ;;  %v2973_v16 = vld [vmem:[#allocation3 + $0x61] sm:$0xff]  ;;  %v8576_v26 = vld [vmem:[%s11146_s5 + $0x228] sm:$0xff]  }
 0x342   : > { %3921 = vmatprep.mubr.bf16.mxu1 %v10053_v38 }
 0x348   : > { %3769 = vmatmul.mubr.bf16.gmra.mrb[132].mxu0 %v10053_v38 }
 0x349   : > { %3922 = vmatmul.mubr.bf16.gmra.mrb[144].mxu1 %v10058_v53  ;;  %3776 = vmatprep.mubr.bf16.mxu0 %v9986_v35  ;;  %v2752_v35 = vld [vmem:[#allocation3 + $0x122] sm:$0xff] }
 0x34a   : > { %3929 = vmatprep.mubr.bf16.mxu1 %v10063_v43  ;;  %v10078_v24 = vpack.c.bf16 %v2753_v62, %v2752_v35  ;;  %v2980_v62 = vld [vmem:[#allocation3 + $0xb1] sm:$0xff] }
 0x34b   : > { %v3006_v33 = vpack.c.bf16 %v2980_v62, %v2979_v27 }
 0x350   : > { %3777 = vmatmul.mubr.bf16.gmra.mrb[136].mxu0 %v10063_v43 }
 0x351   : > { %3930 = vmatmul.mubr.bf16.gmra.mrb[148].mxu1 %v10070_v36  ;;  %3784 = vmatprep.mubr.bf16.mxu0 %v10004_v10  ;;  %v2755_v10 = vld [vmem:[#allocation3 + $0x142] sm:$0xff] }
 0x352   : > { %3937 = vmatprep.mubr.bf16.mxu1 %v10073_v3  ;;  %v10086_v58 = vpack.c.bf16 %v2755_v10, %v2754_v51 }
 0x358   : > { %3785 = vmatmul.mubr.bf16.gmra.mrb[140].mxu0 %v10073_v3 }
 0x359   : > { %3938 = vmatmul.mubr.bf16.gmra.mrb[152].mxu1 %v10078_v24  ;;  %3792 = vmatprep.mubr.bf16.mxu0 %v10002_v47  ;;  %v2757_v47 = vld [vmem:[#allocation3 + $0x15a] sm:$0xff] }
 0x35a   : > { %3945 = vmatprep.mubr.bf16.mxu1 %v10081_v40  ;;  %v10094_v41 = vpack.c.bf16 %v2757_v47, %v2756_v21 }
 0x360   : > { %3793 = vmatmul.mubr.bf16.gmra.mrb[144].mxu0 %v10081_v40 }
 0x361   : > { %3946 = vmatmul.mubr.bf16.gmra.mrb[156].mxu1 %v10086_v58  ;;  %3800 = vmatprep.mubr.bf16.mxu0 %v10018_v59  ;;  %v2758_v59 = vld [vmem:[#allocation3 + $0x16a] sm:$0xff] }
 0x362   : > { %3953 = vmatprep.mubr.bf16.mxu1 %v10089_v42  ;;  %v10102_v22 = vpack.c.bf16 %v2759_v55, %v2758_v59  ;;  %v2994_v59 = vld [vmem:[#allocation3 + $0x159] sm:$0xff] }
 0x368   : > { %3801 = vmatmul.mubr.bf16.gmra.mrb[148].mxu0 %v10089_v42 }
 0x369   : > { %3954 = vmatmul.mubr.bf16.gmra.mrb[160].mxu1 %v10094_v41  ;;  %4002 = vmatprep.mubr.bf16.mxu0 %v9901_v44  ;;  %v8573_v44 = vld [vmem:[%s11146_s5 + $0x210] sm:$0xff]  }
 0x36a   : > { %3961 = vmatprep.mubr.bf16.mxu1 %v10097_v18 }
 0x370   : > { %4003 = vmatmul.mubr.bf16.vlgmr.msra.gmra.mrb[152].mxu0 %v2856_v48 }
 0x371   : > { %3962 = vmatmul.mubr.bf16.gmra.mrb[164].mxu1 %v10102_v22  ;;  %4010 = vmatprep.mubr.bf16.mxu0 %v9937_v23  ;;  %v8575_v23 = vld [vmem:[%s11146_s5 + $0x220] sm:$0xff]  }
 0x372   : > { %4163 = vmatprep.mubr.bf16.mxu1 %v3001_v34  ;;  %8330 = vmatpush3.bf16.msra.mxu0 %v10038_v17  ;;  %v2974_v17 = vld [vmem:[#allocation3 + $0x69] sm:$0xff] }
 0x373   : > { %8331 = vmatprep.subr.bf16.mxu0 %v8572_v50  ;;  %v3003_v15 = vpack.c.bf16 %v2974_v17, %v2973_v16 }
 0x376   : > { %8332 = vmatpush3.bf16.msra.mxu0 %v8572_v50 }
 0x377   : > { %8333 = vmatprep.subr.bf16.mxu0 %v8573_v44 }
 0x378   : > { %4011 = vmatmul.mubr.bf16.gmra.mrb[156].mxu0 %v3001_v34 }
 0x379   : > { %4164 = vmatmul.mubr.bf16.vlgmr.msra.gmra.mrb[168].mxu1 %v9876_v20  ;;  %4018 = vmatprep.mubr.bf16.mxu0 %v9969_v52  ;;  %v8577_v20 = vld [vmem:[%s11146_s5 + $0x230] sm:$0xff]  }
 0x37a   : > { %4171 = vmatprep.mubr.bf16.mxu1 %v3002_v61  ;;  %8334 = vmatpush3.bf16.msra.mxu0 %v8573_v44  ;;  %v2976_v52 = vld [vmem:[#allocation3 + $0x81] sm:$0xff]  ;;  %v3013_v44 = vpack.c.bf16 %v2994_v59, %v2993_v37 }
 0x37b   : > { %8335 = vmatprep.subr.bf16.mxu0 %v8574_v0  ;;  %v3004_v8 = vpack.c.bf16 %v2976_v52, %v2975_v9 }
 0x37e   : > { %8336 = vmatpush3.bf16.msra.mxu0 %v8574_v0 }
 0x37f   : > { %8337 = vmatprep.subr.bf16.mxu0 %v8575_v23 }
 0x380   : > { %4019 = vmatmul.mubr.bf16.gmra.mrb[160].mxu0 %v3002_v61 }
 0x381   : > { %4172 = vmatmul.mubr.bf16.gmra.mrb[172].mxu1 %v9910_v4  ;;  %4026 = vmatprep.mubr.bf16.mxu0 %v9991_v30  ;;  %v2978_v4 = vld [vmem:[#allocation3 + $0x99] sm:$0xff]  ;;  %v2977_v30 = vld [vmem:[#allocation3 + $0x91] sm:$0xff] }
 0x382   : > { %4179 = vmatprep.mubr.bf16.mxu1 %v3003_v15  ;;  %8338 = vmatpush3.bf16.msra.mxu0 %v8575_v23  ;;  %v3005_v35 = vpack.c.bf16 %v2978_v4, %v2977_v30 }
 0x383   : > { %8339 = vmatprep.subr.bf16.mxu0 %v8576_v26 }
 0x386   : > { %8340 = vmatpush3.bf16.msra.mxu0 %v8576_v26  ;;  %v2996_v26 = vld [vmem:[#allocation3 + $0x171] sm:$0xff] }
 0x387   : > { %8341 = vmatprep.subr.bf16.mxu0 %v8577_v20 }
 0x388   : > { %4027 = vmatmul.mubr.bf16.gmra.mrb[164].mxu0 %v3003_v15 }
 0x389   : > { %4180 = vmatmul.mubr.bf16.gmra.mrb[176].mxu1 %v9946_v12  ;;  %4034 = vmatprep.mubr.bf16.mxu0 %v10007_v28  ;;  %v2982_v12 = vld [vmem:[#allocation3 + $0xc9] sm:$0xff]  ;;  %v2981_v28 = vld [vmem:[#allocation3 + $0xc1] sm:$0xff] }
 0x38a   : > { %4187 = vmatprep.mubr.bf16.mxu1 %v3004_v8  ;;  %8342 = vmatpush3.bf16.msra.mxu0 %v8577_v20  ;;  %v3007_v51 = vpack.c.bf16 %v2982_v12, %v2981_v28  ;;  %v2902_v12 = vld [vmem:[#allocation3 + $0x182] sm:$0xff]  ;;  %v2903_v28 = vld [vmem:[#allocation3 + $0x18a] sm:$0xff] }
 0x38b   : > { %8343 = vmatprep.subr.bf16.mxu0 %v8578_v46 }
 0x38e   : > { %8344 = vmatpush3.bf16.msra.mxu0 %v8578_v46 }
 0x390   : > { %4035 = vmatmul.mubr.bf16.gmra.mrb[168].mxu0 %v3004_v8 }
 0x391   : > { %4188 = vmatmul.mubr.bf16.gmra.mrb[180].mxu1 %v9976_v49  ;;  %4042 = vmatprep.mubr.bf16.mxu0 %v10020_v29  ;;  %v2984_v49 = vld [vmem:[#allocation3 + $0xe1] sm:$0xff]  ;;  %v2983_v29 = vld [vmem:[#allocation3 + $0xd9] sm:$0xff] }
 0x392   : > { %4195 = vmatprep.mubr.bf16.mxu1 %v3005_v35  ;;  %v3008_v10 = vpack.c.bf16 %v2984_v49, %v2983_v29 }
 0x398   : > { %4043 = vmatmul.mubr.bf16.gmra.mrb[172].mxu0 %v3005_v35 }
 0x399   : > { %4196 = vmatmul.mubr.bf16.gmra.mrb[184].mxu1 %v9995_v19  ;;  %4050 = vmatprep.mubr.bf16.mxu0 %v10028_v7  ;;  %v2986_v19 = vld [vmem:[#allocation3 + $0xf9] sm:$0xff]  ;;  %v2985_v7 = vld [vmem:[#allocation3 + $0xf1] sm:$0xff] }
 0x39a   : > { %4203 = vmatprep.mubr.bf16.mxu1 %v3006_v33  ;;  %v3009_v54 = vpack.c.bf16 %v2986_v19, %v2985_v7 }
 0x3a0   : > { %4051 = vmatmul.mubr.bf16.gmra.mrb[176].mxu0 %v3006_v33 }
 0x3a1   : > { %4204 = vmatmul.mubr.bf16.gmra.mrb[188].mxu1 %v10011_v1  ;;  %4058 = vmatprep.mubr.bf16.mxu0 %v10042_v14  ;;  %v2988_v1 = vld [vmem:[#allocation3 + $0x111] sm:$0xff]  ;;  %v2987_v14 = vld [vmem:[#allocation3 + $0x109] sm:$0xff] }
 0x3a2   : > { %4211 = vmatprep.mubr.bf16.mxu1 %v3007_v51  ;;  %v3010_v56 = vpack.c.bf16 %v2988_v1, %v2987_v14 }
 0x3a8   : > { %4059 = vmatmul.mubr.bf16.gmra.mrb[180].mxu0 %v3007_v51 }
 0x3a9   : > { %4212 = vmatmul.mubr.bf16.gmra.mrb[192].mxu1 %v10023_v5  ;;  %4066 = vmatprep.mubr.bf16.mxu0 %v10050_v57  ;;  %v2990_v5 = vld [vmem:[#allocation3 + $0x129] sm:$0xff]  ;;  %v2989_v57 = vld [vmem:[#allocation3 + $0x121] sm:$0xff] }
 0x3aa   : > { %4219 = vmatprep.mubr.bf16.mxu1 %v3008_v10  ;;  %v3011_v21 = vpack.c.bf16 %v2990_v5, %v2989_v57 }
 0x3b0   : > { %4067 = vmatmul.mubr.bf16.gmra.mrb[184].mxu0 %v3008_v10  ;;  %v2998_v10 = vld [vmem:[#allocation3 + $0x189] sm:$0xff] }
 0x3b1   : > { %4220 = vmatmul.mubr.bf16.gmra.mrb[196].mxu1 %v10031_v45  ;;  %4074 = vmatprep.mubr.bf16.mxu0 %v10058_v53  ;;  %v2992_v45 = vld [vmem:[#allocation3 + $0x141] sm:$0xff]  ;;  %v2991_v53 = vld [vmem:[#allocation3 + $0x139] sm:$0xff] }
 0x3b2   : > { %4227 = vmatprep.mubr.bf16.mxu1 %v3009_v54  ;;  %v3012_v47 = vpack.c.bf16 %v2992_v45, %v2991_v53 }
 0x3b8   : > { %4075 = vmatmul.mubr.bf16.gmra.mrb[188].mxu0 %v3009_v54 }
 0x3b9   : > { %4228 = vmatmul.mubr.bf16.gmra.mrb[200].mxu1 %v10045_v11  ;;  %4082 = vmatprep.mubr.bf16.mxu0 %v10070_v36  ;;  %v10153_v11 = vld [vmem:[%s11147_s6] ss:$0 sm:$0xff] }
 0x3ba   : > { %4235 = vmatprep.mubr.bf16.mxu1 %v3010_v56  ;;  %v3683_v55 = vadd.f32 %v10060_v6, %v10153_v11  ;;  %v3686_v50 = vadd.f32 %v10067_v63, %v10153_v11 }
 0x3c0   : > { %4083 = vmatmul.mubr.bf16.gmra.mrb[192].mxu0 %v3010_v56  ;;  %v2997_v56 = vld [vmem:[#allocation3 + $0x181] sm:$0xff] }
 0x3c1   : > { %4236 = vmatmul.mubr.bf16.gmra.mrb[204].mxu1 %v10053_v38  ;;  %4090 = vmatprep.mubr.bf16.mxu0 %v10078_v24 }
 0x3c2   : > { %4243 = vmatprep.mubr.bf16.mxu1 %v3011_v21 }
 0x3c8   : > { %4091 = vmatmul.mubr.bf16.gmra.mrb[196].mxu0 %v3011_v21  ;;  %v3015_v21 = vpack.c.bf16 %v2998_v10, %v2997_v56  ;;  %v3025_v56 = vld [vmem:[#allocation3 + $0x92] sm:$0xff] }
 0x3c9   : > { %4244 = vmatmul.mubr.bf16.gmra.mrb[208].mxu1 %v10063_v43  ;;  %4098 = vmatprep.mubr.bf16.mxu0 %v10086_v58 }
 0x3ca   : > { %4251 = vmatprep.mubr.bf16.mxu1 %v3012_v47 }
 0x3cb   : > { %v7295_v36 = vpop.f32.mrb[92].mxu0 }
 0x3cc   : > { %v7401_v2 = vpop.f32.mrb[104].mxu1  ;;  %v7296_v38 = vpop.f32.mrb[93].mxu0 }
 0x3cd   : > { %v7297_v25 = vadd.f32 %v7296_v38, %v7295_v36  ;;  %v7402_v24 = vpop.f32.mrb[105].mxu1  ;;  %v7298_v32 = vpop.f32.mrb[94].mxu0  ;;  %v2999_v36 = vld [vmem:[#allocation3 + $0x199] sm:$0xff] }
 0x3ce   : > { %v7403_v39 = vadd.f32 %v7402_v24, %v7401_v2  ;;  %v7404_v43 = vpop.f32.mrb[106].mxu1  ;;  %v7299_v13 = vpop.f32.mrb[95].mxu0  ;;  %v3000_v2 = vld [vmem:[#allocation3 + $0x1a1] sm:$0xff]  ;;  %v3017_v24 = vld [vmem:[#allocation3 + $0x32] sm:$0xff] }
 0x3cf   : > { %v7300_v58 = vadd.f32 %v7299_v13, %v7298_v32  ;;  %v7405_v48 = vpop.f32.mrb[107].mxu1  ;;  %v3691_v63 = vadd.f32 %v7297_v25, %v10153_v11  ;;  %v3018_v32 = vld [vmem:[#allocation3 + $0x3a] sm:$0xff] }
 0x3d0   : > { %v7406_v34 = vadd.f32 %v7405_v48, %v7404_v43  ;;  %4099 = vmatmul.mubr.bf16.gmra.mrb[200].mxu0 %v3012_v47  ;;  %v10159_v60 = vadd.f32 %v7403_v39, %v3683_v55  ;;  %v3016_v48 = vpack.c.bf16 %v3000_v2, %v2999_v36 }
 0x3d1   : > { %4252 = vmatmul.mubr.bf16.gmra.mrb[212].mxu1 %v10073_v3  ;;  %4106 = vmatprep.mubr.bf16.mxu0 %v10094_v41  ;;  %v2995_v3 = vld [vmem:[#allocation3 + $0x169] sm:$0xff]  ;;  %v3694_v41 = vadd.f32 %v7300_v58, %v10153_v11 }
 0x3d2   : > { %4259 = vmatprep.mubr.bf16.mxu1 %v3013_v44  ;;  %v10163_v6 = vadd.f32 %v7406_v34, %v3686_v50  ;;  %v3014_v4 = vpack.c.bf16 %v2996_v26, %v2995_v3  ;;  %v3049_v34 = vpack.c.bf16 %v3018_v32, %v3017_v24  ;;  %v3020_v26 = vld [vmem:[#allocation3 + $0x52] sm:$0xff] }
 0x3d3   : > { %v7301_v31 = vpop.f32.mrb[96].mxu0 }
 0x3d4   : > { %v7407_v0 = vpop.f32.mrb[108].mxu1  ;;  %v7302_v61 = vpop.f32.mrb[97].mxu0 }
 0x3d5   : > { %v7303_v23 = vadd.f32 %v7302_v61, %v7301_v31  ;;  %v7408_v17 = vpop.f32.mrb[109].mxu1  ;;  %v7304_v16 = vpop.f32.mrb[98].mxu0  ;;  %v2951_v61 = vld [vmem:[#allocation3 + $0x198] sm:$0xff] }
 0x3d6   : > { %v7409_v15 = vadd.f32 %v7408_v17, %v7407_v0  ;;  %v7410_v20 = vpop.f32.mrb[110].mxu1  ;;  %v7305_v52 = vpop.f32.mrb[99].mxu0 }
 0x3d7   : > { %v7306_v9 = vadd.f32 %v7305_v52, %v7304_v16  ;;  %v7411_v46 = vpop.f32.mrb[111].mxu1  ;;  %v3699_v19 = vadd.f32 %v7303_v23, %v10153_v11  ;;  %v3019_v16 = vld [vmem:[#allocation3 + $0x4a] sm:$0xff] }
 0x3d8   : > { %v7412_v8 = vadd.f32 %v7411_v46, %v7410_v20  ;;  %4107 = vmatmul.mubr.bf16.gmra.mrb[204].mxu0 %v3013_v44  ;;  %v10167_v30 = vadd.f32 %v7409_v15, %v3691_v63  ;;  %v3021_v20 = vld [vmem:[#allocation3 + $0x62] sm:$0xff]  ;;  %v3022_v52 = vld [vmem:[#allocation3 + $0x6a] sm:$0xff] }
 0x3d9   : > { %4260 = vmatmul.mubr.bf16.gmra.mrb[216].mxu1 %v10081_v40  ;;  %4114 = vmatprep.mubr.bf16.mxu0 %v10102_v22  ;;  %v10174_v22 = vpack.c.bf16 %v2903_v28, %v2902_v12  ;;  %v3702_v5 = vadd.f32 %v7306_v9, %v10153_v11 }
 0x3da   : > { %4267 = vmatprep.mubr.bf16.mxu1 %v3014_v4  ;;  %v10171_v35 = vadd.f32 %v7412_v8, %v3694_v41  ;;  %v10190_v41 = vld [vmem:[#allocation3 + $0x8] sm:$0xff] }
 0x3db   : > { %v7307_v62 = vpop.f32.mrb[100].mxu0  ;;  %v2968_v8 = vpack.c.bf16 %v10190_v41, %v2951_v61 }
 0x3dc   : > { %v7413_v27 = vpop.f32.mrb[112].mxu1  ;;  %v7308_v33 = vpop.f32.mrb[101].mxu0 }
 0x3dd   : > { %v7309_v51 = vadd.f32 %v7308_v33, %v7307_v62  ;;  %v7414_v49 = vpop.f32.mrb[113].mxu1  ;;  %v7310_v29 = vpop.f32.mrb[102].mxu0  ;;  %v3050_v33 = vpack.c.bf16 %v3020_v26, %v3019_v16 }
 0x3de   : > { %v7415_v7 = vadd.f32 %v7414_v49, %v7413_v27  ;;  %v7416_v54 = vpop.f32.mrb[114].mxu1  ;;  %v7311_v1 = vpop.f32.mrb[103].mxu0 }
 0x3df   : > { %v7312_v40 = vadd.f32 %v7311_v1, %v7310_v29  ;;  %v7417_v14 = vpop.f32.mrb[115].mxu1  ;;  %v3707_v43 = vadd.f32 %v7309_v51, %v10153_v11  ;;  %v3051_v51 = vpack.c.bf16 %v3022_v52, %v3021_v20  ;;  %v3024_v1 = vld [vmem:[#allocation3 + $0x82] sm:$0xff] }
 0x3e0   : > { %v7418_v57 = vadd.f32 %v7417_v14, %v7416_v54  ;;  %4115 = vmatmul.mubr.bf16.gmra.mrb[208].mxu0 %v3014_v4  ;;  %v10177_v45 = vadd.f32 %v7415_v7, %v3699_v19  ;;  %v3023_v54 = vld [vmem:[#allocation3 + $0x7a] sm:$0xff] }
 0x3e1   : > { %4268 = vmatmul.mubr.bf16.gmra.mrb[220].mxu1 %v10089_v42  ;;  %4122 = vmatprep.mubr.bf16.mxu0 %v10174_v22  ;;  %v3710_v44 = vadd.f32 %v7312_v40, %v10153_v11  ;;  %v3052_v24 = vpack.c.bf16 %v3024_v1, %v3023_v54 }
 0x3e2   : > { %4275 = vmatprep.mubr.bf16.mxu1 %v3015_v21  ;;  %v10181_v53 = vadd.f32 %v7418_v57, %v3702_v5  ;;  %v3026_v5 = vld [vmem:[#allocation3 + $0x9a] sm:$0xff] }
 0x3e3   : > { %v7313_v47 = vpop.f32.mrb[104].mxu0 }
 0x3e4   : > { %v7419_v38 = vpop.f32.mrb[116].mxu1  ;;  %v7314_v25 = vpop.f32.mrb[105].mxu0 }
 0x3e5   : > { %v7315_v59 = vadd.f32 %v7314_v25, %v7313_v47  ;;  %v7420_v55 = vpop.f32.mrb[117].mxu1  ;;  %v7316_v39 = vpop.f32.mrb[106].mxu0 }
 0x3e6   : > { %v7421_v13 = vadd.f32 %v7420_v55, %v7419_v38  ;;  %v7422_v58 = vpop.f32.mrb[118].mxu1  ;;  %v7317_v42 = vpop.f32.mrb[107].mxu0  ;;  %v3053_v55 = vpack.c.bf16 %v3026_v5, %v3025_v56 }
 0x3e7   : > { %v7318_v37 = vadd.f32 %v7317_v42, %v7316_v39  ;;  %v7423_v50 = vpop.f32.mrb[119].mxu1 }
 0x3e8   : > { %v7424_v31 = vadd.f32 %v7423_v50, %v7422_v58  ;;  %4123 = vmatmul.mubr.bf16.gmra.mrb[212].mxu0 %v3015_v21  ;;  %v10185_v0 = vadd.f32 %v7421_v13, %v3707_v43 }
 0x3e9   : > { %4276 = vmatmul.mubr.bf16.gmra.mrb[224].mxu1 %v10097_v18  ;;  %8345 = vmatprep.mubr.bf16.mxu0 %v3049_v34  ;;  %v3715_v18 = vadd.f32 %v7315_v59, %v10153_v11  ;;  %v3718_v49 = vadd.f32 %v7318_v37, %v10153_v11  ;;  %v3028_v37 = vld [vmem:[#allocation3 + $0xb2] sm:$0xff] }
 0x3ea   : > { %4283 = vmatprep.mubr.bf16.mxu1 %v3016_v48  ;;  %v10188_v23 = vadd.f32 %v7424_v31, %v3710_v44  ;;  %v3027_v48 = vld [vmem:[#allocation3 + $0xaa] sm:$0xff]  ;;  %v3029_v44 = vld [vmem:[#allocation3 + $0xc2] sm:$0xff] }
 0x3eb   : > { %v7319_v17 = vpop.f32.mrb[108].mxu0  ;;  %v3030_v31 = vld [vmem:[#allocation3 + $0xca] sm:$0xff]  ;;  %v3054_v52 = vpack.c.bf16 %v3028_v37, %v3027_v48 }
 0x3ec   : > { %v7425_v63 = vpop.f32.mrb[120].mxu1  ;;  %v7320_v15 = vpop.f32.mrb[109].mxu0  ;;  %v3038_v48 = vld [vmem:[#allocation3 + $0x12a] sm:$0xff] }
 0x3ed   : > { %v7321_v9 = vadd.f32 %v7320_v15, %v7319_v17  ;;  %v7426_v46 = vpop.f32.mrb[121].mxu1  ;;  %v7322_v3 = vpop.f32.mrb[110].mxu0 }
 0x3ee   : > { %v7427_v4 = vadd.f32 %v7426_v46, %v7425_v63  ;;  %v7428_v62 = vpop.f32.mrb[122].mxu1  ;;  %v7323_v27 = vpop.f32.mrb[111].mxu0 }
 0x3ef   : > { %v7324_v12 = vadd.f32 %v7323_v27, %v7322_v3  ;;  %v7429_v28 = vpop.f32.mrb[123].mxu1  ;;  %v3723_v36 = vadd.f32 %v7321_v9, %v10153_v11  ;;  %v3055_v3 = vpack.c.bf16 %v3030_v31, %v3029_v44 }
 0x3f0   : > { %v7430_v29 = vadd.f32 %v7429_v28, %v7428_v62  ;;  %8346 = vmatmul.mubr.bf16.vlgmr.msra.gmra.mrb[216].mxu0 %v3050_v33  ;;  %v10195_v10 = vadd.f32 %v7427_v4, %v3715_v18  ;;  %v3031_v33 = vld [vmem:[#allocation3 + $0xda] sm:$0xff] }
 0x3f1   : > { %4284 = vmatmul.mubr.bf16.gmra.mrb[228].mxu1 %v2968_v8  ;;  %8349 = vmatprep.mubr.bf16.mxu0 %v3051_v51  ;;  %v3726_v39 = vadd.f32 %v7324_v12, %v10153_v11  ;;  %v3032_v12 = vld [vmem:[#allocation3 + $0xe2] sm:$0xff] }
 0x3f2   : > { %v10197_v19 = vadd.f32 %v7430_v29, %v3718_v49  ;;  %v3033_v49 = vld [vmem:[#allocation3 + $0xf2] sm:$0xff]  ;;  %v3034_v29 = vld [vmem:[#allocation3 + $0xfa] sm:$0xff] }
 0x3f3   : > { %v7325_v7 = vpop.f32.mrb[112].mxu0 }
 0x3f4   : > { %v7431_v40 = vpop.f32.mrb[124].mxu1  ;;  %v7326_v14 = vpop.f32.mrb[113].mxu0 }
 0x3f5   : > { %v7327_v57 = vadd.f32 %v7326_v14, %v7325_v7  ;;  %v7432_v21 = vpop.f32.mrb[125].mxu1  ;;  %v7328_v47 = vpop.f32.mrb[114].mxu0 }
 0x3f6   : > { %v7433_v2 = vadd.f32 %v7432_v21, %v7431_v40  ;;  %v7434_v38 = vpop.f32.mrb[126].mxu1  ;;  %v7329_v25 = vpop.f32.mrb[115].mxu0 }
 0x3f7   : > { %v7330_v32 = vadd.f32 %v7329_v25, %v7328_v47  ;;  %v7435_v59 = vpop.f32.mrb[127].mxu1  ;;  %v3731_v26 = vadd.f32 %v7327_v57, %v10153_v11  ;;  %v3056_v57 = vpack.c.bf16 %v3032_v12, %v3031_v33  ;;  %v3040_v33 = vld [vmem:[#allocation3 + $0x142] sm:$0xff] }
 0x3f8   : > { %v7436_v43 = vadd.f32 %v7435_v59, %v7434_v38  ;;  %8350 = vmatmul.mubr.bf16.gmra.mrb[220].mxu0 %v3052_v24  ;;  %v10201_v13 = vadd.f32 %v7433_v2, %v3723_v36  ;;  %v3057_v36 = vpack.c.bf16 %v3034_v29, %v3033_v49  ;;  %v3035_v59 = vld [vmem:[#allocation3 + $0x10a] sm:$0xff]  ;;  %v3042_v49 = vld [vmem:[#allocation3 + $0x15a] sm:$0xff] }
 0x3f9   : > { %8353 = vmatprep.mubr.bf16.mxu0 %v3053_v55  ;;  %v3734_v8 = vadd.f32 %v7330_v32, %v10153_v11  ;;  %v3036_v55 = vld [vmem:[#allocation3 + $0x112] sm:$0xff] }
 0x3fa   : > { %v10203_v58 = vadd.f32 %v7436_v43, %v3726_v39 }
 0x3fb   : > { %v7331_v42 = vpop.f32.mrb[116].mxu0 }
 0x3fc   : > { %v7437_v50 = vpop.f32.mrb[128].mxu1  ;;  %v7332_v34 = vpop.f32.mrb[117].mxu0 }
 0x3fd   : > { %v7333_v61 = vadd.f32 %v7332_v34, %v7331_v42  ;;  %v7438_v17 = vpop.f32.mrb[129].mxu1  ;;  %v7334_v16 = vpop.f32.mrb[118].mxu0  ;;  %v3037_v42 = vld [vmem:[#allocation3 + $0x122] sm:$0xff] }
 0x3fe   : > { %v7439_v63 = vadd.f32 %v7438_v17, %v7437_v50  ;;  %v7440_v15 = vpop.f32.mrb[130].mxu1  ;;  %v7335_v20 = vpop.f32.mrb[119].mxu0 }
 0x3ff   : > { %v7336_v9 = vadd.f32 %v7335_v20, %v7334_v16  ;;  %v7441_v46 = vpop.f32.mrb[131].mxu1  ;;  %v3739_v40 = vadd.f32 %v7333_v61, %v10153_v11  ;;  %v3058_v16 = vpack.c.bf16 %v3036_v55, %v3035_v59  ;;  %v3043_v55 = vld [vmem:[#allocation3 + $0x16a] sm:$0xff] }
 0x400   : > { %v7442_v18 = vadd.f32 %v7441_v46, %v7440_v15  ;;  %8354 = vmatmul.mubr.bf16.gmra.mrb[224].mxu0 %v3054_v52  ;;  %v10207_v4 = vadd.f32 %v7439_v63, %v3731_v26  ;;  %v3059_v15 = vpack.c.bf16 %v3038_v48, %v3037_v42  ;;  %v8579_v46 = vld [vmem:[%s11148_s7 + $0x40] sm:$0xff]  }
 0x401   : > { %8357 = vmatprep.mubr.bf16.mxu0 %v3055_v3  ;;  %v3742_v2 = vadd.f32 %v7336_v9, %v10153_v11  ;;  %v8580_v3 = vld [vmem:[%s11148_s7] sm:$0xff]   ;;  %7745 = vmatprep.subr.bf16.mxu1 %v8579_v46  ;;  %v3048_v46 = vld [vmem:[#allocation3 + $0x1a2] sm:$0xff] }
 0x402   : > { %v10209_v62 = vadd.f32 %v7442_v18, %v3734_v8  ;;  %7746 = vmatpush3.bf16.msra.mxu1 %v8580_v3  ;;  %v8581_v3 = vld [vmem:[%s11148_s7 + $0x48] sm:$0xff]  }
 0x403   : > { %v7337_v27 = vpop.f32.mrb[120].mxu0  ;;  %7747 = vmatprep.subr.bf16.mxu1 %v8581_v3 }
 0x404   : > { %v7443_v28 = vpop.f32.mrb[132].mxu1  ;;  %v7338_v51 = vpop.f32.mrb[121].mxu0 }
 0x405   : > { %v7339_v7 = vadd.f32 %v7338_v51, %v7337_v27  ;;  %v7444_v54 = vpop.f32.mrb[133].mxu1  ;;  %v7340_v1 = vpop.f32.mrb[122].mxu0  ;;  %v3039_v27 = vld [vmem:[#allocation3 + $0x13a] sm:$0xff]  ;;  %v3041_v51 = vld [vmem:[#allocation3 + $0x152] sm:$0xff] }
 0x406   : > { %v7445_v14 = vadd.f32 %v7444_v54, %v7443_v28  ;;  %v7446_v56 = vpop.f32.mrb[134].mxu1  ;;  %v7341_v5 = vpop.f32.mrb[123].mxu0 }
 0x407   : > { %v7342_v21 = vadd.f32 %v7341_v5, %v7340_v1  ;;  %v7447_v47 = vpop.f32.mrb[135].mxu1  ;;  %v3747_v44 = vadd.f32 %v7339_v7, %v10153_v11  ;;  %v3060_v5 = vpack.c.bf16 %v3040_v33, %v3039_v27 }
 0x408   : > { %v7448_v38 = vadd.f32 %v7447_v47, %v7446_v56  ;;  %8358 = vmatmul.mubr.bf16.gmra.mrb[228].mxu0 %v3056_v57  ;;  %v10213_v25 = vadd.f32 %v7445_v14, %v3739_v40  ;;  %v3061_v47 = vpack.c.bf16 %v3042_v49, %v3041_v51 }
 0x409   : > { %8361 = vmatprep.mubr.bf16.mxu0 %v3057_v36  ;;  %v3750_v52 = vadd.f32 %v7342_v21, %v10153_v11 }
 0x40a   : > { %v10215_v24 = vadd.f32 %v7448_v38, %v3742_v2 }
 0x40b   : > { %v7343_v32 = vpop.f32.mrb[124].mxu0 }
 0x40c   : > { %v7449_v39 = vpop.f32.mrb[136].mxu1  ;;  %v7344_v43 = vpop.f32.mrb[125].mxu0 }
 0x40d   : > { %v7345_v37 = vadd.f32 %v7344_v43, %v7343_v32  ;;  %v7450_v50 = vpop.f32.mrb[137].mxu1  ;;  %v7346_v34 = vpop.f32.mrb[126].mxu0 }
 0x40e   : > { %v7451_v31 = vadd.f32 %v7450_v50, %v7449_v39  ;;  %v7452_v61 = vpop.f32.mrb[138].mxu1  ;;  %v7347_v17 = vpop.f32.mrb[127].mxu0  ;;  %v3044_v39 = vld [vmem:[#allocation3 + $0x172] sm:$0xff] }
 0x40f   : > { %v7348_v26 = vadd.f32 %v7347_v17, %v7346_v34  ;;  %v7453_v63 = vpop.f32.mrb[139].mxu1  ;;  %v3755_v1 = vadd.f32 %v7345_v37, %v10153_v11  ;;  %v3062_v17 = vpack.c.bf16 %v3044_v39, %v3043_v55 }
 0x410   : > { %v10218_v20 = vadd.f32 %v7451_v31, %v3747_v44  ;;  %v7454_v9 = vadd.f32 %v7453_v63, %v7452_v61  ;;  %8362 = vmatmul.mubr.bf16.gmra.mrb[232].mxu0 %v3058_v16 }
 0x411   : > { %8365 = vmatprep.mubr.bf16.mxu0 %v3059_v15  ;;  %v3758_v2 = vadd.f32 %v7348_v26, %v10153_v11 }
 0x412   : > { %v10227_v8 = vadd.f32 %v7454_v9, %v3750_v52  ;;  %v3047_v9 = vld [vmem:[#allocation3 + $0x19a] sm:$0xff] }
 0x413   : > { %v7349_v18 = vpop.f32.mrb[128].mxu0  ;;  %v3064_v51 = vpack.c.bf16 %v3048_v46, %v3047_v9 }
 0x414   : > { %v7455_v12 = vpop.f32.mrb[140].mxu1  ;;  %v7350_v28 = vpop.f32.mrb[129].mxu0 }
 0x415   : > { %v7351_v29 = vadd.f32 %v7350_v28, %v7349_v18  ;;  %v7456_v7 = vpop.f32.mrb[141].mxu1  ;;  %v7352_v54 = vpop.f32.mrb[130].mxu0  ;;  %v8582_v18 = vld [vmem:[%s11148_s7 + $0x8] sm:$0xff]  }
 0x416   : > { %v7457_v40 = vadd.f32 %v7456_v7, %v7455_v12  ;;  %v7458_v14 = vpop.f32.mrb[142].mxu1  ;;  %v7353_v56 = vpop.f32.mrb[131].mxu0  ;;  %7748 = vmatpush3.bf16.msra.mxu1 %v8582_v18 }
 0x417   : > { %v7354_v57 = vadd.f32 %v7353_v56, %v7352_v54  ;;  %v7459_v21 = vpop.f32.mrb[143].mxu1  ;;  %v3763_v34 = vadd.f32 %v7351_v29, %v10153_v11 }
 0x418   : > { %v10230_v36 = vadd.f32 %v7457_v40, %v3755_v1  ;;  %v7460_v38 = vadd.f32 %v7459_v21, %v7458_v14  ;;  %8366 = vmatmul.mubr.bf16.gmra.mrb[236].mxu0 %v3060_v5 }
 0x419   : > { %8369 = vmatprep.mubr.bf16.mxu0 %v3061_v47  ;;  %v3766_v15 = vadd.f32 %v7354_v57, %v10153_v11 }
 0x41a   : > { %v10233_v32 = vadd.f32 %v7460_v38, %v3758_v2 }
 0x41b   : > { %v7355_v59 = vpop.f32.mrb[132].mxu0 }
 0x41c   : > { %v7461_v43 = vpop.f32.mrb[144].mxu1  ;;  %v7356_v42 = vpop.f32.mrb[133].mxu0 }
 0x41d   : > { %v7357_v48 = vadd.f32 %v7356_v42, %v7355_v59  ;;  %v7462_v37 = vpop.f32.mrb[145].mxu1  ;;  %v7358_v50 = vpop.f32.mrb[134].mxu0 }
 0x41e   : > { %v7463_v44 = vadd.f32 %v7462_v37, %v7461_v43  ;;  %v7464_v31 = vpop.f32.mrb[146].mxu1  ;;  %v7359_v61 = vpop.f32.mrb[135].mxu0 }
 0x41f   : > { %v7360_v16 = vadd.f32 %v7359_v61, %v7358_v50  ;;  %v7465_v26 = vpop.f32.mrb[147].mxu1  ;;  %v3771_v7 = vadd.f32 %v7357_v48, %v10153_v11 }
 0x420   : > { %v10236_v63 = vadd.f32 %v7463_v44, %v3763_v34  ;;  %v7466_v52 = vadd.f32 %v7465_v26, %v7464_v31  ;;  %8370 = vmatmul.mubr.bf16.gmra.mrb[240].mxu0 %v3062_v17  ;;  %v8584_v26 = vld [vmem:[%s11148_s7 + $0x10] sm:$0xff]  }
 0x421   : > { %8373 = vmatprep.mubr.bf16.mxu0 %v10174_v22  ;;  %v3774_v57 = vadd.f32 %v7360_v16, %v10153_v11  ;;  %v8583_v16 = vld [vmem:[%s11148_s7 + $0x50] sm:$0xff]  }
 0x422   : > { %v10246_v27 = vadd.f32 %v7466_v52, %v3766_v15  ;;  %7749 = vmatprep.subr.bf16.mxu1 %v8583_v16 }
 0x423   : > { %v7361_v33 = vpop.f32.mrb[136].mxu0  ;;  %7750 = vmatpush3.bf16.msra.mxu1 %v8584_v26 }
 0x424   : > { %v7467_v12 = vpop.f32.mrb[148].mxu1  ;;  %v7362_v28 = vpop.f32.mrb[137].mxu0 }
 0x425   : > { %v7363_v49 = vadd.f32 %v7362_v28, %v7361_v33  ;;  %v7468_v29 = vpop.f32.mrb[149].mxu1  ;;  %v7364_v22 = vpop.f32.mrb[138].mxu0 }
 0x426   : > { %v7469_v54 = vadd.f32 %v7468_v29, %v7467_v12  ;;  %v7470_v1 = vpop.f32.mrb[150].mxu1  ;;  %v7365_v40 = vpop.f32.mrb[139].mxu0 }
 0x427   : > { %v7366_v14 = vadd.f32 %v7365_v40, %v7364_v22  ;;  %v7471_v56 = vpop.f32.mrb[151].mxu1  ;;  %v3779_v42 = vadd.f32 %v7363_v49, %v10153_v11  ;;  %v8585_v40 = vld [vmem:[%s11148_s7 + $0xc0] sm:$0xff]  }
 0x428   : > { %v10249_v5 = vadd.f32 %v7469_v54, %v3771_v7  ;;  %v7472_v21 = vadd.f32 %v7471_v56, %v7470_v1  ;;  %8374 = vmatmul.mubr.bf16.gmra.mrb[244].mxu0 %v3064_v51  ;;  %v8587_v56 = vld [vmem:[%s11148_s7 + $0x80] sm:$0xff]   ;;  %7857 = vmatprep.subr.bf16.mxu0 %v8585_v40 }
 0x429   : > { %v3782_v31 = vadd.f32 %v7366_v14, %v10153_v11  ;;  %v8586_v14 = vld [vmem:[%s11148_s7 + $0x58] sm:$0xff]   ;;  %7858 = vmatpush3.bf16.msra.mxu0 %v8587_v56 }
 0x42a   : > { %v10252_v47 = vadd.f32 %v7472_v21, %v3774_v57  ;;  %v8588_v21 = vld [vmem:[%s11148_s7 + $0x18] sm:$0xff]   ;;  %7751 = vmatprep.subr.bf16.mxu1 %v8586_v14  ;;  %v8598_v14 = vld [vmem:[%s11148_s7 + $0x70] sm:$0xff]  }
 0x42b   : > { %v7367_v2 = vpop.f32.mrb[140].mxu0  ;;  %7752 = vmatpush3.bf16.msra.mxu1 %v8588_v21 }
 0x42c   : > { %v7473_v38 = vpop.f32.mrb[152].mxu1  ;;  %v7368_v59 = vpop.f32.mrb[141].mxu0 }
 0x42d   : > { %v7369_v55 = vadd.f32 %v7368_v59, %v7367_v2  ;;  %v7474_v39 = vpop.f32.mrb[153].mxu1  ;;  %v7370_v43 = vpop.f32.mrb[142].mxu0  ;;  %v8589_v2 = vld [vmem:[%s11148_s7 + $0xc8] sm:$0xff]  }
 0x42e   : > { %v7475_v48 = vadd.f32 %v7474_v39, %v7473_v38  ;;  %v7476_v37 = vpop.f32.mrb[154].mxu1  ;;  %v7371_v50 = vpop.f32.mrb[143].mxu0  ;;  %v8590_v39 = vld [vmem:[%s11148_s7 + $0x60] sm:$0xff]   ;;  %7859 = vmatprep.subr.bf16.mxu0 %v8589_v2 }
 0x42f   : > { %v7372_v34 = vadd.f32 %v7371_v50, %v7370_v43  ;;  %v7477_v44 = vpop.f32.mrb[155].mxu1  ;;  %v3787_v12 = vadd.f32 %v7369_v55, %v10153_v11  ;;  %v8591_v43 = vld [vmem:[%s11148_s7 + $0x88] sm:$0xff]   ;;  %7753 = vmatprep.subr.bf16.mxu1 %v8590_v39 }
 0x430   : > { %v10256_v61 = vadd.f32 %v7475_v48, %v3779_v42  ;;  %v7478_v17 = vadd.f32 %v7477_v44, %v7476_v37  ;;  %7860 = vmatpush3.bf16.msra.mxu0 %v8591_v43 }
 0x431   : > { %v3790_v7 = vadd.f32 %v7372_v34, %v10153_v11 }
 0x432   : > { %v10264_v15 = vadd.f32 %v7478_v17, %v3782_v31  ;;  %v8592_v17 = vld [vmem:[%s11148_s7 + $0x20] sm:$0xff]  }
 0x433   : > { %v7373_v52 = vpop.f32.mrb[144].mxu0  ;;  %7754 = vmatpush3.bf16.msra.mxu1 %v8592_v17  ;;  %v8604_v17 = vld [vmem:[%s11148_s7 + $0x38] sm:$0xff]  }
 0x434   : > { %v7479_v9 = vpop.f32.mrb[156].mxu1  ;;  %v7374_v46 = vpop.f32.mrb[145].mxu0 }
 0x435   : > { %v7375_v3 = vadd.f32 %v7374_v46, %v7373_v52  ;;  %v7480_v18 = vpop.f32.mrb[157].mxu1  ;;  %v7376_v33 = vpop.f32.mrb[146].mxu0 }
 0x436   : > { %v7481_v28 = vadd.f32 %v7480_v18, %v7479_v9  ;;  %v7482_v51 = vpop.f32.mrb[158].mxu1  ;;  %v7377_v49 = vpop.f32.mrb[147].mxu0  ;;  %v8594_v18 = vld [vmem:[%s11148_s7 + $0x68] sm:$0xff]  }
 0x437   : > { %v7378_v29 = vadd.f32 %v7377_v49, %v7376_v33  ;;  %v7483_v22 = vpop.f32.mrb[159].mxu1  ;;  %v3795_v50 = vadd.f32 %v7375_v3, %v10153_v11  ;;  %v8593_v3 = vld [vmem:[%s11148_s7 + $0xd0] sm:$0xff]   ;;  %7755 = vmatprep.subr.bf16.mxu1 %v8594_v18 }
 0x438   : > { %v10268_v54 = vadd.f32 %v7481_v28, %v3787_v12  ;;  %v7484_v1 = vadd.f32 %v7483_v22, %v7482_v51  ;;  %v8595_v33 = vld [vmem:[%s11148_s7 + $0x90] sm:$0xff]   ;;  %v8596_v28 = vld [vmem:[%s11148_s7 + $0x28] sm:$0xff]   ;;  %v8597_v51 = vld [vmem:[%s11148_s7 + $0xd8] sm:$0xff]   ;;  %7861 = vmatprep.subr.bf16.mxu0 %v8593_v3 }
 0x439   : > { %v3798_v52 = vadd.f32 %v7378_v29, %v10153_v11  ;;  %7862 = vmatpush3.bf16.msra.mxu0 %v8595_v33  ;;  %7756 = vmatpush3.bf16.msra.mxu1 %v8596_v28  ;;  %v4517_v33 = vld [vmem:[#allocation3] sm:$0xff] }
 0x43a   : > { %v10279_v57 = vadd.f32 %v7484_v1, %v3790_v7  ;;  %7863 = vmatprep.subr.bf16.mxu0 %v8597_v51  ;;  %7757 = vmatprep.subr.bf16.mxu1 %v8598_v14 }
 0x43b   : > { %v7379_v38 = vpop.f32.mrb[148].mxu0 }
 0x43c   : > { %v7485_v59 = vpop.f32.mrb[160].mxu1  ;;  %v7380_v55 = vpop.f32.mrb[149].mxu0 }
 0x43d   : > { %v7381_v42 = vadd.f32 %v7380_v55, %v7379_v38  ;;  %v7486_v48 = vpop.f32.mrb[161].mxu1  ;;  %v7382_v37 = vpop.f32.mrb[150].mxu0  ;;  %v8600_v55 = vld [vmem:[%s11148_s7 + $0x30] sm:$0xff]  }
 0x43e   : > { %v7487_v34 = vadd.f32 %v7486_v48, %v7485_v59  ;;  %v7488_v44 = vpop.f32.mrb[162].mxu1  ;;  %v7383_v31 = vpop.f32.mrb[151].mxu0  ;;  %v8599_v59 = vld [vmem:[%s11148_s7 + $0x98] sm:$0xff]   ;;  %7758 = vmatpush3.bf16.msra.mxu1 %v8600_v55 }
 0x43f   : > { %v7384_v16 = vadd.f32 %v7383_v31, %v7382_v37  ;;  %v7489_v26 = vpop.f32.mrb[163].mxu1  ;;  %v3803_v56 = vadd.f32 %v7381_v42, %v10153_v11  ;;  %7864 = vmatpush3.bf16.msra.mxu0 %v8599_v59 }
 0x440   : > { %v10298_v9 = vadd.f32 %v7487_v34, %v3795_v50  ;;  %v7490_v46 = vadd.f32 %v7489_v26, %v7488_v44  ;;  %v8601_v44 = vld [vmem:[%s11148_s7 + $0xe0] sm:$0xff]  }
 0x441   : > { %v3806_v37 = vadd.f32 %v7384_v16, %v10153_v11  ;;  %v8603_v11 = vld [vmem:[%s11148_s7 + $0xa0] sm:$0xff]   ;;  %7865 = vmatprep.subr.bf16.mxu0 %v8601_v44 }
 0x442   : > { %v10309_v12 = vadd.f32 %v7490_v46, %v3798_v52  ;;  %v4566_v26 = vld [vmem:[#allocation3 + $0x9] sm:$0xff]  ;;  %v8605_v52 = vld [vmem:[%s11148_s7 + $0xe8] sm:$0xff]  }
 0x443   : > { %v7513_v49 = vpop.f32.mrb[152].mxu0  ;;  %7866 = vmatpush3.bf16.msra.mxu0 %v8603_v11 }
 0x444   : > { %v7491_v29 = vpop.f32.mrb[164].mxu1  ;;  %v7514_v22 = vpop.f32.mrb[153].mxu0  ;;  %7867 = vmatprep.subr.bf16.mxu0 %v8605_v52 }
 0x445   : > { %v7492_v7 = vpop.f32.mrb[165].mxu1  ;;  %v7515_v1 = vadd.f32 %v7514_v22, %v7513_v49  ;;  %v7516_v40 = vpop.f32.mrb[154].mxu0 }
 0x446   : > { %v7493_v21 = vadd.f32 %v7492_v7, %v7491_v29  ;;  %v7494_v2 = vpop.f32.mrb[166].mxu1  ;;  %v7517_v38 = vpop.f32.mrb[155].mxu0  ;;  %v4549_v29 = vpack.c.bf16 %v10190_v41, %v4517_v33  ;;  %v8607_v41 = vld [vmem:[%s11148_s7 + $0xf0] sm:$0xff]  }
 0x447   : > { %v4005_v39 = vadd.f32 %v7515_v1, %v10159_v60  ;;  %v7495_v43 = vpop.f32.mrb[167].mxu1  ;;  %v7518_v48 = vadd.f32 %v7517_v38, %v7516_v40  ;;  %v8602_v60 = vld [vmem:[%s11148_s7 + $0x78] sm:$0xff]   ;;  %v8606_v40 = vld [vmem:[%s11148_s7 + $0xa8] sm:$0xff]  }
 0x448   : > { %v10329_v50 = vadd.f32 %v7493_v21, %v3803_v56  ;;  %v7496_v42 = vadd.f32 %v7495_v43, %v7494_v2  ;;  %7759 = vmatprep.subr.bf16.mxu1 %v8602_v60  ;;  %7868 = vmatpush3.bf16.msra.mxu0 %v8606_v40  ;;  %v8608_v43 = vld [vmem:[%s11148_s7 + $0xb0] sm:$0xff]  }
 0x449   : > { %v4008_v34 = vadd.f32 %v7518_v48, %v10163_v6  ;;  %v4565_v6 = vld [vmem:[#allocation3 + $0x1] sm:$0xff]  ;;  %7760 = vmatpush3.bf16.msra.mxu1 %v8604_v17  ;;  %7869 = vmatprep.subr.bf16.mxu0 %v8607_v41 }
 0x44a   : > { %v10338_v31 = vadd.f32 %v7496_v42, %v3806_v37  ;;  %v4597_v18 = vpack.c.bf16 %v4566_v26, %v4565_v6  ;;  %v8610_v17 = vld [vmem:[%s11148_s7 + $0xb8] sm:$0xff]  }
 0x44b   : > { %v7519_v16 = vpop.f32.mrb[156].mxu0 }
 0x44c   : > { %v7625_v46 = vpop.f32.mrb[168].mxu1  ;;  %v7520_v3 = vpop.f32.mrb[157].mxu0  ;;  %5564 = vmatprep.mubr.bf16.mxu1 %v4597_v18  ;;  %7870 = vmatpush3.bf16.msra.mxu0 %v8608_v43 }
 0x44d   : > { %v7521_v28 = vadd.f32 %v7520_v3, %v7519_v16  ;;  %v7626_v51 = vpop.f32.mrb[169].mxu1  ;;  %v7522_v49 = vpop.f32.mrb[158].mxu0  ;;  %5565 = vmatmul.mubr.bf16.vlgmr.msra.gmra.mrb[232].mxu1 %v4549_v29 }
 0x44e   : > { %v7627_v22 = vadd.f32 %v7626_v51, %v7625_v46  ;;  %v7628_v7 = vpop.f32.mrb[170].mxu1  ;;  %v7523_v1 = vpop.f32.mrb[159].mxu0 }
 0x44f   : > { %v4013_v14 = vadd.f32 %v7521_v28, %v10167_v30  ;;  %v7524_v56 = vadd.f32 %v7523_v1, %v7522_v49  ;;  %v7629_v21 = vpop.f32.mrb[171].mxu1 }
 0x450   : > { %v7630_v2 = vadd.f32 %v7629_v21, %v7628_v7  ;;  %v10354_v38 = vadd.f32 %v7627_v22, %v4005_v39  ;;  %v8609_v39 = vld [vmem:[%s11148_s7 + $0xf8] sm:$0xff]  }
 0x451   : > { %v4016_v59 = vadd.f32 %v7524_v56, %v10171_v35  ;;  %7871 = vmatprep.subr.bf16.mxu0 %v8609_v39 }
 0x452   : > { %v10360_v55 = vadd.f32 %v7630_v2, %v4008_v34  ;;  %7872 = vmatpush3.bf16.msra.mxu0 %v8610_v17 }
 0x453   : > { %v7525_v30 = vpop.f32.mrb[160].mxu0 }
 0x454   : > { %v7631_v48 = vpop.f32.mrb[172].mxu1  ;;  %v7526_v37 = vpop.f32.mrb[161].mxu0 }
 0x455   : > { %v7527_v35 = vadd.f32 %v7526_v37, %v7525_v30  ;;  %v7632_v42 = vpop.f32.mrb[173].mxu1  ;;  %v7528_v44 = vpop.f32.mrb[162].mxu0 }
 0x456   : > { %v7633_v60 = vadd.f32 %v7632_v42, %v7631_v48  ;;  %v7634_v34 = vpop.f32.mrb[174].mxu1  ;;  %v7529_v11 = vpop.f32.mrb[163].mxu0 }
 0x457   : > { %v4021_v16 = vadd.f32 %v7527_v35, %v10177_v45  ;;  %v7530_v6 = vadd.f32 %v7529_v11, %v7528_v44  ;;  %v7635_v26 = vpop.f32.mrb[175].mxu1 }
 0x458   : > { %v7636_v52 = vadd.f32 %v7635_v26, %v7634_v34  ;;  %v10372_v46 = vadd.f32 %v7633_v60, %v4013_v14 }
 0x459   : > { %v4024_v3 = vadd.f32 %v7530_v6, %v10181_v53 }
 0x45a   : > { %v10375_v18 = vadd.f32 %v7636_v52, %v4016_v59 }
 0x45b   : > { %v7531_v33 = vpop.f32.mrb[164].mxu0 }
 0x45c   : > { %v7637_v28 = vpop.f32.mrb[176].mxu1  ;;  %v7532_v51 = vpop.f32.mrb[165].mxu0 }
 0x45d   : > { %v7533_v49 = vadd.f32 %v7532_v51, %v7531_v33  ;;  %v7638_v29 = vpop.f32.mrb[177].mxu1  ;;  %v7534_v22 = vpop.f32.mrb[166].mxu0 }
 0x45e   : > { %v7639_v7 = vadd.f32 %v7638_v29, %v7637_v28  ;;  %v7640_v1 = vpop.f32.mrb[178].mxu1  ;;  %v7535_v40 = vpop.f32.mrb[167].mxu0 }
 0x45f   : > { %v4029_v45 = vadd.f32 %v7533_v49, %v10185_v0  ;;  %v7536_v56 = vadd.f32 %v7535_v40, %v7534_v22  ;;  %v7641_v21 = vpop.f32.mrb[179].mxu1 }
 0x460   : > { %v7642_v14 = vadd.f32 %v7641_v21, %v7640_v1  ;;  %v10378_v2 = vadd.f32 %v7639_v7, %v4021_v16 }
 0x461   : > { %v4032_v53 = vadd.f32 %v7536_v56, %v10188_v23 }
 0x462   : > { %v10381_v59 = vadd.f32 %v7642_v14, %v4024_v3 }
 0x463   : > { %v7537_v41 = vpop.f32.mrb[168].mxu0 }
 0x464   : > { %v7643_v43 = vpop.f32.mrb[180].mxu1  ;;  %v7538_v30 = vpop.f32.mrb[169].mxu0 }
 0x465   : > { %v7539_v39 = vadd.f32 %v7538_v30, %v7537_v41  ;;  %v7644_v48 = vpop.f32.mrb[181].mxu1  ;;  %v7540_v37 = vpop.f32.mrb[170].mxu0 }
 0x466   : > { %v7645_v35 = vadd.f32 %v7644_v48, %v7643_v43  ;;  %v7646_v42 = vpop.f32.mrb[182].mxu1  ;;  %v7541_v44 = vpop.f32.mrb[171].mxu0 }
 0x467   : > { %v4037_v0 = vadd.f32 %v7539_v39, %v10195_v10  ;;  %v7542_v60 = vadd.f32 %v7541_v44, %v7540_v37  ;;  %v7647_v34 = vpop.f32.mrb[183].mxu1 }
 0x468   : > { %v7648_v11 = vadd.f32 %v7647_v34, %v7646_v42  ;;  %v10384_v17 = vadd.f32 %v7645_v35, %v4029_v45 }
 0x469   : > { %v4040_v23 = vadd.f32 %v7542_v60, %v10197_v19 }
 0x46a   : > { %v10387_v16 = vadd.f32 %v7648_v11, %v4032_v53 }
 0x46b   : > { %v7543_v6 = vpop.f32.mrb[172].mxu0 }
 0x46c   : > { %v7649_v26 = vpop.f32.mrb[184].mxu1  ;;  %v7544_v52 = vpop.f32.mrb[173].mxu0 }
 0x46d   : > { %v7545_v3 = vadd.f32 %v7544_v52, %v7543_v6  ;;  %v7650_v33 = vpop.f32.mrb[185].mxu1  ;;  %v7546_v28 = vpop.f32.mrb[174].mxu0 }
 0x46e   : > { %v7651_v51 = vadd.f32 %v7650_v33, %v7649_v26  ;;  %v7652_v49 = vpop.f32.mrb[186].mxu1  ;;  %v7547_v29 = vpop.f32.mrb[175].mxu0 }
 0x46f   : > { %v4045_v10 = vadd.f32 %v7545_v3, %v10201_v13  ;;  %v7548_v22 = vadd.f32 %v7547_v29, %v7546_v28  ;;  %v7653_v7 = vpop.f32.mrb[187].mxu1 }
 0x470   : > { %v7654_v1 = vadd.f32 %v7653_v7, %v7652_v49  ;;  %v10390_v40 = vadd.f32 %v7651_v51, %v4037_v0 }
 0x471   : > { %v4048_v19 = vadd.f32 %v7548_v22, %v10203_v58 }
 0x472   : > { %v10393_v45 = vadd.f32 %v7654_v1, %v4040_v23 }
 0x473   : > { %v7549_v56 = vpop.f32.mrb[176].mxu0 }
 0x474   : > { %v7655_v21 = vpop.f32.mrb[188].mxu1  ;;  %v7550_v14 = vpop.f32.mrb[177].mxu0 }
 0x475   : > { %v7551_v53 = vadd.f32 %v7550_v14, %v7549_v56  ;;  %v7656_v41 = vpop.f32.mrb[189].mxu1  ;;  %v7552_v43 = vpop.f32.mrb[178].mxu0 }
 0x476   : > { %v7657_v30 = vadd.f32 %v7656_v41, %v7655_v21  ;;  %v7658_v39 = vpop.f32.mrb[190].mxu1  ;;  %v7553_v48 = vpop.f32.mrb[179].mxu0 }
 0x477   : > { %v4053_v13 = vadd.f32 %v7551_v53, %v10207_v4  ;;  %v7554_v37 = vadd.f32 %v7553_v48, %v7552_v43  ;;  %v7659_v35 = vpop.f32.mrb[191].mxu1 }
 0x478   : > { %v7660_v42 = vadd.f32 %v7659_v35, %v7658_v39  ;;  %v10396_v44 = vadd.f32 %v7657_v30, %v4045_v10 }
 0x479   : > { %v4056_v58 = vadd.f32 %v7554_v37, %v10209_v62 }
 0x47a   : > { %v10399_v0 = vadd.f32 %v7660_v42, %v4048_v19 }
 0x47b   : > { %v7555_v60 = vpop.f32.mrb[180].mxu0 }
 0x47c   : > { %v7661_v34 = vpop.f32.mrb[192].mxu1  ;;  %v7556_v11 = vpop.f32.mrb[181].mxu0 }
 0x47d   : > { %v7557_v23 = vadd.f32 %v7556_v11, %v7555_v60  ;;  %v7662_v6 = vpop.f32.mrb[193].mxu1  ;;  %v7558_v26 = vpop.f32.mrb[182].mxu0 }
 0x47e   : > { %v7663_v52 = vadd.f32 %v7662_v6, %v7661_v34  ;;  %v7664_v3 = vpop.f32.mrb[194].mxu1  ;;  %v7559_v33 = vpop.f32.mrb[183].mxu0 }
 0x47f   : > { %v4061_v4 = vadd.f32 %v7557_v23, %v10213_v25  ;;  %v7560_v28 = vadd.f32 %v7559_v33, %v7558_v26  ;;  %v7665_v51 = vpop.f32.mrb[195].mxu1 }
 0x480   : > { %v7666_v49 = vadd.f32 %v7665_v51, %v7664_v3  ;;  %v10402_v29 = vadd.f32 %v7663_v52, %v4053_v13 }
 0x481   : > { %v4064_v62 = vadd.f32 %v7560_v28, %v10215_v24 }
 0x482   : > { %v10405_v10 = vadd.f32 %v7666_v49, %v4056_v58 }
 0x483   : > { %v7561_v22 = vpop.f32.mrb[184].mxu0 }
 0x484   : > { %v7667_v7 = vpop.f32.mrb[196].mxu1  ;;  %v7562_v1 = vpop.f32.mrb[185].mxu0 }
 0x485   : > { %v7563_v19 = vadd.f32 %v7562_v1, %v7561_v22  ;;  %v7668_v56 = vpop.f32.mrb[197].mxu1  ;;  %v7564_v21 = vpop.f32.mrb[186].mxu0 }
 0x486   : > { %v7669_v14 = vadd.f32 %v7668_v56, %v7667_v7  ;;  %v7670_v53 = vpop.f32.mrb[198].mxu1  ;;  %v7565_v41 = vpop.f32.mrb[187].mxu0 }
 0x487   : > { %v4069_v25 = vadd.f32 %v7563_v19, %v10218_v20  ;;  %v7566_v43 = vadd.f32 %v7565_v41, %v7564_v21  ;;  %v7671_v30 = vpop.f32.mrb[199].mxu1  ;;  %v8611_v20 = vld [vmem:[%s11148_s7 + $0x140] sm:$0xff]  }
 0x488   : > { %v7672_v39 = vadd.f32 %v7671_v30, %v7670_v53  ;;  %v10408_v48 = vadd.f32 %v7669_v14, %v4061_v4  ;;  %7969 = vmatprep.subr.bf16.mxu1 %v8611_v20 }
 0x489   : > { %v4072_v24 = vadd.f32 %v7566_v43, %v10227_v8  ;;  %v8612_v8 = vld [vmem:[%s11148_s7 + $0x100] sm:$0xff]  }
 0x48a   : > { %v10411_v13 = vadd.f32 %v7672_v39, %v4064_v62  ;;  %7970 = vmatpush3.bf16.msra.mxu1 %v8612_v8 }
 0x48b   : > { %v7567_v37 = vpop.f32.mrb[188].mxu0 }
 0x48c   : > { %v7673_v35 = vpop.f32.mrb[200].mxu1  ;;  %v7568_v42 = vpop.f32.mrb[189].mxu0 }
 0x48d   : > { %v7569_v58 = vadd.f32 %v7568_v42, %v7567_v37  ;;  %v7674_v60 = vpop.f32.mrb[201].mxu1  ;;  %v7570_v34 = vpop.f32.mrb[190].mxu0 }
 0x48e   : > { %v7675_v11 = vadd.f32 %v7674_v60, %v7673_v35  ;;  %v7676_v23 = vpop.f32.mrb[202].mxu1  ;;  %v7571_v6 = vpop.f32.mrb[191].mxu0 }
 0x48f   : > { %v4077_v26 = vadd.f32 %v7569_v58, %v10230_v36  ;;  %v7572_v52 = vadd.f32 %v7571_v6, %v7570_v34  ;;  %v7677_v3 = vpop.f32.mrb[203].mxu1 }
 0x490   : > { %v7678_v33 = vadd.f32 %v7677_v3, %v7676_v23  ;;  %v10420_v4 = vadd.f32 %v7675_v11, %v4069_v25 }
 0x491   : > { %v4080_v28 = vadd.f32 %v7572_v52, %v10233_v32 }
 0x492   : > { %v10423_v51 = vadd.f32 %v7678_v33, %v4072_v24 }
 0x493   : > { %v7573_v49 = vpop.f32.mrb[192].mxu0 }
 0x494   : > { %v7679_v62 = vpop.f32.mrb[204].mxu1  ;;  %v7574_v22 = vpop.f32.mrb[193].mxu0 }
 0x495   : > { %v7575_v7 = vadd.f32 %v7574_v22, %v7573_v49  ;;  %v7680_v36 = vpop.f32.mrb[205].mxu1  ;;  %v7576_v1 = vpop.f32.mrb[194].mxu0 }
 0x496   : > { %v7681_v19 = vadd.f32 %v7680_v36, %v7679_v62  ;;  %v7682_v56 = vpop.f32.mrb[206].mxu1  ;;  %v7577_v21 = vpop.f32.mrb[195].mxu0 }
 0x497   : > { %v4085_v14 = vadd.f32 %v7575_v7, %v10236_v63  ;;  %v7578_v53 = vadd.f32 %v7577_v21, %v7576_v1  ;;  %v7683_v41 = vpop.f32.mrb[207].mxu1  ;;  %v8613_v63 = vld [vmem:[%s11148_s7 + $0x148] sm:$0xff]  }
 0x498   : > { %v7684_v25 = vadd.f32 %v7683_v41, %v7682_v56  ;;  %v10426_v43 = vadd.f32 %v7681_v19, %v4077_v26  ;;  %7971 = vmatprep.subr.bf16.mxu1 %v8613_v63 }
 0x499   : > { %v4088_v32 = vadd.f32 %v7578_v53, %v10246_v27  ;;  %v8614_v27 = vld [vmem:[%s11148_s7 + $0x108] sm:$0xff]  }
 0x49a   : > { %v10429_v30 = vadd.f32 %v7684_v25, %v4080_v28  ;;  %7972 = vmatpush3.bf16.msra.mxu1 %v8614_v27 }
 0x49b   : > { %v7579_v39 = vpop.f32.mrb[196].mxu0 }
 0x49c   : > { %v7685_v24 = vpop.f32.mrb[208].mxu1  ;;  %v7580_v37 = vpop.f32.mrb[197].mxu0 }
 0x49d   : > { %v7581_v35 = vadd.f32 %v7580_v37, %v7579_v39  ;;  %v7686_v42 = vpop.f32.mrb[209].mxu1  ;;  %v7582_v58 = vpop.f32.mrb[198].mxu0 }
 0x49e   : > { %v7687_v60 = vadd.f32 %v7686_v42, %v7685_v24  ;;  %v7688_v34 = vpop.f32.mrb[210].mxu1  ;;  %v7583_v11 = vpop.f32.mrb[199].mxu0 }
 0x49f   : > { %v4093_v23 = vadd.f32 %v7581_v35, %v10249_v5  ;;  %v7584_v6 = vadd.f32 %v7583_v11, %v7582_v58  ;;  %v7689_v20 = vpop.f32.mrb[211].mxu1 }
 0x4a0   : > { %v7690_v26 = vadd.f32 %v7689_v20, %v7688_v34  ;;  %v10438_v52 = vadd.f32 %v7687_v60, %v4085_v14 }
 0x4a1   : > { %v4096_v3 = vadd.f32 %v7584_v6, %v10252_v47 }
 0x4a2   : > { %v10441_v8 = vadd.f32 %v7690_v26, %v4088_v32 }
 0x4a3   : > { %v7585_v33 = vpop.f32.mrb[200].mxu0 }
 0x4a4   : > { %v7691_v28 = vpop.f32.mrb[212].mxu1  ;;  %v7586_v49 = vpop.f32.mrb[201].mxu0 }
 0x4a5   : > { %v7587_v62 = vadd.f32 %v7586_v49, %v7585_v33  ;;  %v7692_v5 = vpop.f32.mrb[213].mxu1  ;;  %v7588_v22 = vpop.f32.mrb[202].mxu0 }
 0x4a6   : > { %v7693_v7 = vadd.f32 %v7692_v5, %v7691_v28  ;;  %v7694_v36 = vpop.f32.mrb[214].mxu1  ;;  %v7589_v1 = vpop.f32.mrb[203].mxu0 }
 0x4a7   : > { %v4101_v19 = vadd.f32 %v7587_v62, %v10256_v61  ;;  %v7590_v56 = vadd.f32 %v7589_v1, %v7588_v22  ;;  %v7695_v21 = vpop.f32.mrb[215].mxu1  ;;  %v8615_v61 = vld [vmem:[%s11148_s7 + $0x150] sm:$0xff]  }
 0x4a8   : > { %v7696_v14 = vadd.f32 %v7695_v21, %v7694_v36  ;;  %v10444_v53 = vadd.f32 %v7693_v7, %v4093_v23  ;;  %7973 = vmatprep.subr.bf16.mxu1 %v8615_v61  ;;  %v8617_v7 = vld [vmem:[%s11148_s7 + $0x1c0] sm:$0xff]  }
 0x4a9   : > { %v4104_v47 = vadd.f32 %v7590_v56, %v10264_v15  ;;  %v8616_v15 = vld [vmem:[%s11148_s7 + $0x110] sm:$0xff]   ;;  %8081 = vmatprep.subr.bf16.mxu0 %v8617_v7  ;;  %v8623_v61 = vld [vmem:[%s11148_s7 + $0x160] sm:$0xff]  }
 0x4aa   : > { %v10447_v41 = vadd.f32 %v7696_v14, %v4096_v3  ;;  %7974 = vmatpush3.bf16.msra.mxu1 %v8616_v15  ;;  %v8621_v14 = vld [vmem:[%s11148_s7 + $0x118] sm:$0xff]   ;;  %v8627_v15 = vld [vmem:[%s11148_s7 + $0x168] sm:$0xff]  }
 0x4ab   : > { %v7591_v25 = vpop.f32.mrb[204].mxu0 }
 0x4ac   : > { %v7697_v32 = vpop.f32.mrb[216].mxu1  ;;  %v7592_v39 = vpop.f32.mrb[205].mxu0 }
 0x4ad   : > { %v7593_v24 = vadd.f32 %v7592_v39, %v7591_v25  ;;  %v7698_v37 = vpop.f32.mrb[217].mxu1  ;;  %v7594_v35 = vpop.f32.mrb[206].mxu0 }
 0x4ae   : > { %v7699_v42 = vadd.f32 %v7698_v37, %v7697_v32  ;;  %v7700_v58 = vpop.f32.mrb[218].mxu1  ;;  %v7595_v60 = vpop.f32.mrb[207].mxu0 }
 0x4af   : > { %v4109_v34 = vadd.f32 %v7593_v24, %v10268_v54  ;;  %v7596_v11 = vadd.f32 %v7595_v60, %v7594_v35  ;;  %v7701_v63 = vpop.f32.mrb[219].mxu1 }
 0x4b0   : > { %v7702_v23 = vadd.f32 %v7701_v63, %v7700_v58  ;;  %v10456_v6 = vadd.f32 %v7699_v42, %v4101_v19  ;;  %v8619_v19 = vld [vmem:[%s11148_s7 + $0x158] sm:$0xff]   ;;  %v8625_v63 = vld [vmem:[%s11148_s7 + $0x120] sm:$0xff]  }
 0x4b1   : > { %v4112_v20 = vadd.f32 %v7596_v11, %v10279_v57  ;;  %7975 = vmatprep.subr.bf16.mxu1 %v8619_v19  ;;  %v8631_v19 = vld [vmem:[%s11148_s7 + $0x170] sm:$0xff]  }
 0x4b2   : > { %v10459_v27 = vadd.f32 %v7702_v23, %v4104_v47  ;;  %7976 = vmatpush3.bf16.msra.mxu1 %v8621_v14 }
 0x4b3   : > { %v7597_v26 = vpop.f32.mrb[208].mxu0  ;;  %7977 = vmatprep.subr.bf16.mxu1 %v8623_v61 }
 0x4b4   : > { %v7703_v3 = vpop.f32.mrb[220].mxu1  ;;  %v7598_v33 = vpop.f32.mrb[209].mxu0 }
 0x4b5   : > { %v7599_v28 = vadd.f32 %v7598_v33, %v7597_v26  ;;  %v7704_v54 = vpop.f32.mrb[221].mxu1  ;;  %v7600_v49 = vpop.f32.mrb[210].mxu0 }
 0x4b6   : > { %v7705_v62 = vadd.f32 %v7704_v54, %v7703_v3  ;;  %v7706_v5 = vpop.f32.mrb[222].mxu1  ;;  %v7601_v22 = vpop.f32.mrb[211].mxu0  ;;  %7978 = vmatpush3.bf16.msra.mxu1 %v8625_v63 }
 0x4b7   : > { %v4117_v36 = vadd.f32 %v7599_v28, %v10298_v9  ;;  %v7602_v1 = vadd.f32 %v7601_v22, %v7600_v49  ;;  %v7707_v57 = vpop.f32.mrb[223].mxu1  ;;  %7979 = vmatprep.subr.bf16.mxu1 %v8627_v15 }
 0x4b8   : > { %v7708_v56 = vadd.f32 %v7707_v57, %v7706_v5  ;;  %v10468_v21 = vadd.f32 %v7705_v62, %v4109_v34 }
 0x4b9   : > { %v4120_v47 = vadd.f32 %v7602_v1, %v10309_v12 }
 0x4ba   : > { %v10474_v25 = vadd.f32 %v7708_v56, %v4112_v20 }
 0x4bb   : > { %v7603_v9 = vpop.f32.mrb[212].mxu0 }
 0x4bc   : > { %v7709_v32 = vpop.f32.mrb[224].mxu1  ;;  %v7604_v39 = vpop.f32.mrb[213].mxu0 }
 0x4bd   : > { %v7605_v24 = vadd.f32 %v7604_v39, %v7603_v9  ;;  %v7710_v37 = vpop.f32.mrb[225].mxu1  ;;  %v7606_v35 = vpop.f32.mrb[214].mxu0 }
 0x4be   : > { %v7711_v42 = vadd.f32 %v7710_v37, %v7709_v32  ;;  %v7712_v58 = vpop.f32.mrb[226].mxu1  ;;  %v7607_v60 = vpop.f32.mrb[215].mxu0 }
 0x4bf   : > { %v4125_v34 = vadd.f32 %v7605_v24, %v10329_v50  ;;  %v7608_v12 = vadd.f32 %v7607_v60, %v7606_v35  ;;  %v7713_v11 = vpop.f32.mrb[227].mxu1  ;;  %v8629_v50 = vld [vmem:[%s11148_s7 + $0x128] sm:$0xff]  }
 0x4c0   : > { %v7714_v23 = vadd.f32 %v7713_v11, %v7712_v58  ;;  %v10486_v20 = vadd.f32 %v7711_v42, %v4117_v36  ;;  %7980 = vmatpush3.bf16.msra.mxu1 %v8629_v50  ;;  %v4614_v50 = vld [vmem:[#allocation3 + $0xa] sm:$0xff] }
 0x4c1   : > { %v4128_v26 = vadd.f32 %v7608_v12, %v10338_v31  ;;  %7981 = vmatprep.subr.bf16.mxu1 %v8631_v19 }
 0x4c2   : > { %v10492_v3 = vadd.f32 %v7714_v23, %v4120_v47  ;;  %v8635_v47 = vld [vmem:[%s11148_s7 + $0x178] sm:$0xff]  }
 0x4c3   : > { %v8347_v33 = vpop.f32.mrb[216].mxu0 }
 0x4c4   : > { %v7715_v28 = vpop.f32.mrb[228].mxu1  ;;  %v4335_v54 = vadd.f32 %v8347_v33, %v10372_v46  ;;  %v4326_v49 = vpop.f32.mrb[217].mxu0 }
 0x4c5   : > { %v7716_v62 = vpop.f32.mrb[229].mxu1  ;;  %v4327_v5 = vadd.f32 %v4326_v49, %v10354_v38  ;;  %v8348_v22 = vpop.f32.mrb[218].mxu0  ;;  %v8633_v38 = vld [vmem:[%s11148_s7 + $0x130] sm:$0xff]  }
 0x4c6   : > { %v4455_v7 = vmax.f32 %v4335_v54, 0.0  ;;  %v7717_v31 = vadd.f32 %v7716_v62, %v7715_v28  ;;  %v7718_v36 = vpop.f32.mrb[230].mxu1  ;;  %v4338_v1 = vadd.f32 %v8348_v22, %v10375_v18  ;;  %v4329_v57 = vpop.f32.mrb[219].mxu0  ;;  %7982 = vmatpush3.bf16.msra.mxu1 %v8633_v38 }
 0x4c7   : > { %v4453_v56 = vmax.f32 %v4327_v5, 0.0  ;;  %v7719_v14 = vpop.f32.mrb[231].mxu1  ;;  %v4330_v46 = vadd.f32 %v4329_v57, %v10360_v55  ;;  %v8637_v55 = vld [vmem:[%s11148_s7 + $0x138] sm:$0xff]   ;;  %7983 = vmatprep.subr.bf16.mxu1 %v8635_v47 }
 0x4c8   : > { %4487 = vst [vmem:[#allocation3 + $0x31] sm:$0xff] %v4455_v7  ;;  %v4456_v9 = vmax.f32 %v4338_v1, 0.0  ;;  %v7720_v18 = vadd.f32 %v7719_v14, %v7718_v36  ;;  %v10507_v32 = vadd.f32 %v7717_v31, %v4125_v34  ;;  %v8620_v1 = vld [vmem:[%s11148_s7 + $0x1c8] sm:$0xff]  }
 0x4c9   : > { %4485 = vst [vmem:[#allocation3 + $0x19] sm:$0xff] %v4453_v56  ;;  %v4454_v39 = vmax.f32 %v4330_v46, 0.0 }
 0x4ca   : > { %4488 = vst [vmem:[#allocation3 + $0x39] sm:$0xff] %v4456_v9  ;;  %v4599_v24 = vpack.c.bf16 %v4456_v9, %v4455_v7  ;;  %v10512_v37 = vadd.f32 %v7720_v18, %v4128_v26  ;;  %7984 = vmatpush3.bf16.msra.mxu1 %v8637_v55  ;;  %v4613_v26 = vld [vmem:[#allocation3 + $0x2] sm:$0xff] }
 0x4cb   : > { %4486 = vst [vmem:[#allocation3 + $0x21] sm:$0xff] %v4454_v39  ;;  %v8351_v35 = vpop.f32.mrb[220].mxu0  ;;  %v4598_v42 = vpack.c.bf16 %v4454_v39, %v4453_v56 }
 0x4cc   : > { %v4351_v58 = vadd.f32 %v8351_v35, %v10384_v17  ;;  %v4342_v60 = vpop.f32.mrb[221].mxu0 }
 0x4cd   : > { %v4343_v61 = vadd.f32 %v4342_v60, %v10378_v2  ;;  %v8352_v34 = vpop.f32.mrb[222].mxu0  ;;  %5572 = vmatprep.mubr.bf16.mxu1 %v4598_v42  ;;  %v4645_v2 = vpack.c.bf16 %v4614_v50, %v4613_v26 }
 0x4ce   : > { %v4459_v12 = vmax.f32 %v4351_v58, 0.0  ;;  %v4354_v11 = vadd.f32 %v8352_v34, %v10387_v16  ;;  %v4345_v63 = vpop.f32.mrb[223].mxu0  ;;  %v8626_v58 = vld [vmem:[%s11148_s7 + $0x190] sm:$0xff]  }
 0x4cf   : > { %v4457_v15 = vmax.f32 %v4343_v61, 0.0  ;;  %v4346_v23 = vadd.f32 %v4345_v63, %v10381_v59  ;;  %v8618_v59 = vld [vmem:[%s11148_s7 + $0x180] sm:$0xff]  }
 0x4d0   : > { %4491 = vst [vmem:[#allocation3 + $0x61] sm:$0xff] %v4459_v12  ;;  %v4460_v33 = vmax.f32 %v4354_v11, 0.0  ;;  %v4661_v17 = vld [vmem:[#allocation3 + $0x18] sm:$0xff]  ;;  %v4663_v36 = vld [vmem:[#allocation3 + $0x30] sm:$0xff]  ;;  %v8628_v11 = vld [vmem:[%s11148_s7 + $0x1d8] sm:$0xff]  }
 0x4d1   : > { %4489 = vst [vmem:[#allocation3 + $0x49] sm:$0xff] %v4457_v15  ;;  %v4458_v28 = vmax.f32 %v4346_v23, 0.0  ;;  %v4664_v49 = vld [vmem:[#allocation3 + $0x38] sm:$0xff] }
 0x4d2   : > { %4492 = vst [vmem:[#allocation3 + $0x69] sm:$0xff] %v4460_v33  ;;  %v4662_v54 = vld [vmem:[#allocation3 + $0x20] sm:$0xff]  ;;  %v10518_v62 = vpack.c.bf16 %v4460_v33, %v4459_v12  ;;  %v10528_v56 = vpack.c.bf16 %v4664_v49, %v4663_v36 }
 0x4d3   : > { %4490 = vst [vmem:[#allocation3 + $0x51] sm:$0xff] %v4458_v28  ;;  %v8355_v5 = vpop.f32.mrb[224].mxu0  ;;  %v4693_v16 = vpack.c.bf16 %v4662_v54, %v4661_v17  ;;  %v4600_v22 = vpack.c.bf16 %v4458_v28, %v4457_v15  ;;  %v4615_v39 = vld [vmem:[#allocation3 + $0x1a] sm:$0xff]  ;;  %v4616_v55 = vld [vmem:[#allocation3 + $0x22] sm:$0xff] }
 0x4d4   : > { %v4367_v7 = vadd.f32 %v8355_v5, %v10396_v44  ;;  %v4358_v31 = vpop.f32.mrb[225].mxu0  ;;  %v10547_v34 = vpack.c.bf16 %v4616_v55, %v4615_v39  ;;  %v4618_v49 = vld [vmem:[#allocation3 + $0x3a] sm:$0xff] }
 0x4d5   : > { %v4359_v57 = vadd.f32 %v4358_v31, %v10390_v40  ;;  %v8356_v19 = vpop.f32.mrb[226].mxu0  ;;  %5725 = vmatprep.mubr.bf16.mxu0 %v4693_v16  ;;  %5573 = vmatmul.mubr.bf16.gmra.mrb[236].mxu1 %v4693_v16  ;;  %v8622_v40 = vld [vmem:[%s11148_s7 + $0x188] sm:$0xff]  }
 0x4d6   : > { %v4463_v14 = vmax.f32 %v4367_v7, 0.0  ;;  %v4370_v46 = vadd.f32 %v8356_v19, %v10399_v0  ;;  %v4361_v38 = vpop.f32.mrb[227].mxu0  ;;  %5726 = vmatmul.mubr.bf16.vlgmr.msra.gmra.mrb[248].mxu0 %v4645_v2  ;;  %5580 = vmatprep.mubr.bf16.mxu1 %v4599_v24  ;;  %v8624_v0 = vld [vmem:[%s11148_s7 + $0x1d0] sm:$0xff]   ;;  %v4617_v2 = vld [vmem:[#allocation3 + $0x32] sm:$0xff] }
 0x4d7   : > { %v4461_v44 = vmax.f32 %v4359_v57, 0.0  ;;  %v4362_v47 = vadd.f32 %v4361_v38, %v10393_v45  ;;  %5733 = vmatprep.mubr.bf16.mxu0 %v10528_v56  ;;  %8082 = vmatpush3.bf16.msra.mxu0 %v8618_v59  ;;  %v8634_v59 = vld [vmem:[%s11148_s7 + $0x1a0] sm:$0xff]   ;;  %v10574_v36 = vpack.c.bf16 %v4618_v49, %v4617_v2  ;;  %v8636_v57 = vld [vmem:[%s11148_s7 + $0x1e8] sm:$0xff]  }
 0x4d8   : > { %4495 = vst [vmem:[#allocation3 + $0x91] sm:$0xff] %v4463_v14  ;;  %v4464_v9 = vmax.f32 %v4370_v46, 0.0  ;;  %8083 = vmatprep.subr.bf16.mxu0 %v8620_v1  ;;  %v4665_v12 = vld [vmem:[#allocation3 + $0x48] sm:$0xff]  ;;  %v4667_v1 = vld [vmem:[#allocation3 + $0x60] sm:$0xff] }
 0x4d9   : > { %4493 = vst [vmem:[#allocation3 + $0x79] sm:$0xff] %v4461_v44  ;;  %v4462_v18 = vmax.f32 %v4362_v47, 0.0 }
 0x4da   : > { %4496 = vst [vmem:[#allocation3 + $0x99] sm:$0xff] %v4464_v9  ;;  %v4666_v45 = vld [vmem:[#allocation3 + $0x50] sm:$0xff]  ;;  %v10539_v24 = vpack.c.bf16 %v4464_v9, %v4463_v14 }
 0x4db   : > { %4494 = vst [vmem:[#allocation3 + $0x81] sm:$0xff] %v4462_v18  ;;  %v8359_v35 = vpop.f32.mrb[228].mxu0  ;;  %v10541_v42 = vpack.c.bf16 %v4462_v18, %v4461_v44  ;;  %8084 = vmatpush3.bf16.msra.mxu0 %v8622_v40  ;;  %v10554_v23 = vpack.c.bf16 %v4666_v45, %v4665_v12  ;;  %v4620_v18 = vld [vmem:[#allocation3 + $0x52] sm:$0xff] }
 0x4dc   : > { %v4383_v60 = vadd.f32 %v8359_v35, %v10408_v48  ;;  %v4374_v61 = vpop.f32.mrb[229].mxu0  ;;  %8085 = vmatprep.subr.bf16.mxu0 %v8624_v0  ;;  %v8640_v35 = vld [vmem:[%s11148_s7 + $0x1b0] sm:$0xff]  }
 0x4dd   : > { %v4375_v63 = vadd.f32 %v4374_v61, %v10402_v29  ;;  %v8360_v15 = vpop.f32.mrb[230].mxu0  ;;  %5581 = vmatmul.mubr.bf16.gmra.mrb[240].mxu1 %v10528_v56  ;;  %v8630_v29 = vld [vmem:[%s11148_s7 + $0x198] sm:$0xff]  }
 0x4de   : > { %v4467_v26 = vmax.f32 %v4383_v60, 0.0  ;;  %v4386_v50 = vadd.f32 %v8360_v15, %v10411_v13  ;;  %v4377_v48 = vpop.f32.mrb[231].mxu0  ;;  %5734 = vmatmul.mubr.bf16.gmra.mrb[252].mxu0 %v10547_v34  ;;  %5588 = vmatprep.mubr.bf16.mxu1 %v4600_v22  ;;  %v8632_v13 = vld [vmem:[%s11148_s7 + $0x1e0] sm:$0xff]  }
 0x4df   : > { %v4465_v33 = vmax.f32 %v4375_v63, 0.0  ;;  %v4378_v28 = vadd.f32 %v4377_v48, %v10405_v10  ;;  %5741 = vmatprep.mubr.bf16.mxu0 %v10554_v23  ;;  %8086 = vmatpush3.bf16.msra.mxu0 %v8626_v58  ;;  %v4668_v10 = vld [vmem:[#allocation3 + $0x68] sm:$0xff] }
 0x4e0   : > { %4499 = vst [vmem:[#allocation3 + $0xc1] sm:$0xff] %v4467_v26  ;;  %v4468_v17 = vmax.f32 %v4386_v50, 0.0  ;;  %8087 = vmatprep.subr.bf16.mxu0 %v8628_v11  ;;  %v10581_v46 = vpack.c.bf16 %v4668_v10, %v4667_v1  ;;  %v4669_v12 = vld [vmem:[#allocation3 + $0x78] sm:$0xff]  ;;  %v8641_v11 = vld [vmem:[%s11148_s7 + $0x1f8] sm:$0xff]  }
 0x4e1   : > { %4497 = vst [vmem:[#allocation3 + $0xa9] sm:$0xff] %v4465_v33  ;;  %v4466_v54 = vmax.f32 %v4378_v28, 0.0 }
 0x4e2   : > { %4500 = vst [vmem:[#allocation3 + $0xc9] sm:$0xff] %v4468_v17  ;;  %v10566_v5 = vpack.c.bf16 %v4468_v17, %v4467_v26  ;;  %v4621_v17 = vld [vmem:[#allocation3 + $0x62] sm:$0xff] }
 0x4e3   : > { %4498 = vst [vmem:[#allocation3 + $0xb1] sm:$0xff] %v4466_v54  ;;  %v8363_v16 = vpop.f32.mrb[232].mxu0  ;;  %v10568_v22 = vpack.c.bf16 %v4466_v54, %v4465_v33  ;;  %8088 = vmatpush3.bf16.msra.mxu0 %v8630_v29  ;;  %v4672_v54 = vld [vmem:[#allocation3 + $0x98] sm:$0xff] }
 0x4e4   : > { %v4399_v7 = vadd.f32 %v8363_v16, %v10426_v43  ;;  %v4390_v31 = vpop.f32.mrb[233].mxu0  ;;  %8089 = vmatprep.subr.bf16.mxu0 %v8632_v13  ;;  %v4622_v13 = vld [vmem:[#allocation3 + $0x6a] sm:$0xff] }
 0x4e5   : > { %v4391_v19 = vadd.f32 %v4390_v31, %v10420_v4  ;;  %v8364_v14 = vpop.f32.mrb[234].mxu0  ;;  %5589 = vmatmul.mubr.bf16.gmra.mrb[244].mxu1 %v10554_v23  ;;  %v8638_v4 = vld [vmem:[%s11148_s7 + $0x1a8] sm:$0xff]   ;;  %v10624_v16 = vpack.c.bf16 %v4622_v13, %v4621_v17 }
 0x4e6   : > { %v4471_v38 = vmax.f32 %v4399_v7, 0.0  ;;  %v4402_v44 = vadd.f32 %v8364_v14, %v10429_v30  ;;  %v4393_v43 = vpop.f32.mrb[235].mxu0  ;;  %5742 = vmatmul.mubr.bf16.gmra.mrb[0].mxu0 %v10574_v36  ;;  %5596 = vmatprep.mubr.bf16.mxu1 %v10518_v62  ;;  %v8639_v30 = vld [vmem:[%s11148_s7 + $0x1f0] sm:$0xff]   ;;  %v4619_v62 = vld [vmem:[#allocation3 + $0x4a] sm:$0xff] }
 0x4e7   : > { %v4469_v47 = vmax.f32 %v4391_v19, 0.0  ;;  %v4394_v40 = vadd.f32 %v4393_v43, %v10423_v51  ;;  %5749 = vmatprep.mubr.bf16.mxu0 %v10581_v46  ;;  %8090 = vmatpush3.bf16.msra.mxu0 %v8634_v59  ;;  %v4670_v51 = vld [vmem:[#allocation3 + $0x80] sm:$0xff]  ;;  %v10602_v61 = vpack.c.bf16 %v4620_v18, %v4619_v62  ;;  %v4671_v59 = vld [vmem:[#allocation3 + $0x90] sm:$0xff] }
 0x4e8   : > { %4503 = vst [vmem:[#allocation3 + $0xf1] sm:$0xff] %v4471_v38  ;;  %v4472_v9 = vmax.f32 %v4402_v44, 0.0  ;;  %8091 = vmatprep.subr.bf16.mxu0 %v8636_v57  ;;  %v10609_v26 = vpack.c.bf16 %v4670_v51, %v4669_v12  ;;  %v10628_v1 = vpack.c.bf16 %v4672_v54, %v4671_v59  ;;  %v4623_v43 = vld [vmem:[#allocation3 + $0x7a] sm:$0xff] }
 0x4e9   : > { %4501 = vst [vmem:[#allocation3 + $0xd9] sm:$0xff] %v4469_v47  ;;  %v4470_v0 = vmax.f32 %v4394_v40, 0.0  ;;  %v4630_v17 = vld [vmem:[#allocation3 + $0xca] sm:$0xff] }
 0x4ea   : > { %4504 = vst [vmem:[#allocation3 + $0xf9] sm:$0xff] %v4472_v9  ;;  %v10594_v39 = vpack.c.bf16 %v4472_v9, %v4471_v38  ;;  %v4674_v40 = vld [vmem:[#allocation3 + $0xb0] sm:$0xff] }
 0x4eb   : > { %4502 = vst [vmem:[#allocation3 + $0xe1] sm:$0xff] %v4470_v0  ;;  %v8367_v55 = vpop.f32.mrb[236].mxu0  ;;  %v10596_v45 = vpack.c.bf16 %v4470_v0, %v4469_v47  ;;  %8092 = vmatpush3.bf16.msra.mxu0 %v8638_v4  ;;  %v4624_v47 = vld [vmem:[#allocation3 + $0x82] sm:$0xff] }
 0x4ec   : > { %v4415_v58 = vadd.f32 %v8367_v55, %v10444_v53  ;;  %v4406_v60 = vpop.f32.mrb[237].mxu0  ;;  %8093 = vmatprep.subr.bf16.mxu0 %v8639_v30  ;;  %v4673_v0 = vld [vmem:[#allocation3 + $0xa8] sm:$0xff] }
 0x4ed   : > { %v4407_v63 = vadd.f32 %v4406_v60, %v10438_v52  ;;  %v8368_v15 = vpop.f32.mrb[238].mxu0  ;;  %5597 = vmatmul.mubr.bf16.gmra.mrb[248].mxu1 %v10581_v46  ;;  %v8642_v52 = vld [vmem:[%s11148_s7 + $0x1b8] sm:$0xff]   ;;  %v10644_v51 = vpack.c.bf16 %v4674_v40, %v4673_v0 }
 0x4ee   : > { %v4475_v50 = vmax.f32 %v4415_v58, 0.0  ;;  %v4418_v48 = vadd.f32 %v8368_v15, %v10447_v41  ;;  %v4409_v53 = vpop.f32.mrb[239].mxu0  ;;  %5750 = vmatmul.mubr.bf16.gmra.mrb[4].mxu0 %v10602_v61  ;;  %5604 = vmatprep.mubr.bf16.mxu1 %v10541_v42  ;;  %v4676_v15 = vld [vmem:[#allocation3 + $0xc8] sm:$0xff] }
 0x4ef   : > { %v4473_v33 = vmax.f32 %v4407_v63, 0.0  ;;  %v4410_v28 = vadd.f32 %v4409_v53, %v10441_v8  ;;  %5757 = vmatprep.mubr.bf16.mxu0 %v10609_v26  ;;  %8094 = vmatpush3.bf16.msra.mxu0 %v8640_v35  ;;  %v4626_v63 = vld [vmem:[#allocation3 + $0x9a] sm:$0xff]  ;;  %v4628_v53 = vld [vmem:[#allocation3 + $0xb2] sm:$0xff] }
 0x4f0   : > { %4507 = vst [vmem:[#allocation3 + $0x121] sm:$0xff] %v4475_v50  ;;  %v4476_v29 = vmax.f32 %v4418_v48, 0.0  ;;  %8095 = vmatprep.subr.bf16.mxu0 %v8641_v11  ;;  %v4625_v11 = vld [vmem:[#allocation3 + $0x92] sm:$0xff]  ;;  %v4675_v48 = vld [vmem:[#allocation3 + $0xc0] sm:$0xff] }
 0x4f1   : > { %4505 = vst [vmem:[#allocation3 + $0x109] sm:$0xff] %v4473_v33  ;;  %v4474_v41 = vmax.f32 %v4410_v28, 0.0  ;;  %v4680_v13 = vld [vmem:[#allocation3 + $0xf8] sm:$0xff] }
 0x4f2   : > { %4508 = vst [vmem:[#allocation3 + $0x129] sm:$0xff] %v4476_v29  ;;  %v10619_v42 = vpack.c.bf16 %v4476_v29, %v4475_v50  ;;  %v10653_v50 = vpack.c.bf16 %v4626_v63, %v4625_v11 }
 0x4f3   : > { %4506 = vst [vmem:[#allocation3 + $0x111] sm:$0xff] %v4474_v41  ;;  %v8371_v8 = vpop.f32.mrb[240].mxu0  ;;  %v10621_v2 = vpack.c.bf16 %v4474_v41, %v4473_v33  ;;  %8096 = vmatpush3.bf16.msra.mxu0 %v8642_v52  ;;  %v4678_v33 = vld [vmem:[#allocation3 + $0xe0] sm:$0xff]  ;;  %v4677_v52 = vld [vmem:[#allocation3 + $0xd8] sm:$0xff] }
 0x4f4   : > { %v4431_v49 = vadd.f32 %v8371_v8, %v10468_v21  ;;  %v4422_v10 = vpop.f32.mrb[241].mxu0  ;;  %v10664_v29 = vpack.c.bf16 %v4678_v33, %v4677_v52  ;;  %v4629_v41 = vld [vmem:[#allocation3 + $0xc2] sm:$0xff]  ;;  %v4679_v8 = vld [vmem:[#allocation3 + $0xf0] sm:$0xff] }
 0x4f5   : > { %v4423_v7 = vadd.f32 %v4422_v10, %v10456_v6  ;;  %v8372_v31 = vpop.f32.mrb[242].mxu0  ;;  %5605 = vmatmul.mubr.bf16.gmra.mrb[252].mxu1 %v10609_v26  ;;  %v10675_v54 = vpack.c.bf16 %v4630_v17, %v4629_v41  ;;  %v4632_v10 = vld [vmem:[#allocation3 + $0xe2] sm:$0xff] }
 0x4f6   : > { %v4479_v57 = vmax.f32 %v4431_v49, 0.0  ;;  %v4434_v19 = vadd.f32 %v8372_v31, %v10474_v25  ;;  %v4425_v14 = vpop.f32.mrb[243].mxu0  ;;  %5758 = vmatmul.mubr.bf16.gmra.mrb[8].mxu0 %v10624_v16  ;;  %5612 = vmatprep.mubr.bf16.mxu1 %v10539_v24  ;;  %v10678_v49 = vpack.c.bf16 %v4680_v13, %v4679_v8  ;;  %v4710_v17 = vld [vmem:[#allocation3 + $0x21] sm:$0xff]  ;;  %v4709_v8 = vld [vmem:[#allocation3 + $0x19] sm:$0xff] }
 0x4f7   : > { %v4477_v21 = vmax.f32 %v4423_v7, 0.0  ;;  %v4426_v38 = vadd.f32 %v4425_v14, %v10459_v27  ;;  %5765 = vmatprep.mubr.bf16.mxu0 %v10628_v1  ;;  %v10640_v27 = vpack.c.bf16 %v4624_v47, %v4623_v43 }
 0x4f8   : > { %4511 = vst [vmem:[#allocation3 + $0x151] sm:$0xff] %v4479_v57  ;;  %v4480_v6 = vmax.f32 %v4434_v19, 0.0  ;;  %v4681_v31 = vld [vmem:[#allocation3 + $0x108] sm:$0xff]  ;;  %v4633_v19 = vld [vmem:[#allocation3 + $0xf2] sm:$0xff] }
 0x4f9   : > { %4509 = vst [vmem:[#allocation3 + $0x139] sm:$0xff] %v4477_v21  ;;  %v4478_v44 = vmax.f32 %v4426_v38, 0.0  ;;  %v4684_v14 = vld [vmem:[#allocation3 + $0x128] sm:$0xff] }
 0x4fa   : > { %4512 = vst [vmem:[#allocation3 + $0x159] sm:$0xff] %v4480_v6  ;;  %v10635_v4 = vpack.c.bf16 %v4480_v6, %v4479_v57  ;;  %v4682_v59 = vld [vmem:[#allocation3 + $0x110] sm:$0xff] }
 0x4fb   : > { %4510 = vst [vmem:[#allocation3 + $0x141] sm:$0xff] %v4478_v44  ;;  %v8375_v25 = vpop.f32.mrb[244].mxu0  ;;  %v10637_v9 = vpack.c.bf16 %v4478_v44, %v4477_v21  ;;  %v10686_v57 = vpack.c.bf16 %v4682_v59, %v4681_v31  ;;  %v4683_v44 = vld [vmem:[#allocation3 + $0x120] sm:$0xff]  ;;  %v4853_v31 = vld [vmem:[#allocation3 + $0x31] sm:$0xff] }
 0x4fc   : > { %v4447_v24 = vadd.f32 %v8375_v25, %v10507_v32  ;;  %v4438_v30 = vpop.f32.mrb[245].mxu0  ;;  %v10696_v40 = vpack.c.bf16 %v4684_v14, %v4683_v44  ;;  %v4856_v14 = vld [vmem:[#allocation3 + $0x51] sm:$0xff] }
 0x4fd   : > { %v4439_v62 = vadd.f32 %v4438_v30, %v10486_v20  ;;  %v8376_v18 = vpop.f32.mrb[246].mxu0  ;;  %5613 = vmatmul.mubr.bf16.gmra.mrb[0].mxu1 %v10628_v1  ;;  %v4636_v30 = vld [vmem:[#allocation3 + $0x112] sm:$0xff] }
 0x4fe   : > { %v4483_v55 = vmax.f32 %v4447_v24, 0.0  ;;  %v4450_v35 = vadd.f32 %v8376_v18, %v10512_v37  ;;  %v4441_v58 = vpop.f32.mrb[247].mxu0  ;;  %5766 = vmatmul.mubr.bf16.gmra.mrb[12].mxu0 %v10640_v27  ;;  %5620 = vmatprep.mubr.bf16.mxu1 %v10568_v22  ;;  %v10656_v22 = vpack.c.bf16 %v4676_v15, %v4675_v48  ;;  %v4635_v24 = vld [vmem:[#allocation3 + $0x10a] sm:$0xff] }
 0x4ff   : > { %v4481_v32 = vmax.f32 %v4439_v62, 0.0  ;;  %v4442_v60 = vadd.f32 %v4441_v58, %v10492_v3  ;;  %5773 = vmatprep.mubr.bf16.mxu0 %v10644_v51  ;;  %v4627_v3 = vld [vmem:[#allocation3 + $0xaa] sm:$0xff]  ;;  %v10703_v62 = vpack.c.bf16 %v4636_v30, %v4635_v24  ;;  %v4859_v30 = vld [vmem:[#allocation3 + $0x79] sm:$0xff] }
 0x500   : > { %4515 = vst [vmem:[#allocation3 + $0x181] sm:$0xff] %v4483_v55  ;;  %v4484_v20 = vmax.f32 %v4450_v35, 0.0  ;;  %v10661_v28 = vpack.c.bf16 %v4628_v53, %v4627_v3  ;;  %v4685_v18 = vld [vmem:[#allocation3 + $0x138] sm:$0xff]  ;;  %v4638_v35 = vld [vmem:[#allocation3 + $0x12a] sm:$0xff] }
 0x501   : > { %4513 = vst [vmem:[#allocation3 + $0x169] sm:$0xff] %v4481_v32  ;;  %v4482_v12 = vmax.f32 %v4442_v60, 0.0  ;;  %v4688_v58 = vld [vmem:[#allocation3 + $0x158] sm:$0xff]  ;;  %v4687_v60 = vld [vmem:[#allocation3 + $0x150] sm:$0xff] }
 0x502   : > { %4516 = vst [vmem:[#allocation3 + $0x189] sm:$0xff] %v4484_v20  ;;  %v4686_v0 = vld [vmem:[#allocation3 + $0x140] sm:$0xff]  ;;  %v10714_v20 = vpack.c.bf16 %v4688_v58, %v4687_v60  ;;  %v4641_v3 = vld [vmem:[#allocation3 + $0x152] sm:$0xff]  ;;  %v4863_v58 = vld [vmem:[#allocation3 + $0xa9] sm:$0xff] }
 0x503   : > { %4514 = vst [vmem:[#allocation3 + $0x171] sm:$0xff] %v4482_v12  ;;  %v10651_v37 = vpack.c.bf16 %v4482_v12, %v4481_v32  ;;  %v10706_v55 = vpack.c.bf16 %v4686_v0, %v4685_v18  ;;  %v4639_v12 = vld [vmem:[#allocation3 + $0x13a] sm:$0xff]  ;;  %v8650_v0 = vld [vmem:[%s11148_s7 + $0x238] sm:$0xff]  }
 0x505   : > { %5621 = vmatmul.mubr.bf16.gmra.mrb[4].mxu1 %v10644_v51 }
 0x506   : > { %5774 = vmatmul.mubr.bf16.gmra.mrb[16].mxu0 %v10653_v50  ;;  %5628 = vmatprep.mubr.bf16.mxu1 %v10566_v5  ;;  %v10671_v5 = vld [vmem:[%s11148_s7 + $0x200] sm:$0xff]  }
 0x507   : > { %5781 = vmatprep.mubr.bf16.mxu0 %v10656_v22  ;;  %8377 = vmatprep.subr.bf16.mxu1 %v10671_v5  ;;  %v4691_v52 = vld [vmem:[#allocation3 + $0x180] sm:$0xff] }
 0x508   : > { %v4689_v15 = vld [vmem:[#allocation3 + $0x168] sm:$0xff] }
 0x509   : > { %v4692_v53 = vld [vmem:[#allocation3 + $0x188] sm:$0xff] }
 0x50a   : > { %v4690_v11 = vld [vmem:[#allocation3 + $0x170] sm:$0xff]  ;;  %v10730_v41 = vpack.c.bf16 %v4692_v53, %v4691_v52 }
 0x50b   : > { %v10722_v48 = vpack.c.bf16 %v4690_v11, %v4689_v15  ;;  %v4644_v13 = vld [vmem:[#allocation3 + $0x172] sm:$0xff] }
 0x50d   : > { %5629 = vmatmul.mubr.bf16.gmra.mrb[8].mxu1 %v10656_v22 }
 0x50e   : > { %5782 = vmatmul.mubr.bf16.gmra.mrb[20].mxu0 %v10661_v28  ;;  %5636 = vmatprep.mubr.bf16.mxu1 %v10596_v45  ;;  %v4631_v45 = vld [vmem:[#allocation3 + $0xda] sm:$0xff] }
 0x50f   : > { %5789 = vmatprep.mubr.bf16.mxu0 %v10664_v29  ;;  %v10683_v7 = vpack.c.bf16 %v4632_v10, %v4631_v45  ;;  %v4854_v45 = vld [vmem:[#allocation3 + $0x39] sm:$0xff]  ;;  %v4741_v10 = vpack.c.bf16 %v4710_v17, %v4709_v8 }
 0x515   : > { %5637 = vmatmul.mubr.bf16.gmra.mrb[12].mxu1 %v10664_v29 }
 0x516   : > { %5790 = vmatmul.mubr.bf16.gmra.mrb[24].mxu0 %v10675_v54  ;;  %5644 = vmatprep.mubr.bf16.mxu1 %v10594_v39  ;;  %v4634_v39 = vld [vmem:[#allocation3 + $0xfa] sm:$0xff] }
 0x517   : > { %5797 = vmatprep.mubr.bf16.mxu0 %v10678_v49  ;;  %v10691_v6 = vpack.c.bf16 %v4634_v39, %v4633_v19  ;;  %v8644_v19 = vld [vmem:[%s11148_s7 + $0x208] sm:$0xff]   ;;  %v4885_v39 = vpack.c.bf16 %v4854_v45, %v4853_v31 }
 0x518   : > { %v4877_v31 = vld [vmem:[#allocation3 + $0x151] sm:$0xff] }
 0x51d   : > { %5645 = vmatmul.mubr.bf16.gmra.mrb[16].mxu1 %v10678_v49 }
 0x51e   : > { %5798 = vmatmul.mubr.bf16.gmra.mrb[28].mxu0 %v10683_v7  ;;  %5652 = vmatprep.mubr.bf16.mxu1 %v10621_v2 }
 0x51f   : > { %5805 = vmatprep.mubr.bf16.mxu0 %v10686_v57 }
 0x520   : > { %v7761_v21 = vpop.f32.mrb[232].mxu1 }
 0x521   : > { %v7762_v38 = vpop.f32.mrb[233].mxu1 }
 0x522   : > { %v10693_v43 = vadd.f32 %v7762_v38, %v7761_v21  ;;  %v7764_v47 = vpop.f32.mrb[234].mxu1  ;;  %v4855_v21 = vld [vmem:[#allocation3 + $0x49] sm:$0xff] }
 0x523   : > { %v7765_v25 = vpop.f32.mrb[235].mxu1  ;;  %v8646_v38 = vld [vmem:[%s11148_s7 + $0x218] sm:$0xff]   ;;  %v4886_v44 = vpack.c.bf16 %v4856_v14, %v4855_v21 }
 0x524   : > { %v10700_v2 = vadd.f32 %v7765_v25, %v7764_v47  ;;  %v4857_v47 = vld [vmem:[#allocation3 + $0x61] sm:$0xff]  ;;  %v8648_v25 = vld [vmem:[%s11148_s7 + $0x228] sm:$0xff]  }
 0x525   : > { %5653 = vmatmul.mubr.bf16.gmra.mrb[20].mxu1 %v10686_v57 }
 0x526   : > { %5806 = vmatmul.mubr.bf16.gmra.mrb[32].mxu0 %v10691_v6  ;;  %5660 = vmatprep.mubr.bf16.mxu1 %v10619_v42  ;;  %v4637_v42 = vld [vmem:[#allocation3 + $0x122] sm:$0xff] }
 0x527   : > { %5813 = vmatprep.mubr.bf16.mxu0 %v10696_v40  ;;  %v10711_v32 = vpack.c.bf16 %v4638_v35, %v4637_v42  ;;  %v4864_v35 = vld [vmem:[#allocation3 + $0xb1] sm:$0xff] }
 0x528   : > { %v4890_v60 = vpack.c.bf16 %v4864_v35, %v4863_v58 }
 0x52d   : > { %5661 = vmatmul.mubr.bf16.gmra.mrb[24].mxu1 %v10696_v40 }
 0x52e   : > { %5814 = vmatmul.mubr.bf16.gmra.mrb[36].mxu0 %v10703_v62  ;;  %5668 = vmatprep.mubr.bf16.mxu1 %v10637_v9  ;;  %v4640_v9 = vld [vmem:[#allocation3 + $0x142] sm:$0xff] }
 0x52f   : > { %5821 = vmatprep.mubr.bf16.mxu0 %v10706_v55  ;;  %v10719_v63 = vpack.c.bf16 %v4640_v9, %v4639_v12 }
 0x535   : > { %5669 = vmatmul.mubr.bf16.gmra.mrb[28].mxu1 %v10706_v55 }
 0x536   : > { %5822 = vmatmul.mubr.bf16.gmra.mrb[40].mxu0 %v10711_v32  ;;  %5676 = vmatprep.mubr.bf16.mxu1 %v10635_v4  ;;  %v4642_v4 = vld [vmem:[#allocation3 + $0x15a] sm:$0xff] }
 0x537   : > { %5829 = vmatprep.mubr.bf16.mxu0 %v10714_v20  ;;  %v10727_v33 = vpack.c.bf16 %v4642_v4, %v4641_v3 }
 0x53d   : > { %5677 = vmatmul.mubr.bf16.gmra.mrb[32].mxu1 %v10714_v20 }
 0x53e   : > { %5830 = vmatmul.mubr.bf16.gmra.mrb[44].mxu0 %v10719_v63  ;;  %5684 = vmatprep.mubr.bf16.mxu1 %v10651_v37  ;;  %v4643_v37 = vld [vmem:[#allocation3 + $0x16a] sm:$0xff] }
 0x53f   : > { %5837 = vmatprep.mubr.bf16.mxu0 %v10722_v48  ;;  %v10735_v59 = vpack.c.bf16 %v4644_v13, %v4643_v37  ;;  %v4878_v37 = vld [vmem:[#allocation3 + $0x159] sm:$0xff] }
 0x540   : > { %v4897_v14 = vpack.c.bf16 %v4878_v37, %v4877_v31 }
 0x545   : > { %5685 = vmatmul.mubr.bf16.gmra.mrb[36].mxu1 %v10722_v48 }
 0x546   : > { %5838 = vmatmul.mubr.bf16.gmra.mrb[48].mxu0 %v10727_v33  ;;  %5886 = vmatprep.mubr.bf16.mxu1 %v10547_v34  ;;  %v8645_v34 = vld [vmem:[%s11148_s7 + $0x210] sm:$0xff]  }
 0x547   : > { %5845 = vmatprep.mubr.bf16.mxu0 %v10730_v41 }
 0x54d   : > { %5887 = vmatmul.mubr.bf16.vlgmr.msra.gmra.mrb[40].mxu1 %v4741_v10 }
 0x54e   : > { %5846 = vmatmul.mubr.bf16.gmra.mrb[52].mxu0 %v10735_v59  ;;  %5894 = vmatprep.mubr.bf16.mxu1 %v10574_v36  ;;  %v8647_v36 = vld [vmem:[%s11148_s7 + $0x220] sm:$0xff]  }
 0x54f   : > { %6047 = vmatprep.mubr.bf16.mxu0 %v4885_v39  ;;  %8378 = vmatpush3.bf16.msra.mxu1 %v10671_v5  ;;  %v4858_v5 = vld [vmem:[#allocation3 + $0x69] sm:$0xff] }
 0x550   : > { %8379 = vmatprep.subr.bf16.mxu1 %v8644_v19  ;;  %v4887_v24 = vpack.c.bf16 %v4858_v5, %v4857_v47 }
 0x553   : > { %8380 = vmatpush3.bf16.msra.mxu1 %v8644_v19 }
 0x554   : > { %8381 = vmatprep.subr.bf16.mxu1 %v8645_v34 }
 0x555   : > { %5895 = vmatmul.mubr.bf16.gmra.mrb[44].mxu1 %v4885_v39 }
 0x556   : > { %6048 = vmatmul.mubr.bf16.vlgmr.msra.gmra.mrb[56].mxu0 %v10528_v56  ;;  %5902 = vmatprep.mubr.bf16.mxu1 %v10602_v61  ;;  %v8649_v56 = vld [vmem:[%s11148_s7 + $0x230] sm:$0xff]  }
 0x557   : > { %6055 = vmatprep.mubr.bf16.mxu0 %v4886_v44  ;;  %8382 = vmatpush3.bf16.msra.mxu1 %v8645_v34  ;;  %v4860_v61 = vld [vmem:[#allocation3 + $0x81] sm:$0xff] }
 0x558   : > { %8383 = vmatprep.subr.bf16.mxu1 %v8646_v38  ;;  %v4888_v18 = vpack.c.bf16 %v4860_v61, %v4859_v30 }
 0x55b   : > { %8384 = vmatpush3.bf16.msra.mxu1 %v8646_v38 }
 0x55c   : > { %8385 = vmatprep.subr.bf16.mxu1 %v8647_v36 }
 0x55d   : > { %5903 = vmatmul.mubr.bf16.gmra.mrb[48].mxu1 %v4886_v44 }
 0x55e   : > { %6056 = vmatmul.mubr.bf16.gmra.mrb[60].mxu0 %v10554_v23  ;;  %5910 = vmatprep.mubr.bf16.mxu1 %v10624_v16  ;;  %v4862_v23 = vld [vmem:[#allocation3 + $0x99] sm:$0xff]  ;;  %v4861_v16 = vld [vmem:[#allocation3 + $0x91] sm:$0xff] }
 0x55f   : > { %6063 = vmatprep.mubr.bf16.mxu0 %v4887_v24  ;;  %8386 = vmatpush3.bf16.msra.mxu1 %v8647_v36  ;;  %v4889_v42 = vpack.c.bf16 %v4862_v23, %v4861_v16 }
 0x560   : > { %8387 = vmatprep.subr.bf16.mxu1 %v8648_v25 }
 0x563   : > { %8388 = vmatpush3.bf16.msra.mxu1 %v8648_v25  ;;  %v4880_v25 = vld [vmem:[#allocation3 + $0x171] sm:$0xff] }
 0x564   : > { %8389 = vmatprep.subr.bf16.mxu1 %v8649_v56 }
 0x565   : > { %5911 = vmatmul.mubr.bf16.gmra.mrb[52].mxu1 %v4887_v24 }
 0x566   : > { %6064 = vmatmul.mubr.bf16.gmra.mrb[64].mxu0 %v10581_v46  ;;  %5918 = vmatprep.mubr.bf16.mxu1 %v10640_v27  ;;  %v4866_v46 = vld [vmem:[#allocation3 + $0xc9] sm:$0xff]  ;;  %v4865_v27 = vld [vmem:[#allocation3 + $0xc1] sm:$0xff] }
 0x567   : > { %6071 = vmatprep.mubr.bf16.mxu0 %v4888_v18  ;;  %8390 = vmatpush3.bf16.msra.mxu1 %v8649_v56  ;;  %v4891_v12 = vpack.c.bf16 %v4866_v46, %v4865_v27  ;;  %v4787_v46 = vld [vmem:[#allocation3 + $0x182] sm:$0xff]  ;;  %v4788_v27 = vld [vmem:[#allocation3 + $0x18a] sm:$0xff] }
 0x568   : > { %8391 = vmatprep.subr.bf16.mxu1 %v8650_v0 }
 0x56b   : > { %8392 = vmatpush3.bf16.msra.mxu1 %v8650_v0 }
 0x56d   : > { %5919 = vmatmul.mubr.bf16.gmra.mrb[56].mxu1 %v4888_v18 }
 0x56e   : > { %6072 = vmatmul.mubr.bf16.gmra.mrb[68].mxu0 %v10609_v26  ;;  %5926 = vmatprep.mubr.bf16.mxu1 %v10653_v50  ;;  %v4868_v26 = vld [vmem:[#allocation3 + $0xe1] sm:$0xff]  ;;  %v4867_v50 = vld [vmem:[#allocation3 + $0xd9] sm:$0xff] }
 0x56f   : > { %6079 = vmatprep.mubr.bf16.mxu0 %v4889_v42  ;;  %v4892_v9 = vpack.c.bf16 %v4868_v26, %v4867_v50 }
 0x575   : > { %5927 = vmatmul.mubr.bf16.gmra.mrb[60].mxu1 %v4889_v42 }
 0x576   : > { %6080 = vmatmul.mubr.bf16.gmra.mrb[72].mxu0 %v10628_v1  ;;  %5934 = vmatprep.mubr.bf16.mxu1 %v10661_v28  ;;  %v4870_v1 = vld [vmem:[#allocation3 + $0xf9] sm:$0xff]  ;;  %v4869_v28 = vld [vmem:[#allocation3 + $0xf1] sm:$0xff] }
 0x577   : > { %6087 = vmatprep.mubr.bf16.mxu0 %v4890_v60  ;;  %v4893_v11 = vpack.c.bf16 %v4870_v1, %v4869_v28 }
 0x57d   : > { %5935 = vmatmul.mubr.bf16.gmra.mrb[64].mxu1 %v4890_v60 }
 0x57e   : > { %6088 = vmatmul.mubr.bf16.gmra.mrb[76].mxu0 %v10644_v51  ;;  %5942 = vmatprep.mubr.bf16.mxu1 %v10675_v54  ;;  %v4872_v51 = vld [vmem:[#allocation3 + $0x111] sm:$0xff]  ;;  %v4871_v54 = vld [vmem:[#allocation3 + $0x109] sm:$0xff] }
 0x57f   : > { %6095 = vmatprep.mubr.bf16.mxu0 %v4891_v12  ;;  %v4894_v15 = vpack.c.bf16 %v4872_v51, %v4871_v54 }
 0x585   : > { %5943 = vmatmul.mubr.bf16.gmra.mrb[68].mxu1 %v4891_v12 }
 0x586   : > { %6096 = vmatmul.mubr.bf16.gmra.mrb[80].mxu0 %v10656_v22  ;;  %5950 = vmatprep.mubr.bf16.mxu1 %v10683_v7  ;;  %v4874_v22 = vld [vmem:[#allocation3 + $0x129] sm:$0xff]  ;;  %v4873_v7 = vld [vmem:[#allocation3 + $0x121] sm:$0xff] }
 0x587   : > { %6103 = vmatprep.mubr.bf16.mxu0 %v4892_v9  ;;  %v4895_v3 = vpack.c.bf16 %v4874_v22, %v4873_v7 }
 0x58d   : > { %5951 = vmatmul.mubr.bf16.gmra.mrb[72].mxu1 %v4892_v9  ;;  %v4882_v9 = vld [vmem:[#allocation3 + $0x189] sm:$0xff] }
 0x58e   : > { %6104 = vmatmul.mubr.bf16.gmra.mrb[84].mxu0 %v10664_v29  ;;  %5958 = vmatprep.mubr.bf16.mxu1 %v10691_v6  ;;  %v4876_v29 = vld [vmem:[#allocation3 + $0x141] sm:$0xff]  ;;  %v4875_v6 = vld [vmem:[#allocation3 + $0x139] sm:$0xff] }
 0x58f   : > { %6111 = vmatprep.mubr.bf16.mxu0 %v4893_v11  ;;  %v4896_v4 = vpack.c.bf16 %v4876_v29, %v4875_v6 }
 0x595   : > { %5959 = vmatmul.mubr.bf16.gmra.mrb[76].mxu1 %v4893_v11 }
 0x596   : > { %6112 = vmatmul.mubr.bf16.gmra.mrb[88].mxu0 %v10678_v49  ;;  %5966 = vmatprep.mubr.bf16.mxu1 %v10703_v62  ;;  %v10786_v49 = vld [vmem:[%s11149_s8] ss:$0 sm:$0xff] }
 0x597   : > { %6119 = vmatprep.mubr.bf16.mxu0 %v4894_v15  ;;  %v5567_v13 = vadd.f32 %v10693_v43, %v10786_v49  ;;  %v5570_v19 = vadd.f32 %v10700_v2, %v10786_v49 }
 0x59d   : > { %5967 = vmatmul.mubr.bf16.gmra.mrb[80].mxu1 %v4894_v15  ;;  %v4881_v15 = vld [vmem:[#allocation3 + $0x181] sm:$0xff] }
 0x59e   : > { %6120 = vmatmul.mubr.bf16.gmra.mrb[92].mxu0 %v10686_v57  ;;  %5974 = vmatprep.mubr.bf16.mxu1 %v10711_v32  ;;  %v4899_v29 = vpack.c.bf16 %v4882_v9, %v4881_v15  ;;  %v4909_v15 = vld [vmem:[#allocation3 + $0x92] sm:$0xff] }
 0x59f   : > { %6127 = vmatprep.mubr.bf16.mxu0 %v4895_v3 }
 0x5a5   : > { %5975 = vmatmul.mubr.bf16.gmra.mrb[84].mxu1 %v4895_v3 }
 0x5a6   : > { %6128 = vmatmul.mubr.bf16.gmra.mrb[96].mxu0 %v10696_v40  ;;  %5982 = vmatprep.mubr.bf16.mxu1 %v10719_v63 }
 0x5a7   : > { %6135 = vmatprep.mubr.bf16.mxu0 %v4896_v4 }
 0x5a8   : > { %v7767_v62 = vpop.f32.mrb[236].mxu1 }
 0x5a9   : > { %v7873_v53 = vpop.f32.mrb[248].mxu0  ;;  %v7768_v57 = vpop.f32.mrb[237].mxu1 }
 0x5aa   : > { %v7769_v52 = vadd.f32 %v7768_v57, %v7767_v62  ;;  %v7874_v32 = vpop.f32.mrb[249].mxu0  ;;  %v7770_v17 = vpop.f32.mrb[238].mxu1  ;;  %v4883_v62 = vld [vmem:[#allocation3 + $0x199] sm:$0xff] }
 0x5ab   : > { %v7875_v8 = vadd.f32 %v7874_v32, %v7873_v53  ;;  %v7876_v40 = vpop.f32.mrb[250].mxu0  ;;  %v7771_v45 = vpop.f32.mrb[239].mxu1  ;;  %v4884_v53 = vld [vmem:[#allocation3 + $0x1a1] sm:$0xff]  ;;  %v4901_v32 = vld [vmem:[#allocation3 + $0x32] sm:$0xff] }
 0x5ac   : > { %v7772_v63 = vadd.f32 %v7771_v45, %v7770_v17  ;;  %v7877_v10 = vpop.f32.mrb[251].mxu0  ;;  %v5575_v2 = vadd.f32 %v7769_v52, %v10786_v49  ;;  %v4902_v17 = vld [vmem:[#allocation3 + $0x3a] sm:$0xff] }
 0x5ad   : > { %v10792_v39 = vadd.f32 %v7875_v8, %v5567_v13  ;;  %v7878_v34 = vadd.f32 %v7877_v10, %v7876_v40  ;;  %5983 = vmatmul.mubr.bf16.gmra.mrb[88].mxu1 %v4896_v4  ;;  %v4900_v10 = vpack.c.bf16 %v4884_v53, %v4883_v62 }
 0x5ae   : > { %6136 = vmatmul.mubr.bf16.gmra.mrb[100].mxu0 %v10706_v55  ;;  %5990 = vmatprep.mubr.bf16.mxu1 %v10727_v33  ;;  %v4879_v55 = vld [vmem:[#allocation3 + $0x169] sm:$0xff]  ;;  %v5578_v33 = vadd.f32 %v7772_v63, %v10786_v49 }
 0x5af   : > { %v10796_v21 = vadd.f32 %v7878_v34, %v5570_v19  ;;  %6143 = vmatprep.mubr.bf16.mxu0 %v4897_v14  ;;  %v4898_v16 = vpack.c.bf16 %v4880_v25, %v4879_v55  ;;  %v4933_v34 = vpack.c.bf16 %v4902_v17, %v4901_v32  ;;  %v4904_v25 = vld [vmem:[#allocation3 + $0x52] sm:$0xff] }
 0x5b0   : > { %v7773_v43 = vpop.f32.mrb[240].mxu1 }
 0x5b1   : > { %v7879_v38 = vpop.f32.mrb[252].mxu0  ;;  %v7774_v44 = vpop.f32.mrb[241].mxu1 }
 0x5b2   : > { %v7775_v36 = vadd.f32 %v7774_v44, %v7773_v43  ;;  %v7880_v5 = vpop.f32.mrb[253].mxu0  ;;  %v7776_v47 = vpop.f32.mrb[242].mxu1 }
 0x5b3   : > { %v7881_v24 = vadd.f32 %v7880_v5, %v7879_v38  ;;  %v7882_v56 = vpop.f32.mrb[254].mxu0  ;;  %v7777_v61 = vpop.f32.mrb[243].mxu1 }
 0x5b4   : > { %v7778_v30 = vadd.f32 %v7777_v61, %v7776_v47  ;;  %v7883_v0 = vpop.f32.mrb[255].mxu0  ;;  %v5583_v1 = vadd.f32 %v7775_v36, %v10786_v49  ;;  %v4835_v36 = vld [vmem:[#allocation3 + $0x198] sm:$0xff]  ;;  %v4903_v47 = vld [vmem:[#allocation3 + $0x4a] sm:$0xff] }
 0x5b5   : > { %v10800_v18 = vadd.f32 %v7881_v24, %v5575_v2  ;;  %v7884_v23 = vadd.f32 %v7883_v0, %v7882_v56  ;;  %5991 = vmatmul.mubr.bf16.gmra.mrb[92].mxu1 %v4897_v14  ;;  %v4905_v56 = vld [vmem:[#allocation3 + $0x62] sm:$0xff]  ;;  %v4906_v61 = vld [vmem:[#allocation3 + $0x6a] sm:$0xff] }
 0x5b6   : > { %6144 = vmatmul.mubr.bf16.gmra.mrb[104].mxu0 %v10714_v20  ;;  %5998 = vmatprep.mubr.bf16.mxu1 %v10735_v59  ;;  %v10807_v59 = vpack.c.bf16 %v4788_v27, %v4787_v46  ;;  %v5586_v22 = vadd.f32 %v7778_v30, %v10786_v49 }
 0x5b7   : > { %v10804_v42 = vadd.f32 %v7884_v23, %v5578_v33  ;;  %6151 = vmatprep.mubr.bf16.mxu0 %v4898_v16  ;;  %v8661_v33 = vld [vmem:[#allocation3 + $0x8] sm:$0xff] }
 0x5b8   : > { %v7779_v35 = vpop.f32.mrb[244].mxu1  ;;  %v4852_v23 = vpack.c.bf16 %v8661_v33, %v4835_v36 }
 0x5b9   : > { %v7885_v58 = vpop.f32.mrb[0].mxu0  ;;  %v7780_v60 = vpop.f32.mrb[245].mxu1 }
 0x5ba   : > { %v7781_v12 = vadd.f32 %v7780_v60, %v7779_v35  ;;  %v7886_v26 = vpop.f32.mrb[1].mxu0  ;;  %v7782_v50 = vpop.f32.mrb[246].mxu1  ;;  %v4934_v60 = vpack.c.bf16 %v4904_v25, %v4903_v47 }
 0x5bb   : > { %v7887_v28 = vadd.f32 %v7886_v26, %v7885_v58  ;;  %v7888_v11 = vpop.f32.mrb[2].mxu0  ;;  %v7783_v51 = vpop.f32.mrb[247].mxu1 }
 0x5bc   : > { %v7784_v20 = vadd.f32 %v7783_v51, %v7782_v50  ;;  %v7889_v54 = vpop.f32.mrb[3].mxu0  ;;  %v5591_v40 = vadd.f32 %v7781_v12, %v10786_v49  ;;  %v4935_v12 = vpack.c.bf16 %v4906_v61, %v4905_v56  ;;  %v4908_v51 = vld [vmem:[#allocation3 + $0x82] sm:$0xff] }
 0x5bd   : > { %v10810_v7 = vadd.f32 %v7887_v28, %v5583_v1  ;;  %v7890_v3 = vadd.f32 %v7889_v54, %v7888_v11  ;;  %5999 = vmatmul.mubr.bf16.gmra.mrb[96].mxu1 %v4898_v16  ;;  %v4907_v11 = vld [vmem:[#allocation3 + $0x7a] sm:$0xff] }
 0x5be   : > { %6152 = vmatmul.mubr.bf16.gmra.mrb[108].mxu0 %v10722_v48  ;;  %6006 = vmatprep.mubr.bf16.mxu1 %v10807_v59  ;;  %v5594_v14 = vadd.f32 %v7784_v20, %v10786_v49  ;;  %v4936_v32 = vpack.c.bf16 %v4908_v51, %v4907_v11 }
 0x5bf   : > { %v10814_v6 = vadd.f32 %v7890_v3, %v5586_v22  ;;  %6159 = vmatprep.mubr.bf16.mxu0 %v4899_v29  ;;  %v4910_v22 = vld [vmem:[#allocation3 + $0x9a] sm:$0xff] }
 0x5c0   : > { %v7785_v4 = vpop.f32.mrb[248].mxu1 }
 0x5c1   : > { %v7891_v57 = vpop.f32.mrb[4].mxu0  ;;  %v7786_v52 = vpop.f32.mrb[249].mxu1 }
 0x5c2   : > { %v7787_v37 = vadd.f32 %v7786_v52, %v7785_v4  ;;  %v7892_v13 = vpop.f32.mrb[5].mxu0  ;;  %v7788_v8 = vpop.f32.mrb[250].mxu1 }
 0x5c3   : > { %v7893_v45 = vadd.f32 %v7892_v13, %v7891_v57  ;;  %v7894_v63 = vpop.f32.mrb[6].mxu0  ;;  %v7789_v48 = vpop.f32.mrb[251].mxu1  ;;  %v4937_v13 = vpack.c.bf16 %v4910_v22, %v4909_v15 }
 0x5c4   : > { %v7790_v31 = vadd.f32 %v7789_v48, %v7788_v8  ;;  %v7895_v19 = vpop.f32.mrb[7].mxu0  ;;  %v5599_v16 = vadd.f32 %v7787_v37, %v10786_v49 }
 0x5c5   : > { %v10818_v43 = vadd.f32 %v7893_v45, %v5591_v40  ;;  %v7896_v38 = vadd.f32 %v7895_v19, %v7894_v63  ;;  %6007 = vmatmul.mubr.bf16.gmra.mrb[100].mxu1 %v4899_v29 }
 0x5c6   : > { %6160 = vmatmul.mubr.bf16.gmra.mrb[112].mxu0 %v10730_v41  ;;  %8393 = vmatprep.mubr.bf16.mxu1 %v4933_v34  ;;  %v5602_v26 = vadd.f32 %v7790_v31, %v10786_v49  ;;  %v4912_v31 = vld [vmem:[#allocation3 + $0xb2] sm:$0xff] }
 0x5c7   : > { %v10821_v44 = vadd.f32 %v7896_v38, %v5594_v14  ;;  %6167 = vmatprep.mubr.bf16.mxu0 %v4900_v10  ;;  %v4911_v10 = vld [vmem:[#allocation3 + $0xaa] sm:$0xff]  ;;  %v4913_v14 = vld [vmem:[#allocation3 + $0xc2] sm:$0xff] }
 0x5c8   : > { %v7791_v5 = vpop.f32.mrb[252].mxu1  ;;  %v4914_v38 = vld [vmem:[#allocation3 + $0xca] sm:$0xff]  ;;  %v4938_v61 = vpack.c.bf16 %v4912_v31, %v4911_v10 }
 0x5c9   : > { %v7897_v2 = vpop.f32.mrb[8].mxu0  ;;  %v7792_v24 = vpop.f32.mrb[253].mxu1 }
 0x5ca   : > { %v7793_v30 = vadd.f32 %v7792_v24, %v7791_v5  ;;  %v7898_v0 = vpop.f32.mrb[9].mxu0  ;;  %v7794_v55 = vpop.f32.mrb[254].mxu1 }
 0x5cb   : > { %v7899_v41 = vadd.f32 %v7898_v0, %v7897_v2  ;;  %v7900_v35 = vpop.f32.mrb[10].mxu0  ;;  %v7795_v58 = vpop.f32.mrb[255].mxu1 }
 0x5cc   : > { %v7796_v46 = vadd.f32 %v7795_v58, %v7794_v55  ;;  %v7901_v27 = vpop.f32.mrb[11].mxu0  ;;  %v5607_v62 = vadd.f32 %v7793_v30, %v10786_v49  ;;  %v4939_v55 = vpack.c.bf16 %v4914_v38, %v4913_v14  ;;  %v4915_v58 = vld [vmem:[#allocation3 + $0xda] sm:$0xff] }
 0x5cd   : > { %v10825_v50 = vadd.f32 %v7899_v41, %v5599_v16  ;;  %v7902_v9 = vadd.f32 %v7901_v27, %v7900_v35  ;;  %8394 = vmatmul.mubr.bf16.vlgmr.msra.gmra.mrb[104].mxu1 %v4934_v60  ;;  %v4916_v60 = vld [vmem:[#allocation3 + $0xe2] sm:$0xff] }
 0x5ce   : > { %6168 = vmatmul.mubr.bf16.gmra.mrb[116].mxu0 %v4852_v23  ;;  %8397 = vmatprep.mubr.bf16.mxu1 %v4935_v12  ;;  %v5610_v8 = vadd.f32 %v7796_v46, %v10786_v49  ;;  %v4917_v12 = vld [vmem:[#allocation3 + $0xf2] sm:$0xff]  ;;  %v4940_v22 = vpack.c.bf16 %v4916_v60, %v4915_v58  ;;  %v4926_v60 = vld [vmem:[#allocation3 + $0x15a] sm:$0xff] }
 0x5cf   : > { %v10827_v1 = vadd.f32 %v7902_v9, %v5602_v26  ;;  %v4918_v26 = vld [vmem:[#allocation3 + $0xfa] sm:$0xff]  ;;  %v4925_v58 = vld [vmem:[#allocation3 + $0x152] sm:$0xff] }
 0x5d0   : > { %v7797_v28 = vpop.f32.mrb[0].mxu1 }
 0x5d1   : > { %v7903_v20 = vpop.f32.mrb[12].mxu0  ;;  %v7798_v54 = vpop.f32.mrb[1].mxu1 }
 0x5d2   : > { %v7799_v3 = vadd.f32 %v7798_v54, %v7797_v28  ;;  %v7904_v29 = vpop.f32.mrb[13].mxu0  ;;  %v7800_v4 = vpop.f32.mrb[2].mxu1 }
 0x5d3   : > { %v7905_v53 = vadd.f32 %v7904_v29, %v7903_v20  ;;  %v7906_v57 = vpop.f32.mrb[14].mxu0  ;;  %v7801_v52 = vpop.f32.mrb[3].mxu1 }
 0x5d4   : > { %v7802_v17 = vadd.f32 %v7801_v52, %v7800_v4  ;;  %v7907_v37 = vpop.f32.mrb[15].mxu0  ;;  %v5615_v25 = vadd.f32 %v7799_v3, %v10786_v49  ;;  %v4941_v4 = vpack.c.bf16 %v4918_v26, %v4917_v12 }
 0x5d5   : > { %v10831_v40 = vadd.f32 %v7905_v53, %v5607_v62  ;;  %v7908_v45 = vadd.f32 %v7907_v37, %v7906_v57  ;;  %8398 = vmatmul.mubr.bf16.gmra.mrb[108].mxu1 %v4936_v32  ;;  %v4920_v37 = vld [vmem:[#allocation3 + $0x112] sm:$0xff] }
 0x5d6   : > { %8401 = vmatprep.mubr.bf16.mxu1 %v4937_v13  ;;  %v5618_v33 = vadd.f32 %v7802_v17, %v10786_v49  ;;  %v4919_v17 = vld [vmem:[#allocation3 + $0x10a] sm:$0xff] }
 0x5d7   : > { %v10833_v63 = vadd.f32 %v7908_v45, %v5610_v8  ;;  %v4921_v45 = vld [vmem:[#allocation3 + $0x122] sm:$0xff] }
 0x5d8   : > { %v7803_v48 = vpop.f32.mrb[4].mxu1 }
 0x5d9   : > { %v7909_v19 = vpop.f32.mrb[16].mxu0  ;;  %v7804_v34 = vpop.f32.mrb[5].mxu1 }
 0x5da   : > { %v7805_v36 = vadd.f32 %v7804_v34, %v7803_v48  ;;  %v7910_v5 = vpop.f32.mrb[17].mxu0  ;;  %v7806_v47 = vpop.f32.mrb[6].mxu1  ;;  %v4922_v48 = vld [vmem:[#allocation3 + $0x12a] sm:$0xff] }
 0x5db   : > { %v7911_v2 = vadd.f32 %v7910_v5, %v7909_v19  ;;  %v7912_v24 = vpop.f32.mrb[18].mxu0  ;;  %v7807_v56 = vpop.f32.mrb[7].mxu1  ;;  %v4942_v5 = vpack.c.bf16 %v4920_v37, %v4919_v17 }
 0x5dc   : > { %v7808_v30 = vadd.f32 %v7807_v56, %v7806_v47  ;;  %v7913_v0 = vpop.f32.mrb[19].mxu0  ;;  %v5623_v51 = vadd.f32 %v7805_v36, %v10786_v49 }
 0x5dd   : > { %v10837_v23 = vadd.f32 %v7911_v2, %v5615_v25  ;;  %v7914_v16 = vadd.f32 %v7913_v0, %v7912_v24  ;;  %8402 = vmatmul.mubr.bf16.gmra.mrb[112].mxu1 %v4938_v61  ;;  %v4943_v2 = vpack.c.bf16 %v4922_v48, %v4921_v45 }
 0x5de   : > { %8405 = vmatprep.mubr.bf16.mxu1 %v4939_v55  ;;  %v5626_v62 = vadd.f32 %v7808_v30, %v10786_v49  ;;  %v4923_v55 = vld [vmem:[#allocation3 + $0x13a] sm:$0xff] }
 0x5df   : > { %v10839_v41 = vadd.f32 %v7914_v16, %v5618_v33  ;;  %v4924_v33 = vld [vmem:[#allocation3 + $0x142] sm:$0xff] }
 0x5e0   : > { %v7809_v35 = vpop.f32.mrb[8].mxu1 }
 0x5e1   : > { %v7915_v46 = vpop.f32.mrb[20].mxu0  ;;  %v7810_v27 = vpop.f32.mrb[9].mxu1 }
 0x5e2   : > { %v7811_v9 = vadd.f32 %v7810_v27, %v7809_v35  ;;  %v7916_v28 = vpop.f32.mrb[21].mxu0  ;;  %v7812_v11 = vpop.f32.mrb[10].mxu1 }
 0x5e3   : > { %v7917_v20 = vadd.f32 %v7916_v28, %v7915_v46  ;;  %v7918_v54 = vpop.f32.mrb[22].mxu0  ;;  %v7813_v15 = vpop.f32.mrb[11].mxu1 }
 0x5e4   : > { %v7814_v3 = vadd.f32 %v7813_v15, %v7812_v11  ;;  %v7919_v29 = vpop.f32.mrb[23].mxu0  ;;  %v5631_v34 = vadd.f32 %v7811_v9, %v10786_v49  ;;  %v4945_v15 = vpack.c.bf16 %v4926_v60, %v4925_v58 }
 0x5e5   : > { %v10843_v53 = vadd.f32 %v7917_v20, %v5623_v51  ;;  %v7920_v57 = vadd.f32 %v7919_v29, %v7918_v54  ;;  %8406 = vmatmul.mubr.bf16.gmra.mrb[116].mxu1 %v4940_v22  ;;  %v4944_v51 = vpack.c.bf16 %v4924_v33, %v4923_v55 }
 0x5e6   : > { %8409 = vmatprep.mubr.bf16.mxu1 %v4941_v4  ;;  %v5634_v24 = vadd.f32 %v7814_v3, %v10786_v49 }
 0x5e7   : > { %v10845_v52 = vadd.f32 %v7920_v57, %v5626_v62  ;;  %v4927_v57 = vld [vmem:[#allocation3 + $0x16a] sm:$0xff] }
 0x5e8   : > { %v7815_v32 = vpop.f32.mrb[12].mxu1 }
 0x5e9   : > { %v7921_v13 = vpop.f32.mrb[24].mxu0  ;;  %v7816_v8 = vpop.f32.mrb[13].mxu1 }
 0x5ea   : > { %v7817_v10 = vadd.f32 %v7816_v8, %v7815_v32  ;;  %v7922_v31 = vpop.f32.mrb[25].mxu0  ;;  %v7818_v19 = vpop.f32.mrb[14].mxu1  ;;  %v4928_v32 = vld [vmem:[#allocation3 + $0x172] sm:$0xff] }
 0x5eb   : > { %v7923_v14 = vadd.f32 %v7922_v31, %v7921_v13  ;;  %v7924_v38 = vpop.f32.mrb[26].mxu0  ;;  %v7819_v36 = vpop.f32.mrb[15].mxu1 }
 0x5ec   : > { %v7820_v47 = vadd.f32 %v7819_v36, %v7818_v19  ;;  %v7925_v25 = vpop.f32.mrb[27].mxu0  ;;  %v5639_v26 = vadd.f32 %v7817_v10, %v10786_v49 }
 0x5ed   : > { %v10849_v56 = vadd.f32 %v7923_v14, %v5631_v34  ;;  %v7926_v61 = vadd.f32 %v7925_v25, %v7924_v38  ;;  %8410 = vmatmul.mubr.bf16.gmra.mrb[120].mxu1 %v4942_v5  ;;  %v4946_v34 = vpack.c.bf16 %v4928_v32, %v4927_v57  ;;  %v4931_v25 = vld [vmem:[#allocation3 + $0x19a] sm:$0xff] }
 0x5ee   : > { %8413 = vmatprep.mubr.bf16.mxu1 %v4943_v2  ;;  %v5642_v22 = vadd.f32 %v7820_v47, %v10786_v49  ;;  %v4932_v2 = vld [vmem:[#allocation3 + $0x1a2] sm:$0xff] }
 0x5ef   : > { %v10851_v30 = vadd.f32 %v7926_v61, %v5634_v24  ;;  %v4948_v33 = vpack.c.bf16 %v4932_v2, %v4931_v25 }
 0x5f0   : > { %v7821_v0 = vpop.f32.mrb[16].mxu1 }
 0x5f1   : > { %v7927_v16 = vpop.f32.mrb[28].mxu0  ;;  %v7822_v35 = vpop.f32.mrb[17].mxu1 }
 0x5f2   : > { %v7823_v46 = vadd.f32 %v7822_v35, %v7821_v0  ;;  %v7928_v27 = vpop.f32.mrb[29].mxu0  ;;  %v7824_v12 = vpop.f32.mrb[18].mxu1 }
 0x5f3   : > { %v7929_v9 = vadd.f32 %v7928_v27, %v7927_v16  ;;  %v7930_v28 = vpop.f32.mrb[30].mxu0  ;;  %v7825_v11 = vpop.f32.mrb[19].mxu1 }
 0x5f4   : > { %v7826_v20 = vadd.f32 %v7825_v11, %v7824_v12  ;;  %v7931_v54 = vpop.f32.mrb[31].mxu0  ;;  %v5647_v48 = vadd.f32 %v7823_v46, %v10786_v49 }
 0x5f5   : > { %v10855_v3 = vadd.f32 %v7929_v9, %v5639_v26  ;;  %v7932_v29 = vadd.f32 %v7931_v54, %v7930_v28  ;;  %8414 = vmatmul.mubr.bf16.gmra.mrb[124].mxu1 %v4944_v51 }
 0x5f6   : > { %8417 = vmatprep.mubr.bf16.mxu1 %v4945_v15  ;;  %v5650_v36 = vadd.f32 %v7826_v20, %v10786_v49 }
 0x5f7   : > { %v10857_v4 = vadd.f32 %v7932_v29, %v5642_v22 }
 0x5f8   : > { %v7827_v62 = vpop.f32.mrb[20].mxu1 }
 0x5f9   : > { %v7933_v17 = vpop.f32.mrb[32].mxu0  ;;  %v7828_v37 = vpop.f32.mrb[21].mxu1 }
 0x5fa   : > { %v7829_v13 = vadd.f32 %v7828_v37, %v7827_v62  ;;  %v7934_v8 = vpop.f32.mrb[33].mxu0  ;;  %v7830_v45 = vpop.f32.mrb[22].mxu1 }
 0x5fb   : > { %v7935_v10 = vadd.f32 %v7934_v8, %v7933_v17  ;;  %v7936_v31 = vpop.f32.mrb[34].mxu0  ;;  %v7831_v19 = vpop.f32.mrb[23].mxu1 }
 0x5fc   : > { %v7832_v14 = vadd.f32 %v7831_v19, %v7830_v45  ;;  %v7937_v38 = vpop.f32.mrb[35].mxu0  ;;  %v5655_v60 = vadd.f32 %v7829_v13, %v10786_v49 }
 0x5fd   : > { %v10861_v5 = vadd.f32 %v7935_v10, %v5647_v48  ;;  %v7938_v47 = vadd.f32 %v7937_v38, %v7936_v31  ;;  %8418 = vmatmul.mubr.bf16.gmra.mrb[128].mxu1 %v4946_v34 }
 0x5fe   : > { %8421 = vmatprep.mubr.bf16.mxu1 %v10807_v59  ;;  %v5658_v59 = vadd.f32 %v7832_v14, %v10786_v49 }
 0x5ff   : > { %v10864_v24 = vadd.f32 %v7938_v47, %v5650_v36 }
 0x600   : > { %v7833_v61 = vpop.f32.mrb[24].mxu1 }
 0x601   : > { %v7939_v0 = vpop.f32.mrb[36].mxu0  ;;  %v7834_v55 = vpop.f32.mrb[25].mxu1 }
 0x602   : > { %v7835_v16 = vadd.f32 %v7834_v55, %v7833_v61  ;;  %v7940_v35 = vpop.f32.mrb[37].mxu0  ;;  %v7836_v58 = vpop.f32.mrb[26].mxu1 }
 0x603   : > { %v7941_v46 = vadd.f32 %v7940_v35, %v7939_v0  ;;  %v7942_v27 = vpop.f32.mrb[38].mxu0  ;;  %v7837_v12 = vpop.f32.mrb[27].mxu1 }
 0x604   : > { %v7838_v26 = vadd.f32 %v7837_v12, %v7836_v58  ;;  %v7943_v9 = vpop.f32.mrb[39].mxu0  ;;  %v5663_v57 = vadd.f32 %v7835_v16, %v10786_v49 }
 0x605   : > { %v10868_v28 = vadd.f32 %v7941_v46, %v5655_v60  ;;  %v7944_v11 = vadd.f32 %v7943_v9, %v7942_v27  ;;  %8422 = vmatmul.mubr.bf16.gmra.mrb[132].mxu1 %v4948_v33 }
 0x606   : > { %v5666_v45 = vadd.f32 %v7838_v26, %v10786_v49 }
 0x607   : > { %v10870_v51 = vadd.f32 %v7944_v11, %v5658_v59 }
 0x608   : > { %v7839_v20 = vpop.f32.mrb[28].mxu1 }
 0x609   : > { %v7945_v54 = vpop.f32.mrb[40].mxu0  ;;  %v7840_v15 = vpop.f32.mrb[29].mxu1 }
 0x60a   : > { %v7841_v22 = vadd.f32 %v7840_v15, %v7839_v20  ;;  %v7946_v29 = vpop.f32.mrb[41].mxu0  ;;  %v7842_v62 = vpop.f32.mrb[30].mxu1 }
 0x60b   : > { %v7947_v32 = vadd.f32 %v7946_v29, %v7945_v54  ;;  %v7948_v17 = vpop.f32.mrb[42].mxu0  ;;  %v7843_v37 = vpop.f32.mrb[31].mxu1 }
 0x60c   : > { %v7844_v13 = vadd.f32 %v7843_v37, %v7842_v62  ;;  %v7949_v8 = vpop.f32.mrb[43].mxu0  ;;  %v5671_v25 = vadd.f32 %v7841_v22, %v10786_v49 }
 0x60d   : > { %v10874_v48 = vadd.f32 %v7947_v32, %v5663_v57  ;;  %v7950_v10 = vadd.f32 %v7949_v8, %v7948_v17 }
 0x60e   : > { %v5674_v16 = vadd.f32 %v7844_v13, %v10786_v49 }
 0x60f   : > { %v10876_v31 = vadd.f32 %v7950_v10, %v5666_v45 }
 0x610   : > { %v7845_v19 = vpop.f32.mrb[32].mxu1 }
 0x611   : > { %v7951_v34 = vpop.f32.mrb[44].mxu0  ;;  %v7846_v14 = vpop.f32.mrb[33].mxu1 }
 0x612   : > { %v7847_v38 = vadd.f32 %v7846_v14, %v7845_v19  ;;  %v7952_v36 = vpop.f32.mrb[45].mxu0  ;;  %v7848_v47 = vpop.f32.mrb[34].mxu1 }
 0x613   : > { %v7953_v2 = vadd.f32 %v7952_v36, %v7951_v34  ;;  %v7954_v61 = vpop.f32.mrb[46].mxu0  ;;  %v7849_v0 = vpop.f32.mrb[35].mxu1 }
 0x614   : > { %v7850_v55 = vadd.f32 %v7849_v0, %v7848_v47  ;;  %v7955_v33 = vpop.f32.mrb[47].mxu0  ;;  %v5679_v11 = vadd.f32 %v7847_v38, %v10786_v49 }
 0x615   : > { %v10880_v35 = vadd.f32 %v7953_v2, %v5671_v25  ;;  %v7956_v58 = vadd.f32 %v7955_v33, %v7954_v61 }
 0x616   : > { %v5682_v62 = vadd.f32 %v7850_v55, %v10786_v49 }
 0x617   : > { %v10882_v60 = vadd.f32 %v7956_v58, %v5674_v16 }
 0x618   : > { %v7851_v46 = vpop.f32.mrb[36].mxu1 }
 0x619   : > { %v7957_v27 = vpop.f32.mrb[48].mxu0  ;;  %v7852_v12 = vpop.f32.mrb[37].mxu1 }
 0x61a   : > { %v7853_v26 = vadd.f32 %v7852_v12, %v7851_v46  ;;  %v7958_v9 = vpop.f32.mrb[49].mxu0  ;;  %v7854_v59 = vpop.f32.mrb[38].mxu1 }
 0x61b   : > { %v7959_v20 = vadd.f32 %v7958_v9, %v7957_v27  ;;  %v7960_v54 = vpop.f32.mrb[50].mxu0  ;;  %v7855_v15 = vpop.f32.mrb[39].mxu1 }
 0x61c   : > { %v7856_v22 = vadd.f32 %v7855_v15, %v7854_v59  ;;  %v7961_v29 = vpop.f32.mrb[51].mxu0  ;;  %v5687_v34 = vadd.f32 %v7853_v26, %v10786_v49 }
 0x61d   : > { %v10886_v57 = vadd.f32 %v7959_v20, %v5679_v11  ;;  %v7962_v32 = vadd.f32 %v7961_v29, %v7960_v54 }
 0x61e   : > { %v5690_v61 = vadd.f32 %v7856_v22, %v10786_v49 }
 0x61f   : > { %v10888_v17 = vadd.f32 %v7962_v32, %v5682_v62 }
 0x620   : > { %v7985_v37 = vpop.f32.mrb[40].mxu1 }
 0x621   : > { %v7963_v13 = vpop.f32.mrb[52].mxu0  ;;  %v7986_v8 = vpop.f32.mrb[41].mxu1 }
 0x622   : > { %v7964_v45 = vpop.f32.mrb[53].mxu0  ;;  %v7987_v10 = vadd.f32 %v7986_v8, %v7985_v37  ;;  %v7988_v19 = vpop.f32.mrb[42].mxu1 }
 0x623   : > { %v7965_v14 = vadd.f32 %v7964_v45, %v7963_v13  ;;  %v7966_v38 = vpop.f32.mrb[54].mxu0  ;;  %v7989_v36 = vpop.f32.mrb[43].mxu1 }
 0x624   : > { %v5889_v47 = vadd.f32 %v7987_v10, %v10792_v39  ;;  %v7967_v25 = vpop.f32.mrb[55].mxu0  ;;  %v7990_v2 = vadd.f32 %v7989_v36, %v7988_v19 }
 0x625   : > { %v10893_v0 = vadd.f32 %v7965_v14, %v5687_v34  ;;  %v7968_v55 = vadd.f32 %v7967_v25, %v7966_v38 }
 0x626   : > { %v5892_v33 = vadd.f32 %v7990_v2, %v10796_v21 }
 0x627   : > { %v10896_v16 = vadd.f32 %v7968_v55, %v5690_v61 }
 0x628   : > { %v7991_v58 = vpop.f32.mrb[44].mxu1 }
 0x629   : > { %v8097_v46 = vpop.f32.mrb[56].mxu0  ;;  %v7992_v27 = vpop.f32.mrb[45].mxu1 }
 0x62a   : > { %v7993_v12 = vadd.f32 %v7992_v27, %v7991_v58  ;;  %v8098_v26 = vpop.f32.mrb[57].mxu0  ;;  %v7994_v9 = vpop.f32.mrb[46].mxu1 }
 0x62b   : > { %v8099_v59 = vadd.f32 %v8098_v26, %v8097_v46  ;;  %v8100_v11 = vpop.f32.mrb[58].mxu0  ;;  %v7995_v39 = vpop.f32.mrb[47].mxu1 }
 0x62c   : > { %v5897_v20 = vadd.f32 %v7993_v12, %v10800_v18  ;;  %v7996_v54 = vadd.f32 %v7995_v39, %v7994_v9  ;;  %v8101_v49 = vpop.f32.mrb[59].mxu0 }
 0x62d   : > { %v8102_v15 = vadd.f32 %v8101_v49, %v8100_v11  ;;  %v10899_v22 = vadd.f32 %v8099_v59, %v5889_v47 }
 0x62e   : > { %v5900_v21 = vadd.f32 %v7996_v54, %v10804_v42 }
 0x62f   : > { %v10902_v29 = vadd.f32 %v8102_v15, %v5892_v33 }
 0x630   : > { %v7997_v62 = vpop.f32.mrb[48].mxu1 }
 0x631   : > { %v8103_v32 = vpop.f32.mrb[60].mxu0  ;;  %v7998_v37 = vpop.f32.mrb[49].mxu1 }
 0x632   : > { %v7999_v13 = vadd.f32 %v7998_v37, %v7997_v62  ;;  %v8104_v8 = vpop.f32.mrb[61].mxu0  ;;  %v8000_v45 = vpop.f32.mrb[50].mxu1 }
 0x633   : > { %v8105_v10 = vadd.f32 %v8104_v8, %v8103_v32  ;;  %v8106_v19 = vpop.f32.mrb[62].mxu0  ;;  %v8001_v34 = vpop.f32.mrb[51].mxu1 }
 0x634   : > { %v5905_v18 = vadd.f32 %v7999_v13, %v10810_v7  ;;  %v8002_v14 = vadd.f32 %v8001_v34, %v8000_v45  ;;  %v8107_v38 = vpop.f32.mrb[63].mxu0 }
 0x635   : > { %v8108_v36 = vadd.f32 %v8107_v38, %v8106_v19  ;;  %v10905_v47 = vadd.f32 %v8105_v10, %v5897_v20 }
 0x636   : > { %v5908_v42 = vadd.f32 %v8002_v14, %v10814_v6 }
 0x637   : > { %v10908_v25 = vadd.f32 %v8108_v36, %v5900_v21 }
 0x638   : > { %v8003_v2 = vpop.f32.mrb[52].mxu1 }
 0x639   : > { %v8109_v61 = vpop.f32.mrb[64].mxu0  ;;  %v8004_v55 = vpop.f32.mrb[53].mxu1 }
 0x63a   : > { %v8005_v33 = vadd.f32 %v8004_v55, %v8003_v2  ;;  %v8110_v58 = vpop.f32.mrb[65].mxu0  ;;  %v8006_v46 = vpop.f32.mrb[54].mxu1 }
 0x63b   : > { %v8111_v27 = vadd.f32 %v8110_v58, %v8109_v61  ;;  %v8112_v12 = vpop.f32.mrb[66].mxu0  ;;  %v8007_v26 = vpop.f32.mrb[55].mxu1 }
 0x63c   : > { %v5913_v7 = vadd.f32 %v8005_v33, %v10818_v43  ;;  %v8008_v9 = vadd.f32 %v8007_v26, %v8006_v46  ;;  %v8113_v59 = vpop.f32.mrb[67].mxu0 }
 0x63d   : > { %v8114_v11 = vadd.f32 %v8113_v59, %v8112_v12  ;;  %v10911_v39 = vadd.f32 %v8111_v27, %v5905_v18 }
 0x63e   : > { %v5916_v6 = vadd.f32 %v8008_v9, %v10821_v44 }
 0x63f   : > { %v10914_v20 = vadd.f32 %v8114_v11, %v5908_v42 }
 0x640   : > { %v8009_v54 = vpop.f32.mrb[56].mxu1 }
 0x641   : > { %v8115_v49 = vpop.f32.mrb[68].mxu0  ;;  %v8010_v15 = vpop.f32.mrb[57].mxu1 }
 0x642   : > { %v8011_v21 = vadd.f32 %v8010_v15, %v8009_v54  ;;  %v8116_v62 = vpop.f32.mrb[69].mxu0  ;;  %v8012_v32 = vpop.f32.mrb[58].mxu1 }
 0x643   : > { %v8117_v37 = vadd.f32 %v8116_v62, %v8115_v49  ;;  %v8118_v13 = vpop.f32.mrb[70].mxu0  ;;  %v8013_v8 = vpop.f32.mrb[59].mxu1 }
 0x644   : > { %v5921_v43 = vadd.f32 %v8011_v21, %v10825_v50  ;;  %v8014_v45 = vadd.f32 %v8013_v8, %v8012_v32  ;;  %v8119_v10 = vpop.f32.mrb[71].mxu0 }
 0x645   : > { %v8120_v19 = vadd.f32 %v8119_v10, %v8118_v13  ;;  %v10917_v34 = vadd.f32 %v8117_v37, %v5913_v7 }
 0x646   : > { %v5924_v44 = vadd.f32 %v8014_v45, %v10827_v1 }
 0x647   : > { %v10920_v18 = vadd.f32 %v8120_v19, %v5916_v6 }
 0x648   : > { %v8015_v14 = vpop.f32.mrb[60].mxu1 }
 0x649   : > { %v8121_v38 = vpop.f32.mrb[72].mxu0  ;;  %v8016_v36 = vpop.f32.mrb[61].mxu1 }
 0x64a   : > { %v8017_v42 = vadd.f32 %v8016_v36, %v8015_v14  ;;  %v8122_v2 = vpop.f32.mrb[73].mxu0  ;;  %v8018_v61 = vpop.f32.mrb[62].mxu1 }
 0x64b   : > { %v8123_v55 = vadd.f32 %v8122_v2, %v8121_v38  ;;  %v8124_v33 = vpop.f32.mrb[74].mxu0  ;;  %v8019_v58 = vpop.f32.mrb[63].mxu1 }
 0x64c   : > { %v5929_v50 = vadd.f32 %v8017_v42, %v10831_v40  ;;  %v8020_v46 = vadd.f32 %v8019_v58, %v8018_v61  ;;  %v8125_v27 = vpop.f32.mrb[75].mxu0 }
 0x64d   : > { %v8126_v12 = vadd.f32 %v8125_v27, %v8124_v33  ;;  %v10923_v26 = vadd.f32 %v8123_v55, %v5921_v43 }
 0x64e   : > { %v5932_v1 = vadd.f32 %v8020_v46, %v10833_v63 }
 0x64f   : > { %v10926_v7 = vadd.f32 %v8126_v12, %v5924_v44 }
 0x650   : > { %v8021_v9 = vpop.f32.mrb[64].mxu1 }
 0x651   : > { %v8127_v59 = vpop.f32.mrb[76].mxu0  ;;  %v8022_v11 = vpop.f32.mrb[65].mxu1 }
 0x652   : > { %v8023_v6 = vadd.f32 %v8022_v11, %v8021_v9  ;;  %v8128_v54 = vpop.f32.mrb[77].mxu0  ;;  %v8024_v49 = vpop.f32.mrb[66].mxu1 }
 0x653   : > { %v8129_v15 = vadd.f32 %v8128_v54, %v8127_v59  ;;  %v8130_v21 = vpop.f32.mrb[78].mxu0  ;;  %v8025_v62 = vpop.f32.mrb[67].mxu1 }
 0x654   : > { %v5937_v40 = vadd.f32 %v8023_v6, %v10837_v23  ;;  %v8026_v32 = vadd.f32 %v8025_v62, %v8024_v49  ;;  %v8131_v37 = vpop.f32.mrb[79].mxu0 }
 0x655   : > { %v8132_v13 = vadd.f32 %v8131_v37, %v8130_v21  ;;  %v10929_v8 = vadd.f32 %v8129_v15, %v5929_v50 }
 0x656   : > { %v5940_v63 = vadd.f32 %v8026_v32, %v10839_v41 }
 0x657   : > { %v10932_v43 = vadd.f32 %v8132_v13, %v5932_v1 }
 0x658   : > { %v8027_v45 = vpop.f32.mrb[68].mxu1 }
 0x659   : > { %v8133_v10 = vpop.f32.mrb[80].mxu0  ;;  %v8028_v19 = vpop.f32.mrb[69].mxu1 }
 0x65a   : > { %v8029_v44 = vadd.f32 %v8028_v19, %v8027_v45  ;;  %v8134_v14 = vpop.f32.mrb[81].mxu0  ;;  %v8030_v38 = vpop.f32.mrb[70].mxu1 }
 0x65b   : > { %v8135_v36 = vadd.f32 %v8134_v14, %v8133_v10  ;;  %v8136_v42 = vpop.f32.mrb[82].mxu0  ;;  %v8031_v2 = vpop.f32.mrb[71].mxu1 }
 0x65c   : > { %v5945_v23 = vadd.f32 %v8029_v44, %v10843_v53  ;;  %v8032_v61 = vadd.f32 %v8031_v2, %v8030_v38  ;;  %v8137_v55 = vpop.f32.mrb[83].mxu0 }
 0x65d   : > { %v8138_v33 = vadd.f32 %v8137_v55, %v8136_v42  ;;  %v10935_v58 = vadd.f32 %v8135_v36, %v5937_v40 }
 0x65e   : > { %v5948_v41 = vadd.f32 %v8032_v61, %v10845_v52 }
 0x65f   : > { %v10938_v50 = vadd.f32 %v8138_v33, %v5940_v63 }
 0x660   : > { %v8033_v46 = vpop.f32.mrb[72].mxu1 }
 0x661   : > { %v8139_v27 = vpop.f32.mrb[84].mxu0  ;;  %v8034_v12 = vpop.f32.mrb[73].mxu1 }
 0x662   : > { %v8035_v1 = vadd.f32 %v8034_v12, %v8033_v46  ;;  %v8140_v9 = vpop.f32.mrb[85].mxu0  ;;  %v8036_v59 = vpop.f32.mrb[74].mxu1 }
 0x663   : > { %v8141_v11 = vadd.f32 %v8140_v9, %v8139_v27  ;;  %v8142_v6 = vpop.f32.mrb[86].mxu0  ;;  %v8037_v54 = vpop.f32.mrb[75].mxu1 }
 0x664   : > { %v5953_v53 = vadd.f32 %v8035_v1, %v10849_v56  ;;  %v8038_v49 = vadd.f32 %v8037_v54, %v8036_v59  ;;  %v8143_v15 = vpop.f32.mrb[87].mxu0 }
 0x665   : > { %v8144_v21 = vadd.f32 %v8143_v15, %v8142_v6  ;;  %v10941_v62 = vadd.f32 %v8141_v11, %v5945_v23 }
 0x666   : > { %v5956_v52 = vadd.f32 %v8038_v49, %v10851_v30 }
 0x667   : > { %v10944_v40 = vadd.f32 %v8144_v21, %v5948_v41 }
 0x668   : > { %v8039_v32 = vpop.f32.mrb[76].mxu1 }
 0x669   : > { %v8145_v37 = vpop.f32.mrb[88].mxu0  ;;  %v8040_v13 = vpop.f32.mrb[77].mxu1 }
 0x66a   : > { %v8041_v63 = vadd.f32 %v8040_v13, %v8039_v32  ;;  %v8146_v45 = vpop.f32.mrb[89].mxu0  ;;  %v8042_v10 = vpop.f32.mrb[78].mxu1 }
 0x66b   : > { %v8147_v19 = vadd.f32 %v8146_v45, %v8145_v37  ;;  %v8148_v44 = vpop.f32.mrb[90].mxu0  ;;  %v8043_v14 = vpop.f32.mrb[79].mxu1 }
 0x66c   : > { %v5961_v56 = vadd.f32 %v8041_v63, %v10855_v3  ;;  %v8044_v38 = vadd.f32 %v8043_v14, %v8042_v10  ;;  %v8149_v36 = vpop.f32.mrb[91].mxu0 }
 0x66d   : > { %v8150_v42 = vadd.f32 %v8149_v36, %v8148_v44  ;;  %v10947_v2 = vadd.f32 %v8147_v19, %v5953_v53 }
 0x66e   : > { %v5964_v30 = vadd.f32 %v8044_v38, %v10857_v4 }
 0x66f   : > { %v10950_v23 = vadd.f32 %v8150_v42, %v5956_v52 }
 0x670   : > { %v8045_v61 = vpop.f32.mrb[80].mxu1 }
 0x671   : > { %v8151_v55 = vpop.f32.mrb[92].mxu0  ;;  %v8046_v33 = vpop.f32.mrb[81].mxu1 }
 0x672   : > { %v8047_v41 = vadd.f32 %v8046_v33, %v8045_v61  ;;  %v8152_v46 = vpop.f32.mrb[93].mxu0  ;;  %v8048_v27 = vpop.f32.mrb[82].mxu1 }
 0x673   : > { %v8153_v12 = vadd.f32 %v8152_v46, %v8151_v55  ;;  %v8154_v1 = vpop.f32.mrb[94].mxu0  ;;  %v8049_v9 = vpop.f32.mrb[83].mxu1 }
 0x674   : > { %v5969_v3 = vadd.f32 %v8047_v41, %v10861_v5  ;;  %v8050_v59 = vadd.f32 %v8049_v9, %v8048_v27  ;;  %v8155_v11 = vpop.f32.mrb[95].mxu0 }
 0x675   : > { %v8156_v6 = vadd.f32 %v8155_v11, %v8154_v1  ;;  %v10953_v54 = vadd.f32 %v8153_v12, %v5961_v56 }
 0x676   : > { %v5972_v4 = vadd.f32 %v8050_v59, %v10864_v24 }
 0x677   : > { %v10956_v53 = vadd.f32 %v8156_v6, %v5964_v30 }
 0x678   : > { %v8051_v49 = vpop.f32.mrb[84].mxu1 }
 0x679   : > { %v8157_v15 = vpop.f32.mrb[96].mxu0  ;;  %v8052_v21 = vpop.f32.mrb[85].mxu1 }
 0x67a   : > { %v8053_v52 = vadd.f32 %v8052_v21, %v8051_v49  ;;  %v8158_v32 = vpop.f32.mrb[97].mxu0  ;;  %v8054_v37 = vpop.f32.mrb[86].mxu1 }
 0x67b   : > { %v8159_v13 = vadd.f32 %v8158_v32, %v8157_v15  ;;  %v8160_v63 = vpop.f32.mrb[98].mxu0  ;;  %v8055_v45 = vpop.f32.mrb[87].mxu1 }
 0x67c   : > { %v5977_v5 = vadd.f32 %v8053_v52, %v10868_v28  ;;  %v8056_v10 = vadd.f32 %v8055_v45, %v8054_v37  ;;  %v8161_v19 = vpop.f32.mrb[99].mxu0  ;;  %v10967_v28 = vld [vmem:[%s11150_s9] sm:$0xff]  }
 0x67d   : > { %v8162_v44 = vadd.f32 %v8161_v19, %v8160_v63  ;;  %v10959_v14 = vadd.f32 %v8159_v13, %v5969_v3  ;;  %8233 = vmatprep.mubr.msk.bf16.mxu0 %vm426_vm0, %v10967_v28 }
 0x67e   : > { %v5980_v24 = vadd.f32 %v8056_v10, %v10870_v51 }
 0x67f   : > { %v10962_v56 = vadd.f32 %v8162_v44, %v5972_v4 }
 0x680   : > { %v8057_v38 = vpop.f32.mrb[88].mxu1 }
 0x681   : > { %v8163_v36 = vpop.f32.mrb[100].mxu0  ;;  %v8058_v42 = vpop.f32.mrb[89].mxu1 }
 0x682   : > { %v8059_v30 = vadd.f32 %v8058_v42, %v8057_v38  ;;  %v8164_v61 = vpop.f32.mrb[101].mxu0  ;;  %v8060_v55 = vpop.f32.mrb[90].mxu1 }
 0x683   : > { %v8165_v33 = vadd.f32 %v8164_v61, %v8163_v36  ;;  %v8166_v41 = vpop.f32.mrb[102].mxu0  ;;  %v8061_v46 = vpop.f32.mrb[91].mxu1 }
 0x684   : > { %v5985_v27 = vadd.f32 %v8059_v30, %v10874_v48  ;;  %v8062_v12 = vadd.f32 %v8061_v46, %v8060_v55  ;;  %v8167_v51 = vpop.f32.mrb[103].mxu0 }
 0x685   : > { %v8168_v1 = vadd.f32 %v8167_v51, %v8166_v41  ;;  %v10970_v9 = vadd.f32 %v8165_v33, %v5977_v5 }
 0x686   : > { %v5988_v3 = vadd.f32 %v8062_v12, %v10876_v31 }
 0x687   : > { %v10975_v59 = vadd.f32 %v8168_v1, %v5980_v24 }
 0x688   : > { %v8063_v11 = vpop.f32.mrb[92].mxu1 }
 0x689   : > { %v8169_v6 = vpop.f32.mrb[104].mxu0  ;;  %v8064_v4 = vpop.f32.mrb[93].mxu1 }
 0x68a   : > { %v8065_v49 = vadd.f32 %v8064_v4, %v8063_v11  ;;  %v8170_v15 = vpop.f32.mrb[105].mxu0  ;;  %v8066_v21 = vpop.f32.mrb[94].mxu1 }
 0x68b   : > { %v8171_v52 = vadd.f32 %v8170_v15, %v8169_v6  ;;  %v8172_v48 = vpop.f32.mrb[106].mxu0  ;;  %v8067_v32 = vpop.f32.mrb[95].mxu1 }
 0x68c   : > { %v5993_v37 = vadd.f32 %v8065_v49, %v10880_v35  ;;  %v8068_v13 = vadd.f32 %v8067_v32, %v8066_v21  ;;  %v8173_v63 = vpop.f32.mrb[107].mxu0 }
 0x68d   : > { %v8174_v45 = vadd.f32 %v8173_v63, %v8172_v48  ;;  %v10978_v5 = vadd.f32 %v8171_v52, %v5985_v27 }
 0x68e   : > { %v5996_v31 = vadd.f32 %v8068_v13, %v10882_v60 }
 0x68f   : > { %v10981_v10 = vadd.f32 %v8174_v45, %v5988_v3 }
 0x690   : > { %v8069_v19 = vpop.f32.mrb[96].mxu1 }
 0x691   : > { %v8175_v44 = vpop.f32.mrb[108].mxu0  ;;  %v8070_v24 = vpop.f32.mrb[97].mxu1 }
 0x692   : > { %v8071_v38 = vadd.f32 %v8070_v24, %v8069_v19  ;;  %v8176_v36 = vpop.f32.mrb[109].mxu0  ;;  %v8072_v42 = vpop.f32.mrb[98].mxu1 }
 0x693   : > { %v8177_v30 = vadd.f32 %v8176_v36, %v8175_v44  ;;  %v8178_v61 = vpop.f32.mrb[110].mxu0  ;;  %v8073_v55 = vpop.f32.mrb[99].mxu1  ;;  %v6393_v36 = vld [vmem:[%s11151_s10] sm:$0xff] }
 0x694   : > { %v6001_v35 = vadd.f32 %v8071_v38, %v10886_v57  ;;  %v8074_v33 = vadd.f32 %v8073_v55, %v8072_v42  ;;  %v8179_v41 = vpop.f32.mrb[111].mxu0  ;;  %v8672_v55 = vmov 0  }
 0x695   : > { %v8180_v46 = vadd.f32 %v8179_v41, %v8178_v61  ;;  %v10984_v27 = vadd.f32 %v8177_v30, %v5993_v37  ;;  %8462 = vset.pattern.permute.xlu1 %v8672_v55  ;;  %8461 = vset.pattern.permute.xlu0 %v8672_v55 }
 0x696   : > { %v6004_v60 = vadd.f32 %v8074_v33, %v10888_v17  ;;  %6403 = vperm.xlu0 %8461, %v6393_v36  }
 0x697   : > { %v10987_v12 = vadd.f32 %v8180_v46, %v5996_v31 }
 0x698   : > { %v8075_v51 = vpop.f32.mrb[100].mxu1 }
 0x699   : > { %v8181_v1 = vpop.f32.mrb[112].mxu0  ;;  %v8076_v3 = vpop.f32.mrb[101].mxu1 }
 0x69a   : > { %v8077_v11 = vadd.f32 %v8076_v3, %v8075_v51  ;;  %v8182_v6 = vpop.f32.mrb[113].mxu0  ;;  %v8078_v4 = vpop.f32.mrb[102].mxu1 }
 0x69b   : > { %v8183_v49 = vadd.f32 %v8182_v6, %v8181_v1  ;;  %v8184_v15 = vpop.f32.mrb[114].mxu0  ;;  %v8079_v21 = vpop.f32.mrb[103].mxu1 }
 0x69c   : > { %v6009_v57 = vadd.f32 %v8077_v11, %v10893_v0  ;;  %v8080_v52 = vadd.f32 %v8079_v21, %v8078_v4  ;;  %v8185_v48 = vpop.f32.mrb[115].mxu0  ;;  %v6394_v0 = vld [vmem:[%s11151_s10 + $0x8] sm:$0xff] }
 0x69d   : > { %v8186_v32 = vadd.f32 %v8185_v48, %v8184_v15  ;;  %v10990_v37 = vadd.f32 %v8183_v49, %v6001_v35  ;;  %6408 = vperm.xlu1 %8462, %v6394_v0   ;;  %v6397_v15 = vld [vmem:[%s11151_s10 + $0x20] sm:$0xff]  ;;  %v6398_v21 = vld [vmem:[%s11151_s10 + $0x28] sm:$0xff] }
 0x69e   : > { %v6012_v17 = vadd.f32 %v8080_v52, %v10896_v16 }
 0x69f   : > { %v10993_v13 = vadd.f32 %v8186_v32, %v6004_v60  ;;  %v6395_v60 = vld [vmem:[%s11151_s10 + $0x10] sm:$0xff] }
 0x6a0   : > { %v8395_v63 = vpop.f32.mrb[104].mxu1 }
 0x6a1   : > { %v8187_v45 = vpop.f32.mrb[116].mxu0  ;;  %v6219_v31 = vadd.f32 %v8395_v63, %v10905_v47  ;;  %v6210_v19 = vpop.f32.mrb[105].mxu1  ;;  %6413 = vperm.xlu1 %8462, %v6395_v60  }
 0x6a2   : > { %v8188_v44 = vpop.f32.mrb[117].mxu0  ;;  %v6211_v24 = vadd.f32 %v6210_v19, %v10899_v22  ;;  %v8396_v38 = vpop.f32.mrb[106].mxu1 }
 0x6a3   : > { %v8189_v16 = vadd.f32 %v8188_v44, %v8187_v45  ;;  %v8190_v42 = vpop.f32.mrb[118].mxu0  ;;  %v6222_v30 = vadd.f32 %v8396_v38, %v10908_v25  ;;  %v6213_v61 = vpop.f32.mrb[107].mxu1  ;;  %v6339_v35 = vmax.f32 %v6219_v31, 0.0  ;;  %v6396_v25 = vld [vmem:[%s11151_s10 + $0x18] sm:$0xff]  ;;  %v6399_v45 = vld [vmem:[%s11151_s10 + $0x30] sm:$0xff] }
 0x6a4   : > { %v8191_v47 = vpop.f32.mrb[119].mxu0  ;;  %v6214_v22 = vadd.f32 %v6213_v61, %v10902_v29  ;;  %v6337_v51 = vmax.f32 %v6211_v24, 0.0  ;;  %6418 = vperm.xlu0 %8461, %v6396_v25   ;;  %v6400_v31 = vld [vmem:[%s11151_s10 + $0x38] sm:$0xff] }
 0x6a5   : > { %v6340_v33 = vmax.f32 %v6222_v30, 0.0  ;;  %v8192_v41 = vadd.f32 %v8191_v47, %v8190_v42  ;;  %v11005_v46 = vadd.f32 %v8189_v16, %v6009_v57  ;;  %6423 = vperm.xlu1 %8462, %v6397_v15  }
 0x6a6   : > { %v6338_v1 = vmax.f32 %v6214_v22, 0.0 }
 0x6a7   : > { %v11013_v3 = vpack.c.bf16 %v6340_v33, %v6339_v35  ;;  %v11015_v29 = vadd.f32 %v8192_v41, %v6012_v17 }
 0x6a8   : > { %v11017_v11 = vpack.c.bf16 %v6338_v1, %v6337_v51  ;;  %v8399_v6 = vpop.f32.mrb[108].mxu1  ;;  %6428 = vperm.xlu0 %8461, %v6398_v21  }
 0x6a9   : > { %v6235_v4 = vadd.f32 %v8399_v6, %v10917_v34  ;;  %v6226_v49 = vpop.f32.mrb[109].mxu1  ;;  %6433 = vperm.xlu1 %8462, %v6399_v45  }
 0x6aa   : > { %v6227_v57 = vadd.f32 %v6226_v49, %v10911_v39  ;;  %v8400_v52 = vpop.f32.mrb[110].mxu1 }
 0x6ab   : > { %v6238_v48 = vadd.f32 %v8400_v52, %v10920_v18  ;;  %v6229_v32 = vpop.f32.mrb[111].mxu1  ;;  %v6343_v34 = vmax.f32 %v6235_v4, 0.0 }
 0x6ac   : > { %v6230_v17 = vadd.f32 %v6229_v32, %v10914_v20  ;;  %v6341_v19 = vmax.f32 %v6227_v57, 0.0  ;;  %6438 = vperm.xlu0 %8461, %v6400_v31  }
 0x6ad   : > { %v6344_v63 = vmax.f32 %v6238_v48, 0.0 }
 0x6ae   : > { %v6342_v39 = vmax.f32 %v6230_v17, 0.0 }
 0x6af   : > { %v11035_v44 = vpack.c.bf16 %v6344_v63, %v6343_v34 }
 0x6b0   : > { %v11037_v18 = vpack.c.bf16 %v6342_v39, %v6341_v19  ;;  %v8403_v24 = vpop.f32.mrb[112].mxu1 }
 0x6b1   : > { %v6251_v20 = vadd.f32 %v8403_v24, %v10929_v8  ;;  %v6242_v38 = vpop.f32.mrb[113].mxu1 }
 0x6b2   : > { %v6243_v0 = vadd.f32 %v6242_v38, %v10923_v26  ;;  %v8404_v36 = vpop.f32.mrb[114].mxu1 }
 0x6b3   : > { %v6254_v16 = vadd.f32 %v8404_v36, %v10932_v43  ;;  %v6245_v42 = vpop.f32.mrb[115].mxu1  ;;  %v6347_v61 = vmax.f32 %v6251_v20, 0.0 }
 0x6b4   : > { %v6246_v30 = vadd.f32 %v6245_v42, %v10926_v7  ;;  %v6345_v47 = vmax.f32 %v6243_v0, 0.0 }
 0x6b5   : > { %v6348_v55 = vmax.f32 %v6254_v16, 0.0 }
 0x6b6   : > { %v6346_v22 = vmax.f32 %v6246_v30, 0.0 }
 0x6b7   : > { %v11043_v35 = vpack.c.bf16 %v6348_v55, %v6347_v61 }
 0x6b8   : > { %v11045_v33 = vpack.c.bf16 %v6346_v22, %v6345_v47  ;;  %v8407_v41 = vpop.f32.mrb[116].mxu1 }
 0x6b9   : > { %v6267_v8 = vadd.f32 %v8407_v41, %v10941_v62  ;;  %v6258_v60 = vpop.f32.mrb[117].mxu1 }
 0x6ba   : > { %v6259_v26 = vadd.f32 %v6258_v60, %v10935_v58  ;;  %v8408_v25 = vpop.f32.mrb[118].mxu1 }
 0x6bb   : > { %v6270_v43 = vadd.f32 %v8408_v25, %v10944_v40  ;;  %v6261_v51 = vpop.f32.mrb[119].mxu1  ;;  %v6351_v1 = vmax.f32 %v6267_v8, 0.0 }
 0x6bc   : > { %v6262_v7 = vadd.f32 %v6261_v51, %v10938_v50  ;;  %v6349_v4 = vmax.f32 %v6259_v26, 0.0 }
 0x6bd   : > { %v6352_v6 = vmax.f32 %v6270_v43, 0.0 }
 0x6be   : > { %v6350_v49 = vmax.f32 %v6262_v7, 0.0 }
 0x6bf   : > { %v11051_v15 = vpack.c.bf16 %v6352_v6, %v6351_v1 }
 0x6c0   : > { %v11053_v21 = vpack.c.bf16 %v6350_v49, %v6349_v4  ;;  %v8411_v57 = vpop.f32.mrb[120].mxu1 }
 0x6c1   : > { %v6283_v62 = vadd.f32 %v8411_v57, %v10953_v54  ;;  %v6274_v52 = vpop.f32.mrb[121].mxu1 }
 0x6c2   : > { %v6275_v58 = vadd.f32 %v6274_v52, %v10947_v2  ;;  %v8412_v48 = vpop.f32.mrb[122].mxu1  ;;  %v6474_v2 = vsel %vm426_vm0, %v11017_v11, 0 }
 0x6c3   : > { %v6286_v40 = vadd.f32 %v8412_v48, %v10956_v53  ;;  %v6277_v32 = vpop.f32.mrb[123].mxu1  ;;  %v6355_v17 = vmax.f32 %v6283_v62, 0.0 }
 0x6c4   : > { %v6278_v50 = vadd.f32 %v6277_v32, %v10950_v23  ;;  %v6353_v63 = vmax.f32 %v6275_v58, 0.0 }
 0x6c5   : > { %v6356_v34 = vmax.f32 %v6286_v40, 0.0 }
 0x6c6   : > { %v6354_v45 = vmax.f32 %v6278_v50, 0.0 }
 0x6c7   : > { %v6386_v31 = vpack.c.bf16 %v6356_v34, %v6355_v17 }
 0x6c8   : > { %v6385_v19 = vpack.c.bf16 %v6354_v45, %v6353_v63  ;;  %v8415_v39 = vpop.f32.mrb[124].mxu1 }
 0x6c9   : > { %v6299_v24 = vadd.f32 %v8415_v39, %v10970_v9  ;;  %v6290_v20 = vpop.f32.mrb[125].mxu1 }
 0x6ca   : > { %v6291_v54 = vadd.f32 %v6290_v20, %v10959_v14  ;;  %v8416_v38 = vpop.f32.mrb[126].mxu1  ;;  %8441 = vmatprep.subr.msk.bf16.mxu0 %vm426_vm0, %v6385_v19 }
 0x6cb   : > { %v6302_v23 = vadd.f32 %v8416_v38, %v10975_v59  ;;  %v6293_v53 = vpop.f32.mrb[127].mxu1  ;;  %8218 = vmatpush3.bf16.xpose.msra.mxu0 %v6474_v2  ;;  %v6359_v36 = vmax.f32 %v6299_v24, 0.0  ;;  %v6477_v59 = vsel %vm426_vm0, %v11013_v3, 0 }
 0x6cc   : > { %v6294_v0 = vadd.f32 %v6293_v53, %v10962_v56  ;;  %8442 = vmatprep.subr.msk.bf16.mxu0 %vm426_vm0, %v6386_v31  ;;  %v6357_v9 = vmax.f32 %v6291_v54, 0.0 }
 0x6cd   : > { %v6360_v16 = vmax.f32 %v6302_v23, 0.0 }
 0x6ce   : > { %v6358_v42 = vmax.f32 %v6294_v0, 0.0 }
 0x6cf   : > { %v6388_v30 = vpack.c.bf16 %v6360_v16, %v6359_v36 }
 0x6d0   : > { %v6387_v14 = vpack.c.bf16 %v6358_v42, %v6357_v9  ;;  %v8419_v61 = vpop.f32.mrb[128].mxu1 }
 0x6d1   : > { %v6315_v55 = vadd.f32 %v8419_v61, %v10984_v27  ;;  %v6306_v47 = vpop.f32.mrb[129].mxu1 }
 0x6d2   : > { %v6307_v11 = vadd.f32 %v6306_v47, %v10978_v5  ;;  %v8420_v22 = vpop.f32.mrb[130].mxu1 }
 0x6d3   : > { %v6318_v56 = vadd.f32 %v8420_v22, %v10987_v12  ;;  %v6309_v41 = vpop.f32.mrb[131].mxu1  ;;  %8220 = vmatpush3.bf16.xpose.msra.mxu0 %v6477_v59  ;;  %v6363_v60 = vmax.f32 %v6315_v55, 0.0  ;;  %v6480_v12 = vsel %vm426_vm0, %v11037_v18, 0  ;;  %v6492_v18 = vsel %vm426_vm0, %v11053_v21, 0 }
 0x6d4   : > { %v6310_v8 = vadd.f32 %v6309_v41, %v10981_v10  ;;  %8443 = vmatprep.subr.msk.bf16.mxu0 %vm426_vm0, %v6387_v14  ;;  %v6361_v25 = vmax.f32 %v6307_v11, 0.0 }
 0x6d5   : > { %v6364_v26 = vmax.f32 %v6318_v56, 0.0 }
 0x6d6   : > { %v6362_v43 = vmax.f32 %v6310_v8, 0.0 }
 0x6d7   : > { %v6390_v27 = vpack.c.bf16 %v6364_v26, %v6363_v60 }
 0x6d8   : > { %v6389_v51 = vpack.c.bf16 %v6362_v43, %v6361_v25  ;;  %v8423_v7 = vpop.f32.mrb[132].mxu1 }
 0x6d9   : > { %v6331_v5 = vadd.f32 %v8423_v7, %v11005_v46  ;;  %v6322_v1 = vpop.f32.mrb[133].mxu1 }
 0x6da   : > { %v6323_v3 = vadd.f32 %v6322_v1, %v10990_v37  ;;  %v8424_v6 = vpop.f32.mrb[134].mxu1  ;;  %v6483_v37 = vsel %vm426_vm0, %v11035_v44, 0  ;;  %v6495_v44 = vsel %vm426_vm0, %v11051_v15, 0  ;;  %v8654_v15 = vld [vmem:[%s11150_s9 + $0x18] sm:$0xff]  }
 0x6db   : > { %v6334_v10 = vadd.f32 %v8424_v6, %v11015_v29  ;;  %v6325_v4 = vpop.f32.mrb[135].mxu1  ;;  %8222 = vmatpush3.bf16.xpose.msra.mxu0 %v6480_v12  ;;  %v6367_v57 = vmax.f32 %v6331_v5, 0.0  ;;  %v6486_v29 = vsel %vm426_vm0, %v11045_v33, 0  ;;  %v8652_v33 = vld [vmem:[%s11150_s9 + $0x8] sm:$0xff]  }
 0x6dc   : > { %v6326_v49 = vadd.f32 %v6325_v4, %v10993_v13  ;;  %8444 = vmatprep.subr.msk.bf16.mxu0 %vm426_vm0, %v6388_v30  ;;  %v6365_v52 = vmax.f32 %v6323_v3, 0.0  ;;  %v6489_v13 = vsel %vm426_vm0, %v11043_v35, 0  ;;  %v8653_v35 = vld [vmem:[%s11150_s9 + $0x10] sm:$0xff]  }
 0x6dd   : > { %v6368_v62 = vmax.f32 %v6334_v10, 0.0 }
 0x6de   : > { %v6366_v58 = vmax.f32 %v6326_v49, 0.0 }
 0x6df   : > { %v6392_v46 = vpack.c.bf16 %v6368_v62, %v6367_v57 }
 0x6e0   : > { %v6391_v48 = vpack.c.bf16 %v6366_v58, %v6365_v52 }
 0x6e3   : > { %8224 = vmatpush3.bf16.xpose.msra.mxu0 %v6483_v37 }
 0x6e4   : > { %8445 = vmatprep.subr.msk.bf16.mxu0 %vm426_vm0, %v6389_v51 }
 0x6eb   : > { %8226 = vmatpush3.bf16.xpose.msra.mxu0 %v6486_v29 }
 0x6ec   : > { %8446 = vmatprep.subr.msk.bf16.mxu0 %vm426_vm0, %v6390_v27 }
 0x6f3   : > { %8228 = vmatpush3.bf16.xpose.msra.mxu0 %v6489_v13 }
 0x6f4   : > { %8447 = vmatprep.subr.msk.bf16.mxu0 %vm426_vm0, %v6391_v48 }
 0x6fb   : > { %8230 = vmatpush3.bf16.xpose.msra.mxu0 %v6492_v18 }
 0x6fc   : > { %8448 = vmatprep.subr.msk.bf16.mxu0 %vm426_vm0, %v6392_v46 }
 0x703   : > { %8232 = vmatpush3.bf16.xpose.msra.mxu0 %v6495_v44 }
 0x70a   : > { %8234 = vmatmul.mubr.msk.bf16.vlgmr.msra.gmra.mrb[120].mxu0 %vm426_vm0, %v10967_v28 }
 0x70b   : > { %8235 = vmatprep.mubr.msk.bf16.mxu0 %vm426_vm0, %v8652_v33 }
 0x712   : > { %8236 = vmatmul.mubr.msk.bf16.gmra.mrb[124].mxu0 %vm426_vm0, %v8652_v33 }
 0x713   : > { %8237 = vmatprep.mubr.msk.bf16.mxu0 %vm426_vm0, %v8653_v35 }
 0x715   : > { %v6404_v28 = vpop.permute.xlu0 %6403 }
 0x71a   : > { %8238 = vmatmul.mubr.msk.bf16.gmra.mrb[128].mxu0 %vm426_vm0, %v8653_v35 }
 0x71b   : > { %8239 = vmatprep.mubr.msk.bf16.mxu0 %vm426_vm0, %v8654_v15 }
 0x71c   : > { %v6409_v40 = vpop.permute.xlu1 %6408 }
 0x720   : > { %v6414_v23 = vpop.permute.xlu1 %6413 }
 0x722   : > { %8240 = vmatmul.mubr.msk.bf16.gmra.mrb[132].mxu0 %vm426_vm0, %v8654_v15 }
 0x723   : > { %v6419_v9 = vpop.permute.xlu0 %6418 }
 0x724   : > { %v6424_v60 = vpop.permute.xlu1 %6423 }
 0x727   : > { %v6429_v51 = vpop.permute.xlu0 %6428 }
 0x728   : > { %v6434_v58 = vpop.permute.xlu1 %6433 }
 0x72b   : > { %v6439_v13 = vpop.permute.xlu0 %6438 }
 0x7dd   : > { %v6555_v21 = vpop.f32.mrb[120].mxu0 }
 0x7de   : > { %v6557_v32 = vpop.f32.mrb[121].mxu0  ;;  %v6556_v50 = vadd.f32 %v6555_v21, %v6404_v28 }
 0x7df   : > { %v6559_v17 = vpop.f32.mrb[122].mxu0  ;;  %v6558_v34 = vadd.f32 %v6557_v32, %v6404_v28 }
 0x7e0   : > { %v6560_v63 = vadd.f32 %v6559_v17, %v6409_v40  ;;  %6594 = vst [vmem:[%s11116_s24] sm:$0xff] %v6556_v50  ;;  %v6561_v45 = vpop.f32.mrb[123].mxu0  ;;  %v6610_v39 = vmul.f32 %v6556_v50, %v6556_v50 }
 0x7e1   : > { %6595 = vst [vmem:[%s11116_s24 + $0x8] sm:$0xff] %v6558_v34  ;;  %v6562_v31 = vadd.f32 %v6561_v45, %v6409_v40  ;;  %v6611_v24 = vmul.f32 %v6558_v34, %v6558_v34 }
 0x7e2   : > { %6596 = vst [vmem:[%s11116_s24 + $0x10] sm:$0xff] %v6560_v63  ;;  %v6612_v19 = vmul.f32 %v6560_v63, %v6560_v63 }
 0x7e3   : > { %6597 = vst [vmem:[%s11116_s24 + $0x18] sm:$0xff] %v6562_v31  ;;  %v6613_v20 = vmul.f32 %v6562_v31, %v6562_v31 }
 0x7e4   : > { %v6626_v54 = vadd.f32 %v6612_v19, %v6610_v39 }
 0x7e5   : > { %v6639_v38 = vadd.f32 %v6613_v20, %v6611_v24  ;;  %v6565_v2 = vpop.f32.mrb[124].mxu0 }
 0x7e6   : > { %v6566_v53 = vadd.f32 %v6565_v2, %v6414_v23  ;;  %v6567_v0 = vpop.f32.mrb[125].mxu0 }
 0x7e7   : > { %v6568_v36 = vadd.f32 %v6567_v0, %v6414_v23  ;;  %v6569_v16 = vpop.f32.mrb[126].mxu0 }
 0x7e8   : > { %6598 = vst [vmem:[%s11116_s24 + $0x20] sm:$0xff] %v6566_v53  ;;  %v6614_v42 = vmul.f32 %v6566_v53, %v6566_v53  ;;  %v6570_v30 = vadd.f32 %v6569_v16, %v6419_v9  ;;  %v6571_v14 = vpop.f32.mrb[127].mxu0  ;;  %v8673_v53 = vmov 1966171168  }
 0x7e9   : > { %6599 = vst [vmem:[%s11116_s24 + $0x28] sm:$0xff] %v6568_v36  ;;  %v6615_v61 = vmul.f32 %v6568_v36, %v6568_v36  ;;  %v6572_v55 = vadd.f32 %v6571_v14, %v6419_v9  ;;  %v6670_v0 = vunpack.c.l.s4 %v8673_v53  ;;  %v6672_v36 = vlaneseq }
 0x7ea   : > { %v6627_v47 = vadd.f32 %v6626_v54, %v6614_v42  ;;  %6600 = vst [vmem:[%s11116_s24 + $0x30] sm:$0xff] %v6570_v30  ;;  %v6616_v11 = vmul.f32 %v6570_v30, %v6570_v30 }
 0x7eb   : > { %v6640_v22 = vadd.f32 %v6639_v38, %v6615_v61  ;;  %6601 = vst [vmem:[%s11116_s24 + $0x38] sm:$0xff] %v6572_v55  ;;  %v6617_v59 = vmul.f32 %v6572_v55, %v6572_v55  ;;  %v6671_v9 = vunpack.c.0.s8 %v6670_v0  ;;  %v6673_v42 = vshrl.u32 %v6672_v36, 7 }
 0x7ec   : > { %v6628_v56 = vadd.f32 %v6627_v47, %v6616_v11  ;;  %vm6686_vm7 = vcmp.lt.s32.totalorder %v6672_v36, 256 }
 0x7ed   : > { %v6641_v41 = vadd.f32 %v6640_v22, %v6617_v59  ;;  %v6575_v8 = vpop.f32.mrb[128].mxu0 }
 0x7ee   : > { %v6576_v26 = vadd.f32 %v6575_v8, %v6424_v60  ;;  %v6577_v25 = vpop.f32.mrb[129].mxu0 }
 0x7ef   : > { %v6578_v43 = vadd.f32 %v6577_v25, %v6424_v60  ;;  %v6579_v27 = vpop.f32.mrb[130].mxu0 }
 0x7f0   : > { %6602 = vst [vmem:[%s11116_s24 + $0x40] sm:$0xff] %v6576_v26  ;;  %v6618_v7 = vmul.f32 %v6576_v26, %v6576_v26  ;;  %v6580_v5 = vadd.f32 %v6579_v27, %v6429_v51  ;;  %v6581_v1 = vpop.f32.mrb[131].mxu0 }
 0x7f1   : > { %6603 = vst [vmem:[%s11116_s24 + $0x48] sm:$0xff] %v6578_v43  ;;  %v6619_v3 = vmul.f32 %v6578_v43, %v6578_v43  ;;  %v6582_v6 = vadd.f32 %v6581_v1, %v6429_v51 }
 0x7f2   : > { %v6629_v12 = vadd.f32 %v6628_v56, %v6618_v7  ;;  %6604 = vst [vmem:[%s11116_s24 + $0x50] sm:$0xff] %v6580_v5  ;;  %v6620_v10 = vmul.f32 %v6580_v5, %v6580_v5  ;;  %v6674_v56 = vsub.s32 %v6671_v9, %v6673_v42 }
 0x7f3   : > { %v6642_v4 = vadd.f32 %v6641_v41, %v6619_v3  ;;  %6605 = vst [vmem:[%s11116_s24 + $0x58] sm:$0xff] %v6582_v6  ;;  %v6621_v49 = vmul.f32 %v6582_v6, %v6582_v6 }
 0x7f4   : > { %v6630_v57 = vadd.f32 %v6629_v12, %v6620_v10 }
 0x7f5   : > { %v6643_v62 = vadd.f32 %v6642_v4, %v6621_v49  ;;  %v6585_v52 = vpop.f32.mrb[132].mxu0 }
 0x7f6   : > { %v6586_v46 = vadd.f32 %v6585_v52, %v6434_v58  ;;  %v6587_v48 = vpop.f32.mrb[133].mxu0 }
 0x7f7   : > { %v6588_v37 = vadd.f32 %v6587_v48, %v6434_v58  ;;  %v6589_v29 = vpop.f32.mrb[134].mxu0 }
 0x7f8   : > { %6606 = vst [vmem:[%s11116_s24 + $0x60] sm:$0xff] %v6586_v46  ;;  %v6622_v18 = vmul.f32 %v6586_v46, %v6586_v46  ;;  %v6590_v44 = vadd.f32 %v6589_v29, %v6439_v13  ;;  %v6591_v33 = vpop.f32.mrb[135].mxu0 }
 0x7f9   : > { %6607 = vst [vmem:[%s11116_s24 + $0x68] sm:$0xff] %v6588_v37  ;;  %v6623_v35 = vmul.f32 %v6588_v37, %v6588_v37  ;;  %v6592_v15 = vadd.f32 %v6591_v33, %v6439_v13 }
 0x7fa   : > { %v6631_v28 = vadd.f32 %v6630_v57, %v6622_v18  ;;  %6608 = vst [vmem:[%s11116_s24 + $0x70] sm:$0xff] %v6590_v44  ;;  %v6624_v21 = vmul.f32 %v6590_v44, %v6590_v44 }
 0x7fb   : > { %v6644_v40 = vadd.f32 %v6643_v62, %v6623_v35  ;;  %6609 = vst [vmem:[%s11116_s24 + $0x78] sm:$0xff] %v6592_v15  ;;  %v6625_v32 = vmul.f32 %v6592_v15, %v6592_v15 }
 0x7fc   : > { %v6632_v50 = vadd.f32 %v6631_v28, %v6624_v21 }
 0x7fd   : > { %v6645_v17 = vadd.f32 %v6644_v40, %v6625_v32 }
 0x7fe   : > { %v6633_v34 = vrot.slane %v6632_v50, 4 }
 0x7ff   : > { %v6646_v63 = vrot.slane %v6645_v17, 4 }
 0x800   : > { %v6634_v45 = vadd.f32 %v6633_v34, %v6632_v50 }
 0x801   : > { %v6647_v31 = vadd.f32 %v6646_v63, %v6645_v17 }
 0x802   : > { %v6635_v19 = vrot.slane %v6634_v45, 2 }
 0x803   : > { %v6648_v39 = vrot.slane %v6647_v31, 2 }
 0x804   : > { %v6636_v24 = vadd.f32 %v6635_v19, %v6634_v45 }
 0x805   : > { %v6649_v20 = vadd.f32 %v6648_v39, %v6647_v31 }
 0x806   : > { %v6637_v54 = vrot.slane %v6636_v24, 1 }
 0x807   : > { %v6650_v38 = vrot.slane %v6649_v20, 1 }
 0x808   : > { %v6638_v2 = vadd.f32 %v6637_v54, %v6636_v24 }
 0x809   : > { %v6651_v23 = vadd.f32 %v6650_v38, %v6649_v20 }
 0x80a   : > { %8655 = vrsqrt.f32 %v6638_v2  ;;  %vm6654_vm3 = vcmp.eq.f32.partialorder %v6638_v2, inf  ;;  %v6657_v61 = vand.u32 2147483648, %v6638_v2  ;;  %vm6656_vm4 = vcmp.eq.f32.partialorder %v6638_v2, 0.0 }
 0x80b   : > { %8657 = vrsqrt.f32 %v6651_v23  ;;  %vm6661_vm5 = vcmp.eq.f32.partialorder %v6651_v23, inf  ;;  %v6664_v11 = vand.u32 2147483648, %v6651_v23  ;;  %vm6663_vm6 = vcmp.eq.f32.partialorder %v6651_v23, 0.0 }
 0x814   : > { %v8656_v16 = vpop.eup %8655 }
 0x815   : > { %v8658_v30 = vpop.eup %8657  ;;  %v6653_v14 = vmul.f32 %v8656_v16, %v6638_v2 }
 0x816   : > { %v6660_v55 = vmul.f32 %v8658_v30, %v6651_v23 }
 0x817   : > { %v6655_v47 = vsel %vm6654_vm3, %v6638_v2, %v6653_v14 }
 0x818   : > { %v6658_v22 = vsel %vm6656_vm4, %v6657_v61, %v6655_v47  ;;  %v6662_v59 = vsel %vm6661_vm5, %v6651_v23, %v6660_v55 }
 0x819   : > { %v6665_v41 = vsel %vm6663_vm6, %v6664_v11, %v6662_v59 }
 0x81a   : > { %v6668_v8 = vcombine.low %v6658_v22, %v6665_v41 }
 0x81c   : > { %v6675_v60 = vrot.slane %v6668_v8, %v6674_v56 }
 0x81e   : > { %v6682_v26 = vrot.slane %v6675_v60, %v6674_v56 }
 0x820   : > { %6688 = vst.msk [vmem:[%s424_s28] sm:$0x3] %vm6686_vm7, %v6682_v26 }
 0x821 PF: > { %s23_s21 = sadd.s32 1, %s8668_s21  }
 0x822   : > { %p20_p4 = scmp.ge.s32.totalorder %s23_s21, 4  }
 0x824   :  { %22 = sbr.rel (!%p20_p4) target bundleno = 1 (0x1), region = 112 }

</bundles_post_ra>
